<compile_context>
chip_gen: v5e
topology: v5e:2x2
jax: 0.10.0
libtpu: 0.0.40
codegen_flags: <defaults>
</compile_context>

<pallas_src>
import functools

import jax
import jax.numpy as jnp
from jax import lax
from jax.experimental import pallas as pl
from jax.experimental.pallas import tpu as pltpu


# ----------------------------------------------------------------------------
# Fused UpConv kernel: conv0+ReLU -> conv1+ReLU -> 1x1 up_conv+ReLU, per sample.
# ----------------------------------------------------------------------------
def _make_upconv_kernel(k, pad, h, w, cm, cs, ch, co):
    cin = cm + cs
    wp = w + 2 * pad                 # width incl. zero columns (no per-tap masks)
    border = (pad + 1) * wp          # zero rows above/below the image (flat layout)
    hwp = h * wp                     # conv output block: interior rows, all wp cols
    L = hwp + 2 * border             # full flat padded length
    # Flat shift of tap (kh, kw): output-block row o reads src[o + shift].
    shifts = [(kh + 1) * wp + kw - pad for kh in range(k) for kw in range(k)]

    def kernel(main_ref, skip_ref, w0_ref, b0_ref, w1_ref, b1_ref,
               wup_ref, bup_ref, o_ref, xpad_ref, y0_ref):
        # main_ref: (h, w, cm) bf16    skip_ref: (h, w, cs) bf16   (one sample, NHWC)
        # w0_ref: (k*k*cin, ch)  w1_ref: (k*k*ch, ch)  wup_ref: (co, ch)   -- bf16
        # b0/b1_ref: (1, ch) f32       bup_ref: (co, 1) f32
        # o_ref: (co, h*w) f32  -- transposed, unpadded, lane-dense == NCHW order
        # xpad_ref: (L, cin) bf16 scratch   y0_ref: (L, ch) bf16 scratch
        cdt = xpad_ref.dtype

        # Zero ONLY the border rows (tiny), every step: keeps each grid step
        # self-contained (safe with 'parallel' batch sharding on v7x megacore).
        zx = jnp.zeros((border, cin), cdt)
        zy = jnp.zeros((border, ch), cdt)
        xpad_ref[0:border, :] = zx
        xpad_ref[border + hwp:L, :] = zx
        y0_ref[0:border, :] = zy
        y0_ref[border + hwp:L, :] = zy

        # Stage [main || skip] into the zero-padded flat layout entirely in VMEM
        # (the wrapper never materializes a concatenated / padded copy in HBM).
        # TODO(synk): for large H switch this static loop to lax.fori_loop with a
        #             pl.ds(dynamic_start, wp) store to bound code size.
        zcol = jnp.zeros((pad, cin), cdt)
        for r in range(h):
            row = jnp.concatenate([main_ref[r], skip_ref[r]], axis=1)   # (w, cin)
            row = jnp.concatenate([zcol, row, zcol], axis=0)            # (wp, cin)
            base = border + r * wp
            xpad_ref[base:base + wp, :] = row

        # Interior-column mask: zeroes the width-padding columns of y0 once
        # (instead of masking 6 of 9 taps per conv).
        col = lax.broadcasted_iota(jnp.int32, (hwp, 1), 0) % wp
        inside = (col >= pad) & (col < pad + w)

        # conv_0 (KxK 'same') as ONE MXU matmul over an in-VMEM im2col of the
        # shifted flat windows; bias + ReLU + border mask fused in f32.
        p0 = jnp.concatenate([xpad_ref[s:s + hwp, :] for s in shifts], axis=1)
        y0 = jnp.dot(p0, w0_ref[...], preferred_element_type=jnp.float32) + b0_ref[...]
        y0 = jnp.where(inside, jnp.maximum(y0, 0.0), 0.0)
        y0_ref[border:border + hwp, :] = y0.astype(cdt)

        # conv_1 (KxK 'same'): same single-matmul im2col over the conv_0 activations.
        p1 = jnp.concatenate([y0_ref[s:s + hwp, :] for s in shifts], axis=1)
        y1 = jnp.dot(p1, w1_ref[...], preferred_element_type=jnp.float32) + b1_ref[...]
        y1 = jnp.maximum(y1, 0.0).astype(cdt)                           # (hwp, ch)

        # Drop the width-padding columns (cheap sublane slices), then compute the
        # 1x1 up_conv directly TRANSPOSED via a contract-last-dims matmul, so the
        # HBM store is (co, h*w): unpadded, lane-dense, already NCHW-ordered.
        y1v = jnp.concatenate(
            [y1[r * wp + pad:r * wp + pad + w, :] for r in range(h)], axis=0)
        up = lax.dot_general(wup_ref[...], y1v,
                             dimension_numbers=(((1,), (1,)), ((), ())),
                             preferred_element_type=jnp.float32)        # (co, h*w)
        o_ref[...] = jnp.maximum(up + bup_ref[...], 0.0).astype(o_ref.dtype)

    return kernel


# ----------------------------------------------------------------------------
# Wrapper: minimal layout prep in plain JAX, hot path in one pallas_call.
# ----------------------------------------------------------------------------
def upconv_forward(main_nchw, skip_nchw, params, *, k_size, stride, padding):
    """UpConv forward (default path). Inputs/outputs are NCHW (PyTorch layout)."""
    if stride != 1 or 2 * padding != k_size - 1:
        # TODO(synk): strided / non-'same' convolutions are not implemented.
        raise NotImplementedError("only stride=1 'same' convs are supported")
    # TODO(synk): use_attention (AttentionGate), refine conv and the last_layer
    #             projection+residual branch are not implemented (default path).

    n, cm, h, w = main_nchw.shape
    _, cs, hs, ws = skip_nchw.shape
    assert (h, w) == (hs, ws), "main/skip spatial sizes must match"
    k, pad = k_size, padding
    cin = cm + cs
    wp = w + 2 * pad
    L = (h + 2 * (pad + 1)) * wp
    hw = h * w

    w0, b0 = params["w0"], params["b0"]
    w1, b1 = params["w1"], params["b1"]
    wup, bup = params["wup"], params["bup"]
    ch = w0.shape[0]
    co = wup.shape[0]

    cdt = jnp.bfloat16  # MXU operand dtype; accumulation / epilogues stay f32.

    # Only wrapper-side passes over the activations: NCHW->NHWC transpose fused
    # with the bf16 downcast.  No concat / pad copies are materialized in HBM.
    # TODO(synk): if the producer can emit NHWC directly, drop these too.
    main_nhwc = jnp.transpose(main_nchw, (0, 2, 3, 1)).astype(cdt)
    skip_nhwc = jnp.transpose(skip_nchw, (0, 2, 3, 1)).astype(cdt)

    def conv_w(wt):
        # (Cout, Cin, K, K) -> (K*K*Cin, Cout): rows in (kh, kw, cin) order matching
        # the in-kernel im2col column order.  No 128 padding anywhere.
        co_, ci_, kk, _ = wt.shape
        return jnp.transpose(wt, (2, 3, 1, 0)).reshape(kk * kk * ci_, co_).astype(cdt)

    w0_k = conv_w(w0)                                  # (k*k*cin, ch)
    w1_k = conv_w(w1)                                  # (k*k*ch,  ch)
    wup_k = wup.reshape(co, ch).astype(cdt)            # (co, ch): transposed 1x1 conv
    b0_k = b0.astype(jnp.float32).reshape(1, ch)
    b1_k = b1.astype(jnp.float32).reshape(1, ch)
    bup_k = bup.astype(jnp.float32).reshape(co, 1)

    kernel = _make_upconv_kernel(k, pad, h, w, cm, cs, ch, co)

    out = pl.pallas_call(
        kernel,
        out_shape=jax.ShapeDtypeStruct((n, co, hw), jnp.float32),
        grid=(n,),
        in_specs=[
            pl.BlockSpec((None, h, w, cm), lambda i: (i, 0, 0, 0)),   # main, per sample
            pl.BlockSpec((None, h, w, cs), lambda i: (i, 0, 0, 0)),   # skip, per sample
            pl.BlockSpec((k * k * cin, ch), lambda i: (0, 0)),        # conv_0 W
            pl.BlockSpec((1, ch), lambda i: (0, 0)),                  # conv_0 b
            pl.BlockSpec((k * k * ch, ch), lambda i: (0, 0)),         # conv_1 W
            pl.BlockSpec((1, ch), lambda i: (0, 0)),                  # conv_1 b
            pl.BlockSpec((co, ch), lambda i: (0, 0)),                 # up_conv W (transposed)
            pl.BlockSpec((co, 1), lambda i: (0, 0)),                  # up_conv b
        ],
        out_specs=pl.BlockSpec((None, co, hw), lambda i: (i, 0, 0)),
        scratch_shapes=[pltpu.VMEM((L, cin), cdt),      # padded [main||skip] staging
                        pltpu.VMEM((L, ch), cdt)],      # padded conv_0 activations
        compiler_params=pltpu.CompilerParams(
            dimension_semantics=("parallel",),          # batch across TCs (v7x)
            # v7x-safe budget (64 MiB/TC total); raise toward ~96 MiB on v5e/v6e
            # once the row-tile axis (below) makes bigger tiles worthwhile.
            vmem_limit_bytes=48 * 1024 * 1024),
    )(main_nhwc, skip_nhwc, w0_k, b0_k, w1_k, b1_k, wup_k, bup_k)
    # TODO(synk): for large H*W add a row-tile grid axis (halo'd staging window +
    #             recomputed conv_0 halo rows) so per-tile VMEM stays inside the
    #             v7x budget; whole-sample blocks are fine at these sizes.

    # (n, co, h*w) is already channel-major: a free reshape yields NCHW.  No slice,
    # no transpose, no lane padding on the HBM output.
    return out.reshape(n, co, h, w)


# ----------------------------------------------------------------------------
# Pure-JAX references (correctness check only)
# ----------------------------------------------------------------------------
def _ref_forward(main_nchw, skip_nchw, params, *, stride, padding, mxu_dtype=None):
    """mxu_dtype=jnp.bfloat16 mirrors the kernel numerics (bf16 operands, f32 acc)."""
    dn = ("NCHW", "OIHW", "NCHW")
    prec = lax.Precision.HIGHEST

    def cast(z):
        return z if mxu_dtype is None else z.astype(mxu_dtype).astype(jnp.float32)

    def conv(z, wt, bt, p):
        z = lax.conv_general_dilated(cast(z), cast(wt), (stride, stride),
                                     [(p, p), (p, p)], dimension_numbers=dn,
                                     precision=prec)
        return z + bt[None, :, None, None]

    x = jnp.concatenate([main_nchw, skip_nchw], axis=1)
    x = jnp.maximum(conv(x, params["w0"], params["b0"], padding), 0.0)
    x = jnp.maximum(conv(x, params["w1"], params["b1"], padding), 0.0)
    x = jnp.maximum(conv(x, params["wup"], params["bup"], 0), 0.0)
    return x


# ----------------------------------------------------------------------------
# Deterministic parameter init (synthetic — no checkpoint load)
# ----------------------------------------------------------------------------
def init_params(key, nc_down, nc_skip, nc_hidden, nc_out, k_size):
    ks = jax.random.split(key, 6)
    cin = nc_down + nc_skip

    def kaiming(kk, shape, fan_in):
        return jax.random.normal(kk, shape, jnp.float32) * jnp.sqrt(2.0 / fan_in)

    w0 = kaiming(ks[0], (nc_hidden, cin, k_size, k_size), cin * k_size * k_size)
    w1 = kaiming(ks[1], (nc_hidden, nc_hidden, k_size, k_size),
                 nc_hidden * k_size * k_size)
    wup = kaiming(ks[2], (nc_out, nc_hidden, 1, 1), nc_hidden)
    b0 = 0.1 * jax.random.normal(ks[3], (nc_hidden,), jnp.float32)
    b1 = 0.1 * jax.random.normal(ks[4], (nc_hidden,), jnp.float32)
    bup = 0.1 * jax.random.normal(ks[5], (nc_out,), jnp.float32)
    return {"w0": w0, "b0": b0, "w1": w1, "b1": b1, "wup": wup, "bup": bup}


# ----------------------------------------------------------------------------
if __name__ == "__main__":
    # UpConv(nc_down_stream=4, nc_skip_stream=4, nc_hidden=16, nc_out=8,
    #        k_size=3, stride=1, padding=1, bias=True)  — default path.
    nc_down, nc_skip, nc_hidden, nc_out = 4, 4, 16, 8
    k_size, stride, padding = 3, 1, 1
    N, H, W = 2, 16, 16

    key = jax.random.PRNGKey(0)
    km, ksk, kp = jax.random.split(key, 3)
    main_stream = jax.random.normal(km, (N, nc_down, H, W), jnp.float32)   # NCHW
    skip_stream = jax.random.normal(ksk, (N, nc_skip, H, W), jnp.float32)  # NCHW
    params = init_params(kp, nc_down, nc_skip, nc_hidden, nc_out, k_size)

    fwd = functools.partial(upconv_forward, k_size=k_size, stride=stride,
                            padding=padding)
    out = jax.block_until_ready(jax.jit(fwd)(main_stream, skip_stream, params))
    assert out.shape == (N, nc_out, H, W), out.shape

    # Tight check vs a reference that mirrors the kernel numerics (bf16 MXU
    # operands, f32 accumulation); loose sanity check vs the pure-f32 reference.
    ref_mxu = _ref_forward(main_stream, skip_stream, params, stride=stride,
                           padding=padding, mxu_dtype=jnp.bfloat16)
    ref_f32 = _ref_forward(main_stream, skip_stream, params, stride=stride,
                           padding=padding)
    err_mxu = float(jnp.max(jnp.abs(out - ref_mxu)))
    err_f32 = float(jnp.max(jnp.abs(out - ref_f32)))
    assert err_mxu < 3e-2, f"max abs error vs bf16-operand reference: {err_mxu}"
    assert err_f32 < 0.3, f"max abs error vs f32 reference: {err_f32}"
    print("KERNEL_OK")
</pallas_src>

<mosaic_0001>
module attributes {stable_mosaic.version = 11 : i64} {
  func.func @kernel(%arg0: i32, %arg1: memref<1x16x16x4xbf16, #tpu.memory_space<vmem>>, %arg2: memref<1x16x16x4xbf16, #tpu.memory_space<vmem>>, %arg3: memref<72x16xbf16, #tpu.memory_space<vmem>>, %arg4: memref<1x16xf32, #tpu.memory_space<vmem>>, %arg5: memref<144x16xbf16, #tpu.memory_space<vmem>>, %arg6: memref<1x16xf32, #tpu.memory_space<vmem>>, %arg7: memref<8x16xbf16, #tpu.memory_space<vmem>>, %arg8: memref<8x1xf32, #tpu.memory_space<vmem>>, %arg9: memref<1x8x256xf32, #tpu.memory_space<vmem>>, %arg10: memref<360x8xbf16, #tpu.memory_space<vmem>>, %arg11: memref<360x16xbf16, #tpu.memory_space<vmem>>) attributes {dimension_semantics = [#tpu.dimension_semantics<parallel>], iteration_bounds = array<i64: 2>, scalar_prefetch = 0 : i64, scratch_operands = 2 : i64, tpu.core_type = #tpu.core_type<tc>, window_params = [{transform_indices = @transform_0, window_bounds = array<i64: 1, 16, 16, 4>}, {transform_indices = @transform_1, window_bounds = array<i64: 1, 16, 16, 4>}, {pipeline_mode = #tpu.pipeline_mode<synchronous>, transform_indices = @transform_2, window_bounds = array<i64: 72, 16>}, {pipeline_mode = #tpu.pipeline_mode<synchronous>, transform_indices = @transform_3, window_bounds = array<i64: 1, 16>}, {pipeline_mode = #tpu.pipeline_mode<synchronous>, transform_indices = @transform_4, window_bounds = array<i64: 144, 16>}, {pipeline_mode = #tpu.pipeline_mode<synchronous>, transform_indices = @transform_5, window_bounds = array<i64: 1, 16>}, {pipeline_mode = #tpu.pipeline_mode<synchronous>, transform_indices = @transform_6, window_bounds = array<i64: 8, 16>}, {pipeline_mode = #tpu.pipeline_mode<synchronous>, transform_indices = @transform_7, window_bounds = array<i64: 8, 1>}, {transform_indices = @transform_8, window_bounds = array<i64: 1, 8, 256>}]} {
    %cst = arith.constant 0.000000e+00 : bf16
    %0 = vector.broadcast %cst : bf16 to vector<36x8xbf16>
    %cst_0 = arith.constant 0.000000e+00 : bf16
    %1 = vector.broadcast %cst_0 : bf16 to vector<36x16xbf16>
    %c0 = arith.constant 0 : index
    %c0_1 = arith.constant 0 : index
    %2 = vector.load %arg10[%c0, %c0_1] : memref<360x8xbf16, #tpu.memory_space<vmem>>, vector<36x8xbf16>
    tpu.vector_store %arg10[%c0, %c0_1], %0 {strides = array<i32>} : memref<360x8xbf16, #tpu.memory_space<vmem>>, vector<36x8xbf16>,
    %c324 = arith.constant 324 : index
    %c0_2 = arith.constant 0 : index
    %3 = vector.load %arg10[%c324, %c0_2] : memref<360x8xbf16, #tpu.memory_space<vmem>>, vector<36x8xbf16>
    tpu.vector_store %arg10[%c324, %c0_2], %0 {strides = array<i32>} : memref<360x8xbf16, #tpu.memory_space<vmem>>, vector<36x8xbf16>,
    %c0_3 = arith.constant 0 : index
    %c0_4 = arith.constant 0 : index
    %4 = vector.load %arg11[%c0_3, %c0_4] : memref<360x16xbf16, #tpu.memory_space<vmem>>, vector<36x16xbf16>
    tpu.vector_store %arg11[%c0_3, %c0_4], %1 {strides = array<i32>} : memref<360x16xbf16, #tpu.memory_space<vmem>>, vector<36x16xbf16>,
    %c324_5 = arith.constant 324 : index
    %c0_6 = arith.constant 0 : index
    %5 = vector.load %arg11[%c324_5, %c0_6] : memref<360x16xbf16, #tpu.memory_space<vmem>>, vector<36x16xbf16>
    tpu.vector_store %arg11[%c324_5, %c0_6], %1 {strides = array<i32>} : memref<360x16xbf16, #tpu.memory_space<vmem>>, vector<36x16xbf16>,
    %cst_7 = arith.constant 0.000000e+00 : bf16
    %6 = vector.broadcast %cst_7 : bf16 to vector<1x8xbf16>
    %c0_8 = arith.constant 0 : index
    %c0_9 = arith.constant 0 : index
    %c0_10 = arith.constant 0 : index
    %c0_11 = arith.constant 0 : index
    %7 = vector.load %arg1[%c0_8, %c0_9, %c0_10, %c0_11] : memref<1x16x16x4xbf16, #tpu.memory_space<vmem>>, vector<1x1x16x4xbf16>
    %8 = vector.shape_cast %7 : vector<1x1x16x4xbf16> to vector<16x4xbf16>
    %c0_12 = arith.constant 0 : index
    %c0_13 = arith.constant 0 : index
    %c0_14 = arith.constant 0 : index
    %c0_15 = arith.constant 0 : index
    %9 = vector.load %arg2[%c0_12, %c0_13, %c0_14, %c0_15] : memref<1x16x16x4xbf16, #tpu.memory_space<vmem>>, vector<1x1x16x4xbf16>
    %10 = vector.shape_cast %9 : vector<1x1x16x4xbf16> to vector<16x4xbf16>
    %11 = tpu.concatenate %8, %10 in 1 : vector<16x4xbf16>, vector<16x4xbf16> -> vector<16x8xbf16>
    %12 = tpu.concatenate %6, %11, %6 in 0 : vector<1x8xbf16>, vector<16x8xbf16>, vector<1x8xbf16> -> vector<18x8xbf16>
    %c36 = arith.constant 36 : index
    %c0_16 = arith.constant 0 : index
    %13 = vector.load %arg10[%c36, %c0_16] : memref<360x8xbf16, #tpu.memory_space<vmem>>, vector<18x8xbf16>
    tpu.vector_store %arg10[%c36, %c0_16], %12 {strides = array<i32>} : memref<360x8xbf16, #tpu.memory_space<vmem>>, vector<18x8xbf16>,
    %c0_17 = arith.constant 0 : index
    %c1 = arith.constant 1 : index
    %c0_18 = arith.constant 0 : index
    %c0_19 = arith.constant 0 : index
    %14 = vector.load %arg1[%c0_17, %c1, %c0_18, %c0_19] : memref<1x16x16x4xbf16, #tpu.memory_space<vmem>>, vector<1x1x16x4xbf16>
    %15 = vector.shape_cast %14 : vector<1x1x16x4xbf16> to vector<16x4xbf16>
    %c0_20 = arith.constant 0 : index
    %c1_21 = arith.constant 1 : index
    %c0_22 = arith.constant 0 : index
    %c0_23 = arith.constant 0 : index
    %16 = vector.load %arg2[%c0_20, %c1_21, %c0_22, %c0_23] : memref<1x16x16x4xbf16, #tpu.memory_space<vmem>>, vector<1x1x16x4xbf16>
    %17 = vector.shape_cast %16 : vector<1x1x16x4xbf16> to vector<16x4xbf16>
    %18 = tpu.concatenate %15, %17 in 1 : vector<16x4xbf16>, vector<16x4xbf16> -> vector<16x8xbf16>
    %19 = tpu.concatenate %6, %18, %6 in 0 : vector<1x8xbf16>, vector<16x8xbf16>, vector<1x8xbf16> -> vector<18x8xbf16>
    %c54 = arith.constant 54 : index
    %c0_24 = arith.constant 0 : index
    %20 = vector.load %arg10[%c54, %c0_24] : memref<360x8xbf16, #tpu.memory_space<vmem>>, vector<18x8xbf16>
    tpu.vector_store %arg10[%c54, %c0_24], %19 {strides = array<i32>} : memref<360x8xbf16, #tpu.memory_space<vmem>>, vector<18x8xbf16>,
    %c0_25 = arith.constant 0 : index
    %c2 = arith.constant 2 : index
    %c0_26 = arith.constant 0 : index
    %c0_27 = arith.constant 0 : index
    %21 = vector.load %arg1[%c0_25, %c2, %c0_26, %c0_27] : memref<1x16x16x4xbf16, #tpu.memory_space<vmem>>, vector<1x1x16x4xbf16>
    %22 = vector.shape_cast %21 : vector<1x1x16x4xbf16> to vector<16x4xbf16>
    %c0_28 = arith.constant 0 : index
    %c2_29 = arith.constant 2 : index
    %c0_30 = arith.constant 0 : index
    %c0_31 = arith.constant 0 : index
    %23 = vector.load %arg2[%c0_28, %c2_29, %c0_30, %c0_31] : memref<1x16x16x4xbf16, #tpu.memory_space<vmem>>, vector<1x1x16x4xbf16>
    %24 = vector.shape_cast %23 : vector<1x1x16x4xbf16> to vector<16x4xbf16>
    %25 = tpu.concatenate %22, %24 in 1 : vector<16x4xbf16>, vector<16x4xbf16> -> vector<16x8xbf16>
    %26 = tpu.concatenate %6, %25, %6 in 0 : vector<1x8xbf16>, vector<16x8xbf16>, vector<1x8xbf16> -> vector<18x8xbf16>
    %c72 = arith.constant 72 : index
    %c0_32 = arith.constant 0 : index
    %27 = vector.load %arg10[%c72, %c0_32] : memref<360x8xbf16, #tpu.memory_space<vmem>>, vector<18x8xbf16>
    tpu.vector_store %arg10[%c72, %c0_32], %26 {strides = array<i32>} : memref<360x8xbf16, #tpu.memory_space<vmem>>, vector<18x8xbf16>,
    %c0_33 = arith.constant 0 : index
    %c3 = arith.constant 3 : index
    %c0_34 = arith.constant 0 : index
    %c0_35 = arith.constant 0 : index
    %28 = vector.load %arg1[%c0_33, %c3, %c0_34, %c0_35] : memref<1x16x16x4xbf16, #tpu.memory_space<vmem>>, vector<1x1x16x4xbf16>
    %29 = vector.shape_cast %28 : vector<1x1x16x4xbf16> to vector<16x4xbf16>
    %c0_36 = arith.constant 0 : index
    %c3_37 = arith.constant 3 : index
    %c0_38 = arith.constant 0 : index
    %c0_39 = arith.constant 0 : index
    %30 = vector.load %arg2[%c0_36, %c3_37, %c0_38, %c0_39] : memref<1x16x16x4xbf16, #tpu.memory_space<vmem>>, vector<1x1x16x4xbf16>
    %31 = vector.shape_cast %30 : vector<1x1x16x4xbf16> to vector<16x4xbf16>
    %32 = tpu.concatenate %29, %31 in 1 : vector<16x4xbf16>, vector<16x4xbf16> -> vector<16x8xbf16>
    %33 = tpu.concatenate %6, %32, %6 in 0 : vector<1x8xbf16>, vector<16x8xbf16>, vector<1x8xbf16> -> vector<18x8xbf16>
    %c90 = arith.constant 90 : index
    %c0_40 = arith.constant 0 : index
    %34 = vector.load %arg10[%c90, %c0_40] : memref<360x8xbf16, #tpu.memory_space<vmem>>, vector<18x8xbf16>
    tpu.vector_store %arg10[%c90, %c0_40], %33 {strides = array<i32>} : memref<360x8xbf16, #tpu.memory_space<vmem>>, vector<18x8xbf16>,
    %c0_41 = arith.constant 0 : index
    %c4 = arith.constant 4 : index
    %c0_42 = arith.constant 0 : index
    %c0_43 = arith.constant 0 : index
    %35 = vector.load %arg1[%c0_41, %c4, %c0_42, %c0_43] : memref<1x16x16x4xbf16, #tpu.memory_space<vmem>>, vector<1x1x16x4xbf16>
    %36 = vector.shape_cast %35 : vector<1x1x16x4xbf16> to vector<16x4xbf16>
    %c0_44 = arith.constant 0 : index
    %c4_45 = arith.constant 4 : index
    %c0_46 = arith.constant 0 : index
    %c0_47 = arith.constant 0 : index
    %37 = vector.load %arg2[%c0_44, %c4_45, %c0_46, %c0_47] : memref<1x16x16x4xbf16, #tpu.memory_space<vmem>>, vector<1x1x16x4xbf16>
    %38 = vector.shape_cast %37 : vector<1x1x16x4xbf16> to vector<16x4xbf16>
    %39 = tpu.concatenate %36, %38 in 1 : vector<16x4xbf16>, vector<16x4xbf16> -> vector<16x8xbf16>
    %40 = tpu.concatenate %6, %39, %6 in 0 : vector<1x8xbf16>, vector<16x8xbf16>, vector<1x8xbf16> -> vector<18x8xbf16>
    %c108 = arith.constant 108 : index
    %c0_48 = arith.constant 0 : index
    %41 = vector.load %arg10[%c108, %c0_48] : memref<360x8xbf16, #tpu.memory_space<vmem>>, vector<18x8xbf16>
    tpu.vector_store %arg10[%c108, %c0_48], %40 {strides = array<i32>} : memref<360x8xbf16, #tpu.memory_space<vmem>>, vector<18x8xbf16>,
    %c0_49 = arith.constant 0 : index
    %c5 = arith.constant 5 : index
    %c0_50 = arith.constant 0 : index
    %c0_51 = arith.constant 0 : index
    %42 = vector.load %arg1[%c0_49, %c5, %c0_50, %c0_51] : memref<1x16x16x4xbf16, #tpu.memory_space<vmem>>, vector<1x1x16x4xbf16>
    %43 = vector.shape_cast %42 : vector<1x1x16x4xbf16> to vector<16x4xbf16>
    %c0_52 = arith.constant 0 : index
    %c5_53 = arith.constant 5 : index
    %c0_54 = arith.constant 0 : index
    %c0_55 = arith.constant 0 : index
    %44 = vector.load %arg2[%c0_52, %c5_53, %c0_54, %c0_55] : memref<1x16x16x4xbf16, #tpu.memory_space<vmem>>, vector<1x1x16x4xbf16>
    %45 = vector.shape_cast %44 : vector<1x1x16x4xbf16> to vector<16x4xbf16>
    %46 = tpu.concatenate %43, %45 in 1 : vector<16x4xbf16>, vector<16x4xbf16> -> vector<16x8xbf16>
    %47 = tpu.concatenate %6, %46, %6 in 0 : vector<1x8xbf16>, vector<16x8xbf16>, vector<1x8xbf16> -> vector<18x8xbf16>
    %c126 = arith.constant 126 : index
    %c0_56 = arith.constant 0 : index
    %48 = vector.load %arg10[%c126, %c0_56] : memref<360x8xbf16, #tpu.memory_space<vmem>>, vector<18x8xbf16>
    tpu.vector_store %arg10[%c126, %c0_56], %47 {strides = array<i32>} : memref<360x8xbf16, #tpu.memory_space<vmem>>, vector<18x8xbf16>,
    %c0_57 = arith.constant 0 : index
    %c6 = arith.constant 6 : index
    %c0_58 = arith.constant 0 : index
    %c0_59 = arith.constant 0 : index
    %49 = vector.load %arg1[%c0_57, %c6, %c0_58, %c0_59] : memref<1x16x16x4xbf16, #tpu.memory_space<vmem>>, vector<1x1x16x4xbf16>
    %50 = vector.shape_cast %49 : vector<1x1x16x4xbf16> to vector<16x4xbf16>
    %c0_60 = arith.constant 0 : index
    %c6_61 = arith.constant 6 : index
    %c0_62 = arith.constant 0 : index
    %c0_63 = arith.constant 0 : index
    %51 = vector.load %arg2[%c0_60, %c6_61, %c0_62, %c0_63] : memref<1x16x16x4xbf16, #tpu.memory_space<vmem>>, vector<1x1x16x4xbf16>
    %52 = vector.shape_cast %51 : vector<1x1x16x4xbf16> to vector<16x4xbf16>
    %53 = tpu.concatenate %50, %52 in 1 : vector<16x4xbf16>, vector<16x4xbf16> -> vector<16x8xbf16>
    %54 = tpu.concatenate %6, %53, %6 in 0 : vector<1x8xbf16>, vector<16x8xbf16>, vector<1x8xbf16> -> vector<18x8xbf16>
    %c144 = arith.constant 144 : index
    %c0_64 = arith.constant 0 : index
    %55 = vector.load %arg10[%c144, %c0_64] : memref<360x8xbf16, #tpu.memory_space<vmem>>, vector<18x8xbf16>
    tpu.vector_store %arg10[%c144, %c0_64], %54 {strides = array<i32>} : memref<360x8xbf16, #tpu.memory_space<vmem>>, vector<18x8xbf16>,
    %c0_65 = arith.constant 0 : index
    %c7 = arith.constant 7 : index
    %c0_66 = arith.constant 0 : index
    %c0_67 = arith.constant 0 : index
    %56 = vector.load %arg1[%c0_65, %c7, %c0_66, %c0_67] : memref<1x16x16x4xbf16, #tpu.memory_space<vmem>>, vector<1x1x16x4xbf16>
    %57 = vector.shape_cast %56 : vector<1x1x16x4xbf16> to vector<16x4xbf16>
    %c0_68 = arith.constant 0 : index
    %c7_69 = arith.constant 7 : index
    %c0_70 = arith.constant 0 : index
    %c0_71 = arith.constant 0 : index
    %58 = vector.load %arg2[%c0_68, %c7_69, %c0_70, %c0_71] : memref<1x16x16x4xbf16, #tpu.memory_space<vmem>>, vector<1x1x16x4xbf16>
    %59 = vector.shape_cast %58 : vector<1x1x16x4xbf16> to vector<16x4xbf16>
    %60 = tpu.concatenate %57, %59 in 1 : vector<16x4xbf16>, vector<16x4xbf16> -> vector<16x8xbf16>
    %61 = tpu.concatenate %6, %60, %6 in 0 : vector<1x8xbf16>, vector<16x8xbf16>, vector<1x8xbf16> -> vector<18x8xbf16>
    %c162 = arith.constant 162 : index
    %c0_72 = arith.constant 0 : index
    %62 = vector.load %arg10[%c162, %c0_72] : memref<360x8xbf16, #tpu.memory_space<vmem>>, vector<18x8xbf16>
    tpu.vector_store %arg10[%c162, %c0_72], %61 {strides = array<i32>} : memref<360x8xbf16, #tpu.memory_space<vmem>>, vector<18x8xbf16>,
    %c0_73 = arith.constant 0 : index
    %c8 = arith.constant 8 : index
    %c0_74 = arith.constant 0 : index
    %c0_75 = arith.constant 0 : index
    %63 = vector.load %arg1[%c0_73, %c8, %c0_74, %c0_75] : memref<1x16x16x4xbf16, #tpu.memory_space<vmem>>, vector<1x1x16x4xbf16>
    %64 = vector.shape_cast %63 : vector<1x1x16x4xbf16> to vector<16x4xbf16>
    %c0_76 = arith.constant 0 : index
    %c8_77 = arith.constant 8 : index
    %c0_78 = arith.constant 0 : index
    %c0_79 = arith.constant 0 : index
    %65 = vector.load %arg2[%c0_76, %c8_77, %c0_78, %c0_79] : memref<1x16x16x4xbf16, #tpu.memory_space<vmem>>, vector<1x1x16x4xbf16>
    %66 = vector.shape_cast %65 : vector<1x1x16x4xbf16> to vector<16x4xbf16>
    %67 = tpu.concatenate %64, %66 in 1 : vector<16x4xbf16>, vector<16x4xbf16> -> vector<16x8xbf16>
    %68 = tpu.concatenate %6, %67, %6 in 0 : vector<1x8xbf16>, vector<16x8xbf16>, vector<1x8xbf16> -> vector<18x8xbf16>
    %c180 = arith.constant 180 : index
    %c0_80 = arith.constant 0 : index
    %69 = vector.load %arg10[%c180, %c0_80] : memref<360x8xbf16, #tpu.memory_space<vmem>>, vector<18x8xbf16>
    tpu.vector_store %arg10[%c180, %c0_80], %68 {strides = array<i32>} : memref<360x8xbf16, #tpu.memory_space<vmem>>, vector<18x8xbf16>,
    %c0_81 = arith.constant 0 : index
    %c9 = arith.constant 9 : index
    %c0_82 = arith.constant 0 : index
    %c0_83 = arith.constant 0 : index
    %70 = vector.load %arg1[%c0_81, %c9, %c0_82, %c0_83] : memref<1x16x16x4xbf16, #tpu.memory_space<vmem>>, vector<1x1x16x4xbf16>
    %71 = vector.shape_cast %70 : vector<1x1x16x4xbf16> to vector<16x4xbf16>
    %c0_84 = arith.constant 0 : index
    %c9_85 = arith.constant 9 : index
    %c0_86 = arith.constant 0 : index
    %c0_87 = arith.constant 0 : index
    %72 = vector.load %arg2[%c0_84, %c9_85, %c0_86, %c0_87] : memref<1x16x16x4xbf16, #tpu.memory_space<vmem>>, vector<1x1x16x4xbf16>
    %73 = vector.shape_cast %72 : vector<1x1x16x4xbf16> to vector<16x4xbf16>
    %74 = tpu.concatenate %71, %73 in 1 : vector<16x4xbf16>, vector<16x4xbf16> -> vector<16x8xbf16>
    %75 = tpu.concatenate %6, %74, %6 in 0 : vector<1x8xbf16>, vector<16x8xbf16>, vector<1x8xbf16> -> vector<18x8xbf16>
    %c198 = arith.constant 198 : index
    %c0_88 = arith.constant 0 : index
    %76 = vector.load %arg10[%c198, %c0_88] : memref<360x8xbf16, #tpu.memory_space<vmem>>, vector<18x8xbf16>
    tpu.vector_store %arg10[%c198, %c0_88], %75 {strides = array<i32>} : memref<360x8xbf16, #tpu.memory_space<vmem>>, vector<18x8xbf16>,
    %c0_89 = arith.constant 0 : index
    %c10 = arith.constant 10 : index
    %c0_90 = arith.constant 0 : index
    %c0_91 = arith.constant 0 : index
    %77 = vector.load %arg1[%c0_89, %c10, %c0_90, %c0_91] : memref<1x16x16x4xbf16, #tpu.memory_space<vmem>>, vector<1x1x16x4xbf16>
    %78 = vector.shape_cast %77 : vector<1x1x16x4xbf16> to vector<16x4xbf16>
    %c0_92 = arith.constant 0 : index
    %c10_93 = arith.constant 10 : index
    %c0_94 = arith.constant 0 : index
    %c0_95 = arith.constant 0 : index
    %79 = vector.load %arg2[%c0_92, %c10_93, %c0_94, %c0_95] : memref<1x16x16x4xbf16, #tpu.memory_space<vmem>>, vector<1x1x16x4xbf16>
    %80 = vector.shape_cast %79 : vector<1x1x16x4xbf16> to vector<16x4xbf16>
    %81 = tpu.concatenate %78, %80 in 1 : vector<16x4xbf16>, vector<16x4xbf16> -> vector<16x8xbf16>
    %82 = tpu.concatenate %6, %81, %6 in 0 : vector<1x8xbf16>, vector<16x8xbf16>, vector<1x8xbf16> -> vector<18x8xbf16>
    %c216 = arith.constant 216 : index
    %c0_96 = arith.constant 0 : index
    %83 = vector.load %arg10[%c216, %c0_96] : memref<360x8xbf16, #tpu.memory_space<vmem>>, vector<18x8xbf16>
    tpu.vector_store %arg10[%c216, %c0_96], %82 {strides = array<i32>} : memref<360x8xbf16, #tpu.memory_space<vmem>>, vector<18x8xbf16>,
    %c0_97 = arith.constant 0 : index
    %c11 = arith.constant 11 : index
    %c0_98 = arith.constant 0 : index
    %c0_99 = arith.constant 0 : index
    %84 = vector.load %arg1[%c0_97, %c11, %c0_98, %c0_99] : memref<1x16x16x4xbf16, #tpu.memory_space<vmem>>, vector<1x1x16x4xbf16>
    %85 = vector.shape_cast %84 : vector<1x1x16x4xbf16> to vector<16x4xbf16>
    %c0_100 = arith.constant 0 : index
    %c11_101 = arith.constant 11 : index
    %c0_102 = arith.constant 0 : index
    %c0_103 = arith.constant 0 : index
    %86 = vector.load %arg2[%c0_100, %c11_101, %c0_102, %c0_103] : memref<1x16x16x4xbf16, #tpu.memory_space<vmem>>, vector<1x1x16x4xbf16>
    %87 = vector.shape_cast %86 : vector<1x1x16x4xbf16> to vector<16x4xbf16>
    %88 = tpu.concatenate %85, %87 in 1 : vector<16x4xbf16>, vector<16x4xbf16> -> vector<16x8xbf16>
    %89 = tpu.concatenate %6, %88, %6 in 0 : vector<1x8xbf16>, vector<16x8xbf16>, vector<1x8xbf16> -> vector<18x8xbf16>
    %c234 = arith.constant 234 : index
    %c0_104 = arith.constant 0 : index
    %90 = vector.load %arg10[%c234, %c0_104] : memref<360x8xbf16, #tpu.memory_space<vmem>>, vector<18x8xbf16>
    tpu.vector_store %arg10[%c234, %c0_104], %89 {strides = array<i32>} : memref<360x8xbf16, #tpu.memory_space<vmem>>, vector<18x8xbf16>,
    %c0_105 = arith.constant 0 : index
    %c12 = arith.constant 12 : index
    %c0_106 = arith.constant 0 : index
    %c0_107 = arith.constant 0 : index
    %91 = vector.load %arg1[%c0_105, %c12, %c0_106, %c0_107] : memref<1x16x16x4xbf16, #tpu.memory_space<vmem>>, vector<1x1x16x4xbf16>
    %92 = vector.shape_cast %91 : vector<1x1x16x4xbf16> to vector<16x4xbf16>
    %c0_108 = arith.constant 0 : index
    %c12_109 = arith.constant 12 : index
    %c0_110 = arith.constant 0 : index
    %c0_111 = arith.constant 0 : index
    %93 = vector.load %arg2[%c0_108, %c12_109, %c0_110, %c0_111] : memref<1x16x16x4xbf16, #tpu.memory_space<vmem>>, vector<1x1x16x4xbf16>
    %94 = vector.shape_cast %93 : vector<1x1x16x4xbf16> to vector<16x4xbf16>
    %95 = tpu.concatenate %92, %94 in 1 : vector<16x4xbf16>, vector<16x4xbf16> -> vector<16x8xbf16>
    %96 = tpu.concatenate %6, %95, %6 in 0 : vector<1x8xbf16>, vector<16x8xbf16>, vector<1x8xbf16> -> vector<18x8xbf16>
    %c252 = arith.constant 252 : index
    %c0_112 = arith.constant 0 : index
    %97 = vector.load %arg10[%c252, %c0_112] : memref<360x8xbf16, #tpu.memory_space<vmem>>, vector<18x8xbf16>
    tpu.vector_store %arg10[%c252, %c0_112], %96 {strides = array<i32>} : memref<360x8xbf16, #tpu.memory_space<vmem>>, vector<18x8xbf16>,
    %c0_113 = arith.constant 0 : index
    %c13 = arith.constant 13 : index
    %c0_114 = arith.constant 0 : index
    %c0_115 = arith.constant 0 : index
    %98 = vector.load %arg1[%c0_113, %c13, %c0_114, %c0_115] : memref<1x16x16x4xbf16, #tpu.memory_space<vmem>>, vector<1x1x16x4xbf16>
    %99 = vector.shape_cast %98 : vector<1x1x16x4xbf16> to vector<16x4xbf16>
    %c0_116 = arith.constant 0 : index
    %c13_117 = arith.constant 13 : index
    %c0_118 = arith.constant 0 : index
    %c0_119 = arith.constant 0 : index
    %100 = vector.load %arg2[%c0_116, %c13_117, %c0_118, %c0_119] : memref<1x16x16x4xbf16, #tpu.memory_space<vmem>>, vector<1x1x16x4xbf16>
    %101 = vector.shape_cast %100 : vector<1x1x16x4xbf16> to vector<16x4xbf16>
    %102 = tpu.concatenate %99, %101 in 1 : vector<16x4xbf16>, vector<16x4xbf16> -> vector<16x8xbf16>
    %103 = tpu.concatenate %6, %102, %6 in 0 : vector<1x8xbf16>, vector<16x8xbf16>, vector<1x8xbf16> -> vector<18x8xbf16>
    %c270 = arith.constant 270 : index
    %c0_120 = arith.constant 0 : index
    %104 = vector.load %arg10[%c270, %c0_120] : memref<360x8xbf16, #tpu.memory_space<vmem>>, vector<18x8xbf16>
    tpu.vector_store %arg10[%c270, %c0_120], %103 {strides = array<i32>} : memref<360x8xbf16, #tpu.memory_space<vmem>>, vector<18x8xbf16>,
    %c0_121 = arith.constant 0 : index
    %c14 = arith.constant 14 : index
    %c0_122 = arith.constant 0 : index
    %c0_123 = arith.constant 0 : index
    %105 = vector.load %arg1[%c0_121, %c14, %c0_122, %c0_123] : memref<1x16x16x4xbf16, #tpu.memory_space<vmem>>, vector<1x1x16x4xbf16>
    %106 = vector.shape_cast %105 : vector<1x1x16x4xbf16> to vector<16x4xbf16>
    %c0_124 = arith.constant 0 : index
    %c14_125 = arith.constant 14 : index
    %c0_126 = arith.constant 0 : index
    %c0_127 = arith.constant 0 : index
    %107 = vector.load %arg2[%c0_124, %c14_125, %c0_126, %c0_127] : memref<1x16x16x4xbf16, #tpu.memory_space<vmem>>, vector<1x1x16x4xbf16>
    %108 = vector.shape_cast %107 : vector<1x1x16x4xbf16> to vector<16x4xbf16>
    %109 = tpu.concatenate %106, %108 in 1 : vector<16x4xbf16>, vector<16x4xbf16> -> vector<16x8xbf16>
    %110 = tpu.concatenate %6, %109, %6 in 0 : vector<1x8xbf16>, vector<16x8xbf16>, vector<1x8xbf16> -> vector<18x8xbf16>
    %c288 = arith.constant 288 : index
    %c0_128 = arith.constant 0 : index
    %111 = vector.load %arg10[%c288, %c0_128] : memref<360x8xbf16, #tpu.memory_space<vmem>>, vector<18x8xbf16>
    tpu.vector_store %arg10[%c288, %c0_128], %110 {strides = array<i32>} : memref<360x8xbf16, #tpu.memory_space<vmem>>, vector<18x8xbf16>,
    %c0_129 = arith.constant 0 : index
    %c15 = arith.constant 15 : index
    %c0_130 = arith.constant 0 : index
    %c0_131 = arith.constant 0 : index
    %112 = vector.load %arg1[%c0_129, %c15, %c0_130, %c0_131] : memref<1x16x16x4xbf16, #tpu.memory_space<vmem>>, vector<1x1x16x4xbf16>
    %113 = vector.shape_cast %112 : vector<1x1x16x4xbf16> to vector<16x4xbf16>
    %c0_132 = arith.constant 0 : index
    %c15_133 = arith.constant 15 : index
    %c0_134 = arith.constant 0 : index
    %c0_135 = arith.constant 0 : index
    %114 = vector.load %arg2[%c0_132, %c15_133, %c0_134, %c0_135] : memref<1x16x16x4xbf16, #tpu.memory_space<vmem>>, vector<1x1x16x4xbf16>
    %115 = vector.shape_cast %114 : vector<1x1x16x4xbf16> to vector<16x4xbf16>
    %116 = tpu.concatenate %113, %115 in 1 : vector<16x4xbf16>, vector<16x4xbf16> -> vector<16x8xbf16>
    %117 = tpu.concatenate %6, %116, %6 in 0 : vector<1x8xbf16>, vector<16x8xbf16>, vector<1x8xbf16> -> vector<18x8xbf16>
    %c306 = arith.constant 306 : index
    %c0_136 = arith.constant 0 : index
    %118 = vector.load %arg10[%c306, %c0_136] : memref<360x8xbf16, #tpu.memory_space<vmem>>, vector<18x8xbf16>
    tpu.vector_store %arg10[%c306, %c0_136], %117 {strides = array<i32>} : memref<360x8xbf16, #tpu.memory_space<vmem>>, vector<18x8xbf16>,
    %119 = tpu.iota {dimensions = array<i32: 0>} : vector<288x1xi32>
    %c18_i32 = arith.constant 18 : i32
    %c0_i32 = arith.constant 0 : i32
    %120 = arith.cmpi eq, %c18_i32, %c0_i32 : i32
    %c1_i32 = arith.constant 1 : i32
    %121 = arith.select %120, %c1_i32, %c18_i32 : i32
    %122 = vector.broadcast %121 : i32 to vector<288x1xi32>
    %123 = arith.remsi %119, %122 : vector<288x1xi32>
    %c0_i32_137 = arith.constant 0 : i32
    %124 = vector.broadcast %c0_i32_137 : i32 to vector<288x1xi32>
    %125 = arith.cmpi ne, %123, %124 : vector<288x1xi32>
    %c0_i32_138 = arith.constant 0 : i32
    %126 = vector.broadcast %c0_i32_138 : i32 to vector<288x1xi32>
    %127 = arith.cmpi slt, %123, %126 : vector<288x1xi32>
    %c0_i32_139 = arith.constant 0 : i32
    %128 = arith.cmpi slt, %121, %c0_i32_139 : i32
    %129 = vector.broadcast %128 : i1 to vector<288x1xi1>
    %130 = vector.broadcast %129 : vector<288x1xi1> to vector<288x1xi1>
    %131 = arith.xori %127, %130 : vector<288x1xi1>
    %132 = arith.andi %131, %125 : vector<288x1xi1>
    %133 = vector.broadcast %121 : i32 to vector<288x1xi32>
    %134 = arith.addi %123, %133 : vector<288x1xi32>
    %135 = arith.select %132, %134, %123 : vector<288x1xi1>, vector<288x1xi32>
    %c1_i32_140 = arith.constant 1 : i32
    %136 = vector.broadcast %c1_i32_140 : i32 to vector<288x1xi32>
    %137 = arith.cmpi sge, %135, %136 : vector<288x1xi32>
    %c17_i32 = arith.constant 17 : i32
    %138 = vector.broadcast %c17_i32 : i32 to vector<288x1xi32>
    %139 = arith.cmpi slt, %135, %138 : vector<288x1xi32>
    %140 = arith.andi %137, %139 : vector<288x1xi1>
    %c17 = arith.constant 17 : index
    %c0_141 = arith.constant 0 : index
    %141 = vector.load %arg10[%c17, %c0_141] : memref<360x8xbf16, #tpu.memory_space<vmem>>, vector<288x8xbf16>
    %c18 = arith.constant 18 : index
    %c0_142 = arith.constant 0 : index
    %142 = vector.load %arg10[%c18, %c0_142] : memref<360x8xbf16, #tpu.memory_space<vmem>>, vector<288x8xbf16>
    %c19 = arith.constant 19 : index
    %c0_143 = arith.constant 0 : index
    %143 = vector.load %arg10[%c19, %c0_143] : memref<360x8xbf16, #tpu.memory_space<vmem>>, vector<288x8xbf16>
    %c35 = arith.constant 35 : index
    %c0_144 = arith.constant 0 : index
    %144 = vector.load %arg10[%c35, %c0_144] : memref<360x8xbf16, #tpu.memory_space<vmem>>, vector<288x8xbf16>
    %c36_145 = arith.constant 36 : index
    %c0_146 = arith.constant 0 : index
    %145 = vector.load %arg10[%c36_145, %c0_146] : memref<360x8xbf16, #tpu.memory_space<vmem>>, vector<288x8xbf16>
    %c37 = arith.constant 37 : index
    %c0_147 = arith.constant 0 : index
    %146 = vector.load %arg10[%c37, %c0_147] : memref<360x8xbf16, #tpu.memory_space<vmem>>, vector<288x8xbf16>
    %c53 = arith.constant 53 : index
    %c0_148 = arith.constant 0 : index
    %147 = vector.load %arg10[%c53, %c0_148] : memref<360x8xbf16, #tpu.memory_space<vmem>>, vector<288x8xbf16>
    %c54_149 = arith.constant 54 : index
    %c0_150 = arith.constant 0 : index
    %148 = vector.load %arg10[%c54_149, %c0_150] : memref<360x8xbf16, #tpu.memory_space<vmem>>, vector<288x8xbf16>
    %c55 = arith.constant 55 : index
    %c0_151 = arith.constant 0 : index
    %149 = vector.load %arg10[%c55, %c0_151] : memref<360x8xbf16, #tpu.memory_space<vmem>>, vector<288x8xbf16>
    %150 = tpu.concatenate %141, %142, %143, %144, %145, %146, %147, %148, %149 in 1 : vector<288x8xbf16>, vector<288x8xbf16>, vector<288x8xbf16>, vector<288x8xbf16>, vector<288x8xbf16>, vector<288x8xbf16>, vector<288x8xbf16>, vector<288x8xbf16>, vector<288x8xbf16> -> vector<288x72xbf16>
    %c0_152 = arith.constant 0 : index
    %c0_153 = arith.constant 0 : index
    %151 = vector.load %arg3[%c0_152, %c0_153] : memref<72x16xbf16, #tpu.memory_space<vmem>>, vector<72x16xbf16>
    %cst_154 = arith.constant dense<0.000000e+00> : vector<288x16xf32>
    %152 = tpu.matmul %150, %151, %cst_154 {dimension_numbers = #tpu.dot_dimension_numbers<[1], [0], [0], [1], [0, 0, 1, 1], [], []>} : vector<288x72xbf16>, vector<72x16xbf16>, vector<288x16xf32> -> vector<288x16xf32>
    %c0_155 = arith.constant 0 : index
    %c0_156 = arith.constant 0 : index
    %153 = vector.load %arg4[%c0_155, %c0_156] : memref<1x16xf32, #tpu.memory_space<vmem>>, vector<1x16xf32>
    %154 = vector.broadcast %153 : vector<1x16xf32> to vector<288x16xf32>
    %155 = arith.addf %152, %154 : vector<288x16xf32>
    %cst_157 = arith.constant 0.000000e+00 : f32
    %156 = vector.broadcast %cst_157 : f32 to vector<288x16xf32>
    %157 = arith.maximumf %155, %156 : vector<288x16xf32>
    %cst_158 = arith.constant 0.000000e+00 : f32
    %158 = vector.shape_cast %140 : vector<288x1xi1> to vector<288x1xi1>
    %159 = vector.broadcast %158 : vector<288x1xi1> to vector<288x16xi1>
    %160 = vector.broadcast %cst_158 : f32 to vector<288x16xf32>
    %161 = arith.select %159, %157, %160 : vector<288x16xi1>, vector<288x16xf32>
    %162 = arith.truncf %161 : vector<288x16xf32> to vector<288x16xbf16>
    %c36_159 = arith.constant 36 : index
    %c0_160 = arith.constant 0 : index
    %163 = vector.load %arg11[%c36_159, %c0_160] : memref<360x16xbf16, #tpu.memory_space<vmem>>, vector<288x16xbf16>
    tpu.vector_store %arg11[%c36_159, %c0_160], %162 {strides = array<i32>} : memref<360x16xbf16, #tpu.memory_space<vmem>>, vector<288x16xbf16>,
    %c17_161 = arith.constant 17 : index
    %c0_162 = arith.constant 0 : index
    %164 = vector.load %arg11[%c17_161, %c0_162] : memref<360x16xbf16, #tpu.memory_space<vmem>>, vector<288x16xbf16>
    %c18_163 = arith.constant 18 : index
    %c0_164 = arith.constant 0 : index
    %165 = vector.load %arg11[%c18_163, %c0_164] : memref<360x16xbf16, #tpu.memory_space<vmem>>, vector<288x16xbf16>
    %c19_165 = arith.constant 19 : index
    %c0_166 = arith.constant 0 : index
    %166 = vector.load %arg11[%c19_165, %c0_166] : memref<360x16xbf16, #tpu.memory_space<vmem>>, vector<288x16xbf16>
    %c35_167 = arith.constant 35 : index
    %c0_168 = arith.constant 0 : index
    %167 = vector.load %arg11[%c35_167, %c0_168] : memref<360x16xbf16, #tpu.memory_space<vmem>>, vector<288x16xbf16>
    %c36_169 = arith.constant 36 : index
    %c0_170 = arith.constant 0 : index
    %168 = vector.load %arg11[%c36_169, %c0_170] : memref<360x16xbf16, #tpu.memory_space<vmem>>, vector<288x16xbf16>
    %c37_171 = arith.constant 37 : index
    %c0_172 = arith.constant 0 : index
    %169 = vector.load %arg11[%c37_171, %c0_172] : memref<360x16xbf16, #tpu.memory_space<vmem>>, vector<288x16xbf16>
    %c53_173 = arith.constant 53 : index
    %c0_174 = arith.constant 0 : index
    %170 = vector.load %arg11[%c53_173, %c0_174] : memref<360x16xbf16, #tpu.memory_space<vmem>>, vector<288x16xbf16>
    %c54_175 = arith.constant 54 : index
    %c0_176 = arith.constant 0 : index
    %171 = vector.load %arg11[%c54_175, %c0_176] : memref<360x16xbf16, #tpu.memory_space<vmem>>, vector<288x16xbf16>
    %c55_177 = arith.constant 55 : index
    %c0_178 = arith.constant 0 : index
    %172 = vector.load %arg11[%c55_177, %c0_178] : memref<360x16xbf16, #tpu.memory_space<vmem>>, vector<288x16xbf16>
    %173 = tpu.concatenate %164, %165, %166, %167, %168, %169, %170, %171, %172 in 1 : vector<288x16xbf16>, vector<288x16xbf16>, vector<288x16xbf16>, vector<288x16xbf16>, vector<288x16xbf16>, vector<288x16xbf16>, vector<288x16xbf16>, vector<288x16xbf16>, vector<288x16xbf16> -> vector<288x144xbf16>
    %c0_179 = arith.constant 0 : index
    %c0_180 = arith.constant 0 : index
    %174 = vector.load %arg5[%c0_179, %c0_180] : memref<144x16xbf16, #tpu.memory_space<vmem>>, vector<144x16xbf16>
    %cst_181 = arith.constant dense<0.000000e+00> : vector<288x16xf32>
    %175 = tpu.matmul %173, %174, %cst_181 {dimension_numbers = #tpu.dot_dimension_numbers<[1], [0], [0], [1], [0, 0, 1, 1], [], []>} : vector<288x144xbf16>, vector<144x16xbf16>, vector<288x16xf32> -> vector<288x16xf32>
    %c0_182 = arith.constant 0 : index
    %c0_183 = arith.constant 0 : index
    %176 = vector.load %arg6[%c0_182, %c0_183] : memref<1x16xf32, #tpu.memory_space<vmem>>, vector<1x16xf32>
    %177 = vector.broadcast %176 : vector<1x16xf32> to vector<288x16xf32>
    %178 = arith.addf %175, %177 : vector<288x16xf32>
    %cst_184 = arith.constant 0.000000e+00 : f32
    %179 = vector.broadcast %cst_184 : f32 to vector<288x16xf32>
    %180 = arith.maximumf %178, %179 : vector<288x16xf32>
    %181 = arith.truncf %180 : vector<288x16xf32> to vector<288x16xbf16>
    %182 = vector.extract_strided_slice %181 {offsets = [1, 0], sizes = [16, 16], strides = [1, 1]} : vector<288x16xbf16> to vector<16x16xbf16>
    %183 = vector.extract_strided_slice %181 {offsets = [19, 0], sizes = [16, 16], strides = [1, 1]} : vector<288x16xbf16> to vector<16x16xbf16>
    %184 = vector.extract_strided_slice %181 {offsets = [37, 0], sizes = [16, 16], strides = [1, 1]} : vector<288x16xbf16> to vector<16x16xbf16>
    %185 = vector.extract_strided_slice %181 {offsets = [55, 0], sizes = [16, 16], strides = [1, 1]} : vector<288x16xbf16> to vector<16x16xbf16>
    %186 = vector.extract_strided_slice %181 {offsets = [73, 0], sizes = [16, 16], strides = [1, 1]} : vector<288x16xbf16> to vector<16x16xbf16>
    %187 = vector.extract_strided_slice %181 {offsets = [91, 0], sizes = [16, 16], strides = [1, 1]} : vector<288x16xbf16> to vector<16x16xbf16>
    %188 = vector.extract_strided_slice %181 {offsets = [109, 0], sizes = [16, 16], strides = [1, 1]} : vector<288x16xbf16> to vector<16x16xbf16>
    %189 = vector.extract_strided_slice %181 {offsets = [127, 0], sizes = [16, 16], strides = [1, 1]} : vector<288x16xbf16> to vector<16x16xbf16>
    %190 = vector.extract_strided_slice %181 {offsets = [145, 0], sizes = [16, 16], strides = [1, 1]} : vector<288x16xbf16> to vector<16x16xbf16>
    %191 = vector.extract_strided_slice %181 {offsets = [163, 0], sizes = [16, 16], strides = [1, 1]} : vector<288x16xbf16> to vector<16x16xbf16>
    %192 = vector.extract_strided_slice %181 {offsets = [181, 0], sizes = [16, 16], strides = [1, 1]} : vector<288x16xbf16> to vector<16x16xbf16>
    %193 = vector.extract_strided_slice %181 {offsets = [199, 0], sizes = [16, 16], strides = [1, 1]} : vector<288x16xbf16> to vector<16x16xbf16>
    %194 = vector.extract_strided_slice %181 {offsets = [217, 0], sizes = [16, 16], strides = [1, 1]} : vector<288x16xbf16> to vector<16x16xbf16>
    %195 = vector.extract_strided_slice %181 {offsets = [235, 0], sizes = [16, 16], strides = [1, 1]} : vector<288x16xbf16> to vector<16x16xbf16>
    %196 = vector.extract_strided_slice %181 {offsets = [253, 0], sizes = [16, 16], strides = [1, 1]} : vector<288x16xbf16> to vector<16x16xbf16>
    %197 = vector.extract_strided_slice %181 {offsets = [271, 0], sizes = [16, 16], strides = [1, 1]} : vector<288x16xbf16> to vector<16x16xbf16>
    %198 = tpu.concatenate %182, %183, %184, %185, %186, %187, %188, %189, %190, %191, %192, %193, %194, %195, %196, %197 in 0 : vector<16x16xbf16>, vector<16x16xbf16>, vector<16x16xbf16>, vector<16x16xbf16>, vector<16x16xbf16>, vector<16x16xbf16>, vector<16x16xbf16>, vector<16x16xbf16>, vector<16x16xbf16>, vector<16x16xbf16>, vector<16x16xbf16>, vector<16x16xbf16>, vector<16x16xbf16>, vector<16x16xbf16>, vector<16x16xbf16>, vector<16x16xbf16> -> vector<256x16xbf16>
    %c0_185 = arith.constant 0 : index
    %c0_186 = arith.constant 0 : index
    %199 = vector.load %arg7[%c0_185, %c0_186] : memref<8x16xbf16, #tpu.memory_space<vmem>>, vector<8x16xbf16>
    %cst_187 = arith.constant dense<0.000000e+00> : vector<8x256xf32>
    %200 = tpu.matmul %199, %198, %cst_187 {dimension_numbers = #tpu.dot_dimension_numbers<[1], [1], [0], [0], [0, 0, 1, 0], [], []>} : vector<8x16xbf16>, vector<256x16xbf16>, vector<8x256xf32> -> vector<8x256xf32>
    %c0_188 = arith.constant 0 : index
    %c0_189 = arith.constant 0 : index
    %201 = vector.load %arg8[%c0_188, %c0_189] : memref<8x1xf32, #tpu.memory_space<vmem>>, vector<8x1xf32>
    %202 = vector.broadcast %201 : vector<8x1xf32> to vector<8x256xf32>
    %203 = arith.addf %200, %202 : vector<8x256xf32>
    %cst_190 = arith.constant 0.000000e+00 : f32
    %204 = vector.broadcast %cst_190 : f32 to vector<8x256xf32>
    %205 = arith.maximumf %203, %204 : vector<8x256xf32>
    %c0_191 = arith.constant 0 : index
    %c0_192 = arith.constant 0 : index
    %c0_193 = arith.constant 0 : index
    %206 = vector.load %arg9[%c0_191, %c0_192, %c0_193] : memref<1x8x256xf32, #tpu.memory_space<vmem>>, vector<1x8x256xf32>
    %207 = vector.shape_cast %206 : vector<1x8x256xf32> to vector<8x256xf32>
    %208 = vector.shape_cast %205 : vector<8x256xf32> to vector<1x8x256xf32>
    tpu.vector_store %arg9[%c0_191, %c0_192, %c0_193], %208 {strides = array<i32>} : memref<1x8x256xf32, #tpu.memory_space<vmem>>, vector<1x8x256xf32>,
    return
  }
  func.func @transform_0(%arg0: i32) -> (i32, i32, i32, i32) {
    %c0_i32 = arith.constant 0 : i32
    %c0_i32_0 = arith.constant 0 : i32
    %c0_i32_1 = arith.constant 0 : i32
    %c0_i32_2 = arith.constant 0 : i32
    return %arg0, %c0_i32, %c0_i32_0, %c0_i32_1 : i32, i32, i32, i32
  }
  func.func @transform_1(%arg0: i32) -> (i32, i32, i32, i32) {
    %c0_i32 = arith.constant 0 : i32
    %c0_i32_0 = arith.constant 0 : i32
    %c0_i32_1 = arith.constant 0 : i32
    %c0_i32_2 = arith.constant 0 : i32
    return %arg0, %c0_i32, %c0_i32_0, %c0_i32_1 : i32, i32, i32, i32
  }
  func.func @transform_2(%arg0: i32) -> (i32, i32) {
    %c0_i32 = arith.constant 0 : i32
    %c0_i32_0 = arith.constant 0 : i32
    %c0_i32_1 = arith.constant 0 : i32
    return %c0_i32, %c0_i32_0 : i32, i32
  }
  func.func @transform_3(%arg0: i32) -> (i32, i32) {
    %c0_i32 = arith.constant 0 : i32
    %c0_i32_0 = arith.constant 0 : i32
    %c0_i32_1 = arith.constant 0 : i32
    return %c0_i32, %c0_i32_0 : i32, i32
  }
  func.func @transform_4(%arg0: i32) -> (i32, i32) {
    %c0_i32 = arith.constant 0 : i32
    %c0_i32_0 = arith.constant 0 : i32
    %c0_i32_1 = arith.constant 0 : i32
    return %c0_i32, %c0_i32_0 : i32, i32
  }
  func.func @transform_5(%arg0: i32) -> (i32, i32) {
    %c0_i32 = arith.constant 0 : i32
    %c0_i32_0 = arith.constant 0 : i32
    %c0_i32_1 = arith.constant 0 : i32
    return %c0_i32, %c0_i32_0 : i32, i32
  }
  func.func @transform_6(%arg0: i32) -> (i32, i32) {
    %c0_i32 = arith.constant 0 : i32
    %c0_i32_0 = arith.constant 0 : i32
    %c0_i32_1 = arith.constant 0 : i32
    return %c0_i32, %c0_i32_0 : i32, i32
  }
  func.func @transform_7(%arg0: i32) -> (i32, i32) {
    %c0_i32 = arith.constant 0 : i32
    %c0_i32_0 = arith.constant 0 : i32
    %c0_i32_1 = arith.constant 0 : i32
    return %c0_i32, %c0_i32_0 : i32, i32
  }
  func.func @transform_8(%arg0: i32) -> (i32, i32, i32) {
    %c0_i32 = arith.constant 0 : i32
    %c0_i32_0 = arith.constant 0 : i32
    %c0_i32_1 = arith.constant 0 : i32
    return %arg0, %c0_i32, %c0_i32_0 : i32, i32, i32
  }
}

</mosaic_0001>

<bundles_post_ra>
// kernel: upconv_forward.1
= control target key start
LH: loop header
LB: loop body
LE: loop exit
PB: predicated region body
PF: predicated region fallthrough
CT: control target
= control target key end

     0   :  { %s7576_s27 = smov 0   ;;  %s12004_s0 = inlined_call_operand.vmem [shape: bf16[2,16,16,4], index: 0, kind: input, shape index: {}]   ;;  %s12005_s1 = inlined_call_operand.vmem [shape: bf16[2,16,16,4], index: 1, kind: input, shape index: {}]   ;;  %s12006_s2 = inlined_call_operand.vmem [shape: bf16[72,16], index: 2, kind: input, shape index: {}]   ;;  %s12007_s3 = inlined_call_operand.vmem [shape: f32[1,16], index: 3, kind: input, shape index: {}]   ;;  %s12008_s4 = inlined_call_operand.vmem [shape: bf16[144,16], index: 4, kind: input, shape index: {}]   ;;  %s12009_s5 = inlined_call_operand.vmem [shape: f32[1,16], index: 5, kind: input, shape index: {}]   ;;  %s12010_s6 = inlined_call_operand.vmem [shape: bf16[8,16], index: 6, kind: input, shape index: {}]   ;;  %s12011_s7 = inlined_call_operand.vmem [shape: f32[8,1], index: 7, kind: input, shape index: {}]   ;;  %s12012_s8 = inlined_call_operand.vmem [shape: f32[2,8,256], index: 8, kind: output, shape index: {}]  }
   0x1 LB: > { %s6904_s28 = sadd.s32 4294967295, %s7516_s27   ;;  %p6908_p0 = scmp.ge.s32.totalorder %s7516_s27, 1  ;;  %s7516_s27 = sphi %s7576_s27, %s18_s27  }
   0x2   : > { %p272_p1 = scmp.lt.s32.totalorder %s7516_s27, 3 }
   0x4   : > { %p273_p2 = pnand %p6908_p0, %p272_p1 }
   0x6   : > { %276 = sbr.rel (%p273_p2) target bundleno = 1630 (0x65e), region = 52 }
   0xb   : > { %p311_p3 = scmp.lt.s32.totalorder %s6904_s28, 1  ;;  %vm334_vm0 = vcmask 60418   ;;  %vm12038_vm1 = vcmask 60416   ;;  %v12017_v0 = vmov 0   ;;  %s7519_s11 = smov 4   ;;  %vm12036_vm2 = vcmask 31744  }
   0xc   : > { %335 = vst.msk [vmem:[#allocation2 + $0xa0] sm:$0xc] %vm334_vm0, %v12017_v0  ;;  %7470 = vset.pattern.permute.xlu1 %v12017_v0  ;;  %7471 = vset.pattern.permute.xlu0 %v12017_v0  ;;  %vm381_vm3 = vcmask 1040384   ;;  %vm382_vm4 = vsmask.f32 256  ;;  %vm12016_vm6 = vcmask 58368  }
   0xd   : > { %s12382_s28 = smov (!%p311_p3, %s6904_s28), 1  ;;  %330 = vst.msk [vmem:[#allocation2 + $0x8] sm:$0xf] %vm12038_vm1, %v12017_v0  ;;  %vm7628_vm5 = vmand %vm381_vm3, %vm382_vm4  ;;  %vm394_vm7 = vcmask 1041408   ;;  %vm395_vm8 = vcmask 1045508   ;;  %vm409_vm10 = vcmask 59392  }
   0xe   : > { %s7331_s29 = sshll.u32 %s12382_s28, 7  ;;  %331 = vst.msk [vmem:[#allocation2 + $0xc] sm:$0xf] %vm12038_vm1, %v12017_v0  ;;  %vm7642_vm9 = vmor %vm394_vm7, %vm395_vm8  ;;  %vm450_vm11 = vcmask 1042432   ;;  %vm451_vm12 = vcmask 1046532   ;;  %vm12015_vm13 = vcmask 60419  }
   0xf   : > { %s7596_s10 = scalar_lea.vmem %s12005_s1, %s7331_s29  ;;  %336 = vst.msk [vmem:[#allocation2 + $0xa4] sm:$0xf] %vm12038_vm1, %v12017_v0  ;;  %s7621_s14 = scalar_lea.vmem %s12004_s0, %s7331_s29  ;;  %vm7663_vm14 = vmor %vm450_vm11, %vm451_vm12  ;;  %vm12013_vm15 = vcmask 57344   ;;  %vm552_vm4 = vcmask 1044484   ;;  %vm12029_vm7 = vcmask 60417   ;;  %vm12035_vm12 = vcmask 1045504  }
  0x10   : > { %v7339_v1 = vld [vmem:[%s7596_s10 + $0x10] sm:$0xff]  ;;  %v7335_v2 = vld [vmem:[%s7596_s10] sm:$0xff]  ;;  %337 = vst.msk [vmem:[#allocation2 + $0xa8] sm:$0xf] %vm12038_vm1, %v12017_v0  ;;  %v7341_v4 = vld [vmem:[%s7596_s10 + $0x18] sm:$0xff]  ;;  %s7520_s15 = smov 16  }
  0x11   : > { %v7343_v3 = vld [vmem:[%s7596_s10 + $0x20] sm:$0xff]  ;;  %483 = vrot.lane.b32.xlu1 %v7339_v1, %s7519_s11  ;;  %367 = vrot.lane.b32.xlu0 %v7335_v2, %s7519_s11  ;;  %v7337_v5 = vld [vmem:[%s7596_s10 + $0x8] sm:$0xff]  ;;  %333 = vst.msk [vmem:[#allocation2 + $0x10] sm:$0x3] %vm12016_vm6, %v12017_v0  ;;  %vm7716_vm8 = vmor %vm381_vm3, %vm552_vm4  ;;  %vm12033_vm3 = vcmask 1046528   ;;  %s7521_s16 = smov 8  }
  0x12   : > { %584 = vrot.lane.b32.xlu2 %v7343_v3, %s7519_s11  ;;  %v7345_v6 = vld [vmem:[%s7596_s10 + $0x28] sm:$0xff]  ;;  %v7347_v7 = vld [vmem:[%s7596_s10 + $0x30] sm:$0xff]  ;;  %v7342_v8 = vld [vmem:[%s7621_s14 + $0x20] sm:$0xff]  ;;  %vm12014_vm11 = vsmask.f32 7424  ;;  %s7522_s17 = smov 40  }
  0x13   : > { %v7349_v9 = vld [vmem:[%s7596_s10 + $0x38] sm:$0xff]  ;;  %v7344_v16 = vld [vmem:[%s7621_s14 + $0x28] sm:$0xff]  ;;  %v7351_v20 = vld [vmem:[%s7596_s10 + $0x40] sm:$0xff]  ;;  %s7523_s18 = smov 24   ;;  %s7524_s19 = smov 48   ;;  %vm12041_vm4 = vcmask 1044480  }
  0x14   : > { %v7355_v38 = vld [vmem:[%s7596_s10 + $0x50] sm:$0xff]  ;;  %v7353_v42 = vld [vmem:[%s7596_s10 + $0x48] sm:$0xff]  ;;  %v7334_v52 = vld [vmem:[%s7621_s14] sm:$0xff]  ;;  %s7525_s20 = smov 64   ;;  %s7526_s21 = smov 32  }
  0x15   : > { %v7338_v51 = vld [vmem:[%s7621_s14 + $0x10] sm:$0xff]  ;;  %v7357_v61 = vld [vmem:[%s7596_s10 + $0x58] sm:$0xff]  ;;  %s7527_s22 = smov 56   ;;  %s7528_s24 = smov 80  }
  0x16   : > { %s7530_s25 = smov 112  }
  0x19   : > { %529 = vrot.lane.b32.xlu1 %v7341_v4, %s7519_s11  ;;  %427 = vrot.lane.b32.xlu0 %v7337_v5, %s7519_s11 }
  0x1a   : > { %636 = vrot.lane.b32.xlu2 %v7345_v6, %s7519_s11 }
  0x21   : > { %688 = vrot.lane.b32.xlu0 %v7347_v7, %s7519_s11  ;;  %889 = vrot.lane.b32.xlu1 %v7355_v38, %s7519_s11 }
  0x22   : > { %733 = vrot.lane.b32.xlu2 %v7349_v9, %s7519_s11 }
  0x2a   : > { %785 = vrot.lane.b32.xlu2 %v7351_v20, %s7519_s11 }
  0x32   : > { %837 = vrot.lane.b32.xlu2 %v7353_v42, %s7519_s11 }
  0x3a   : > { %934 = vrot.lane.b32.xlu2 %v7357_v61, %s7519_s11 }
  0x6c   : > { %v585_v10 = vpop.permute.xlu2 %584 }
  0x6d   : > { %v588_v11 = vsel %vm12036_vm2, %v7342_v8, %v585_v10 }
  0x6e   : > { %v589_v12 = vshrl.u32 %v588_v11, 16  ;;  %v592_v13 = vshll.u32 %v588_v11, 16  ;;  %v7340_v11 = vld [vmem:[%s7621_s14 + $0x18] sm:$0xff] }
  0x70   : > { %v591_v14 = vrot.slane %v589_v12, 7 }
  0x72   : > { %v594_v17 = vor.u32 %v592_v13, %v591_v14  ;;  %v598_v18 = vsel %vm7628_vm5, %v591_v14, 0 }
  0x73   : > { %v603_v19 = vunpack.c.l.b16 %v598_v18 }
  0x74   : > { %v597_v21 = vsel %vm7628_vm5, 0, %v594_v17  ;;  %v637_v22 = vpop.permute.xlu2 %636  ;;  %v7441_v17 = vld [vmem:[#allocation2 + $0x8] sm:$0xe] }
  0x75   : > { %v601_v23 = vunpack.c.l.b16 %v597_v21  ;;  %v602_v24 = vunpack.c.h.b16 %v597_v21  ;;  %v606_v25 = vpack.c.b16 %v603_v19, %v603_v19  ;;  %v640_v26 = vsel %vm12036_vm2, %v7344_v16, %v637_v22  ;;  %v7440_v16 = vld [vmem:[#allocation2 + $0x8] sm:$0xf0] }
  0x76   : > { %v641_v27 = vshrl.u32 %v640_v26, 16  ;;  %v644_v28 = vshll.u32 %v640_v26, 16  ;;  %v7336_v22 = vld [vmem:[%s7621_s14 + $0x8] sm:$0xff] }
  0x77   : > { %v604_v29 = vpack.c.b16 %v601_v23, %v601_v23  ;;  %v605_v30 = vpack.c.b16 %v602_v24, %v602_v24  ;;  %v612_v34 = vrot.slane %v606_v25, 6 }
  0x78   : > { %v643_v31 = vrot.slane %v641_v27, 7 }
  0x79   : > { %v607_v32 = vrot.slane %v604_v29, 6  ;;  %v609_v33 = vrot.slane %v605_v30, 6  ;;  %v7689_v30 = vor.u32 %v7441_v17, %v7440_v16 }
  0x7a   : > { %v646_v36 = vor.u32 %v644_v28, %v643_v31  ;;  %v650_v37 = vsel %vm7628_vm5, %v643_v31, 0 }
  0x7b   : > { %v608_v39 = vrot.slane %v607_v32, 4  ;;  %v611_v40 = vrot.slane %v609_v33, 4  ;;  %617 = vst.msk [vmem:[#allocation2 + $0x34] sm:$0xc] %vm334_vm0, %v607_v32  ;;  %v655_v41 = vunpack.c.l.b16 %v650_v37 }
  0x7c   : > { %v649_v43 = vsel %vm7628_vm5, 0, %v646_v36 }
  0x7d   : > { %v610_v44 = vsel %vm7642_vm9, %v608_v39, %v609_v33  ;;  %v613_v45 = vsel %vm7642_vm9, %v611_v40, %v612_v34  ;;  %v653_v46 = vunpack.c.l.b16 %v649_v43  ;;  %v654_v47 = vunpack.c.h.b16 %v649_v43  ;;  %v7346_v40 = vld [vmem:[%s7621_s14 + $0x30] sm:$0xff] }
  0x7e   : > { %618 = vst.msk [vmem:[#allocation2 + $0x38] sm:$0xf] %vm12038_vm1, %v610_v44  ;;  %v658_v48 = vpack.c.b16 %v655_v41, %v655_v41 }
  0x7f   : > { %619 = vst.msk [vmem:[#allocation2 + $0x3c] sm:$0x7] %vm409_vm10, %v613_v45  ;;  %v656_v49 = vpack.c.b16 %v653_v46, %v653_v46  ;;  %v657_v50 = vpack.c.b16 %v654_v47, %v654_v47  ;;  %v2691_v46 = vshll.u32 %v7689_v30, 16 }
  0x80   : > { %v664_v55 = vrot.slane %v658_v48, 5 }
  0x81   : > { %v659_v53 = vrot.slane %v656_v49, 5  ;;  %v661_v54 = vrot.slane %v657_v50, 5  ;;  %v2689_v50 = vshrl.u32 %v7689_v30, 16 }
  0x83   : > { %v660_v57 = vrot.slane %v659_v53, 4  ;;  %v663_v58 = vrot.slane %v661_v54, 4  ;;  %669 = vst.msk [vmem:[#allocation2 + $0x3c] sm:$0x8] %vm12015_vm13, %v659_v53  ;;  %v484_v59 = vpop.permute.xlu1 %483  ;;  %v368_v60 = vpop.permute.xlu0 %367 }
  0x84   : > { %v487_v62 = vsel %vm12036_vm2, %v7338_v51, %v484_v59  ;;  %v372_v63 = vsel %vm12036_vm2, %v7334_v52, %v368_v60 }
  0x85   : > { %v662_v1 = vsel %vm7663_vm14, %v660_v57, %v661_v54  ;;  %v665_v2 = vsel %vm7663_vm14, %v663_v58, %v664_v55  ;;  %v488_v3 = vshrl.u32 %v487_v62, 16  ;;  %v491_v4 = vshll.u32 %v487_v62, 16 }
  0x86   : > { %670 = vst.msk [vmem:[#allocation2 + $0x40] sm:$0xf] %vm12038_vm1, %v662_v1  ;;  %v373_v5 = vshrl.u32 %v372_v63, 16  ;;  %v376_v8 = vshll.u32 %v372_v63, 16 }
  0x87   : > { %671 = vst.msk [vmem:[#allocation2 + $0x44] sm:$0xf] %vm12038_vm1, %v665_v2  ;;  %v490_v6 = vrot.slane %v488_v3, 7 }
  0x88   : > { %v375_v7 = vrot.slane %v373_v5, 7 }
  0x89   : > { %v493_v9 = vor.u32 %v491_v4, %v490_v6  ;;  %v497_v10 = vsel %vm7628_vm5, %v490_v6, 0 }
  0x8a   : > { %v502_v12 = vunpack.c.l.b16 %v497_v10  ;;  %v378_v13 = vor.u32 %v376_v8, %v375_v7  ;;  %v385_v14 = vsel %vm7628_vm5, %v375_v7, 0 }
  0x8b   : > { %v496_v18 = vsel %vm7628_vm5, 0, %v493_v9  ;;  %v390_v19 = vunpack.c.l.b16 %v385_v14  ;;  %v530_v20 = vpop.permute.xlu1 %529  ;;  %v428_v21 = vpop.permute.xlu0 %427 }
  0x8c   : > { %v500_v23 = vunpack.c.l.b16 %v496_v18  ;;  %v501_v24 = vunpack.c.h.b16 %v496_v18  ;;  %v505_v25 = vpack.c.b16 %v502_v12, %v502_v12  ;;  %v384_v26 = vsel %vm7628_vm5, 0, %v378_v13 }
  0x8d   : > { %v388_v27 = vunpack.c.l.b16 %v384_v26  ;;  %v389_v28 = vunpack.c.h.b16 %v384_v26  ;;  %v533_v29 = vsel %vm12036_vm2, %v7340_v11, %v530_v20  ;;  %v393_v38 = vpack.c.b16 %v390_v19, %v390_v19 }
  0x8e   : > { %v503_v31 = vpack.c.b16 %v500_v23, %v500_v23  ;;  %v504_v32 = vpack.c.b16 %v501_v24, %v501_v24  ;;  %512 = vst.msk [vmem:[#allocation2 + $0x2c] sm:$0x1] %vm12013_vm15, %v505_v25  ;;  %v534_v33 = vshrl.u32 %v533_v29, 16  ;;  %v537_v34 = vshll.u32 %v533_v29, 16 }
  0x8f   : > { %v391_v36 = vpack.c.b16 %v388_v27, %v388_v27  ;;  %v392_v37 = vpack.c.b16 %v389_v28, %v389_v28  ;;  %v431_v39 = vsel %vm12036_vm2, %v7336_v22, %v428_v21  ;;  %v402_v53 = vrot.slane %v393_v38, 6 }
  0x90   : > { %509 = vst.msk [vmem:[#allocation2 + $0x24] sm:$0xf] %vm12038_vm1, %v503_v31  ;;  %v536_v41 = vrot.slane %v534_v33, 7  ;;  %v432_v42 = vshrl.u32 %v431_v39, 16  ;;  %v435_v43 = vshll.u32 %v431_v39, 16  ;;  %v2693_v13 = vrot.slane %v2691_v46, 1 }
  0x91   : > { %510 = vst.msk [vmem:[#allocation2 + $0x28] sm:$0xf] %vm12038_vm1, %v504_v32  ;;  %v397_v44 = vrot.slane %v391_v36, 6  ;;  %v399_v45 = vrot.slane %v392_v37, 6  ;;  %v12050_v19 = vmov 0  ;;  %v2880_v31 = vrot.slane %v7689_v30, 1 }
  0x92   : > { %v539_v47 = vor.u32 %v537_v34, %v536_v41  ;;  %v543_v48 = vsel %vm7628_vm5, %v536_v41, 0  ;;  %v434_v49 = vrot.slane %v432_v42, 7  ;;  %v12051_v19 = vsel %vm7716_vm8, 4294967295, %v12050_v19 }
  0x93   : > { %v398_v51 = vrot.slane %v397_v44, 4  ;;  %v401_v52 = vrot.slane %v399_v45, 4  ;;  %407 = vst.msk [vmem:[#allocation2 + $0x10] sm:$0xc] %vm334_vm0, %v397_v44  ;;  %v548_v54 = vunpack.c.l.b16 %v543_v48  ;;  %v689_v55 = vpop.permute.xlu0 %688  ;;  %v2694_v42 = vor.u32 %v2693_v13, %v2689_v50  ;;  %v7753_v50 = vld [vmem:[#allocation2 + $0x38] sm:$0xff] }
  0x94   : > { %v542_v57 = vsel %vm7628_vm5, 0, %v539_v47  ;;  %v437_v58 = vor.u32 %v435_v43, %v434_v49  ;;  %v441_v59 = vsel %vm7628_vm5, %v434_v49, 0  ;;  %v692_v60 = vsel %vm12036_vm2, %v7346_v40, %v689_v55  ;;  %12052 = vst [vmem:[#allocation4_spill] sm:$0xff] %v12051_v19 }
  0x95   : > { %v400_v61 = vsel %vm7642_vm9, %v398_v51, %v399_v45  ;;  %v403_v62 = vsel %vm7642_vm9, %v401_v52, %v402_v53  ;;  %v546_v63 = vunpack.c.l.b16 %v542_v57  ;;  %v547_v1 = vunpack.c.h.b16 %v542_v57 }
  0x96   : > { %408 = vst.msk [vmem:[#allocation2 + $0x14] sm:$0xf] %vm12038_vm1, %v400_v61  ;;  %v551_v2 = vpack.c.b16 %v548_v54, %v548_v54  ;;  %v440_v3 = vsel %vm7628_vm5, 0, %v437_v58  ;;  %v446_v4 = vunpack.c.l.b16 %v441_v59  ;;  %v693_v5 = vshrl.u32 %v692_v60, 16 }
  0x97   : > { %410 = vst.msk [vmem:[#allocation2 + $0x18] sm:$0x7] %vm409_vm10, %v403_v62  ;;  %v549_v6 = vpack.c.b16 %v546_v63, %v546_v63  ;;  %v550_v7 = vpack.c.b16 %v547_v1, %v547_v1  ;;  %v444_v8 = vunpack.c.l.b16 %v440_v3  ;;  %v445_v9 = vunpack.c.h.b16 %v440_v3 }
  0x98   : > { %v449_v10 = vpack.c.b16 %v446_v4, %v446_v4  ;;  %v695_v11 = vrot.slane %v693_v5, 7  ;;  %v696_v12 = vshll.u32 %v692_v60, 16  ;;  %v559_v20 = vrot.slane %v551_v2, 7 }
  0x99   : > { %v554_v14 = vrot.slane %v549_v6, 7  ;;  %v556_v16 = vrot.slane %v550_v7, 7  ;;  %v447_v17 = vpack.c.b16 %v444_v8, %v444_v8  ;;  %v448_v18 = vpack.c.b16 %v445_v9, %v445_v9 }
  0x9a   : > { %v458_v21 = vrot.slane %v449_v10, 5  ;;  %v698_v22 = vor.u32 %v696_v12, %v695_v11  ;;  %v702_v23 = vsel %vm7628_vm5, %v695_v11, 0  ;;  %v2891_v53 = vrot.slane %v7753_v50, 1  ;;  %v2579_v59 = vld [vmem:[#allocation2 + $0x10] sm:$0xe] }
  0x9b   : > { %v555_v24 = vrot.slane %v554_v14, 4  ;;  %v558_v25 = vrot.slane %v556_v16, 4  ;;  %565 = vst.msk [vmem:[#allocation2 + $0x2c] sm:$0xe] %vm12029_vm7, %v554_v14  ;;  %v453_v26 = vrot.slane %v447_v17, 5  ;;  %v455_v27 = vrot.slane %v448_v18, 5 }
  0x9c   : > { %v701_v28 = vsel %vm7628_vm5, 0, %v698_v22  ;;  %v707_v29 = vunpack.c.l.b16 %v702_v23  ;;  %v2959_v1 = vunpack.c.l.b16 %v2579_v59  ;;  %v2583_v2 = vld [vmem:[#allocation2 + $0x10] sm:$0xc] }
  0x9d   : > { %v557_v32 = vsel %vm7716_vm8, %v555_v24, %v556_v16  ;;  %v560_v33 = vsel %vm7716_vm8, %v558_v25, %v559_v20  ;;  %v454_v34 = vrot.slane %v453_v26, 4  ;;  %v457_v36 = vrot.slane %v455_v27, 4  ;;  %464 = vst.msk [vmem:[#allocation2 + $0x18] sm:$0x8] %vm12015_vm13, %v453_v26  ;;  %v7731_v37 = vld [vmem:[#allocation2 + $0x10] sm:$0xff]  }
  0x9e   : > { %566 = vst.msk [vmem:[#allocation2 + $0x30] sm:$0xf] %vm12038_vm1, %v557_v32  ;;  %v705_v38 = vunpack.c.l.b16 %v701_v28  ;;  %v706_v39 = vunpack.c.h.b16 %v701_v28  ;;  %v2881_v40 = vrot.slane %v7731_v37, 1  ;;  %v2696_v43 = vshll.u32 %v7731_v37, 16 }
  0x9f   : > { %567 = vst.msk [vmem:[#allocation2 + $0x34] sm:$0x3] %vm12016_vm6, %v560_v33  ;;  %v456_v30 = vsel %vm7663_vm14, %v454_v34, %v455_v27  ;;  %v459_v41 = vsel %vm7663_vm14, %v457_v36, %v458_v21  ;;  %v710_v46 = vpack.c.b16 %v707_v29, %v707_v29  ;;  %v7420_v60 = vunpack.c.h.b16 %v7731_v37 }
  0xa0   : > { %465 = vst.msk [vmem:[#allocation2 + $0x1c] sm:$0xf] %vm12038_vm1, %v456_v30  ;;  %v708_v44 = vpack.c.b16 %v705_v38, %v705_v38  ;;  %v709_v45 = vpack.c.b16 %v706_v39, %v706_v39  ;;  %v2882_v47 = vsel %vm12033_vm3, %v2880_v31, %v2881_v40  ;;  %v7745_v48 = vrot.slane %v2696_v43, 1 }
  0xa1   : > { %466 = vst.msk [vmem:[#allocation2 + $0x20] sm:$0xf] %vm12038_vm1, %v459_v41  ;;  %2917 = vrot.lane.b32.xlu1 %v2882_v47, %s7520_s15  ;;  %v2963_v4 = vpack.c.b16 %v7420_v60, %v2959_v1  ;;  %v3011_v7 = vunpack.c.l.b16 %v2583_v2  ;;  %v734_v1 = vpop.permute.xlu2 %733  ;;  %v7348_v2 = vld [vmem:[%s7621_s14 + $0x38] sm:$0xff] }
  0xa2   : > { %714 = vst.msk [vmem:[#allocation2 + $0x48] sm:$0xf] %vm12038_vm1, %v708_v44  ;;  %v2699_v49 = vsel %vm12014_vm11, %v2694_v42, %v7745_v48  ;;  %v7784_v6 = vld [vmem:[#allocation2 + $0x28] sm:$0xff] }
  0xa3   : > { %715 = vst.msk [vmem:[#allocation2 + $0x4c] sm:$0xf] %vm12038_vm1, %v709_v45  ;;  %2838 = vrot.lane.b32.xlu0 %v2699_v49, %s7521_s16  ;;  %v3012_v9 = vpack.c.b16 %v7420_v60, %v3011_v7  ;;  %v2966_v10 = vrot.slane %v2963_v4, 1  ;;  %v2887_v12 = vrot.slane %v7784_v6, 1  ;;  %v7809_v24 = vshll.u32 %v7784_v6, 16 }
  0xa4   : > { %716 = vst.msk [vmem:[#allocation2 + $0x50] sm:$0x1] %vm12013_vm15, %v710_v46  ;;  %v3151_v25 = vrot.slane %v7784_v6, 2  ;;  %v7833_v39 = vshrl.u32 %v7784_v6, 16  ;;  %v3415_v46 = vrot.slane %v7784_v6, 3  ;;  %v737_v4 = vsel %vm12036_vm2, %v7348_v2, %v734_v1 }
  0xa5   : > { %v3146_v18 = vrot.slane %v3012_v9, 2  ;;  %v2722_v32 = vrot.slane %v7809_v24, 1  ;;  %v3015_v36 = vshrl.u32 %v3012_v9, 16  ;;  %v3018_v38 = vshll.u32 %v3012_v9, 16 }
  0xa6   : > { %v7755_v51 = vld [vmem:[#allocation2 + $0x30] sm:$0xff]  ;;  %vm12034_vm15 = vsmask.f32 6400  ;;  %v741_v7 = vshll.u32 %v737_v4, 16 }
  0xa7   : > { %v7757_v52 = vld [vmem:[#allocation2 + $0x18] sm:$0xff]   ;;  %v2889_v58 = vrot.slane %v7755_v51, 1  ;;  %v3153_v26 = vrot.slane %v7755_v51, 2  ;;  %v7824_v33 = vshll.u32 %v7755_v51, 16  ;;  %v3017_v41 = vrot.slane %v3015_v36, 1 }
  0xa8   : > { %v2883_v54 = vrot.slane %v7757_v52, 1  ;;  %v7761_v55 = vld [vmem:[#allocation2 + $0x20] sm:$0xff]  ;;  %v3147_v57 = vrot.slane %v7757_v52, 2  ;;  %v2704_v8 = vshll.u32 %v7757_v52, 16  ;;  %v2708_v20 = vshrl.u32 %v7757_v52, 16 }
  0xa9   : > { %v7768_v62 = vrot.slane %v7761_v55, 2  ;;  %v7775_v63 = vsel %vm12033_vm3, %v2889_v58, %v2891_v53  ;;  %v2885_v5 = vrot.slane %v7761_v55, 1  ;;  %v7794_v16 = vshll.u32 %v7761_v55, 16 }
  0xaa   : > { %v2884_v61 = vsel %vm12033_vm3, %v2881_v40, %v2883_v54  ;;  %v2967_v13 = vsel %vm12033_vm3, %v2966_v10, %v2883_v54  ;;  %v7791_v14 = vrot.slane %v2704_v8, 1  ;;  %v7804_v21 = vsel %vm12035_vm12, %v3146_v18, %v3147_v57 }
  0xab   : > { %2919 = vrot.lane.b32.xlu1 %v2884_v61, %s7520_s15  ;;  %v3150_v3 = vsel %vm12035_vm12, %v3147_v57, %v7768_v62  ;;  %2927 = vrot.lane.b32.xlu0 %v7775_v63, %s7520_s15  ;;  %v2886_v11 = vsel %vm12033_vm3, %v2883_v54, %v2885_v5  ;;  %v7797_v17 = vsel %vm12033_vm3, %v2885_v5, %v2887_v12  ;;  %v2714_v23 = vrot.slane %v7794_v16, 1 }
  0xac   : > { %3185 = vrot.lane.b32.xlu2 %v3150_v3, %s7522_s17  ;;  %v2710_v22 = vor.u32 %v2708_v20, %v7791_v14  ;;  %v7815_v27 = vsel %vm12035_vm12, %v7768_v62, %v3151_v25  ;;  %v3022_v28 = vrot.slane %v2708_v20, 1  ;;  %v3023_v29 = vrot.slane %v2704_v8, 2 }
  0xad   : > { %v7827_v34 = vsel %vm12035_vm12, %v3151_v25, %v3153_v26  ;;  %v3413_v40 = vrot.slane %v7761_v55, 3  ;;  %v3020_v42 = vrot.slane %v3018_v38, 2  ;;  %v2726_v43 = vor.u32 %v7833_v39, %v2722_v32 }
  0xae   : > { %v2715_v31 = vsel %vm12014_vm11, %v2710_v22, %v2714_v23  ;;  %v3024_v30 = vor.u32 %v3023_v29, %v3022_v28  ;;  %v2730_v44 = vrot.slane %v7824_v33, 1  ;;  %v7841_v45 = vshrl.u32 %v7761_v55, 16  ;;  %v7350_v28 = vld [vmem:[%s7621_s14 + $0x40] sm:$0xff] }
  0xaf   : > { %v3021_v47 = vor.u32 %v3020_v42, %v3017_v41  ;;  %v3416_v49 = vsel %vm12041_vm4, %v3413_v40, %v3415_v46  ;;  %v3027_v60 = vrot.slane %v7794_v16, 2  ;;  %v7861_v61 = vsel %vm12033_vm3, %v2887_v12, %v2889_v58 }
  0xb0   : > { %v2731_v57 = vsel %vm12014_vm11, %v2726_v43, %v2730_v44  ;;  %v3026_v59 = vrot.slane %v7841_v45, 1  ;;  %v738_v5 = vshrl.u32 %v737_v4, 16  ;;  %v3155_v8 = vrot.slane %v7753_v50, 2 }
  0xb1   : > { %v7850_v54 = vsel %vm12034_vm15, %v3021_v47, %v3024_v30  ;;  %v3288_v9 = vrot.slane %v7841_v45, 2  ;;  %v3289_v58 = vrot.slane %v7794_v16, 3  ;;  %v3292_v20 = vrot.slane %v7833_v39, 2 }
  0xb2   : > { %v7867_v3 = vor.u32 %v3027_v60, %v3026_v59  ;;  %v740_v10 = vrot.slane %v738_v5, 7  ;;  %v7880_v18 = vsel %vm12035_vm12, %v3153_v26, %v3155_v8  ;;  %vm12030_vm11 = vsmask.f32 5376  ;;  %v7899_v59 = vld [vmem:[#allocation2 + $0x40] sm:$0xff] }
  0xb3   : > { %2974 = vrot.lane.b32.xlu1 %v2886_v11, %s7523_s18  ;;  %2972 = vrot.lane.b32.xlu0 %v2967_v13, %s7523_s18  ;;  %v3293_v13 = vrot.slane %v7809_v24, 3  ;;  %v7889_v29 = vor.u32 %v3289_v58, %v3288_v9  ;;  %v3031_v9 = vrot.slane %v7809_v24, 2 }
  0xb4   : > { %2976 = vrot.lane.b32.xlu2 %v7797_v17, %s7523_s18  ;;  %v3029_v12 = vsel %vm12034_vm15, %v3024_v30, %v7867_v3  ;;  %v743_v22 = vor.u32 %v741_v7, %v740_v10  ;;  %v747_v25 = vsel %vm7628_vm5, %v740_v10, 0  ;;  %v786_v30 = vpop.permute.xlu2 %785  ;;  %v3030_v7 = vrot.slane %v7833_v39, 1 }
  0xb5   : > { %v7893_v41 = vor.u32 %v3293_v13, %v3292_v20  ;;  %v789_v42 = vsel %vm12036_vm2, %v7350_v28, %v786_v30  ;;  %v7352_v13 = vld [vmem:[%s7621_s14 + $0x48] sm:$0xff]  ;;  %v3417_v20 = vrot.slane %v7755_v51, 3  ;;  %v7915_v39 = vshrl.u32 %v7755_v51, 16 }
  0xb6   : > { %v746_v26 = vsel %vm7628_vm5, 0, %v743_v22  ;;  %v793_v60 = vshll.u32 %v789_v42, 16  ;;  %v3157_v22 = vrot.slane %v7899_v59, 2 }
  0xb7   : > { %v751_v36 = vunpack.c.h.b16 %v746_v26  ;;  %v2734_v55 = vor.u32 %v7915_v39, %v2730_v44 }
  0xb8   : > { %v7944_v6 = vsel %vm12035_vm12, %v3155_v8, %v3157_v22  ;;  %v2893_v8 = vrot.slane %v7899_v59, 1 }
  0xb9   : > { %v754_v47 = vpack.c.b16 %v751_v36, %v751_v36 }
  0xbb   : > { %3240 = vrot.lane.b32.xlu1 %v7815_v27, %s7524_s19  ;;  %2842 = vrot.lane.b32.xlu0 %v2715_v31, %s7521_s16  ;;  %v750_v31 = vunpack.c.l.b16 %v746_v26  ;;  %v758_v2 = vrot.slane %v754_v47, 7 }
  0xbc   : > { %3242 = vrot.lane.b32.xlu2 %v7827_v34, %s7524_s19  ;;  %v838_v26 = vpop.permute.xlu2 %837 }
  0xbd   : > { %v753_v43 = vpack.c.b16 %v750_v31, %v750_v31  ;;  %v760_v10 = vrot.slane %v758_v2, 4  ;;  %v841_v30 = vsel %vm12036_vm2, %v7352_v13, %v838_v26 }
  0xbe   : > { %v845_v47 = vshll.u32 %v841_v30, 16 }
  0xbf   : > { %v756_v1 = vrot.slane %v753_v43, 7  ;;  %v842_v43 = vshrl.u32 %v841_v30, 16 }
  0xc1   : > { %v757_v58 = vrot.slane %v756_v1, 4  ;;  %766 = vst.msk [vmem:[#allocation2 + $0x50] sm:$0xe] %vm12029_vm7, %v756_v1 }
  0xc3   : > { %3451 = vrot.lane.b32.xlu1 %v3416_v49, %s7525_s20  ;;  %2846 = vrot.lane.b32.xlu0 %v2731_v57, %s7521_s16  ;;  %v790_v49 = vshrl.u32 %v789_v42, 16  ;;  %v3295_v57 = vsel %vm12030_vm11, %v7889_v29, %v7893_v41  ;;  %v7925_v42 = vor.u32 %v3031_v9, %v3030_v7 }
  0xc4   : > { %2978 = vrot.lane.b32.xlu2 %v7861_v61, %s7523_s18 }
  0xc5   : > { %v792_v5 = vrot.slane %v790_v49, 7  ;;  %v3418_v49 = vsel %vm12041_vm4, %v3415_v46, %v3417_v20  ;;  %v3033_v1 = vsel %vm12034_vm15, %v7867_v3, %v7925_v42 }
  0xcb   : > { %2921 = vrot.lane.b32.xlu1 %v2886_v11, %s7520_s15  ;;  %3106 = vrot.lane.b32.xlu0 %v3029_v12, %s7526_s21  ;;  %v752_v11 = vunpack.c.l.b16 %v747_v25  ;;  %v795_v12 = vor.u32 %v793_v60, %v792_v5 }
  0xcc   : > { %3244 = vrot.lane.b32.xlu2 %v7880_v18, %s7524_s19 }
  0xcd   : > { %v755_v38 = vpack.c.b16 %v752_v11, %v752_v11  ;;  %v798_v28 = vsel %vm7628_vm5, 0, %v795_v12 }
  0xce   : > { %v802_v31 = vunpack.c.l.b16 %v798_v28  ;;  %v803_v36 = vunpack.c.h.b16 %v798_v28 }
  0xcf   : > { %v761_v4 = vrot.slane %v755_v38, 7 }
  0xd0   : > { %v806_v60 = vpack.c.b16 %v803_v36, %v803_v36  ;;  %v935_v36 = vpop.permute.xlu2 %934 }
  0xd1   : > { %v762_v11 = vsel %vm7716_vm8, %v760_v10, %v761_v4  ;;  %v3297_v4 = vrot.slane %v7824_v33, 3  ;;  %v7356_v10 = vld [vmem:[%s7621_s14 + $0x58] sm:$0xff] }
  0xd2   : > { %768 = vst.msk [vmem:[#allocation2 + $0x58] sm:$0x3] %vm12016_vm6, %v762_v11  ;;  %v810_v7 = vrot.slane %v806_v60, 6  ;;  %v938_v30 = vsel %vm12036_vm2, %v7356_v10, %v935_v36  ;;  %v7972_v60 = vsel %vm12033_vm3, %v2891_v53, %v2893_v8  ;;  %v2718_v53 = vor.u32 %v7841_v45, %v2714_v23  ;;  %v7354_v36 = vld [vmem:[%s7621_s14 + $0x50] sm:$0xff] }
  0xd3   : > { %3187 = vrot.lane.b32.xlu1 %v7815_v27, %s7522_s17  ;;  %3372 = vrot.lane.b32.xlu0 %v3295_v57, %s7527_s22  ;;  %v799_v27 = vsel %vm7628_vm5, %v792_v5, 0  ;;  %v805_v57 = vpack.c.b16 %v802_v31, %v802_v31  ;;  %v844_v5 = vrot.slane %v842_v43, 7 }
  0xd4   : > { %2980 = vrot.lane.b32.xlu2 %v7775_v63, %s7523_s18  ;;  %v804_v25 = vunpack.c.l.b16 %v799_v27  ;;  %v759_v63 = vsel %vm7716_vm8, %v757_v58, %v758_v2  ;;  %v3296_v2 = vrot.slane %v7915_v39, 2  ;;  %v812_v27 = vrot.slane %v810_v7, 4 }
  0xd5   : > { %767 = vst.msk [vmem:[#allocation2 + $0x54] sm:$0xf] %vm12038_vm1, %v759_v63  ;;  %v808_v46 = vrot.slane %v805_v57, 6  ;;  %v847_v3 = vor.u32 %v845_v47, %v844_v5  ;;  %v851_v58 = vsel %vm7628_vm5, %v844_v5, 0  ;;  %v942_v57 = vshll.u32 %v938_v30, 16 }
  0xd6   : > { %v807_v38 = vpack.c.b16 %v804_v25, %v804_v25  ;;  %v856_v13 = vunpack.c.l.b16 %v851_v58  ;;  %v7954_v25 = vor.u32 %v3297_v4, %v3296_v2  ;;  %v7978_v2 = vld [vmem:[#allocation2 + $0x48] sm:$0xff] }
  0xd7   : > { %v809_v12 = vrot.slane %v808_v46, 4  ;;  %818 = vst.msk [vmem:[#allocation2 + $0x58] sm:$0xc] %vm334_vm0, %v808_v46  ;;  %v850_v63 = vsel %vm7628_vm5, 0, %v847_v3  ;;  %v3159_v10 = vrot.slane %v7978_v2, 2 }
  0xd8   : > { %v813_v9 = vrot.slane %v807_v38, 6  ;;  %v854_v26 = vunpack.c.l.b16 %v850_v63  ;;  %v855_v31 = vunpack.c.h.b16 %v850_v63  ;;  %v859_v38 = vpack.c.b16 %v856_v13, %v856_v13 }
  0xd9   : > { %v811_v11 = vsel %vm7642_vm9, %v809_v12, %v810_v7  ;;  %v8010_v24 = vsel %vm12035_vm12, %v3157_v22, %v3159_v10  ;;  %v2700_v22 = vshrl.u32 %v7731_v37, 16 }
  0xda   : > { %v814_v28 = vsel %vm7642_vm9, %v812_v27, %v813_v9  ;;  %819 = vst.msk [vmem:[#allocation2 + $0x5c] sm:$0xf] %vm12038_vm1, %v811_v11  ;;  %v857_v43 = vpack.c.b16 %v854_v26, %v854_v26  ;;  %v858_v47 = vpack.c.b16 %v855_v31, %v855_v31  ;;  %v865_v46 = vrot.slane %v859_v38, 5 }
  0xdb   : > { %3453 = vrot.lane.b32.xlu1 %v3418_v49, %s7525_s20  ;;  %3108 = vrot.lane.b32.xlu0 %v3033_v1, %s7526_s21  ;;  %820 = vst.msk [vmem:[#allocation2 + $0x60] sm:$0x7] %vm409_vm10, %v814_v28  ;;  %v939_v49 = vshrl.u32 %v938_v30, 16  ;;  %v3299_v1 = vsel %vm12030_vm11, %v7893_v41, %v7954_v25  ;;  %v3034_v11 = vrot.slane %v7915_v39, 1  ;;  %v3035_v28 = vrot.slane %v7824_v33, 2  ;;  %v890_v30 = vpop.permute.xlu1 %889 }
  0xdc   : > { %3246 = vrot.lane.b32.xlu2 %v7944_v6, %s7524_s19  ;;  %v860_v4 = vrot.slane %v857_v43, 5  ;;  %v862_v5 = vrot.slane %v858_v47, 5  ;;  %v2585_v33 = vld [vmem:[#allocation2 + $0x18] sm:$0xc]  ;;  %v3423_v39 = vrot.slane %v7978_v2, 3 }
  0xdd   : > { %v941_v7 = vrot.slane %v939_v49, 7  ;;  %v3036_v43 = vor.u32 %v3035_v28, %v3034_v11 }
  0xde   : > { %v864_v9 = vrot.slane %v862_v5, 4  ;;  %870 = vst.msk [vmem:[#allocation2 + $0x60] sm:$0x8] %vm12015_vm13, %v860_v4  ;;  %vm12053_vm13 = vsmask.f32 7424 }
  0xdf   : > { %v944_v41 = vor.u32 %v942_v57, %v941_v7  ;;  %v948_v3 = vsel %vm7628_vm5, %v941_v7, 0  ;;  %v2723_v63 = vsel %vm12053_vm13, %v2718_v53, %v2722_v32  ;;  %v893_v57 = vsel %vm12036_vm2, %v7354_v36, %v890_v30 }
  0xe0   : > { %v953_v58 = vunpack.c.l.b16 %v948_v3  ;;  %v866_v16 = vsel %vm7663_vm14, %v864_v9, %v865_v46  ;;  %v8020_v46 = vshrl.u32 %v7753_v50, 16  ;;  %v2702_v9 = vor.u32 %v2700_v22, %v7745_v48 }
  0xe1   : > { %v947_v23 = vsel %vm7628_vm5, 0, %v944_v41  ;;  %872 = vst.msk [vmem:[#allocation2 + $0x68] sm:$0xf] %vm12038_vm1, %v866_v16  ;;  %v3037_v41 = vsel %vm12034_vm15, %v7925_v42, %v3036_v43  ;;  %v8035_v3 = vshll.u32 %v7753_v50, 16  ;;  %v7424_v36 = vunpack.c.h.b16 %v7757_v52 }
  0xe2   : > { %v951_v45 = vunpack.c.l.b16 %v947_v23  ;;  %v952_v27 = vunpack.c.h.b16 %v947_v23  ;;  %v956_v13 = vpack.c.b16 %v953_v58, %v953_v58  ;;  %v2707_v51 = vsel %vm12053_vm13, %v2702_v9, %v7791_v14 }
  0xe3   : > { %2923 = vrot.lane.b32.xlu1 %v7797_v17, %s7520_s15  ;;  %3374 = vrot.lane.b32.xlu0 %v3299_v1, %s7527_s22  ;;  %v861_v17 = vrot.slane %v860_v4, 4  ;;  %v3419_v1 = vrot.slane %v7753_v50, 3  ;;  %v894_v4 = vshrl.u32 %v893_v57, 16  ;;  %v3300_v58 = vrot.slane %v8020_v46, 2 }
  0xe4   : > { %2982 = vrot.lane.b32.xlu2 %v7972_v60, %s7523_s18  ;;  %v954_v26 = vpack.c.b16 %v951_v45, %v951_v45  ;;  %v955_v31 = vpack.c.b16 %v952_v27, %v952_v27  ;;  %v962_v38 = vrot.slane %v956_v13, 7  ;;  %v3301_v42 = vrot.slane %v8035_v3, 3 }
  0xe5   : > { %v863_v12 = vsel %vm7663_vm14, %v861_v17, %v862_v5  ;;  %v897_v5 = vshll.u32 %v893_v57, 16  ;;  %v3420_v17 = vsel %vm12041_vm4, %v3417_v20, %v3419_v1  ;;  %v896_v37 = vrot.slane %v894_v4, 7 }
  0xe6   : > { %871 = vst.msk [vmem:[#allocation2 + $0x64] sm:$0xf] %vm12038_vm1, %v863_v12  ;;  %v957_v32 = vrot.slane %v954_v26, 7  ;;  %v3302_v14 = vor.u32 %v3301_v42, %v3300_v58  ;;  %vm12054_vm13 = vcmask 57344   ;;  %v3038_v11 = vrot.slane %v8020_v46, 1 }
  0xe7   : > { %v899_v20 = vor.u32 %v897_v5, %v896_v37  ;;  %v903_v48 = vsel %vm7628_vm5, %v896_v37, 0  ;;  %v3039_v28 = vrot.slane %v8035_v3, 2  ;;  %v2589_v26 = vld [vmem:[#allocation2 + $0x18] sm:$0x8] }
  0xe8   : > { %v958_v47 = vrot.slane %v957_v32, 4  ;;  %967 = vst.msk [vmem:[#allocation2 + $0x74] sm:$0xe] %vm12029_vm7, %v957_v32  ;;  %v908_v12 = vunpack.c.l.b16 %v903_v48  ;;  %v3277_v32 = vunpack.c.l.b16 %v2589_v26  ;;  %v3225_v48 = vunpack.c.l.b16 %v2585_v33 }
  0xe9   : > { %v902_v50 = vsel %vm7628_vm5, 0, %v899_v20  ;;  %vm12074_vm7 = vsmask.f32 7424 }
  0xea   : > { %v906_v16 = vunpack.c.l.b16 %v902_v50  ;;  %v907_v23 = vunpack.c.h.b16 %v902_v50  ;;  %v911_v45 = vpack.c.b16 %v908_v12, %v908_v12  ;;  %v3278_v52 = vpack.c.b16 %v7424_v36, %v3277_v32 }
  0xeb   : > { %3189 = vrot.lane.b32.xlu1 %v7827_v34, %s7522_s17  ;;  %2844 = vrot.lane.b32.xlu0 %v2723_v63, %s7521_s16  ;;  %v959_v34 = vrot.slane %v955_v31, 7  ;;  %v3303_v63 = vsel %vm12030_vm11, %v7954_v25, %v3302_v14  ;;  %v8061_v31 = vshll.u32 %v7899_v59, 16  ;;  %v2895_v25 = vrot.slane %v7978_v2, 1 }
  0xec   : > { %3248 = vrot.lane.b32.xlu2 %v8010_v24, %s7524_s19  ;;  %v909_v27 = vpack.c.b16 %v906_v16, %v906_v16  ;;  %v910_v13 = vpack.c.b16 %v907_v23, %v907_v23  ;;  %917 = vst.msk [vmem:[#allocation2 + $0x74] sm:$0x1] %vm12054_vm13, %v911_v45  ;;  %v3412_v57 = vrot.slane %v3278_v52, 3  ;;  %vm12055_vm13 = vsmask.f32 7424  ;;  %v8136_v45 = vld [vmem:[#allocation2 + $0x50] sm:$0xff] }
  0xed   : > { %v961_v49 = vrot.slane %v959_v34, 4  ;;  %v960_v7 = vsel %vm7716_vm8, %v958_v47, %v959_v34  ;;  %v3040_v34 = vor.u32 %v3039_v28, %v3038_v11  ;;  %v3305_v30 = vrot.slane %v8061_v31, 3  ;;  %12057 = vst [vmem:[#allocation6_spill] sm:$0xff] %v8136_v45 }
  0xee   : > { %968 = vst.msk [vmem:[#allocation2 + $0x78] sm:$0xf] %vm12038_vm1, %v960_v7  ;;  %v8078_v47 = vsel %vm12033_vm3, %v2893_v8, %v2895_v25  ;;  %v3043_v5 = vrot.slane %v8061_v31, 2  ;;  %v3414_v7 = vsel %vm12041_vm4, %v3412_v57, %v3413_v40  ;;  %v2738_v40 = vrot.slane %v8035_v3, 1 }
  0xef   : > { %v963_v53 = vsel %vm7716_vm8, %v961_v49, %v962_v38  ;;  %915 = vst.msk [vmem:[#allocation2 + $0x6c] sm:$0xf] %vm12038_vm1, %v909_v27  ;;  %v3229_v42 = vpack.c.b16 %v7424_v36, %v3225_v48  ;;  %v3284_v11 = vshll.u32 %v3278_v52, 16  ;;  %v3161_v28 = vrot.slane %v8136_v45, 2 }
  0xf0   : > { %969 = vst.msk [vmem:[#allocation2 + $0x7c] sm:$0x3] %vm12016_vm6, %v963_v53  ;;  %v2739_v20 = vsel %vm12055_vm13, %v2734_v55, %v2738_v40  ;;  %v2742_v27 = vor.u32 %v8020_v46, %v2738_v40  ;;  %v8190_v40 = vld [vmem:[#allocation2 + $0x58] sm:$0xff]  ;;  %vm12064_vm6 = vmmov %vm12055_vm13 }
  0xf1   : > { %916 = vst.msk [vmem:[#allocation2 + $0x70] sm:$0xf] %vm12038_vm1, %v910_v13  ;;  %v3232_v23 = vrot.slane %v3229_v42, 2  ;;  %v2746_v13 = vrot.slane %v8061_v31, 1  ;;  %v3286_v32 = vrot.slane %v3284_v11, 3  ;;  %v3162_v46 = vsel %vm12035_vm12, %v3159_v10, %v3161_v28 }
  0xf2   : > { %12059 = vst [vmem:[#allocation8_spill] sm:$0xff] %v8190_v40 }
  0xf3   : > { %3455 = vrot.lane.b32.xlu1 %v3420_v17, %s7525_s20  ;;  %3110 = vrot.lane.b32.xlu0 %v3037_v41, %s7526_s21  ;;  %v8104_v17 = vshrl.u32 %v7978_v2, 16  ;;  %v3233_v26 = vsel %vm12035_vm12, %v3232_v23, %v7768_v62 }
  0xf4   : > { %2840 = vrot.lane.b32.xlu2 %v2707_v51, %s7521_s16 }
  0xf5   : > { %v3308_v41 = vrot.slane %v8104_v17, 2  ;;  %v3046_v10 = vrot.slane %v8104_v17, 1 }
  0xfb   : > { %2925 = vrot.lane.b32.xlu1 %v7861_v61, %s7520_s15  ;;  %3376 = vrot.lane.b32.xlu0 %v3303_v63, %s7527_s22  ;;  %v8064_v61 = vshrl.u32 %v7899_v59, 16  ;;  %v3281_v63 = vshrl.u32 %v3278_v52, 16 }
  0xfc   : > { %3183 = vrot.lane.b32.xlu2 %v7804_v21, %s7522_s17  ;;  %v3041_v21 = vsel %vm12034_vm15, %v3036_v43, %v3040_v34 }
  0xfd   : > { %v3304_v38 = vrot.slane %v8064_v61, 2  ;;  %v3042_v8 = vrot.slane %v8064_v61, 1  ;;  %v3283_v36 = vrot.slane %v3281_v63, 2  ;;  %v2750_v23 = vor.u32 %v8064_v61, %v2746_v13 }
  0xff   : > { %v3306_v49 = vor.u32 %v3305_v30, %v3304_v38  ;;  %v8098_v53 = vor.u32 %v3043_v5, %v3042_v8  ;;  %v3287_v62 = vor.u32 %v3286_v32, %v3283_v36  ;;  %v7359_v38 = vld [vmem:[%s7596_s10 + $0x60] sm:$0xff] }
 0x101   : > { %v3307_v4 = vsel %vm12030_vm11, %v3302_v14, %v3306_v49  ;;  %v3045_v37 = vsel %vm12034_vm15, %v3040_v34, %v8098_v53  ;;  %v3291_v30 = vsel %vm12030_vm11, %v3287_v62, %v7889_v29  ;;  %v2897_v29 = vrot.slane %v8136_v45, 1 }
 0x103   : > { %3191 = vrot.lane.b32.xlu1 %v7880_v18, %s7522_s17  ;;  %3112 = vrot.lane.b32.xlu0 %v3041_v21, %s7526_s21  ;;  %v3421_v18 = vrot.slane %v7899_v59, 3  ;;  %v2898_v55 = vsel %vm12033_vm3, %v2895_v25, %v2897_v29 }
 0x104   : > { %2984 = vrot.lane.b32.xlu2 %v8078_v47, %s7523_s18 }
 0x105   : > { %v3422_v22 = vsel %vm12041_vm4, %v3419_v1, %v3421_v18  ;;  %v8101_v1 = vshll.u32 %v7978_v2, 16  ;;  %v3424_v58 = vsel %vm12041_vm4, %v3421_v18, %v3423_v39  ;;  %v3163_v2 = vrot.slane %v8190_v40, 2 }
 0x106   : > { %v8084_v43 = vpop.permute.xlu2 %3185 }
 0x107   : > { %v3309_v51 = vrot.slane %v8101_v1, 3  ;;  %v3047_v52 = vrot.slane %v8101_v1, 2  ;;  %v8205_v33 = vsel %vm12035_vm12, %v3161_v28, %v3163_v2 }
 0x109   : > { %v3310_v3 = vor.u32 %v3309_v51, %v3308_v41 }
 0x10b   : > { %3457 = vrot.lane.b32.xlu1 %v3422_v22, %s7525_s20  ;;  %3378 = vrot.lane.b32.xlu0 %v3307_v4, %s7527_s22  ;;  %v3311_v12 = vsel %vm12030_vm11, %v3306_v49, %v3310_v3  ;;  %v3048_v22 = vor.u32 %v3047_v52, %v3046_v10  ;;  %v8178_v4 = vshll.u32 %v8136_v45, 16 }
 0x10c   : > { %3449 = vrot.lane.b32.xlu2 %v3414_v7, %s7525_s20 }
 0x10d   : > { %v3049_v8 = vsel %vm12034_vm15, %v8098_v53, %v3048_v22  ;;  %v3313_v7 = vrot.slane %v8178_v4, 3  ;;  %v3425_v53 = vrot.slane %v8136_v45, 3  ;;  %v3051_v63 = vrot.slane %v8178_v4, 2 }
 0x10e   : > { %v8096_v59 = vpop.permute.xlu2 %2976 }
 0x10f   : > { %v3426_v25 = vsel %vm12041_vm4, %v3423_v39, %v3425_v53  ;;  %v2754_v39 = vrot.slane %v8101_v1, 1 }
 0x113   : > { %3193 = vrot.lane.b32.xlu1 %v7944_v6, %s7522_s17  ;;  %v8112_v9 = vpop.permute.xlu1 %2917  ;;  %3114 = vrot.lane.b32.xlu0 %v3045_v37, %s7526_s21 }
 0x114   : > { %2848 = vrot.lane.b32.xlu2 %v2739_v20, %s7521_s16 }
 0x115   : > { %v8121_v44 = vpop.permute.xlu0 %2838 }
 0x116   : > { %v8124_v6 = vpop.permute.xlu2 %3242 }
 0x11b   : > { %3459 = vrot.lane.b32.xlu1 %v3424_v58, %s7525_s20  ;;  %3380 = vrot.lane.b32.xlu0 %v3311_v12, %s7527_s22  ;;  %v7361_v12 = vld [vmem:[%s7596_s10 + $0x68] sm:$0xff] }
 0x11c   : > { %3104 = vrot.lane.b32.xlu2 %v7850_v54, %s7526_s21  ;;  %v2747_v54 = vsel %vm12055_vm13, %v2742_v27, %v2746_v13  ;;  %v8233_v13 = vshll.u32 %v8190_v40, 16 }
 0x11d   : > { %v8130_v50 = vpop.permute.xlu1 %2919  ;;  %v8134_v16 = vpop.permute.xlu0 %2927 }
 0x11e   : > { %12056 = vst [vmem:[#allocation5_spill] sm:$0xff] %v8134_v16  ;;  %v8138_v14 = vpop.permute.xlu2 %2978  ;;  %v3317_v32 = vrot.slane %v8233_v13, 3 }
 0x123   : > { %3238 = vrot.lane.b32.xlu1 %v3233_v26, %s7524_s19  ;;  %2850 = vrot.lane.b32.xlu0 %v2747_v54, %s7521_s16  ;;  %v12021_v26 = vrot.slane %v8190_v40, 1 }
 0x124   : > { %3250 = vrot.lane.b32.xlu2 %v3162_v46, %s7524_s19 }
 0x125   : > { %v8151_v31 = vpop.permute.xlu1 %2974  ;;  %v8154_v34 = vpop.permute.xlu0 %2972  ;;  %v8246_v62 = vsel %vm12033_vm3, %v2897_v29, %v12021_v26 }
 0x126   : > { %v8156_v21 = vpop.permute.xlu2 %3244 }
 0x12b   : > { %2929 = vrot.lane.b32.xlu1 %v7972_v60, %s7520_s15  ;;  %3370 = vrot.lane.b32.xlu0 %v3291_v30, %s7527_s22  ;;  %v8174_v60 = vshrl.u32 %v8136_v45, 16 }
 0x12c   : > { %986 = vrot.lane.b32.xlu2 %v7359_v38, %s7519_s11 }
 0x12d   : > { %v8166_v18 = vpop.permute.xlu1 %3240  ;;  %v8169_v49 = vpop.permute.xlu0 %2842  ;;  %v3312_v5 = vrot.slane %v8174_v60, 2  ;;  %v3050_v27 = vrot.slane %v8174_v60, 1 }
 0x12e   : > { %v8171_v57 = vpop.permute.xlu2 %2980 }
 0x12f   : > { %12058 = vst [vmem:[#allocation7_spill] sm:$0xff] %v8171_v57  ;;  %v3314_v51 = vor.u32 %v3313_v7, %v3312_v5  ;;  %v3052_v61 = vor.u32 %v3051_v63, %v3050_v27  ;;  %v3055_v63 = vrot.slane %v8233_v13, 2 }
 0x131   : > { %v3315_v20 = vsel %vm12030_vm11, %v3310_v3, %v3314_v51  ;;  %v2755_v3 = vsel %vm12055_vm13, %v2750_v23, %v2754_v39  ;;  %v3053_v54 = vsel %vm12034_vm15, %v3048_v22, %v3052_v61  ;;  %v8258_v22 = vld [vmem:[#allocation2 + $0x60] sm:$0xff] }
 0x132   : > { %12063 = vst [vmem:[#allocation12_spill] sm:$0xff] %v8258_v22  ;;  %v12020_v29 = vrot.slane %v8258_v22, 2 }
 0x133   : > { %3195 = vrot.lane.b32.xlu1 %v8010_v24, %s7522_s17  ;;  %3116 = vrot.lane.b32.xlu0 %v3049_v8, %s7526_s21 }
 0x134   : > { %2986 = vrot.lane.b32.xlu2 %v2898_v55, %s7523_s18  ;;  %v8267_v7 = vsel %vm12035_vm12, %v3163_v2, %v12020_v29  ;;  %v12019_v2 = vrot.slane %v8233_v13, 1 }
 0x135   : > { %v8192_v37 = vpop.permute.xlu1 %3451  ;;  %v8195_v24 = vpop.permute.xlu0 %2846 }
 0x136   : > { %v8198_v41 = vpop.permute.xlu2 %3246 }
 0x137   : > { %12060 = vst [vmem:[#allocation9_spill] sm:$0xff] %v8198_v41 }
 0x13b   : > { %3461 = vrot.lane.b32.xlu1 %v3426_v25, %s7525_s20  ;;  %3382 = vrot.lane.b32.xlu0 %v3315_v20, %s7527_s22  ;;  %v2762_v25 = vrot.slane %v8178_v4, 1 }
 0x13c   : > { %3252 = vrot.lane.b32.xlu2 %v8205_v33, %s7524_s19 }
 0x13d   : > { %v8208_v48 = vpop.permute.xlu1 %2921  ;;  %v8212_v58 = vpop.permute.xlu0 %3106  ;;  %v2766_v23 = vor.u32 %v8174_v60, %v2762_v25 }
 0x13e   : > { %v8214_v42 = vpop.permute.xlu2 %2982 }
 0x13f   : > { %12061 = vst [vmem:[#allocation10_spill] sm:$0xff] %v8214_v42  ;;  %v3808_v42 = vld [vmem:[%s12006_s2 + $0x20] sm:$0xf] }
 0x143   : > { %2931 = vrot.lane.b32.xlu1 %v8078_v47, %s7520_s15  ;;  %2852 = vrot.lane.b32.xlu0 %v2755_v3, %s7521_s16  ;;  %v8236_v47 = vshrl.u32 %v8190_v40, 16  ;;  %v8283_v3 = vshrl.u32 %v8258_v22, 16 }
 0x144   : > { %1038 = vrot.lane.b32.xlu2 %v7361_v12, %s7519_s11 }
 0x145   : > { %v8225_v11 = vpop.permute.xlu1 %3187  ;;  %v8228_v28 = vpop.permute.xlu0 %3372  ;;  %v3316_v36 = vrot.slane %v8236_v47, 2  ;;  %v3054_v27 = vrot.slane %v8236_v47, 1 }
 0x146   : > { %v8230_v1 = vpop.permute.xlu2 %3248 }
 0x147   : > { %12062 = vst [vmem:[#allocation11_spill] sm:$0xff] %v8230_v1  ;;  %v3318_v52 = vor.u32 %v3317_v32, %v3316_v36  ;;  %v8303_v32 = vld [vmem:[#allocation2 + $0x68] sm:$0xff] }
 0x149   : > { %v3319_v5 = vsel %vm12030_vm11, %v3314_v51, %v3318_v52  ;;  %v2758_v51 = vor.u32 %v8104_v17, %v2754_v39  ;;  %v8294_v17 = vshll.u32 %v8258_v22, 16  ;;  %v3058_v39 = vrot.slane %v8283_v3, 1 }
 0x14b   : > { %3197 = vrot.lane.b32.xlu1 %v3162_v46, %s7522_s17  ;;  %3118 = vrot.lane.b32.xlu0 %v3053_v54, %s7526_s21  ;;  %v3427_v46 = vrot.slane %v8190_v40, 3  ;;  %v2763_v4 = vsel %vm12055_vm13, %v2758_v51, %v2762_v25  ;;  %v2771_v54 = vsel %vm12064_vm6, %v2766_v23, %v12019_v2  ;;  %v3059_v36 = vrot.slane %v8294_v17, 2 }
 0x14c   : > { %2988 = vrot.lane.b32.xlu2 %v8246_v62, %s7523_s18  ;;  %v8308_v25 = vshrl.u32 %v8303_v32, 16  ;;  %v8311_v23 = vshll.u32 %v8303_v32, 16  ;;  %vm4024_vm6 = vcmask 1043456  }
 0x14d   : > { %v8249_v38 = vpop.permute.xlu1 %3453  ;;  %v8253_v30 = vpop.permute.xlu0 %3108  ;;  %v3428_v8 = vsel %vm12041_vm4, %v3425_v53, %v3427_v46  ;;  %v3060_v51 = vor.u32 %v3059_v36, %v3058_v39 }
 0x14e   : > { %v8256_v10 = vpop.permute.xlu2 %2840  ;;  %v3325_v39 = vrot.slane %v8311_v23, 3 }
 0x153   : > { %3463 = vrot.lane.b32.xlu1 %v3428_v8, %s7525_s20  ;;  %3384 = vrot.lane.b32.xlu0 %v3319_v5, %s7527_s22  ;;  %v3056_v5 = vor.u32 %v3055_v63, %v3054_v27  ;;  %v3321_v27 = vrot.slane %v8294_v17, 3  ;;  %v3324_v63 = vrot.slane %v8308_v25, 2 }
 0x154   : > { %3254 = vrot.lane.b32.xlu2 %v8267_v7, %s7524_s19 }
 0x155   : > { %v8271_v20 = vpop.permute.xlu1 %2923  ;;  %v8275_v53 = vpop.permute.xlu0 %3374  ;;  %v3061_v0 = vsel %vm12034_vm15, %v3056_v5, %v3060_v51 }
 0x156   : > { %v8277_v12 = vpop.permute.xlu2 %3183 }
 0x15b   : > { %2933 = vrot.lane.b32.xlu1 %v2898_v55, %s7520_s15  ;;  %2854 = vrot.lane.b32.xlu0 %v2763_v4, %s7521_s16  ;;  %v3057_v4 = vsel %vm12034_vm15, %v3052_v61, %v3056_v5  ;;  %v3429_v61 = vrot.slane %v8258_v22, 3  ;;  %v3326_v5 = vor.u32 %v3325_v39, %v3324_v63  ;;  %v12026_v63 = vrot.slane %v8303_v32, 2  ;;  %v8357_v39 = vld [vmem:[#allocation2 + $0x70] sm:$0xff] }
 0x15c   : > { %2856 = vrot.lane.b32.xlu2 %v2771_v54, %s7521_s16  ;;  %v3320_v54 = vrot.slane %v8283_v3, 2 }
 0x15d   : > { %v8296_v60 = vpop.permute.xlu1 %3189  ;;  %v8299_v55 = vpop.permute.xlu0 %2844 }
 0x15e   : > { %v8305_v8 = vpop.permute.xlu2 %2984  ;;  %v3322_v29 = vor.u32 %v3321_v27, %v3320_v54  ;;  %v2901_v54 = vrot.slane %v8258_v22, 1 }
 0x15f   : > { %12065 = vst [vmem:[#allocation13_spill] sm:$0xff] %v8305_v8 }
 0x160   : > { %v3323_v26 = vsel %vm12030_vm11, %v3318_v52, %v3322_v29  ;;  %v3327_v19 = vsel %vm12030_vm11, %v3322_v29, %v3326_v5  ;;  %v3063_v52 = vrot.slane %v8311_v23, 2 }
 0x163   : > { %3199 = vrot.lane.b32.xlu1 %v8205_v33, %s7522_s17  ;;  %3120 = vrot.lane.b32.xlu0 %v3057_v4, %s7526_s21  ;;  %v3430_v4 = vsel %vm12041_vm4, %v3427_v46, %v3429_v61  ;;  %v12067_v46 = vrot.slane %v8190_v40, 1  ;;  %v12070_v40 = vrot.slane %v8258_v22, 2 }
 0x164   : > { %3122 = vrot.lane.b32.xlu2 %v3061_v0, %s7526_s21 }
 0x165   : > { %v8322_v36 = vpop.permute.xlu1 %3455  ;;  %v8325_v2 = vpop.permute.xlu0 %3110  ;;  %v2902_v27 = vsel %vm12033_vm3, %v12067_v46, %v2901_v54  ;;  %v8371_v1 = vsel %vm12035_vm12, %v12070_v40, %v12026_v63 }
 0x166   : > { %v8327_v33 = vpop.permute.xlu2 %3449 }
 0x16b   : > { %3465 = vrot.lane.b32.xlu1 %v3430_v4, %s7525_s20  ;;  %3386 = vrot.lane.b32.xlu0 %v3323_v26, %s7527_s22  ;;  %v3062_v26 = vrot.slane %v8308_v25, 1 }
 0x16c   : > { %3388 = vrot.lane.b32.xlu2 %v3327_v19, %s7527_s22 }
 0x16d   : > { %v8335_v45 = vpop.permute.xlu1 %2925  ;;  %v8338_v0 = vpop.permute.xlu0 %3376  ;;  %v8361_v46 = vor.u32 %v3063_v52, %v3062_v26  ;;  %v3959_v26 = vunpack.c.l.b16 %v3808_v42  ;;  %v12071_v42 = vrot.slane %v8233_v13, 1 }
 0x16e   : > { %v8340_v8 = vpop.permute.xlu2 %2848 }
 0x16f   : > { %12066 = vst [vmem:[#allocation14_spill] sm:$0xff] %v8340_v8  ;;  %v3065_v52 = vsel %vm12034_vm15, %v3060_v51, %v8361_v46  ;;  %v3964_v16 = vpack.c.b16 %v3959_v26, %v3959_v26  ;;  %v2774_v51 = vor.u32 %v8236_v47, %v12071_v42  ;;  %v7386_v26 = vld [vmem:[%s12006_s2 + $0x18] sm:$0xff]  ;;  %v7358_v47 = vld [vmem:[%s7621_s14 + $0x60] sm:$0xff]  ;;  %v7474_v42 = vld [vmem:[#allocation2 + $0x10] sm:$0xff]  }
 0x173   : > { %2990 = vrot.lane.b32.xlu1 %v2902_v27, %s7523_s18  ;;  %2935 = vrot.lane.b32.xlu0 %v8246_v62, %s7520_s15  ;;  %v8364_v62 = vshrl.u32 %v8357_v39, 16 }
 0x174   : > { %2937 = vrot.lane.b32.xlu2 %v2902_v27, %s7520_s15  ;;  %v8374_v27 = vshll.u32 %v8357_v39, 16 }
 0x175   : > { %v8351_v19 = vpop.permute.xlu1 %3191  ;;  %v8354_v29 = vpop.permute.xlu0 %3112  ;;  %v3328_v40 = vrot.slane %v8364_v62, 2 }
 0x176   : > { %12068 = vst [vmem:[#allocation15_spill] sm:$0xff] %v8351_v19  ;;  %v8359_v4 = vpop.permute.xlu2 %3104  ;;  %v3329_v63 = vrot.slane %v8374_v27, 3  ;;  %v4026_v19 = vsel %vm4024_vm6, %v3964_v16, 0  ;;  %vm3487_vm6 = vcmask 64512  }
 0x177   : > { %12069 = vst [vmem:[#allocation16_spill] sm:$0xff] %v8354_v29  ;;  %v2778_v29 = vrot.slane %v8294_v17, 1  ;;  %4031 = vmatpush.bf16.msra.mxu0 %v4026_v19  ;;  %v7385_v17 = vld [vmem:[%s12006_s2 + $0x10] sm:$0xff] }
 0x178   : > { %v8399_v57 = vor.u32 %v3329_v63, %v3328_v40 }
 0x17a   : > { %v3331_v16 = vsel %vm12030_vm11, %v3326_v5, %v8399_v57  ;;  %v3492_v5 = vsel %vm3487_vm6, %v7474_v42, %v8256_v10  ;;  %vm3566_vm11 = vcmask 195584  }
 0x17b   : > { %3256 = vrot.lane.b32.xlu1 %v8371_v1, %s7524_s19  ;;  %3201 = vrot.lane.b32.xlu0 %v8267_v7, %s7522_s17  ;;  %v12028_v7 = vrot.slane %v8303_v32, 3 }
 0x17c   : > { %3124 = vrot.lane.b32.xlu2 %v3065_v52, %s7526_s21  ;;  %v2779_v52 = vsel %vm12055_vm13, %v2774_v51, %v2778_v29  ;;  %4032 = vmatpush.bf16.msra.mxu0 %v7386_v26  ;;  %v2782_v26 = vor.u32 %v8283_v3, %v2778_v29  ;;  %vm3527_vm13 = vcmask 130048   ;;  %v3066_v3 = vrot.slane %v8364_v62, 1 }
 0x17d   : > { %v8387_v22 = vpop.permute.xlu1 %3457  ;;  %v8390_v8 = vpop.permute.xlu0 %3378  ;;  %v3432_v13 = vsel %vm12041_vm4, %v3429_v61, %v12028_v7  ;;  %v12032_v61 = vrot.slane %v8303_v32, 1  ;;  %v3067_v29 = vrot.slane %v8374_v27, 2 }
 0x17e   : > { %v8395_v41 = vpop.permute.xlu2 %3250 }
 0x17f   : > { %12072 = vst [vmem:[#allocation17_spill] sm:$0xff] %v8395_v41  ;;  %v12031_v41 = vrot.slane %v8311_v23, 1 }
 0x180   : > { %4033 = vmatpush.bf16.msra.mxu0 %v7385_v17 }
 0x183   : > { %2858 = vrot.lane.b32.xlu1 %v2779_v52, %s7521_s16  ;;  %3467 = vrot.lane.b32.xlu0 %v3432_v13, %s7525_s20  ;;  %v7363_v52 = vld [vmem:[%s7596_s10 + $0x70] sm:$0xff] }
 0x184   : > { %3390 = vrot.lane.b32.xlu2 %v3331_v16, %s7527_s22  ;;  %v8430_v16 = vsel %vm12033_vm3, %v2901_v54, %v12032_v61  ;;  %v12075_v61 = vrot.slane %v8303_v32, 2  ;;  %vm12037_vm3 = vcmask 326656  }
 0x185   : > { %v8416_v19 = vpop.permute.xlu1 %3193  ;;  %v8419_v63 = vpop.permute.xlu0 %3114 }
 0x186   : > { %12073 = vst [vmem:[#allocation18_spill] sm:$0xff] %v8416_v19  ;;  %v987_v40 = vpop.permute.xlu2 %986  ;;  %v3531_v19 = vsel %vm3527_vm13, %v3492_v5, %v8130_v50 }
 0x187   : > { %v990_v51 = vsel %vm12036_vm2, %v7358_v47, %v987_v40  ;;  %v2787_v47 = vsel %vm12074_vm7, %v2782_v26, %v12031_v41  ;;  %v3570_v40 = vsel %vm3566_vm11, %v3531_v19, %v8151_v31  ;;  %vm3605_vm7 = vcmask 261120   ;;  %v7437_v31 = vld [vmem:[#allocation2 + $0x8] sm:$0xff]  }
 0x188   : > { %v991_v13 = vshrl.u32 %v990_v51, 16  ;;  %v994_v7 = vshll.u32 %v990_v51, 16  ;;  %v3169_v51 = vrot.slane %v8357_v39, 2 }
 0x18a   : > { %v993_v10 = vrot.slane %v991_v13, 7 }
 0x18b   : > { %2992 = vrot.lane.b32.xlu1 %v8430_v16, %s7523_s18  ;;  %1090 = vrot.lane.b32.xlu0 %v7363_v52, %s7519_s11 }
 0x18c   : > { %v996_v54 = vor.u32 %v994_v7, %v993_v10  ;;  %v1000_v17 = vsel %vm7628_vm5, %v993_v10, 0  ;;  %2860 = vrot.lane.b32.xlu2 %v2787_v47, %s7521_s16  ;;  %v8457_v7 = vor.u32 %v3067_v29, %v3066_v3  ;;  %v3609_v47 = vsel %vm3605_vm7, %v3570_v40, %v8212_v58  ;;  %v7384_v3 = vld [vmem:[%s12006_s2 + $0x8] sm:$0xff] }
 0x18d   : > { %v8445_v50 = vpop.permute.xlu1 %3459  ;;  %v1005_v42 = vunpack.c.l.b16 %v1000_v17  ;;  %v8450_v5 = vpop.permute.xlu0 %3380  ;;  %v3648_v29 = vsel %vm12037_vm3, %v3609_v47, %v8084_v43  ;;  %4034 = vmatpush.bf16.msra.mxu0 %v7384_v3  ;;  %v7365_v47 = vld [vmem:[%s7596_s10 + $0x78] sm:$0xff] }
 0x18e   : > { %v999_v26 = vsel %vm7628_vm5, 0, %v996_v54  ;;  %v8455_v52 = vpop.permute.xlu2 %2986  ;;  %v8466_v54 = vsel %vm12035_vm12, %v12075_v61, %v3169_v51  ;;  %v3069_v58 = vsel %vm12034_vm15, %v8361_v46, %v8457_v7  ;;  %vm3683_vm15 = vcmask 392192  }
 0x18f   : > { %v1003_v13 = vunpack.c.l.b16 %v999_v26  ;;  %v1004_v10 = vunpack.c.h.b16 %v999_v26  ;;  %v1008_v41 = vpack.c.b16 %v1005_v42, %v1005_v42  ;;  %v7383_v26 = vld [vmem:[%s12006_s2] sm:$0xff]  ;;  %vm3722_vm12 = vcmask 457728  }
 0x191   : > { %v1006_v19 = vpack.c.b16 %v1003_v13, %v1003_v13  ;;  %v1007_v17 = vpack.c.b16 %v1004_v10, %v1004_v10  ;;  %v1014_v61 = vrot.slane %v1008_v41, 6  ;;  %v3490_v13 = vsel %vm3487_vm6, %v7437_v31, %v8121_v44  ;;  %4035 = vmatpush.bf16.msra.mxu0 %v7383_v26 }
 0x192   : > { %v3529_v44 = vsel %vm3527_vm13, %v3490_v13, %v8112_v9 }
 0x193   : > { %3258 = vrot.lane.b32.xlu1 %v8466_v54, %s7524_s19  ;;  %v1009_v40 = vrot.slane %v1006_v19, 6  ;;  %v1011_v42 = vrot.slane %v1007_v17, 6  ;;  %3203 = vrot.lane.b32.xlu0 %v8371_v1, %s7522_s17  ;;  %v3433_v19 = vrot.slane %v8357_v39, 3  ;;  %v3687_v17 = vsel %vm3683_vm15, %v3648_v29, %v8166_v18 }
 0x194   : > { %3126 = vrot.lane.b32.xlu2 %v3069_v58, %s7526_s21  ;;  %v3568_v58 = vsel %vm3566_vm11, %v3529_v44, %v8154_v34  ;;  %v3726_v9 = vsel %vm3722_vm12, %v3687_v17, %v8228_v28  ;;  %v12076_v29 = vrot.slane %v8303_v32, 3  ;;  %v7475_v34 = vld [vmem:[#allocation2 + $0x18] sm:$0xff]  }
 0x195   : > { %v3239_v10 = vpop.permute.xlu1 %3238  ;;  %v1010_v43 = vrot.slane %v1009_v40, 4  ;;  %v1013_v46 = vrot.slane %v1011_v42, 4  ;;  %1019 = vst.msk [vmem:[#allocation2 + $0x7c] sm:$0xc] %vm334_vm0, %v1009_v40  ;;  %v8487_v41 = vpop.permute.xlu0 %2850  ;;  %vm12043_vm0 = vcmask 523264   ;;  %v3607_v18 = vsel %vm3605_vm7, %v3568_v58, %v8359_v4  ;;  %v7360_v4 = vld [vmem:[%s7621_s14 + $0x68] sm:$0xff] }
 0x196   : > { %v8489_v1 = vpop.permute.xlu2 %3252  ;;  %v3434_v40 = vsel %vm12041_vm4, %v12076_v29, %v3433_v19  ;;  %v3646_v28 = vsel %vm12037_vm3, %v3607_v18, %v8277_v12 }
 0x197   : > { %v1012_v31 = vsel %vm7642_vm9, %v1010_v43, %v1011_v42  ;;  %v1015_v3 = vsel %vm7642_vm9, %v1013_v46, %v1014_v61  ;;  %v3494_v42 = vsel %vm3487_vm6, %v7475_v34, %v8169_v49  ;;  %v8529_v43 = vsel %vm12043_vm0, %v3726_v9, %v8192_v37 }
 0x198   : > { %1020 = vst.msk [vmem:[#allocation2 + $0x80] sm:$0xf] %vm12038_vm1, %v1012_v31  ;;  %v3533_v61 = vsel %vm3527_vm13, %v3494_v42, %v8208_v48  ;;  %v3685_v46 = vsel %vm3683_vm15, %v3646_v28, %v3239_v10 }
 0x199   : > { %1021 = vst.msk [vmem:[#allocation2 + $0x84] sm:$0x7] %vm409_vm10, %v1015_v3  ;;  %v3572_v31 = vsel %vm3566_vm11, %v3533_v61, %v8096_v59  ;;  %v3819_v3 = vshll.u32 %v8529_v43, 16  ;;  %vm12078_vm10 = vcmask 1046528  }
 0x19a   : > { %v3611_v58 = vsel %vm3605_vm7, %v3572_v31, %v8253_v30 }
 0x19b   : > { %1135 = vrot.lane.b32.xlu1 %v7365_v47, %s7519_s11  ;;  %3469 = vrot.lane.b32.xlu0 %v3434_v40, %s7525_s20  ;;  %v2905_v47 = vrot.slane %v8357_v39, 1  ;;  %v12077_v40 = vrot.slane %v8303_v32, 1  ;;  %v3650_v30 = vsel %vm12037_vm3, %v3611_v58, %v8225_v11  ;;  %v3821_v32 = vrot.slane %v3819_v3, 1 }
 0x19c   : > { %v8525_v13 = vld [vmem:[#allocation2 + $0x78] sm:$0xff]  ;;  %vm12080_vm3 = vsmask.f32 7424 }
 0x19d   : > { %v8523_v26 = vpop.permute.xlu1 %2929  ;;  %v3371_v49 = vpop.permute.xlu0 %3370  ;;  %v8535_v48 = vshll.u32 %v8525_v13, 16  ;;  %v8538_v12 = vshrl.u32 %v8525_v13, 16  ;;  %v2906_v34 = vsel %vm12078_vm10, %v12077_v40, %v2905_v47  ;;  %vm3969_vm10 = vcmask 588800  }
 0x19e   : > { %v1039_v17 = vpop.permute.xlu2 %1038  ;;  %v3724_v44 = vsel %vm3722_vm12, %v3685_v46, %v3371_v49 }
 0x19f   : > { %v1042_v37 = vsel %vm12036_vm2, %v7360_v4, %v1039_v17  ;;  %v3763_v10 = vsel %vm12043_vm0, %v3724_v44, %v8327_v33  ;;  %v3332_v59 = vrot.slane %v8538_v12, 2  ;;  %v3333_v42 = vrot.slane %v8535_v48, 3 }
 0x1a0   : > { %v1043_v18 = vshrl.u32 %v1042_v37, 16  ;;  %v1046_v9 = vshll.u32 %v1042_v37, 16  ;;  %v3815_v29 = vshll.u32 %v3763_v10, 16  ;;  %v3813_v33 = vshrl.u32 %v3763_v10, 16 }
 0x1a1   : > { %v8560_v28 = vor.u32 %v3333_v42, %v3332_v59  ;;  %vm12079_vm2 = vsmask.f32 5376  ;;  %v3070_v56 = vrot.slane %v8538_v12, 1 }
 0x1a2   : > { %v1045_v4 = vrot.slane %v1043_v18, 7  ;;  %v3817_v61 = vrot.slane %v3815_v29, 1  ;;  %v3689_v18 = vsel %vm3683_vm15, %v3650_v30, %v8124_v6 }
 0x1a3   : > { %2994 = vrot.lane.b32.xlu1 %v2906_v34, %s7523_s18  ;;  %2939 = vrot.lane.b32.xlu0 %v8430_v16, %s7520_s15  ;;  %v3335_v37 = vsel %vm12079_vm2, %v8399_v57, %v8560_v28  ;;  %v3171_v16 = vrot.slane %v8525_v13, 2  ;;  %v3728_v57 = vsel %vm3722_vm12, %v3689_v18, %v8275_v53  ;;  %vm12081_vm2 = vcmask 1045504  }
 0x1a4   : > { %v1048_v46 = vor.u32 %v1046_v9, %v1045_v4  ;;  %v1052_v49 = vsel %vm7628_vm5, %v1045_v4, 0  ;;  %v3818_v44 = vor.u32 %v3817_v61, %v3813_v33  ;;  %3392 = vrot.lane.b32.xlu2 %v3335_v37, %s7527_s22  ;;  %v7476_v33 = vld [vmem:[#allocation2 + $0x20] sm:$0xff]  ;;  %v8593_v61 = vsel %vm12043_vm0, %v3728_v57, %v8249_v38 }
 0x1a5   : > { %v8564_v17 = vpop.permute.xlu1 %3195  ;;  %v1057_v31 = vunpack.c.l.b16 %v1052_v49  ;;  %v8569_v11 = vpop.permute.xlu0 %3116  ;;  %v3172_v4 = vsel %vm12081_vm2, %v3169_v51, %v3171_v16  ;;  %v3496_v6 = vsel %vm3487_vm6, %v7476_v33, %v8299_v55  ;;  %v12083_v38 = vrot.slane %v8311_v23, 1 }
 0x1a6   : > { %v1051_v10 = vsel %vm7628_vm5, 0, %v1048_v46  ;;  %v8575_v3 = vpop.permute.xlu2 %2988  ;;  %v3822_v58 = vsel %vm12080_vm3, %v3818_v44, %v3821_v32  ;;  %v3535_v51 = vsel %vm3527_vm13, %v3496_v6, %v8271_v20  ;;  %vm12082_vm3 = vcmask 60419  }
 0x1a7   : > { %v1055_v9 = vunpack.c.l.b16 %v1051_v10  ;;  %v1056_v29 = vunpack.c.h.b16 %v1051_v10  ;;  %v1060_v40 = vpack.c.b16 %v1057_v31, %v1057_v31  ;;  %7187 = vmatmul.msk.bf16.vlgmr.msra.gmra.mxu0 %vm3969_vm10, %v3822_v58  ;;  %v2790_v37 = vor.u32 %v8308_v25, %v12083_v38 }
 0x1a8   : > { %v3826_v10 = vshll.u32 %v8593_v61, 16  ;;  %v3435_v58 = vrot.slane %v8525_v13, 3  ;;  %v3574_v23 = vsel %vm3566_vm11, %v3535_v51, %v8138_v14  ;;  %v3823_v25 = vshrl.u32 %v8529_v43, 16 }
 0x1a9   : > { %v1058_v59 = vpack.c.b16 %v1055_v9, %v1055_v9  ;;  %v1059_v42 = vpack.c.b16 %v1056_v29, %v1056_v29  ;;  %v1066_v46 = vrot.slane %v1060_v40, 5  ;;  %v2794_v9 = vrot.slane %v8374_v27, 1 }
 0x1aa   : > { %vm12084_vm2 = vsmask.f32 7424  ;;  %v3071_v40 = vrot.slane %v8535_v48, 2  ;;  %v3828_v57 = vrot.slane %v3826_v10, 1  ;;  %v3436_v14 = vsel %vm12041_vm4, %v3433_v19, %v3435_v58 }
 0x1ab   : > { %3260 = vrot.lane.b32.xlu1 %v3172_v4, %s7524_s19  ;;  %v1061_v30 = vrot.slane %v1058_v59, 5  ;;  %v1063_v53 = vrot.slane %v1059_v42, 5  ;;  %3205 = vrot.lane.b32.xlu0 %v8466_v54, %s7522_s17  ;;  %v2795_v29 = vsel %vm12084_vm2, %v2790_v37, %v2794_v9  ;;  %v3825_v43 = vor.u32 %v3823_v25, %v3821_v32  ;;  %v7477_v37 = vld [vmem:[#allocation2 + $0x28] sm:$0xff]  ;;  %v12089_v25 = vld [vmem:[#allocation7_spill] sm:$0xff] }
 0x1ac   : > { %2941 = vrot.lane.b32.xlu2 %v2906_v34, %s7520_s15  ;;  %v3613_v34 = vsel %vm3605_vm7, %v3574_v23, %v8325_v2  ;;  %v8642_v6 = vor.u32 %v3071_v40, %v3070_v56  ;;  %v2907_v32 = vrot.slane %v8525_v13, 1  ;;  %v3830_v40 = vshrl.u32 %v8593_v61, 16  ;;  %v12096_v13 = vld [vmem:[#allocation9_spill] sm:$0xff] }
 0x1ad   : > { %v8597_v49 = vpop.permute.xlu1 %3461  ;;  %v1062_v44 = vrot.slane %v1061_v30, 4  ;;  %v1065_v31 = vrot.slane %v1063_v53, 4  ;;  %1071 = vst.msk [vmem:[#allocation2 + $0x84] sm:$0x8] %vm12082_vm3, %v1061_v30  ;;  %v8602_v55 = vpop.permute.xlu0 %3382  ;;  %vm12086_vm3 = vmmov %vm12084_vm2  ;;  %vm12087_vm2 = vsmask.f32 6400 }
 0x1ae   : > { %v8609_v54 = vpop.permute.xlu2 %3254  ;;  %v3829_v19 = vsel %vm12086_vm3, %v3825_v43, %v3828_v57  ;;  %v3073_v51 = vsel %vm12087_vm2, %v8457_v7, %v8642_v6  ;;  %vm12091_vm3 = vsmask.f32 5376  ;;  %vm12092_vm2 = vcmask 1045504  }
 0x1af   : > { %v1064_v20 = vsel %vm7663_vm14, %v1062_v44, %v1063_v53  ;;  %v1067_v18 = vsel %vm7663_vm14, %v1065_v31, %v1066_v46  ;;  %vm12085_vm14 = vcmask 326656  }
 0x1b0   : > { %1072 = vst.msk [vmem:[#allocation2 + $0x88] sm:$0xf] %vm12038_vm1, %v1064_v20  ;;  %v3652_v2 = vsel %vm12085_vm14, %v3613_v34, %v8296_v60  ;;  %vm12088_vm14 = vcmask 1046528   ;;  %v12090_v34 = vld [vmem:[#allocation16_spill] sm:$0xff] }
 0x1b1   : > { %1073 = vst.msk [vmem:[#allocation2 + $0x8c] sm:$0xf] %vm12038_vm1, %v1067_v18  ;;  %v3691_v46 = vsel %vm3683_vm15, %v3652_v2, %v8156_v21  ;;  %v2908_v21 = vsel %vm12088_vm14, %v2905_v47, %v2907_v32  ;;  %v12093_v2 = vld [vmem:[#allocation15_spill] sm:$0xff]  ;;  %vm12094_vm14 = vcmask 326656  }
 0x1b3   : > { %2862 = vrot.lane.b32.xlu1 %v2795_v29, %s7521_s16  ;;  %3471 = vrot.lane.b32.xlu0 %v3436_v14, %s7525_s20 }
 0x1b4   : > { %v8638_v42 = vld [vmem:[#allocation2 + $0x80] sm:$0xff]  ;;  %3207 = vrot.lane.b32.xlu2 %v3172_v4, %s7522_s17  ;;  %v3730_v4 = vsel %vm3722_vm12, %v3691_v46, %v8338_v0  ;;  %v3498_v0 = vsel %vm3487_vm6, %v7477_v37, %v8195_v24  ;;  %v2802_v37 = vrot.slane %v8535_v48, 1 }
 0x1b5   : > { %v8636_v59 = vpop.permute.xlu1 %2931  ;;  %v8640_v33 = vpop.permute.xlu0 %2852  ;;  %v8650_v53 = vshll.u32 %v8638_v42, 16  ;;  %v8653_v60 = vshrl.u32 %v8638_v42, 16  ;;  %v3437_v44 = vrot.slane %v8638_v42, 3  ;;  %v8674_v10 = vsel %vm12043_vm0, %v3730_v4, %v8322_v36 }
 0x1b6   : > { %v8645_v30 = vpop.permute.xlu2 %2856  ;;  %v3537_v7 = vsel %vm3527_vm13, %v3498_v0, %v8335_v45  ;;  %v3833_v24 = vshll.u32 %v8674_v10, 16  ;;  %v3173_v23 = vrot.slane %v8638_v42, 2  ;;  %v2909_v56 = vrot.slane %v8638_v42, 1 }
 0x1b7   : > { %7188 = vmatmul.msk.bf16.gmra.mxu0 %vm3969_vm10, %v3829_v19  ;;  %v3336_v31 = vrot.slane %v8653_v60, 2  ;;  %v3337_v38 = vrot.slane %v8650_v53, 3  ;;  %v3438_v39 = vsel %vm12041_vm4, %v3435_v58, %v3437_v44  ;;  %v3576_v45 = vsel %vm3566_vm11, %v3537_v7, %v12089_v25  ;;  %v12098_v25 = vld [vmem:[#allocation14_spill] sm:$0xff] }
 0x1b8   : > { %v3615_v29 = vsel %vm3605_vm7, %v3576_v45, %v12090_v34  ;;  %v3835_v14 = vrot.slane %v3833_v24, 1  ;;  %v3174_v43 = vsel %vm12092_vm2, %v3171_v16, %v3173_v23  ;;  %v8709_v46 = vld [vmem:[#allocation2 + $0x88] sm:$0xff]  ;;  %vm12097_vm2 = vsmask.f32 7424  ;;  %v7478_v24 = vld [vmem:[#allocation2 + $0x30] sm:$0xff] }
 0x1b9   : > { %v8686_v18 = vor.u32 %v3337_v38, %v3336_v31  ;;  %v3654_v19 = vsel %vm12094_vm14, %v3615_v29, %v12093_v2  ;;  %v2798_v0 = vor.u32 %v8364_v62, %v2794_v9  ;;  %v3074_v7 = vrot.slane %v8653_v60, 1  ;;  %vm12099_vm14 = vmmov %vm12097_vm2  ;;  %v12101_v9 = vld [vmem:[#allocation5_spill] sm:$0xff] }
 0x1ba   : > { %v3693_v16 = vsel %vm3683_vm15, %v3654_v19, %v12096_v13  ;;  %v3500_v45 = vsel %vm3487_vm6, %v7478_v24, %v12098_v25  ;;  %v3837_v13 = vshrl.u32 %v8674_v10, 16  ;;  %v12104_v10 = vld [vmem:[#allocation18_spill] sm:$0xff] }
 0x1bb   : > { %3128 = vrot.lane.b32.xlu1 %v3073_v51, %s7526_s21  ;;  %2996 = vrot.lane.b32.xlu0 %v2908_v21, %s7523_s18  ;;  %v3339_v58 = vsel %vm12091_vm3, %v8560_v28, %v8686_v18  ;;  %v3832_v28 = vor.u32 %v3830_v40, %v3828_v57  ;;  %vm12095_vm3 = vcmask 1046528   ;;  %v3732_v57 = vsel %vm3722_vm12, %v3693_v16, %v8390_v8 }
 0x1bc   : > { %3473 = vrot.lane.b32.xlu2 %v3438_v39, %s7525_s20  ;;  %v8716_v61 = vsel %vm12095_vm3, %v2907_v32, %v2909_v56  ;;  %v3175_v32 = vrot.slane %v8709_v46, 2  ;;  %v3075_v39 = vrot.slane %v8650_v53, 2  ;;  %v8741_v48 = vsel %vm12043_vm0, %v3732_v57, %v8387_v22 }
 0x1bd   : > { %v8679_v20 = vpop.permute.xlu1 %3197  ;;  %v8684_v47 = vpop.permute.xlu0 %3118  ;;  %v3836_v38 = vsel %vm12097_vm2, %v3832_v28, %v3835_v14  ;;  %v2803_v8 = vsel %vm12099_vm14, %v2798_v0, %v2802_v37  ;;  %vm12100_vm3 = vcmask 1045504   ;;  %v3539_v34 = vsel %vm3527_vm13, %v3500_v45, %v12101_v9 }
 0x1be   : > { %v8690_v36 = vpop.permute.xlu2 %3122  ;;  %v8749_v62 = vsel %vm12100_vm3, %v3173_v23, %v3175_v32  ;;  %v3840_v29 = vshll.u32 %v8741_v48, 16  ;;  %v8764_v40 = vshrl.u32 %v8709_v46, 16  ;;  %v12102_v23 = vld [vmem:[#allocation10_spill] sm:$0xff]  ;;  %v2810_v28 = vrot.slane %v8650_v53, 1 }
 0x1bf   : > { %v3578_v2 = vsel %vm3566_vm11, %v3539_v34, %v12102_v23  ;;  %vm12103_vm2 = vsmask.f32 6400  ;;  %v2806_v53 = vor.u32 %v8538_v12, %v2802_v37  ;;  %vm12105_vm14 = vcmask 326656  }
 0x1c0   : > { %v3842_v16 = vrot.slane %v3840_v29, 1  ;;  %v3340_v0 = vrot.slane %v8764_v40, 2  ;;  %vm12106_vm3 = vsmask.f32 7424  ;;  %v3078_v9 = vrot.slane %v8764_v40, 1 }
 0x1c3   : > { %3394 = vrot.lane.b32.xlu1 %v3339_v58, %s7527_s22  ;;  %3262 = vrot.lane.b32.xlu0 %v3174_v43, %s7524_s19  ;;  %v3076_v58 = vor.u32 %v3075_v39, %v3074_v7  ;;  %v2814_v39 = vor.u32 %v8653_v60, %v2810_v28  ;;  %v3439_v60 = vrot.slane %v8709_v46, 3 }
 0x1c4   : > { %2998 = vrot.lane.b32.xlu2 %v8716_v61, %s7523_s18 }
 0x1c5   : > { %v8711_v4 = vpop.permute.xlu1 %3463  ;;  %v8718_v51 = vpop.permute.xlu0 %3384  ;;  %v3077_v57 = vsel %vm12103_vm2, %v8642_v6, %v3076_v58  ;;  %v3839_v6 = vor.u32 %v3837_v13, %v3835_v14  ;;  %vm12107_vm2 = vmmov %vm12106_vm3  ;;  %v12109_v14 = vld [vmem:[#allocation11_spill] sm:$0xff] }
 0x1c6   : > { %v8724_v31 = vpop.permute.xlu2 %3388  ;;  %v2811_v45 = vsel %vm12107_vm2, %v2806_v53, %v2810_v28  ;;  %vm12108_vm1 = vmmov %vm12107_vm2  ;;  %vm12114_vm2 = vcmask 326656  }
 0x1c7   : > { %7189 = vmatmul.msk.bf16.gmra.mxu0 %vm3969_vm10, %v3836_v38  ;;  %v3617_v38 = vsel %vm3605_vm7, %v3578_v2, %v8419_v63  ;;  %v3843_v12 = vsel %vm12108_vm1, %v3839_v6, %v3842_v16  ;;  %vm12110_vm1 = vsmask.f32 5376 }
 0x1c8   : > { %v3656_v63 = vsel %vm12105_vm14, %v3617_v38, %v12104_v10  ;;  %vm12111_vm14 = vsmask.f32 6400 }
 0x1c9   : > { %v3695_v29 = vsel %vm3683_vm15, %v3656_v63, %v12109_v14  ;;  %v7480_v14 = vld [vmem:[#allocation2 + $0x40] sm:$0xff] }
 0x1ca   : > { %v3734_v23 = vsel %vm3722_vm12, %v3695_v29, %v8450_v5  ;;  %v7479_v5 = vld [vmem:[#allocation2 + $0x38] sm:$0xff] }
 0x1cb   : > { %2943 = vrot.lane.b32.xlu1 %v2908_v21, %s7520_s15  ;;  %2864 = vrot.lane.b32.xlu0 %v2803_v8, %s7521_s16  ;;  %v8761_v21 = vshll.u32 %v8709_v46, 16  ;;  %v3773_v38 = vsel %vm12043_vm0, %v3734_v23, %v8445_v50  ;;  %v12112_v50 = vld [vmem:[#allocation13_spill] sm:$0xff] }
 0x1cc   : > { %3264 = vrot.lane.b32.xlu2 %v8749_v62, %s7524_s19  ;;  %v3847_v53 = vshll.u32 %v3773_v38, 16 }
 0x1cd   : > { %v8751_v27 = vpop.permute.xlu1 %2933  ;;  %v8756_v22 = vpop.permute.xlu0 %2854  ;;  %v3341_v7 = vrot.slane %v8761_v21, 3  ;;  %v2818_v24 = vrot.slane %v8761_v21, 1  ;;  %v3079_v34 = vrot.slane %v8761_v21, 2  ;;  %v3440_v21 = vsel %vm12041_vm4, %v3437_v44, %v3439_v60 }
 0x1ce   : > { %v8768_v19 = vpop.permute.xlu2 %2937  ;;  %v3849_v63 = vrot.slane %v3847_v53, 1 }
 0x1cf   : > { %v8798_v37 = vor.u32 %v3341_v7, %v3340_v0  ;;  %v8810_v2 = vor.u32 %v3079_v34, %v3078_v9  ;;  %v12116_v34 = vld [vmem:[#allocation17_spill] sm:$0xff] }
 0x1d1   : > { %v3343_v13 = vsel %vm12110_vm1, %v8686_v18, %v8798_v37  ;;  %v3081_v7 = vsel %vm12111_vm14, %v3076_v58, %v8810_v2  ;;  %v2911_v18 = vrot.slane %v8709_v46, 1  ;;  %v3844_v58 = vshrl.u32 %v8741_v48, 16  ;;  %vm12117_vm14 = vmmov %vm12114_vm2 }
 0x1d2   : > { %vm12115_vm1 = vsmask.f32 7424 }
 0x1d3   : > { %3209 = vrot.lane.b32.xlu1 %v3174_v43, %s7522_s17  ;;  %3130 = vrot.lane.b32.xlu0 %v3077_v57, %s7526_s21  ;;  %v8788_v43 = vsel %vm12106_vm3, %v2814_v39, %v2818_v24  ;;  %v3502_v57 = vsel %vm3487_vm6, %v7479_v5, %v8487_v41  ;;  %vm12113_vm3 = vcmask 1046528   ;;  %v3846_v9 = vor.u32 %v3844_v58, %v3842_v16 }
 0x1d4   : > { %2866 = vrot.lane.b32.xlu2 %v2811_v45, %s7521_s16  ;;  %v3541_v0 = vsel %vm3527_vm13, %v3502_v57, %v8523_v26  ;;  %v8840_v26 = vsel %vm12113_vm3, %v2909_v56, %v2911_v18  ;;  %v8870_v5 = vor.u32 %v8764_v40, %v2818_v24  ;;  %v3851_v57 = vshrl.u32 %v3773_v38, 16  ;;  %v12118_v40 = vld [vmem:[#allocation6_spill] sm:$0xff]  ;;  %vm12119_vm3 = vmmov %vm12115_vm1 }
 0x1d5   : > { %v8785_v25 = vpop.permute.xlu1 %3199  ;;  %v8791_v8 = vpop.permute.xlu0 %3120  ;;  %v3580_v10 = vsel %vm3566_vm11, %v3541_v0, %v12112_v50  ;;  %v3850_v56 = vsel %vm12115_vm1, %v3846_v9, %v3849_v63  ;;  %v3508_v24 = vsel %vm3487_vm6, %v12118_v40, %v8645_v30  ;;  %vm12120_vm1 = vmmov %vm12114_vm2 }
 0x1d6   : > { %v8812_v28 = vpop.permute.xlu2 %3124  ;;  %v3619_v41 = vsel %vm3605_vm7, %v3580_v10, %v8569_v11  ;;  %v3853_v53 = vor.u32 %v3851_v57, %v3849_v63 }
 0x1d7   : > { %7190 = vmatmul.msk.bf16.gmra.mxu0 %vm3969_vm10, %v3843_v12  ;;  %v3658_v6 = vsel %vm12114_vm2, %v3619_v41, %v8564_v17 }
 0x1d8   : > { %v3697_v48 = vsel %vm3683_vm15, %v3658_v6, %v12116_v34 }
 0x1d9   : > { %v3736_v12 = vsel %vm3722_vm12, %v3697_v48, %v8602_v55 }
 0x1da   : > { %v3775_v17 = vsel %vm12043_vm0, %v3736_v12, %v8597_v49 }
 0x1db   : > { %3475 = vrot.lane.b32.xlu1 %v3440_v21, %s7525_s20  ;;  %3396 = vrot.lane.b32.xlu0 %v3343_v13, %s7527_s22  ;;  %v3854_v21 = vshll.u32 %v3775_v17, 16  ;;  %v3858_v48 = vshrl.u32 %v3775_v17, 16 }
 0x1dc   : > { %3132 = vrot.lane.b32.xlu2 %v3081_v7, %s7526_s21 }
 0x1dd   : > { %v8823_v44 = vpop.permute.xlu1 %3465  ;;  %v3387_v39 = vpop.permute.xlu0 %3386 }
 0x1de   : > { %v8849_v11 = vpop.permute.xlu2 %3390 }
 0x1e3   : > { %3000 = vrot.lane.b32.xlu1 %v8840_v26, %s7523_s18  ;;  %2945 = vrot.lane.b32.xlu0 %v8716_v61, %s7520_s15  ;;  %v3504_v61 = vsel %vm3487_vm6, %v7480_v14, %v8640_v33  ;;  %v7481_v33 = vld [vmem:[#allocation2 + $0x48] sm:$0xff] }
 0x1e4   : > { %v3543_v16 = vsel %vm3527_vm13, %v3504_v61, %v8636_v59  ;;  %v3506_v59 = vsel %vm3487_vm6, %v7481_v33, %v8756_v22 }
 0x1e5   : > { %v2991_v45 = vpop.permute.xlu1 %2990  ;;  %v2936_v42 = vpop.permute.xlu0 %2935  ;;  %v3582_v13 = vsel %vm3566_vm11, %v3543_v16, %v8455_v52  ;;  %v3545_v52 = vsel %vm3527_vm13, %v3506_v59, %v8751_v27 }
 0x1e6   : > { %v8867_v55 = vpop.permute.xlu2 %2860  ;;  %v3621_v49 = vsel %vm3605_vm7, %v3582_v13, %v8684_v47  ;;  %v3547_v38 = vsel %vm3527_vm13, %v3508_v24, %v2936_v42  ;;  %v12123_v24 = vmov 0  }
 0x1e7   : > { %7191 = vmatmul.msk.bf16.gmra.mxu0 %vm3969_vm10, %v3850_v56  ;;  %v3660_v0 = vsel %vm12117_vm14, %v3621_v49, %v8679_v20  ;;  %v3584_v20 = vsel %vm3566_vm11, %v3545_v52, %v8575_v3  ;;  %v3586_v41 = vsel %vm3566_vm11, %v3547_v38, %v2991_v45  ;;  %v7362_v3 = vld [vmem:[%s7621_s14 + $0x70] sm:$0xff]  ;;  %vm12122_vm14 = vcmask 31744  }
 0x1e8   : > { %v3699_v47 = vsel %vm3683_vm15, %v3660_v0, %v8489_v1  ;;  %v3623_v10 = vsel %vm3605_vm7, %v3584_v20, %v8791_v8  ;;  %v3625_v63 = vsel %vm3605_vm7, %v3586_v41, %v8690_v36  ;;  %v7364_v41 = vld [vmem:[%s7621_s14 + $0x78] sm:$0xff] }
 0x1e9   : > { %v3738_v22 = vsel %vm3722_vm12, %v3699_v47, %v8718_v51  ;;  %v3662_v51 = vsel %vm12114_vm2, %v3623_v10, %v8785_v25  ;;  %vm12039_vm2 = vcmask 125954  }
 0x1ea   : > { %v3777_v1 = vsel %vm12043_vm0, %v3738_v22, %v8711_v4  ;;  %v3701_v8 = vsel %vm3683_vm15, %v3662_v51, %v8609_v54  ;;  %v12121_v4 = vld [vmem:[#allocation8_spill] sm:$0xff]  ;;  %348 = vst.msk [vmem:[#allocation3 + $0xa0] sm:$0xc] %vm12039_vm2, %v12123_v24  ;;  %vm12128_vm2 = vcmask 31744  }
 0x1eb   : > { %3211 = vrot.lane.b32.xlu0 %v8749_v62, %s7522_s17  ;;  %v3856_v62 = vrot.slane %v3854_v21, 1  ;;  %v3861_v58 = vshll.u32 %v3777_v1, 16  ;;  %v3740_v56 = vsel %vm3722_vm12, %v3701_v8, %v3387_v39  ;;  %v3865_v22 = vshrl.u32 %v3777_v1, 16 }
 0x1ec   : > { %v3779_v54 = vsel %vm12043_vm0, %v3740_v56, %v8823_v44 }
 0x1ed   : > { %v3257_v29 = vpop.permute.xlu1 %3256  ;;  %v3202_v23 = vpop.permute.xlu0 %3201  ;;  %v3857_v27 = vsel %vm12119_vm3, %v3853_v53, %v3856_v62  ;;  %v3863_v12 = vrot.slane %v3861_v58, 1  ;;  %v3860_v21 = vor.u32 %v3858_v48, %v3856_v62  ;;  %v3868_v49 = vshll.u32 %v3779_v54, 16 }
 0x1ee   : > { %v8894_v30 = vpop.permute.xlu2 %3126  ;;  %v3664_v9 = vsel %vm12120_vm1, %v3625_v63, %v3202_v23  ;;  %v3872_v58 = vshrl.u32 %v3779_v54, 16 }
 0x1ef   : > { %v3703_v14 = vsel %vm3683_vm15, %v3664_v9, %v3257_v29  ;;  %v3864_v57 = vsel %vm12119_vm3, %v3860_v21, %v3863_v12  ;;  %v3870_v20 = vrot.slane %v3868_v49, 1  ;;  %vm12125_vm3 = vcmask 60416  }
 0x1f0   : > { %v3742_v13 = vsel %vm3722_vm12, %v3703_v14, %v8724_v31  ;;  %v1171_v31 = vlaneseq  ;;  %v3867_v63 = vor.u32 %v3865_v22, %v3863_v12 }
 0x1f5   : > { %v2859_v7 = vpop.permute.xlu1 %2858  ;;  %v3468_v50 = vpop.permute.xlu0 %3467 }
 0x1f6   : > { %v3510_v45 = vsel %vm3487_vm6, %v12121_v4, %v2859_v7  ;;  %v3781_v33 = vsel %vm12043_vm0, %v3742_v13, %v3468_v50  ;;  %v8933_v50 = vshrl.u32 %v1171_v31, 7 }
 0x1f7   : > { %7192 = vmatmul.msk.bf16.gmra.mxu0 %vm3969_vm10, %v3857_v27  ;;  %v3549_v61 = vsel %vm3527_vm13, %v3510_v45, %v8768_v19  ;;  %v3875_v47 = vshll.u32 %v3781_v33, 16 }
 0x1f8   : > { %v1211_v51 = vand.u32 65535, %v8933_v50 }
 0x1fa   : > { %v1214_v1 = vmul.u32 14564, %v1211_v51  ;;  %v8944_v8 = vmul.u32 58254, %v1211_v51 }
 0x1fc   : > { %v1218_v14 = vshll.u32 %v8944_v8, 16 }
 0x1fd   : > { %v2993_v6 = vpop.permute.xlu1 %2992  ;;  %v1091_v42 = vpop.permute.xlu0 %1090 }
 0x1fe   : > { %v1094_v34 = vsel %vm12122_vm14, %v7362_v3, %v1091_v42  ;;  %v8912_v36 = vpop.permute.xlu2 %3392  ;;  %v3588_v23 = vsel %vm3566_vm11, %v3549_v61, %v2993_v6  ;;  %vm12124_vm14 = vcmask 57344   ;;  %v1212_v3 = vshrl.u32 %v8933_v50, 16  ;;  %v12129_v61 = vld [vmem:[#allocation12_spill] sm:$0xff] }
 0x1ff   : > { %v1095_v25 = vshrl.u32 %v1094_v34, 16  ;;  %v1098_v39 = vshll.u32 %v1094_v34, 16  ;;  %v3627_v62 = vsel %vm3605_vm7, %v3588_v23, %v8812_v28  ;;  %v3877_v6 = vrot.slane %v3875_v47, 1 }
 0x200   : > { %v8946_v9 = vmul.u32 14564, %v1212_v3  ;;  %v3879_v42 = vshrl.u32 %v3781_v33, 16  ;;  %v3874_v34 = vor.u32 %v3872_v58, %v3870_v20  ;;  %v1217_v12 = vmul.u32 58254, %v1212_v3 }
 0x201   : > { %v1097_v16 = vrot.slane %v1095_v25, 7  ;;  %v8976_v47 = vadd.s32 8, %v8933_v50 }
 0x202   : > { %v1220_v54 = vshll.u32 %v8946_v9, 16 }
 0x203   : > { %v1100_v17 = vor.u32 %v1098_v39, %v1097_v16  ;;  %v1104_v29 = vsel %vm7628_vm5, %v1097_v16, 0  ;;  %v3512_v16 = vsel %vm3487_vm6, %v12129_v61, %v8867_v55  ;;  %v1219_v55 = vshrl.u32 %v8944_v8, 16 }
 0x204   : > { %v1109_v59 = vunpack.c.l.b16 %v1104_v29 }
 0x205   : > { %v3259_v44 = vpop.permute.xlu1 %3258  ;;  %v1103_v19 = vsel %vm7628_vm5, 0, %v1100_v17  ;;  %v3204_v0 = vpop.permute.xlu0 %3203  ;;  %v1224_v17 = vadd.s32 %v1218_v14, %v1214_v1 }
 0x206   : > { %v1107_v52 = vunpack.c.l.b16 %v1103_v19  ;;  %v1108_v7 = vunpack.c.h.b16 %v1103_v19  ;;  %v1112_v53 = vpack.c.b16 %v1109_v59, %v1109_v59  ;;  %v3666_v40 = vsel %vm12120_vm1, %v3627_v62, %v3204_v0  ;;  %v8936_v27 = vpop.permute.xlu2 %2941  ;;  %vm12126_vm1 = vmmov %vm12125_vm3 }
 0x207   : > { %7193 = vmatmul.msk.bf16.gmra.mxu0 %vm3969_vm10, %v3864_v57  ;;  %v3705_v10 = vsel %vm3683_vm15, %v3666_v40, %v3259_v44  ;;  %v1221_v44 = vshrl.u32 %v8946_v9, 16 }
 0x208   : > { %v1110_v28 = vpack.c.b16 %v1107_v52, %v1107_v52  ;;  %v1111_v38 = vpack.c.b16 %v1108_v7, %v1108_v7  ;;  %1118 = vst.msk [vmem:[#allocation2 + $0x98] sm:$0x1] %vm12124_vm14, %v1112_v53  ;;  %v3744_v4 = vsel %vm3722_vm12, %v3705_v10, %v8849_v11  ;;  %vm12127_vm14 = vsmask.f32 7424 }
 0x209   : > { %v3871_v45 = vsel %vm12127_vm14, %v3867_v63, %v3870_v20  ;;  %v8958_v11 = vor.u32 %v3879_v42, %v3877_v6 }
 0x20a   : > { %1116 = vst.msk [vmem:[#allocation2 + $0x90] sm:$0xf] %vm12125_vm3, %v1110_v28  ;;  %vm1222_vm3 = vc.u32 %v1214_v1, %v1218_v14 }
 0x20b   : > { %1117 = vst.msk [vmem:[#allocation2 + $0x94] sm:$0xf] %vm12126_vm1, %v1111_v38  ;;  %v1223_v33 = vsel %vm1222_vm3, 1, %v12123_v24  ;;  %vm12040_vm1 = vcmask 125952   ;;  %vm12132_vm3 = vcmask 60417  }
 0x20c   : > { %v1225_v57 = vadd.s32 %v1223_v33, %v1217_v12  ;;  %343 = vst.msk [vmem:[#allocation3 + $0x8] sm:$0xf] %vm12040_vm1, %v12123_v24 }
 0x20d   : > { %v1136_v56 = vpop.permute.xlu1 %1135  ;;  %v3470_v48 = vpop.permute.xlu0 %3469  ;;  %344 = vst.msk [vmem:[#allocation3 + $0xc] sm:$0xf] %vm12040_vm1, %v12123_v24 }
 0x20e   : > { %v1139_v25 = vsel %vm12128_vm2, %v7364_v41, %v1136_v56  ;;  %v3783_v21 = vsel %vm12043_vm0, %v3744_v4, %v3470_v48  ;;  %v8960_v49 = vpop.permute.xlu2 %3207  ;;  %vm12130_vm2 = vmmov %vm12127_vm14  ;;  %vm1226_vm14 = vc.u32 %v1224_v17, %v1220_v54  ;;  %v1241_v48 = vshrl.u32 %v8976_v47, 16  ;;  %349 = vst.msk [vmem:[#allocation3 + $0xa4] sm:$0xf] %vm12040_vm1, %v12123_v24 }
 0x20f   : > { %v1140_v39 = vshrl.u32 %v1139_v25, 16  ;;  %v1143_v23 = vshll.u32 %v1139_v25, 16  ;;  %v3882_v13 = vshll.u32 %v3783_v21, 16  ;;  %v8964_v59 = vsel %vm12130_vm2, %v3874_v34, %v3877_v6  ;;  %350 = vst.msk [vmem:[#allocation3 + $0xa8] sm:$0xf] %vm12040_vm1, %v12123_v24 }
 0x210   : > { %v3886_v0 = vshrl.u32 %v3783_v21, 16  ;;  %v1227_v52 = vsel %vm1226_vm14, 1, %v12123_v24  ;;  %vm12133_vm2 = vsmask.f32 5376  ;;  %vm12135_vm14 = vcmask 60416  }
 0x211   : > { %v1142_v29 = vrot.slane %v1140_v39, 7  ;;  %v8973_v53 = vrot.slane %v3882_v13, 1  ;;  %v1229_v40 = vadd.s32 %v1227_v52, %v1225_v57  ;;  %vm12140_vm1 = vsmask.f32 7424 }
 0x212   : > { %v8970_v31 = vld [vmem:[#allocation2 + $0x90] sm:$0xff] }
 0x213   : > { %v1145_v19 = vor.u32 %v1143_v23, %v1142_v29  ;;  %v1149_v62 = vsel %vm7628_vm5, %v1142_v29, 0  ;;  %v3441_v28 = vrot.slane %v8970_v31, 3  ;;  %v3177_v38 = vrot.slane %v8970_v31, 2 }
 0x214   : > { %v1154_v7 = vunpack.c.l.b16 %v1149_v62  ;;  %v8983_v10 = vshll.u32 %v8970_v31, 16  ;;  %v8986_v63 = vshrl.u32 %v8970_v31, 16  ;;  %v9007_v56 = vor.u32 %v3886_v0, %v8973_v53  ;;  %v2576_v62 = vld [vmem:[#allocation2 + $0x98] sm:$0x1] }
 0x215   : > { %v1148_v22 = vsel %vm7628_vm5, 0, %v1145_v19  ;;  %v2995_v20 = vpop.permute.xlu1 %2994  ;;  %v2940_v58 = vpop.permute.xlu0 %2939  ;;  %v3442_v6 = vsel %vm12041_vm4, %v3439_v60, %v3441_v28  ;;  %vm12131_vm5 = vcmask 1045504   ;;  %v1240_v60 = vand.u32 65535, %v8976_v47 }
 0x216   : > { %v1152_v41 = vunpack.c.l.b16 %v1148_v22  ;;  %v1153_v51 = vunpack.c.h.b16 %v1148_v22  ;;  %v1157_v3 = vpack.c.b16 %v1154_v7, %v1154_v7  ;;  %v3551_v15 = vsel %vm3527_vm13, %v3512_v16, %v2940_v58  ;;  %3477 = vrot.lane.b32.xlu0 %v3442_v6, %s7525_s20  ;;  %v9012_v34 = vpop.permute.xlu2 %3473 }
 0x217   : > { %v9001_v1 = vsel %vm12131_vm5, %v3175_v32, %v3177_v38  ;;  %v3345_v8 = vrot.slane %v8983_v10, 3  ;;  %7194 = vmatmul.msk.bf16.gmra.mxu0 %vm3969_vm10, %v3871_v45  ;;  %v3344_v32 = vrot.slane %v8986_v63, 2  ;;  %v1230_v25 = vadd.s32 %v1229_v40, %v1219_v55 }
 0x218   : > { %v1155_v9 = vpack.c.b16 %v1152_v41, %v1152_v41  ;;  %v1156_v42 = vpack.c.b16 %v1153_v51, %v1153_v51  ;;  %v1163_v4 = vrot.slane %v1157_v3, 7  ;;  %3266 = vrot.lane.b32.xlu1 %v9001_v1, %s7524_s19  ;;  %v3590_v14 = vsel %vm3566_vm11, %v3551_v15, %v2995_v20 }
 0x219   : > { %v9022_v54 = vrot.slane %v8970_v31, 1  ;;  %v9026_v61 = vor.u32 %v3345_v8, %v3344_v32  ;;  %v1231_v16 = vadd.s32 %v1230_v25, %v1221_v44  ;;  %v3082_v39 = vrot.slane %v8986_v63, 1 }
 0x21a   : > { %v1158_v12 = vrot.slane %v1155_v9, 7  ;;  %v1160_v45 = vrot.slane %v1156_v42, 7  ;;  %v3083_v23 = vrot.slane %v8983_v10, 2  ;;  %v1243_v17 = vmul.u32 14564, %v1240_v60  ;;  %v9068_v42 = vld [vmem:[%s12007_s3] ss:$0 sm:$0xff] }
 0x21b   : > { %v1244_v29 = vmul.u32 58254, %v1240_v60  ;;  %v3347_v55 = vsel %vm12133_vm2, %v8798_v37, %v9026_v61  ;;  %v3629_v57 = vsel %vm3605_vm7, %v3590_v14, %v8894_v30  ;;  %v1232_v19 = vshrl.u32 %v1231_v16, 4 }
 0x21c   : > { %v1159_v21 = vrot.slane %v1158_v12, 4  ;;  %v1162_v13 = vrot.slane %v1160_v45, 4  ;;  %1168 = vst.msk [vmem:[#allocation2 + $0x98] sm:$0xe] %vm12132_vm3, %v1158_v12  ;;  %v9036_v44 = vmul.u32 14564, %v1241_v48  ;;  %3398 = vrot.lane.b32.xlu2 %v3347_v55, %s7527_s22  ;;  %v1246_v22 = vmul.u32 58254, %v1241_v48 }
 0x21d   : > { %v3261_v33 = vpop.permute.xlu1 %3260  ;;  %v3206_v40 = vpop.permute.xlu0 %3205  ;;  %v1247_v20 = vshll.u32 %v1244_v29, 16  ;;  %vm12136_vm5 = vcmask 326656   ;;  %vm12137_vm3 = vcmask 1046528   ;;  %v1233_v41 = vmul.u32 18, %v1232_v19 }
 0x21e   : > { %v1161_v52 = vsel %vm7716_vm8, %v1159_v21, %v1160_v45  ;;  %v1164_v7 = vsel %vm7716_vm8, %v1162_v13, %v1163_v4  ;;  %v3668_v37 = vsel %vm12136_vm5, %v3629_v57, %v3206_v40  ;;  %v9049_v30 = vsel %vm12137_vm3, %v2911_v18, %v9022_v54  ;;  %v9058_v8 = vpop.permute.xlu2 %2998 }
 0x21f   : > { %1169 = vst.msk [vmem:[#allocation2 + $0x9c] sm:$0xf] %vm12135_vm14, %v1161_v52  ;;  %v1249_v51 = vshll.u32 %v9036_v44, 16  ;;  %vm12138_vm2 = vcmask 58368   ;;  %3002 = vrot.lane.b32.xlu0 %v9049_v30, %s7523_s18  ;;  %v9055_v3 = vor.u32 %v3083_v23, %v3082_v39  ;;  %vm1251_vm8 = vc.u32 %v1243_v17, %v1247_v20 }
 0x220   : > { %1170 = vst.msk [vmem:[#allocation2 + $0xa0] sm:$0x3] %vm12138_vm2, %v1164_v7  ;;  %v1253_v58 = vadd.s32 %v1247_v20, %v1243_v17  ;;  %v2664_v15 = vunpack.c.l.b16 %v2576_v62  ;;  %v3707_v6 = vsel %vm3683_vm15, %v3668_v37, %v3261_v33  ;;  %2868 = vrot.lane.b32.xlu1 %v8788_v43, %s7521_s16  ;;  %v1234_v46 = vsub.s32 %v8933_v50, %v1233_v41  ;;  %v7482_v62 = vld [vmem:[#allocation2 + $0x68] sm:$0xff] }
 0x221   : > { %v1252_v18 = vsel %vm1251_vm8, 1, %v12123_v24  ;;  %v2826_v9 = vrot.slane %v8983_v10, 1  ;;  %v1248_v60 = vshrl.u32 %v1244_v29, 16  ;;  %v9071_v32 = vadd.s32 16, %v8933_v50 }
 0x222   : > { %v1254_v4 = vadd.s32 %v1252_v18, %v1246_v22  ;;  %vm1255_vm14 = vc.u32 %v1253_v58, %v1249_v51  ;;  %vm2252_vm5 = vcmp.ne.s32.totalorder %v1234_v46, 0  ;;  %vm2288_vm3 = vcmp.lt.s32.totalorder %v1234_v46, 0 }
 0x223   : > { %v2360_v43 = vadd.s32 18, %v1234_v46  ;;  %v1256_v25 = vsel %vm1255_vm14, 1, %v12123_v24  ;;  %vm2324_vm2 = vmand %vm2288_vm3, %vm2252_vm5  ;;  %v3746_v10 = vsel %vm3722_vm12, %v3707_v6, %v8912_v36  ;;  %vm12139_vm8 = vsmask.f32 6400 }
 0x224   : > { %v3085_v48 = vsel %vm12139_vm8, %v8810_v2, %v9055_v3  ;;  %v1250_v12 = vshrl.u32 %v9036_v44, 16  ;;  %v1258_v45 = vadd.s32 %v1256_v25, %v1254_v4  ;;  %v4037_v39 = vpop.f32.mrf.mxu0  ;;  %v9082_v23 = vsel %vm12140_vm1, %v8870_v5, %v2826_v9  ;;  %vm12141_vm14 = vmmov %vm12140_vm1  ;;  %2947 = vrot.lane.b32.xlu2 %v8840_v26, %s7520_s15 }
 0x225   : > { %v2863_v14 = vpop.permute.xlu1 %2862  ;;  %v2396_v16 = vsel %vm2324_vm2, %v2360_v43, %v1234_v46  ;;  %v1269_v21 = vand.u32 65535, %v9071_v32  ;;  %v9088_v36 = vsel %vm12141_vm14, %v8958_v11, %v8973_v53  ;;  %v4038_v2 = vadd.f32 %v9068_v42, %v4037_v39  ;;  %v3472_v13 = vpop.permute.xlu0 %3471 }
 0x226   : > { %vm2432_vm5 = vcmp.ge.s32.totalorder %v2396_v16, 1  ;;  %vm2468_vm3 = vcmp.lt.s32.totalorder %v2396_v16, 17  ;;  %v9093_v17 = vld [vmem:[#allocation2 + $0x98] sm:$0xff]  ;;  %v1270_v5 = vshrl.u32 %v9071_v32, 16  ;;  %v3785_v33 = vsel %vm12043_vm0, %v3746_v10, %v3472_v13  ;;  %v9122_v20 = vpop.permute.xlu2 %3264 }
 0x227   : > { %vm9096_vm1 = vmand %vm2432_vm5, %vm2468_vm3  ;;  %v1259_v11 = vadd.s32 %v1258_v45, %v1248_v60  ;;  %v9102_v53 = vadd.s32 24, %v8933_v50  ;;  %v9104_v26 = vpack.c.b16 %v2664_v15, %v2664_v15  ;;  %v4127_v55 = vmax.f32 %v4038_v2, 0.0  ;;  %7195 = vmatmul.msk.bf16.gmra.mxu0 %vm3969_vm10, %v8964_v59 }
 0x228   : > { %v3889_v57 = vshll.u32 %v3785_v33, 16  ;;  %v9109_v19 = vrot.slane %v9093_v17, 2  ;;  %v9112_v44 = vor.u32 %v8986_v63, %v2826_v9  ;;  %v3514_v0 = vsel %vm3487_vm6, %v7482_v62, %v2863_v14  ;;  %3134 = vrot.lane.b32.xlu1 %v3085_v48, %s7526_s21 }
 0x229   : > { %v1260_v52 = vadd.s32 %v1259_v11, %v1250_v12  ;;  %v3087_v7 = vshrl.u32 %v9093_v17, 16  ;;  %v3090_v40 = vshll.u32 %v9093_v17, 16  ;;  %v4235_v22 = vsel %vm9096_vm1, %v4127_v55, 0.0 }
 0x22a   : > { %v9120_v59 = vrot.slane %v3889_v57, 1  ;;  %vm12144_vm2 = vcmask 1045504   ;;  %v1273_v37 = vmul.u32 58254, %v1269_v21  ;;  %v4271_v41 = vpack.c.bf16 %v4235_v22, %v4235_v22 }
 0x22b   : > { %v9128_v63 = vsel %vm12144_vm2, %v3177_v38, %v9109_v19  ;;  %v1261_v51 = vshrl.u32 %v1260_v52, 4  ;;  %v3348_v58 = vrot.slane %v3087_v7, 2  ;;  %v3349_v15 = vrot.slane %v3090_v40, 3 }
 0x22c   : > { %3268 = vrot.lane.b32.xlu0 %v9128_v63, %s7524_s19  ;;  %v3893_v6 = vshrl.u32 %v3785_v33, 16  ;;  %v3443_v46 = vrot.slane %v9093_v17, 3  ;;  %v1272_v18 = vmul.u32 14564, %v1269_v21  ;;  %v1274_v9 = vmul.u32 14564, %v1270_v5  ;;  %v4039_v25 = vpop.f32.mrf.mxu0  ;;  %3213 = vrot.lane.b32.xlu2 %v9001_v1, %s7522_s17 }
 0x22d   : > { %v9133_v60 = vrot.slane %v4271_v41, 6  ;;  %v3129_v4 = vpop.permute.xlu1 %3128  ;;  %v1262_v43 = vmul.u32 18, %v1261_v51  ;;  %v9135_v38 = vor.u32 %v3349_v15, %v3348_v58  ;;  %v1276_v10 = vshll.u32 %v1273_v37, 16  ;;  %v2997_v45 = vpop.permute.xlu0 %2996 }
 0x22e   : > { %v4040_v48 = vadd.f32 %v9068_v42, %v4039_v25  ;;  %v3553_v12 = vsel %vm3527_vm13, %v3514_v0, %v8936_v27  ;;  %v1275_v14 = vmul.u32 58254, %v1270_v5  ;;  %v1278_v16 = vshll.u32 %v1274_v9, 16  ;;  %v2867_v62 = vpop.permute.xlu2 %2866 }
 0x22f   : > { %vm12145_vm8 = vcmask 125954   ;;  %v9145_v39 = vor.u32 %v3893_v6, %v9120_v59  ;;  %v1263_v21 = vsub.s32 %v8976_v47, %v1262_v43  ;;  %v3592_v2 = vsel %vm3566_vm11, %v3553_v12, %v2997_v45 }
 0x230   : > { %4487 = vst.msk [vmem:[#allocation3 + $0x10] sm:$0xc] %vm12145_vm8, %v9133_v60  ;;  %vm12146_vm14 = vsmask.f32 5376  ;;  %v3444_v27 = vsel %vm12041_vm4, %v3441_v28, %v3443_v46  ;;  %v1277_v13 = vshrl.u32 %v1273_v37, 16  ;;  %vm1280_vm5 = vc.u32 %v1272_v18, %v1276_v10 }
 0x231   : > { %v3351_v1 = vsel %vm12146_vm14, %v9026_v61, %v9135_v38  ;;  %v1282_v5 = vadd.s32 %v1276_v10, %v1272_v18  ;;  %vm2253_vm3 = vcmp.ne.s32.totalorder %v1263_v21, 0  ;;  %vm2289_vm1 = vcmp.lt.s32.totalorder %v1263_v21, 0 }
 0x232   : > { %v2361_v29 = vadd.s32 18, %v1263_v21  ;;  %3400 = vrot.lane.b32.xlu1 %v3351_v1, %s7527_s22  ;;  %v1281_v47 = vsel %vm1280_vm5, 1, %v12123_v24  ;;  %vm2325_vm2 = vmand %vm2289_vm1, %vm2253_vm3  ;;  %v4128_v33 = vmax.f32 %v4040_v48, 0.0  ;;  %v3631_v61 = vsel %vm3605_vm7, %v3592_v2, %v3129_v4  ;;  %v7483_v4 = vld [vmem:[#allocation2 + $0x78] sm:$0xff] }
 0x233   : > { %v1283_v11 = vadd.s32 %v1281_v47, %v1275_v14  ;;  %vm1284_vm8 = vc.u32 %v1282_v5, %v1278_v16  ;;  %v3089_v28 = vrot.slane %v3087_v7, 1  ;;  %v3092_v57 = vrot.slane %v3090_v40, 2 }
 0x234   : > { %v2397_v55 = vsel %vm2325_vm2, %v2361_v29, %v1263_v21  ;;  %2870 = vrot.lane.b32.xlu0 %v9082_v23, %s7521_s16  ;;  %v1285_v31 = vsel %vm1284_vm8, 1, %v12123_v24  ;;  %v1279_v0 = vshrl.u32 %v1274_v9, 16  ;;  %v4344_v22 = vrot.slane %v9133_v60, 4  ;;  %v4042_v37 = vpop.f32.mrf.mxu0  ;;  %v9167_v23 = vld [vmem:[#allocation2 + $0xa0] sm:$0xff]  ;;  %3479 = vrot.lane.b32.xlu2 %v3444_v27, %s7525_s20 }
 0x235   : > { %vm2433_vm14 = vcmp.ge.s32.totalorder %v2397_v55, 1  ;;  %vm2469_vm4 = vcmp.lt.s32.totalorder %v2397_v55, 17  ;;  %v1287_v52 = vadd.s32 %v1285_v31, %v1283_v11  ;;  %v2968_v41 = vrot.slane %v9093_v17, 1  ;;  %v3395_v7 = vpop.permute.xlu1 %3394  ;;  %v3263_v18 = vpop.permute.xlu0 %3262 }
 0x236   : > { %vm2505_vm5 = vmand %vm2433_vm14, %vm2469_vm4  ;;  %v1298_v51 = vand.u32 65535, %v9102_v53  ;;  %v1299_v58 = vshrl.u32 %v9102_v53, 16  ;;  %vm12147_vm3 = vcmask 326656   ;;  %v9172_v9 = vor.u32 %v3092_v57, %v3089_v28 }
 0x237   : > { %v4236_v15 = vsel %vm2505_vm5, %v4128_v33, 0.0  ;;  %v1288_v40 = vadd.s32 %v1287_v52, %v1277_v13  ;;  %v3670_v6 = vsel %vm12147_vm3, %v3631_v61, %v8960_v49  ;;  %v9175_v43 = vsel %vm3487_vm6, %v7483_v4, %v2867_v62  ;;  %7196 = vmatmul.msk.bf16.gmra.mxu0 %vm3969_vm10, %v9088_v36 }
 0x238   : > { %v4272_v60 = vpack.c.bf16 %v4236_v15, %v4236_v15  ;;  %v9178_v25 = vadd.f32 %v9068_v42, %v4042_v37  ;;  %v3709_v10 = vsel %vm3683_vm15, %v3670_v6, %v3263_v18  ;;  %v1301_v49 = vmul.u32 14564, %v1298_v51  ;;  %v7484_v37 = vld [vmem:[#allocation2 + $0x70] sm:$0xff] }
 0x239   : > { %v1289_v48 = vadd.s32 %v1288_v40, %v1279_v0  ;;  %v3748_v12 = vsel %vm3722_vm12, %v3709_v10, %v3395_v7  ;;  %v1302_v45 = vmul.u32 58254, %v1298_v51  ;;  %vm12148_vm4 = vcmask 1046528  }
 0x23a   : > { %v9184_v14 = vrot.slane %v4272_v60, 6  ;;  %2949 = vrot.lane.b32.xlu1 %v9049_v30, %s7520_s15  ;;  %v2969_v16 = vsel %vm12148_vm4, %v9022_v54, %v2968_v41  ;;  %v1303_v21 = vmul.u32 14564, %v1299_v58  ;;  %v3353_v2 = vshrl.u32 %v9167_v23, 16 }
 0x23b   : > { %v1290_v1 = vshrl.u32 %v1289_v48, 4  ;;  %vm12149_vm1 = vsmask.f32 6400  ;;  %v1304_v27 = vmul.u32 58254, %v1299_v58  ;;  %v1305_v13 = vshll.u32 %v1302_v45, 16 }
 0x23c   : > { %v3094_v36 = vsel %vm12149_vm1, %v9055_v3, %v9172_v9  ;;  %v4346_v5 = vsel %vm7642_vm9, %v4344_v22, %v9184_v14  ;;  %v4129_v30 = vmax.f32 %v9178_v25, 0.0  ;;  %v9202_v29 = vsel %vm12043_vm0, %v3748_v12, %v9012_v34  ;;  %v4044_v55 = vpop.f32.mrf.mxu0  ;;  %3004 = vrot.lane.b32.xlu2 %v2969_v16, %s7523_s18 }
 0x23d   : > { %3136 = vrot.lane.b32.xlu0 %v3094_v36, %s7526_s21  ;;  %v1307_v47 = vshll.u32 %v1303_v21, 16  ;;  %vm12150_vm2 = vcmask 125952   ;;  %v1291_v33 = vmul.u32 18, %v1290_v1  ;;  %v1306_v61 = vshrl.u32 %v1302_v45, 16  ;;  %v2865_v52 = vpop.permute.xlu0 %2864  ;;  %v2944_v40 = vpop.permute.xlu1 %2943 }
 0x23e   : > { %4488 = vst.msk [vmem:[#allocation3 + $0x14] sm:$0xf] %vm12150_vm2, %v4346_v5  ;;  %vm1309_vm8 = vc.u32 %v1301_v49, %v1305_v13  ;;  %v1311_v3 = vadd.s32 %v1305_v13, %v1301_v49  ;;  %v3355_v31 = vrot.slane %v3353_v2, 2  ;;  %v3356_v28 = vshll.u32 %v9167_v23, 16 }
 0x23f   : > { %v1310_v11 = vsel %vm1309_vm8, 1, %v12123_v24  ;;  %v9209_v57 = vadd.s32 32, %v8933_v50  ;;  %v1292_v34 = vsub.s32 %v9071_v32, %v1291_v33  ;;  %v1308_v62 = vshrl.u32 %v1303_v21, 16 }
 0x240   : > { %v1312_v0 = vadd.s32 %v1310_v11, %v1304_v27  ;;  %vm1313_vm14 = vc.u32 %v1311_v3, %v1307_v47  ;;  %v3516_v51 = vsel %vm3487_vm6, %v7484_v37, %v2865_v52  ;;  %v3358_v58 = vrot.slane %v3356_v28, 3 }
 0x241   : > { %v1314_v22 = vsel %vm1313_vm14, 1, %v12123_v24  ;;  %v3234_v15 = vrot.slane %v9167_v23, 2  ;;  %vm2254_vm5 = vcmp.ne.s32.totalorder %v1292_v34, 0  ;;  %vm2290_vm3 = vcmp.lt.s32.totalorder %v1292_v34, 0 }
 0x242   : > { %v2362_v7 = vadd.s32 18, %v1292_v34  ;;  %v1316_v6 = vadd.s32 %v1314_v22, %v1312_v0  ;;  %v4347_v32 = vrot.slane %v9184_v14, 4  ;;  %vm2326_vm4 = vmand %vm2290_vm3, %vm2254_vm5  ;;  %v9218_v18 = vadd.f32 %v9068_v42, %v4044_v55  ;;  %3215 = vrot.lane.b32.xlu1 %v9128_v63, %s7522_s17 }
 0x243   : > { %v9222_v60 = vor.u32 %v3358_v58, %v3355_v31  ;;  %v1327_v4 = vand.u32 65535, %v9209_v57  ;;  %v3555_v48 = vsel %vm3527_vm13, %v3516_v51, %v2944_v40  ;;  %v1328_v12 = vshrl.u32 %v9209_v57, 16 }
 0x244   : > { %v2398_v25 = vsel %vm2326_vm4, %v2362_v7, %v1292_v34  ;;  %v1317_v10 = vadd.s32 %v1316_v6, %v1306_v61  ;;  %vm12151_vm8 = vsmask.f32 5376  ;;  %vm12152_vm14 = vcmask 1045504   ;;  %v4047_v33 = vpop.f32.mrf.mxu0  ;;  %v2588_v34 = vld [vmem:[#allocation2 + $0xa8] sm:$0x7] }
 0x245   : > { %vm2434_vm1 = vcmp.ge.s32.totalorder %v2398_v25, 1  ;;  %vm2470_vm2 = vcmp.lt.s32.totalorder %v2398_v25, 17  ;;  %v3360_v49 = vsel %vm12151_vm8, %v9135_v38, %v9222_v60  ;;  %v3235_v63 = vsel %vm12152_vm14, %v9109_v19, %v3234_v15  ;;  %v3131_v11 = vpop.permute.xlu0 %3130  ;;  %v3210_v37 = vpop.permute.xlu1 %3209 }
 0x246   : > { %vm2506_vm5 = vmand %vm2434_vm1, %vm2470_vm2  ;;  %v1318_v45 = vadd.s32 %v1317_v10, %v1308_v62  ;;  %3402 = vrot.lane.b32.xlu0 %v3360_v49, %s7527_s22  ;;  %v1330_v14 = vmul.u32 14564, %v1327_v4  ;;  %v1331_v16 = vmul.u32 58254, %v1327_v4  ;;  %v9235_v21 = vmul.u32 14564, %v1328_v12  ;;  %3270 = vrot.lane.b32.xlu2 %v3235_v63, %s7524_s19  ;;  %v2578_v63 = vld [vmem:[#allocation2 + $0x98] sm:$0x3] }
 0x247   : > { %v4237_v2 = vsel %vm2506_vm5, %v4129_v30, 0.0  ;;  %v4130_v1 = vmax.f32 %v9218_v18, 0.0  ;;  %v3594_v36 = vsel %vm3566_vm11, %v3555_v48, %v9058_v8  ;;  %v3445_v38 = vrot.slane %v9167_v23, 3 }
 0x248   : > { %v4273_v27 = vpack.c.bf16 %v4237_v2, %v4237_v2  ;;  %v1319_v13 = vshrl.u32 %v1318_v45, 4  ;;  %v1333_v5 = vmul.u32 58254, %v1328_v12  ;;  %v1334_v47 = vshll.u32 %v1331_v16, 16 }
 0x249   : > { %v1335_v61 = vshrl.u32 %v1331_v16, 16  ;;  %v1336_v3 = vshll.u32 %v9235_v21, 16  ;;  %vm12153_vm3 = vsmask.f32 7424  ;;  %v2832_v55 = vshll.u32 %v9104_v26, 16 }
 0x24a   : > { %v3892_v30 = vsel %vm12153_vm3, %v9007_v56, %v9120_v59  ;;  %v9247_v8 = vrot.slane %v4273_v27, 6  ;;  %v1320_v31 = vmul.u32 18, %v1319_v13  ;;  %vm1338_vm4 = vc.u32 %v1330_v14, %v1334_v47 }
 0x24b   : > { %v1340_v28 = vadd.s32 %v1334_v47, %v1330_v14  ;;  %7197 = vmatmul.msk.bf16.gmra.mxu0 %vm3969_vm10, %v3892_v30  ;;  %v1337_v62 = vshrl.u32 %v9235_v21, 16  ;;  %v1339_v0 = vsel %vm1338_vm4, 1, %v12123_v24  ;;  %v9253_v52 = vadd.f32 %v9068_v42, %v4047_v33 }
 0x24c   : > { %vm12154_vm1 = vcmask 1044480   ;;  %v4349_v59 = vsel %vm7642_vm9, %v4347_v32, %v9247_v8  ;;  %v1321_v22 = vsub.s32 %v9102_v53, %v1320_v31  ;;  %v1341_v51 = vadd.s32 %v1339_v0, %v1333_v5  ;;  %v4049_v5 = vpop.f32.mrf.mxu0 }
 0x24d   : > { %v3446_v56 = vsel %vm12154_vm1, %v3443_v46, %v3445_v38  ;;  %v3633_v58 = vsel %vm3605_vm7, %v3594_v36, %v3131_v11  ;;  %vm12155_vm2 = vcmask 125952   ;;  %vm1342_vm8 = vc.u32 %v1340_v28, %v1336_v3  ;;  %v3397_v47 = vpop.permute.xlu0 %3396 }
 0x24e   : > { %3481 = vrot.lane.b32.xlu1 %v3446_v56, %s7525_s20  ;;  %4489 = vst.msk [vmem:[#allocation3 + $0x18] sm:$0xf] %vm12155_vm2, %v4349_v59  ;;  %v2834_v7 = vrot.slane %v2832_v55, 1  ;;  %v3228_v40 = vunpack.c.l.b16 %v2588_v34  ;;  %v9268_v6 = vadd.s32 40, %v8933_v50  ;;  %vm2255_vm14 = vcmp.ne.s32.totalorder %v1321_v22, 0  ;;  %v3476_v34 = vpop.permute.xlu1 %3475 }
 0x24f   : > { %vm2291_vm5 = vcmp.lt.s32.totalorder %v1321_v22, 0  ;;  %v2363_v46 = vadd.s32 18, %v1321_v22  ;;  %v1343_v32 = vsel %vm1342_vm8, 1, %v12123_v24  ;;  %vm12156_vm4 = vsmask.f32 7424 }
 0x250   : > { %vm2327_vm3 = vmand %vm2291_vm5, %vm2255_vm14  ;;  %v1345_v53 = vadd.s32 %v1343_v32, %v1341_v51  ;;  %v2835_v18 = vsel %vm12156_vm4, %v9112_v44, %v2834_v7  ;;  %v9273_v4 = vpack.c.b16 %v3228_v40, %v3228_v40  ;;  %v1356_v25 = vand.u32 65535, %v9268_v6 }
 0x251   : > { %v2399_v10 = vsel %vm2327_vm3, %v2363_v46, %v1321_v22  ;;  %v4131_v48 = vmax.f32 %v9253_v52, 0.0  ;;  %vm12157_vm1 = vcmask 326656   ;;  %2872 = vrot.lane.b32.xlu0 %v2835_v18, %s7521_s16  ;;  %v1357_v49 = vshrl.u32 %v9268_v6, 16 }
 0x252   : > { %v3672_v12 = vsel %vm12157_vm1, %v3633_v58, %v3210_v37  ;;  %vm2435_vm2 = vcmp.ge.s32.totalorder %v2399_v10, 1  ;;  %vm2471_vm8 = vcmp.lt.s32.totalorder %v2399_v10, 17  ;;  %v1346_v45 = vadd.s32 %v1345_v53, %v1335_v61  ;;  %v2590_v37 = vld [vmem:[#allocation2 + $0xa8] sm:$0xf] }
 0x253   : > { %v3236_v14 = vrot.slane %v9273_v4, 2  ;;  %v4350_v44 = vrot.slane %v9247_v8, 4  ;;  %vm2507_vm14 = vmand %vm2435_vm2, %vm2471_vm8  ;;  %v1359_v16 = vmul.u32 14564, %v1356_v25  ;;  %v1360_v21 = vmul.u32 58254, %v1356_v25 }
 0x254   : > { %v1361_v2 = vmul.u32 14564, %v1357_v49  ;;  %v4238_v36 = vsel %vm2507_vm14, %v4130_v1, 0.0  ;;  %v1347_v27 = vadd.s32 %v1346_v45, %v1337_v62  ;;  %vm12158_vm5 = vcmask 1045504  }
 0x255   : > { %v3237_v13 = vsel %vm12158_vm5, %v3234_v15, %v3236_v14  ;;  %v2877_v33 = vunpack.c.l.b16 %v2578_v63  ;;  %v4274_v61 = vpack.c.bf16 %v4238_v36, %v4238_v36  ;;  %v1362_v3 = vmul.u32 58254, %v1357_v49 }
 0x256   : > { %3272 = vrot.lane.b32.xlu2 %v3237_v13, %s7524_s19  ;;  %v1363_v11 = vshll.u32 %v1360_v21, 16  ;;  %v1365_v30 = vshll.u32 %v1361_v2, 16  ;;  %v1348_v55 = vshrl.u32 %v1347_v27, 4  ;;  %v1364_v8 = vshrl.u32 %v1360_v21, 16  ;;  %v4052_v27 = vpop.f32.mrf.mxu0 }
 0x257   : > { %v3711_v1 = vsel %vm3683_vm15, %v3672_v12, %v9122_v20  ;;  %v3362_v31 = vshrl.u32 %v9273_v4, 16  ;;  %v9291_v28 = vrot.slane %v4274_v61, 6  ;;  %v1366_v56 = vshrl.u32 %v1361_v2, 16 }
 0x258   : > { %vm1367_vm3 = vc.u32 %v1359_v16, %v1363_v11  ;;  %v1369_v15 = vadd.s32 %v1363_v11, %v1359_v16  ;;  %v3750_v62 = vsel %vm3722_vm12, %v3711_v1, %v3397_v47  ;;  %v1349_v0 = vmul.u32 18, %v1348_v55 }
 0x259   : > { %v1368_v59 = vsel %vm1367_vm3, 1, %v12123_v24  ;;  %v3789_v22 = vsel %vm12043_vm0, %v3750_v62, %v3476_v34  ;;  %v4352_v20 = vsel %vm7642_vm9, %v4350_v44, %v9291_v28  ;;  %v9299_v58 = vrot.slane %v3362_v31, 2 }
 0x25a   : > { %v1370_v51 = vadd.s32 %v1368_v59, %v1362_v3  ;;  %vm1371_vm4 = vc.u32 %v1369_v15, %v1365_v30  ;;  %vm12159_vm1 = vcmask 125952   ;;  %v1350_v7 = vsub.s32 %v9209_v57, %v1349_v0 }
 0x25b   : > { %4490 = vst.msk [vmem:[#allocation3 + $0x1c] sm:$0xf] %vm12159_vm1, %v4352_v20  ;;  %v1372_v40 = vsel %vm1371_vm4, 1, %v12123_v24  ;;  %v3903_v46 = vshll.u32 %v3789_v22, 16  ;;  %v3907_v32 = vshrl.u32 %v3789_v22, 16  ;;  %v3365_v18 = vshll.u32 %v9273_v4, 16 }
 0x25c   : > { %v1374_v53 = vadd.s32 %v1372_v40, %v1370_v51  ;;  %v9305_v25 = vpack.c.b16 %v2877_v33, %v2877_v33  ;;  %v3409_v10 = vunpack.c.l.b16 %v2590_v37  ;;  %vm2256_vm2 = vcmp.ne.s32.totalorder %v1350_v7, 0  ;;  %v2582_v20 = vld [vmem:[#allocation2 + $0xa0] sm:$0x3] }
 0x25d   : > { %vm2292_vm8 = vcmp.lt.s32.totalorder %v1350_v7, 0  ;;  %v2364_v12 = vadd.s32 18, %v1350_v7  ;;  %v9307_v49 = vrot.slane %v3903_v46, 1  ;;  %v3367_v45 = vrot.slane %v3365_v18, 3 }
 0x25e   : > { %vm2328_vm14 = vmand %vm2292_vm8, %vm2256_vm2  ;;  %v1375_v63 = vadd.s32 %v1374_v53, %v1364_v8  ;;  %v2915_v57 = vrot.slane %v9305_v25, 1  ;;  %v9310_v44 = vpack.c.b16 %v3409_v10, %v3409_v10  ;;  %v9313_v21 = vadd.f32 %v9068_v42, %v4049_v5 }
 0x25f   : > { %v2400_v16 = vsel %vm2328_vm14, %v2364_v12, %v1350_v7  ;;  %v9316_v2 = vor.u32 %v3907_v32, %v9307_v49  ;;  %v9319_v36 = vadd.s32 48, %v8933_v50  ;;  %v3368_v47 = vor.u32 %v3367_v45, %v9299_v58  ;;  %v2946_v32 = vpop.permute.xlu0 %2945 }
 0x260   : > { %vm2436_vm5 = vcmp.ge.s32.totalorder %v2400_v16, 1  ;;  %vm2472_vm3 = vcmp.lt.s32.totalorder %v2400_v16, 17  ;;  %v1376_v13 = vadd.s32 %v1375_v63, %v1366_v56  ;;  %vm12160_vm1 = vcmask 1046528   ;;  %v4054_v16 = vpop.f32.mrf.mxu0 }
 0x261   : > { %vm2508_vm4 = vmand %vm2436_vm5, %vm2472_vm3  ;;  %v2916_v33 = vsel %vm12160_vm1, %v9022_v54, %v2915_v57  ;;  %v3447_v5 = vrot.slane %v9310_v44, 3  ;;  %v1385_v61 = vand.u32 65535, %v9319_v36  ;;  %v1386_v3 = vshrl.u32 %v9319_v36, 16 }
 0x262   : > { %v4239_v11 = vsel %vm2508_vm4, %v4131_v48, 0.0  ;;  %v1377_v30 = vshrl.u32 %v1376_v13, 4  ;;  %vm12161_vm2 = vsmask.f32 5376  ;;  %2951 = vrot.lane.b32.xlu0 %v2916_v33, %s7520_s15  ;;  %v9335_v8 = vadd.f32 %v9068_v42, %v4052_v27 }
 0x263   : > { %v3369_v55 = vsel %vm12161_vm2, %v9222_v60, %v3368_v47  ;;  %v4275_v1 = vpack.c.bf16 %v4239_v11, %v4239_v11  ;;  %vm12162_vm8 = vcmask 1044480   ;;  %v1388_v52 = vmul.u32 14564, %v1385_v61 }
 0x264   : > { %3404 = vrot.lane.b32.xlu1 %v3369_v55, %s7527_s22  ;;  %v3448_v54 = vsel %vm12162_vm8, %v3445_v38, %v3447_v5  ;;  %v1389_v48 = vmul.u32 58254, %v1385_v61  ;;  %v3900_v31 = vshrl.u32 %v9202_v29, 16  ;;  %v1378_v34 = vmul.u32 18, %v1377_v30 }
 0x265   : > { %v4132_v60 = vmax.f32 %v9313_v21, 0.0  ;;  %3483 = vrot.lane.b32.xlu2 %v3448_v54, %s7525_s20  ;;  %v1390_v15 = vmul.u32 14564, %v1386_v3  ;;  %v4353_v62 = vrot.slane %v9291_v28, 4  ;;  %v9347_v0 = vrot.slane %v4275_v1, 6  ;;  %v3001_v54 = vpop.permute.xlu1 %3000 }
 0x266   : > { %v1391_v56 = vmul.u32 58254, %v1386_v3  ;;  %v1392_v59 = vshll.u32 %v1389_v48, 16  ;;  %v1379_v23 = vsub.s32 %v9268_v6, %v1378_v34  ;;  %v1393_v22 = vshrl.u32 %v1389_v48, 16 }
 0x267   : > { %v1394_v38 = vshll.u32 %v1390_v15, 16  ;;  %v4133_v37 = vmax.f32 %v9335_v8, 0.0  ;;  %v4355_v51 = vsel %vm7642_vm9, %v4353_v62, %v9347_v0  ;;  %v2836_v40 = vshrl.u32 %v9104_v26, 16 }
 0x268   : > { %vm1396_vm14 = vc.u32 %v1388_v52, %v1392_v59  ;;  %v1398_v7 = vadd.s32 %v1392_v59, %v1388_v52  ;;  %vm12163_vm5 = vcmask 125952   ;;  %vm2257_vm3 = vcmp.ne.s32.totalorder %v1379_v23, 0 }
 0x269   : > { %4491 = vst.msk [vmem:[#allocation3 + $0x20] sm:$0xf] %vm12163_vm5, %v4355_v51  ;;  %vm2293_vm4 = vcmp.lt.s32.totalorder %v1379_v23, 0  ;;  %v2365_v28 = vadd.s32 18, %v1379_v23  ;;  %v1397_v6 = vsel %vm1396_vm14, 1, %v12123_v24  ;;  %v3896_v53 = vshll.u32 %v9202_v29, 16 }
 0x26a   : > { %vm2329_vm1 = vmand %vm2293_vm4, %vm2257_vm3  ;;  %v1399_v46 = vadd.s32 %v1397_v6, %v1391_v56  ;;  %vm1400_vm2 = vc.u32 %v1398_v7, %v1394_v38  ;;  %v2962_v18 = vunpack.c.l.b16 %v2582_v20  ;;  %v1395_v12 = vshrl.u32 %v1390_v15, 16 }
 0x26b   : > { %v2401_v10 = vsel %vm2329_vm1, %v2365_v28, %v1379_v23  ;;  %v1401_v63 = vsel %vm1400_vm2, 1, %v12123_v24  ;;  %v9360_v45 = vadd.s32 56, %v8933_v50  ;;  %v9363_v27 = vrot.slane %v3896_v53, 1 }
 0x26c   : > { %vm2437_vm8 = vcmp.ge.s32.totalorder %v2401_v10, 1  ;;  %vm2473_vm5 = vcmp.lt.s32.totalorder %v2401_v10, 17  ;;  %v1403_v21 = vadd.s32 %v1401_v63, %v1399_v46  ;;  %2874 = vrot.lane.b32.xlu1 %v2836_v40, %s7521_s16  ;;  %v3557_v13 = vsel %vm3527_vm13, %v9175_v43, %v2946_v32 }
 0x26d   : > { %vm2509_vm14 = vmand %vm2437_vm8, %vm2473_vm5  ;;  %v2965_v47 = vpack.c.b16 %v2962_v18, %v2962_v18  ;;  %v1414_v33 = vand.u32 65535, %v9360_v45  ;;  %v1415_v61 = vshrl.u32 %v9360_v45, 16  ;;  %vm12164_vm3 = vsmask.f32 7424 }
 0x26e   : > { %v4240_v3 = vsel %vm2509_vm14, %v4132_v60, 0.0  ;;  %v1404_v11 = vadd.s32 %v1403_v21, %v1393_v22  ;;  %v3899_v30 = vsel %vm12164_vm3, %v9145_v39, %v9363_v27  ;;  %v9373_v55 = vadd.f32 %v9068_v42, %v4054_v16  ;;  %v3133_v22 = vpop.permute.xlu2 %3132 }
 0x26f   : > { %v4276_v1 = vpack.c.bf16 %v4240_v3, %v4240_v3  ;;  %7198 = vmatmul.msk.bf16.gmra.mxu0 %vm3969_vm10, %v3899_v30  ;;  %v2970_v52 = vrot.slane %v2965_v47, 1  ;;  %v1417_v43 = vmul.u32 14564, %v1414_v33  ;;  %v1418_v48 = vmul.u32 58254, %v1414_v33 }
 0x270   : > { %v4356_v34 = vrot.slane %v9347_v0, 4  ;;  %v1405_v15 = vadd.s32 %v1404_v11, %v1395_v12  ;;  %v3596_v60 = vsel %vm3566_vm11, %v3557_v13, %v3001_v54  ;;  %v1419_v62 = vmul.u32 14564, %v1415_v61  ;;  %v4057_v54 = vpop.f32.mrf.mxu0 }
 0x271   : > { %v9378_v56 = vrot.slane %v4276_v1, 6  ;;  %vm12165_vm4 = vcmask 1046528   ;;  %3008 = vrot.lane.b32.xlu2 %v2970_v52, %s7523_s18  ;;  %v1420_v59 = vmul.u32 58254, %v1415_v61  ;;  %v1421_v23 = vshll.u32 %v1418_v48, 16 }
 0x272   : > { %v2971_v39 = vsel %vm12165_vm4, %v2968_v41, %v2970_v52  ;;  %v1406_v38 = vshrl.u32 %v1405_v15, 4  ;;  %v1423_v20 = vshll.u32 %v1419_v62, 16  ;;  %v4134_v0 = vmax.f32 %v9373_v55, 0.0  ;;  %v7446_v15 = vld [vmem:[#allocation3 + $0x8] sm:$0xf0] }
 0x273   : > { %3006 = vrot.lane.b32.xlu0 %v2971_v39, %s7523_s18  ;;  %v3096_v51 = vshrl.u32 %v2965_v47, 16  ;;  %v4358_v7 = vsel %vm7642_vm9, %v4356_v34, %v9378_v56  ;;  %vm1425_vm1 = vc.u32 %v1417_v43, %v1421_v23  ;;  %v1427_v17 = vadd.s32 %v1421_v23, %v1417_v43  ;;  %v9421_v39 = vld [vmem:[#allocation2 + $0xa0] sm:$0x7] }
 0x274   : > { %v9390_v41 = vsel %vm3605_vm7, %v3596_v60, %v3133_v22  ;;  %vm12166_vm2 = vcmask 125952   ;;  %v1407_v40 = vmul.u32 18, %v1406_v38  ;;  %v1426_v28 = vsel %vm1425_vm1, 1, %v12123_v24 }
 0x275   : > { %4492 = vst.msk [vmem:[#allocation3 + $0x24] sm:$0xf] %vm12166_vm2, %v4358_v7  ;;  %v3098_v6 = vrot.slane %v3096_v51, 1  ;;  %v3099_v46 = vshll.u32 %v2965_v47, 16  ;;  %v1422_v32 = vshrl.u32 %v1418_v48, 16  ;;  %v1428_v53 = vadd.s32 %v1426_v28, %v1420_v59 }
 0x276   : > { %vm1429_vm8 = vc.u32 %v1427_v17, %v1423_v20  ;;  %v9395_v18 = vadd.s32 64, %v8933_v50  ;;  %v1408_v10 = vsub.s32 %v9319_v36, %v1407_v40  ;;  %v1424_v12 = vshrl.u32 %v1419_v62, 16 }
 0x277   : > { %v1430_v63 = vsel %vm1429_vm8, 1, %v12123_v24  ;;  %3140 = vrot.lane.b32.xlu1 %v3098_v6, %s7526_s21  ;;  %v3101_v16 = vrot.slane %v3099_v46, 2  ;;  %v4359_v21 = vrot.slane %v9378_v56, 4  ;;  %vm12167_vm4 = vsmask.f32 6400 }
 0x278   : > { %v1432_v13 = vadd.s32 %v1430_v63, %v1428_v53  ;;  %v1443_v33 = vand.u32 65535, %v9395_v18  ;;  %v1444_v47 = vshrl.u32 %v9395_v18, 16  ;;  %vm2258_vm5 = vcmp.ne.s32.totalorder %v1408_v10, 0 }
 0x279   : > { %vm2294_vm14 = vcmp.lt.s32.totalorder %v1408_v10, 0  ;;  %v2366_v61 = vadd.s32 18, %v1408_v10  ;;  %v3102_v3 = vor.u32 %v3101_v16, %v3098_v6  ;;  %3274 = vrot.lane.b32.xlu2 %v3236_v14, %s7524_s19  ;;  %v3902_v34 = vor.u32 %v3900_v31, %v9363_v27  ;;  %v7447_v14 = vld [vmem:[#allocation3 + $0x8] sm:$0xe] }
 0x27a   : > { %vm2330_vm3 = vmand %vm2294_vm14, %vm2258_vm5  ;;  %v1433_v11 = vadd.s32 %v1432_v13, %v1422_v32  ;;  %v1446_v36 = vmul.u32 14564, %v1443_v33  ;;  %v1447_v30 = vmul.u32 58254, %v1443_v33  ;;  %v1448_v1 = vmul.u32 14564, %v1444_v47 }
 0x27b   : > { %v2402_v52 = vsel %vm2330_vm3, %v2366_v61, %v1408_v10  ;;  %v3103_v43 = vsel %vm12167_vm4, %v9172_v9, %v3102_v3  ;;  %v1449_v48 = vmul.u32 58254, %v1444_v47  ;;  %v9413_v56 = vadd.f32 %v9068_v42, %v4057_v54 }
 0x27c   : > { %vm2438_vm1 = vcmp.ge.s32.totalorder %v2402_v52, 1  ;;  %vm2474_vm2 = vcmp.lt.s32.totalorder %v2402_v52, 17  ;;  %v1434_v60 = vadd.s32 %v1433_v11, %v1424_v12  ;;  %3138 = vrot.lane.b32.xlu0 %v3103_v43, %s7526_s21  ;;  %v1450_v4 = vshll.u32 %v1447_v30, 16 }
 0x27d   : > { %vm2510_vm8 = vmand %vm2438_vm1, %vm2474_vm2  ;;  %v1452_v62 = vshll.u32 %v1448_v1, 16  ;;  %vm12168_vm5 = vsmask.f32 7424  ;;  %vm12042_vm14 = vcmask 123904   ;;  %v7448_v22 = vor.u32 %v7447_v14, %v7446_v15 }
 0x27e   : > { %v3906_v9 = vsel %vm12168_vm5, %v3902_v34, %v9307_v49  ;;  %v4241_v29 = vsel %vm2510_vm8, %v4133_v37, 0.0  ;;  %v1435_v31 = vshrl.u32 %v1434_v60, 4  ;;  %vm1454_vm3 = vc.u32 %v1446_v36, %v1450_v4  ;;  %346 = vst.msk [vmem:[#allocation3 + $0x10] sm:$0x3] %vm12042_vm14, %v12123_v24  ;;  %v9453_v34 = vld [vmem:[#allocation3 + $0x18] sm:$0xff]  }
 0x27f   : > { %v1456_v27 = vadd.s32 %v1450_v4, %v1446_v36  ;;  %v4277_v59 = vpack.c.bf16 %v4241_v29, %v4241_v29  ;;  %v1455_v23 = vsel %vm1454_vm3, 1, %v12123_v24  ;;  %3406 = vrot.lane.b32.xlu1 %v9299_v58, %s7527_s22  ;;  %v9427_v49 = vadd.s32 72, %v8933_v50  ;;  %7199 = vmatmul.msk.bf16.gmra.mxu0 %vm3969_vm10, %v3906_v9 }
 0x280   : > { %v1436_v8 = vmul.u32 18, %v1435_v31  ;;  %v1451_v37 = vshrl.u32 %v1447_v30, 16  ;;  %v1457_v38 = vadd.s32 %v1455_v23, %v1449_v48  ;;  %v1453_v51 = vshrl.u32 %v1448_v1, 16  ;;  %v4059_v48 = vpop.f32.mrf.mxu0 }
 0x281   : > { %vm1458_vm4 = vc.u32 %v1456_v27, %v1452_v62  ;;  %v9430_v20 = vrot.slane %v4277_v59, 6  ;;  %v3143_v17 = vunpack.c.l.b16 %v9421_v39  ;;  %v4674_v28 = vshll.u32 %v7448_v22, 16 }
 0x282   : > { %v1459_v7 = vsel %vm1458_vm4, 1, %v12123_v24  ;;  %v1437_v40 = vsub.s32 %v9360_v45, %v1436_v8  ;;  %v1472_v6 = vand.u32 65535, %v9427_v49  ;;  %v4862_v32 = vrot.slane %v7448_v22, 1 }
 0x283   : > { %v1461_v58 = vadd.s32 %v1459_v7, %v1457_v38  ;;  %v4361_v46 = vsel %vm7642_vm9, %v4359_v21, %v9430_v20  ;;  %v4672_v53 = vshrl.u32 %v7448_v22, 16  ;;  %v1473_v10 = vshrl.u32 %v9427_v49, 16 }
 0x284   : > { %vm12169_vm1 = vcmask 125952   ;;  %vm2259_vm2 = vcmp.ne.s32.totalorder %v1437_v40, 0  ;;  %vm2295_vm8 = vcmp.lt.s32.totalorder %v1437_v40, 0  ;;  %v2367_v12 = vadd.s32 18, %v1437_v40 }
 0x285   : > { %4493 = vst.msk [vmem:[#allocation3 + $0x28] sm:$0xf] %vm12169_vm1, %v4361_v46  ;;  %v1462_v63 = vadd.s32 %v1461_v58, %v1451_v37  ;;  %vm2331_vm5 = vmand %vm2295_vm8, %vm2259_vm2  ;;  %v9441_v45 = vld [vmem:[#allocation3 + $0x10] sm:$0xff]   ;;  %v4676_v16 = vrot.slane %v4674_v28, 1  ;;  %v1475_v13 = vmul.u32 14564, %v1472_v6  ;;  %v9443_v33 = vmul.u32 58254, %v1472_v6 }
 0x286   : > { %v9445_v47 = vmul.u32 14564, %v1473_v10  ;;  %v2403_v21 = vsel %vm2331_vm5, %v2367_v12, %v1437_v40  ;;  %v4863_v3 = vrot.slane %v9441_v45, 1  ;;  %v4679_v11 = vshll.u32 %v9441_v45, 16  ;;  %v4563_v31 = vld [vmem:[#allocation3 + $0x10] sm:$0xe] }
 0x287   : > { %v1463_v61 = vadd.s32 %v1462_v63, %v1453_v51  ;;  %vm2439_vm3 = vcmp.ge.s32.totalorder %v2403_v21, 1  ;;  %vm2475_vm4 = vcmp.lt.s32.totalorder %v2403_v21, 17  ;;  %v4677_v36 = vor.u32 %v4676_v16, %v4672_v53  ;;  %v4573_v46 = vld [vmem:[#allocation3 + $0x18] sm:$0x8] }
 0x288   : > { %v1478_v30 = vmul.u32 58254, %v1473_v10  ;;  %vm2511_vm1 = vmand %vm2439_vm3, %vm2475_vm4  ;;  %vm12170_vm2 = vcmask 1046528   ;;  %v9450_v52 = vrot.slane %v4679_v11, 1  ;;  %v1479_v43 = vshll.u32 %v9443_v33, 16 }
 0x289   : > { %v1464_v1 = vshrl.u32 %v1463_v61, 4  ;;  %v4864_v54 = vsel %vm12170_vm2, %v4862_v32, %v4863_v3  ;;  %v4362_v15 = vrot.slane %v9430_v20, 4  ;;  %v4242_v60 = vsel %vm2511_vm1, %v4134_v0, 0.0  ;;  %vm12172_vm4 = vmmov %vm12170_vm2 }
 0x28a   : > { %v4135_v4 = vmax.f32 %v9413_v56, 0.0  ;;  %4899 = vrot.lane.b32.xlu0 %v4864_v54, %s7526_s21  ;;  %v1481_v14 = vshll.u32 %v9445_v47, 16  ;;  %v4278_v62 = vpack.c.bf16 %v4242_v60, %v4242_v60  ;;  %vm12171_vm8 = vsmask.f32 7424 }
 0x28b   : > { %v1465_v9 = vmul.u32 18, %v1464_v1  ;;  %v4682_v29 = vsel %vm12171_vm8, %v4677_v36, %v9450_v52  ;;  %vm1483_vm5 = vc.u32 %v1475_v13, %v1479_v43  ;;  %v1485_v39 = vadd.s32 %v1479_v43, %v1475_v13 }
 0x28c   : > { %4821 = vrot.lane.b32.xlu2 %v4682_v29, %s7520_s15  ;;  %v1484_v27 = vsel %vm1483_vm5, 1, %v12123_v24  ;;  %v9466_v55 = vadd.f32 %v9068_v42, %v4059_v48  ;;  %v9469_v0 = vrot.slane %v9453_v34, 1  ;;  %v9471_v56 = vrot.slane %v4278_v62, 6 }
 0x28d   : > { %v1466_v59 = vsub.s32 %v9395_v18, %v1465_v9  ;;  %v1486_v23 = vadd.s32 %v1484_v27, %v1478_v30  ;;  %v9474_v22 = vpack.c.b16 %v3143_v17, %v3143_v17  ;;  %vm1487_vm3 = vc.u32 %v1485_v39, %v1481_v14 }
 0x28e   : > { %v4866_v8 = vsel %vm12172_vm4, %v4863_v3, %v9469_v0  ;;  %v7432_v37 = vunpack.c.h.b16 %v9441_v45  ;;  %v4941_v38 = vunpack.c.l.b16 %v4563_v31  ;;  %v4364_v42 = vsel %vm7642_vm9, %v4362_v15, %v9471_v56  ;;  %v9518_v31 = vld [vmem:[#allocation3 + $0x20] sm:$0xff] }
 0x28f   : > { %vm2260_vm1 = vcmp.ne.s32.totalorder %v1466_v59, 0  ;;  %vm2296_vm2 = vcmp.lt.s32.totalorder %v1466_v59, 0  ;;  %v1480_v20 = vshrl.u32 %v9443_v33, 16  ;;  %4901 = vrot.lane.b32.xlu1 %v4866_v8, %s7526_s21  ;;  %vm12173_vm8 = vcmask 125952  }
 0x290   : > { %4494 = vst.msk [vmem:[#allocation3 + $0x2c] sm:$0xf] %vm12173_vm8, %v4364_v42  ;;  %vm2332_vm5 = vmand %vm2296_vm2, %vm2260_vm1  ;;  %v2368_v18 = vadd.s32 18, %v1466_v59  ;;  %v1488_v51 = vsel %vm1487_vm3, 1, %v12123_v24  ;;  %v3181_v7 = vrot.slane %v9474_v22, 2  ;;  %v4945_v17 = vpack.c.b16 %v7432_v37, %v4941_v38 }
 0x291   : > { %v1482_v40 = vshrl.u32 %v9445_v47, 16  ;;  %v1490_v58 = vadd.s32 %v1488_v51, %v1486_v23  ;;  %v4136_v28 = vmax.f32 %v9466_v55, 0.0  ;;  %v9492_v6 = vadd.s32 80, %v8933_v50  ;;  %v7412_v47 = vld [vmem:[%s12008_s4 + $0x40] sm:$0xff]  ;;  %v4062_v51 = vpop.f32.mrf.mxu0 }
 0x292   : > { %v4365_v32 = vrot.slane %v9471_v56, 4  ;;  %v2404_v53 = vsel %vm2332_vm5, %v2368_v18, %v1466_v59  ;;  %vm12174_vm3 = vcmask 1045504   ;;  %v4948_v12 = vrot.slane %v4945_v17, 1  ;;  %6228 = vmatpush.bf16.msra.mxu2 %v7412_v47  ;;  %v4567_v59 = vld [vmem:[#allocation3 + $0x10] sm:$0xc] }
 0x293   : > { %v3182_v10 = vsel %vm12174_vm3, %v9109_v19, %v3181_v7  ;;  %vm2440_vm4 = vcmp.ge.s32.totalorder %v2404_v53, 1  ;;  %vm2476_vm1 = vcmp.lt.s32.totalorder %v2404_v53, 17  ;;  %v1491_v63 = vadd.s32 %v1490_v58, %v1480_v20 }
 0x294   : > { %3217 = vrot.lane.b32.xlu0 %v3182_v10, %s7522_s17  ;;  %v1501_v16 = vand.u32 65535, %v9492_v6  ;;  %vm2512_vm2 = vmand %vm2440_vm4, %vm2476_vm1  ;;  %vm12175_vm8 = vcmask 1046528   ;;  %v1502_v33 = vshrl.u32 %v9492_v6, 16  ;;  %v4683_v19 = vshrl.u32 %v9441_v45, 16 }
 0x295   : > { %v4949_v13 = vsel %vm12175_vm8, %v4948_v12, %v9469_v0  ;;  %v5257_v21 = vunpack.c.l.b16 %v4573_v46  ;;  %v4243_v61 = vsel %vm2512_vm2, %v4135_v4, 0.0  ;;  %v1492_v3 = vadd.s32 %v1491_v63, %v1482_v40  ;;  %v3212_v40 = vpop.permute.xlu0 %3211 }
 0x296   : > { %4954 = vrot.lane.b32.xlu2 %v4949_v13, %s7524_s19  ;;  %v1504_v11 = vmul.u32 14564, %v1501_v16  ;;  %v1505_v36 = vmul.u32 58254, %v1501_v16  ;;  %v4279_v30 = vpack.c.bf16 %v4243_v61, %v4243_v61  ;;  %v1506_v1 = vmul.u32 14564, %v1502_v33 }
 0x297   : > { %v4685_v54 = vor.u32 %v4683_v19, %v9450_v52  ;;  %v4687_v43 = vshll.u32 %v9453_v34, 16  ;;  %v1493_v48 = vshrl.u32 %v1492_v3, 4  ;;  %v1507_v15 = vmul.u32 58254, %v1502_v33  ;;  %v9520_v27 = vld [vmem:[#allocation3 + $0x28] sm:$0xff] }
 0x298   : > { %v1508_v60 = vshll.u32 %v1505_v36, 16  ;;  %v7436_v14 = vunpack.c.h.b16 %v9453_v34  ;;  %v9512_v62 = vrot.slane %v4279_v30, 6  ;;  %v1509_v4 = vshrl.u32 %v1505_v36, 16 }
 0x299   : > { %v1510_v9 = vshll.u32 %v1506_v1, 16  ;;  %v9516_v29 = vrot.slane %v4687_v43, 1  ;;  %v1494_v52 = vmul.u32 18, %v1493_v48  ;;  %v1511_v8 = vshrl.u32 %v1506_v1, 16 }
 0x29a   : > { %vm1512_vm5 = vc.u32 %v1504_v11, %v1508_v60  ;;  %v1514_v39 = vadd.s32 %v1508_v60, %v1504_v11  ;;  %v9524_v56 = vpack.c.b16 %v7436_v14, %v5257_v21  ;;  %v4367_v23 = vsel %vm7642_vm9, %v4365_v32, %v9512_v62 }
 0x29b   : > { %v1513_v38 = vsel %vm1512_vm5, 1, %v12123_v24  ;;  %vm12176_vm3 = vsmask.f32 7424  ;;  %vm12177_vm4 = vcmask 125952   ;;  %v1495_v20 = vsub.s32 %v9427_v49, %v1494_v52 }
 0x29c   : > { %v4690_v42 = vsel %vm12176_vm3, %v4685_v54, %v9516_v29  ;;  %4495 = vst.msk [vmem:[#allocation3 + $0x30] sm:$0xf] %vm12177_vm4, %v4367_v23  ;;  %v1515_v18 = vadd.s32 %v1513_v38, %v1507_v15  ;;  %vm1516_vm1 = vc.u32 %v1514_v39, %v1510_v9  ;;  %v5390_v17 = vrot.slane %v9524_v56, 3  ;;  %2953 = vrot.lane.b32.xlu0 %v2915_v57, %s7520_s15  ;;  %v4064_v23 = vpop.f32.mrf.mxu0 }
 0x29d   : > { %4823 = vrot.lane.b32.xlu1 %v4690_v42, %s7520_s15  ;;  %v1517_v58 = vsel %vm1516_vm1, 1, %v12123_v24  ;;  %v5391_v46 = vrot.slane %v9518_v31, 3  ;;  %v5393_v32 = vrot.slane %v9520_v27, 3  ;;  %v4993_v53 = vunpack.c.l.b16 %v4567_v59 }
 0x29e   : > { %vm2261_vm2 = vcmp.ne.s32.totalorder %v1495_v20, 0  ;;  %vm2297_vm8 = vcmp.lt.s32.totalorder %v1495_v20, 0  ;;  %v2369_v49 = vadd.s32 18, %v1495_v20  ;;  %v1519_v10 = vadd.s32 %v1517_v58, %v1515_v18 }
 0x29f   : > { %vm2333_vm5 = vmand %vm2297_vm8, %vm2261_vm2  ;;  %vm12178_vm3 = vcmask 1044480   ;;  %v4994_v16 = vpack.c.b16 %v7432_v37, %v4993_v53  ;;  %v5127_v13 = vrot.slane %v9453_v34, 2  ;;  %vm12180_vm1 = vcmask 326656  }
 0x2a0   : > { %v5392_v12 = vsel %vm12178_vm3, %v5390_v17, %v5391_v46  ;;  %vm12179_vm4 = vmmov %vm12178_vm3  ;;  %v9553_v25 = vsel %vm12180_vm1, %v9390_v41, %v3212_v40  ;;  %v2405_v57 = vsel %vm2333_vm5, %v2369_v49, %v1495_v20  ;;  %v1520_v33 = vadd.s32 %v1519_v10, %v1509_v4  ;;  %v9564_v41 = vld [vmem:[%s12007_s3] ss:$0 sm:$0xff] }
 0x2a1   : > { %v9546_v63 = vsel %vm12179_vm4, %v5391_v46, %v5393_v32  ;;  %v5732_v47 = vshll.u32 %v5392_v12, 16  ;;  %vm2441_vm2 = vcmp.ge.s32.totalorder %v2405_v57, 1  ;;  %vm2477_vm8 = vcmp.lt.s32.totalorder %v2405_v57, 17 }
 0x2a2   : > { %v5737_v19 = vshll.u32 %v9546_v63, 16  ;;  %v5126_v21 = vrot.slane %v4994_v16, 2  ;;  %vm2513_vm3 = vmand %vm2441_vm2, %vm2477_vm8  ;;  %v1521_v61 = vadd.s32 %v1520_v33, %v1511_v8  ;;  %v5730_v3 = vshrl.u32 %v5392_v12, 16 }
 0x2a3   : > { %v5734_v11 = vrot.slane %v5732_v47, 1  ;;  %v9557_v45 = vadd.s32 88, %v8933_v50  ;;  %v4244_v37 = vsel %vm2513_vm3, %v4136_v28, 0.0  ;;  %v4063_v36 = vadd.f32 %v9564_v41, %v4062_v51 }
 0x2a4   : > { %v9567_v30 = vrot.slane %v5737_v19, 1  ;;  %vm12181_vm5 = vcmask 1045504   ;;  %v4280_v54 = vpack.c.bf16 %v4244_v37, %v4244_v37  ;;  %v1522_v48 = vshrl.u32 %v1521_v61, 4  ;;  %3219 = vrot.lane.b32.xlu0 %v3181_v7, %s7522_s17  ;;  %s7529_s17 = smov 96  }
 0x2a5   : > { %v5128_v1 = vsel %vm12181_vm5, %v5126_v21, %v5127_v13  ;;  %v5735_v15 = vor.u32 %v5734_v11, %v5730_v3  ;;  %v1530_v55 = vand.u32 65535, %v9557_v45  ;;  %v4368_v28 = vrot.slane %v9512_v62, 4 }
 0x2a6   : > { %5163 = vrot.lane.b32.xlu2 %v5128_v1, %s7528_s24  ;;  %v1531_v60 = vshrl.u32 %v9557_v45, 16  ;;  %v4691_v4 = vshrl.u32 %v9453_v34, 16  ;;  %v4996_v9 = vshrl.u32 %v4994_v16, 16  ;;  %v9580_v52 = vrot.slane %v4280_v54, 6 }
 0x2a7   : > { %v1523_v39 = vmul.u32 18, %v1522_v48  ;;  %vm12182_vm4 = vsmask.f32 7424  ;;  %v4999_v8 = vshll.u32 %v4994_v16, 16  ;;  %v1533_v62 = vmul.u32 14564, %v1530_v55 }
 0x2a8   : > { %v5740_v59 = vsel %vm12182_vm4, %v5735_v15, %v9567_v30  ;;  %v1534_v38 = vmul.u32 58254, %v1530_v55  ;;  %v1535_v42 = vmul.u32 14564, %v1531_v60  ;;  %v4867_v20 = vrot.slane %v9518_v31, 1  ;;  %v4067_v55 = vpop.f32.mrf.mxu0 }
 0x2a9   : > { %7309 = vmatmul.msk.bf16.vlgmr.msra.gmra.mxu2 %vm3527_vm13, %v5740_v59  ;;  %v4370_v22 = vsel %vm7642_vm9, %v4368_v28, %v9580_v52  ;;  %v1524_v7 = vsub.s32 %v9492_v6, %v1523_v39  ;;  %v4137_v18 = vmax.f32 %v4063_v36, 0.0  ;;  %v1536_v51 = vmul.u32 58254, %v1531_v60 }
 0x2aa   : > { %vm12183_vm1 = vcmask 125952   ;;  %v1537_v17 = vshll.u32 %v1534_v38, 16  ;;  %v1538_v40 = vshrl.u32 %v1534_v38, 16  ;;  %v1539_v58 = vshll.u32 %v1535_v42, 16 }
 0x2ab   : > { %4496 = vst.msk [vmem:[#allocation3 + $0x34] sm:$0xf] %vm12183_vm1, %v4370_v22  ;;  %v4998_v46 = vrot.slane %v4996_v9, 1  ;;  %vm2262_vm2 = vcmp.ne.s32.totalorder %v1524_v7, 0  ;;  %vm2298_vm8 = vcmp.lt.s32.totalorder %v1524_v7, 0  ;;  %v2370_v53 = vadd.s32 18, %v1524_v7 }
 0x2ac   : > { %vm12184_vm3 = vcmask 1046528   ;;  %vm2334_vm5 = vmand %vm2298_vm8, %vm2262_vm2  ;;  %vm1541_vm4 = vc.u32 %v1533_v62, %v1537_v17  ;;  %v1543_v6 = vadd.s32 %v1537_v17, %v1533_v62  ;;  %v5001_v10 = vrot.slane %v4999_v8, 2 }
 0x2ad   : > { %v9595_v49 = vsel %vm12184_vm3, %v9469_v0, %v4867_v20  ;;  %v5003_v12 = vrot.slane %v4691_v4, 1  ;;  %v2406_v16 = vsel %vm2334_vm5, %v2370_v53, %v1524_v7  ;;  %v1542_v57 = vsel %vm1541_vm4, 1, %v12123_v24 }
 0x2ae   : > { %4956 = vrot.lane.b32.xlu1 %v9595_v49, %s7524_s19  ;;  %v5004_v33 = vrot.slane %v4687_v43, 2  ;;  %v9605_v47 = vadd.s32 96, %v8933_v50  ;;  %vm2442_vm1 = vcmp.ge.s32.totalorder %v2406_v16, 1  ;;  %vm2478_vm2 = vcmp.lt.s32.totalorder %v2406_v16, 17 }
 0x2af   : > { %v1544_v0 = vadd.s32 %v1542_v57, %v1536_v51  ;;  %vm1545_vm8 = vc.u32 %v1543_v6, %v1539_v58  ;;  %vm2514_vm3 = vmand %vm2442_vm1, %vm2478_vm2  ;;  %v5002_v21 = vor.u32 %v5001_v10, %v4998_v46  ;;  %v1540_v37 = vshrl.u32 %v1535_v42, 16  ;;  %v3399_v57 = vpop.permute.xlu2 %3398 }
 0x2b0   : > { %v1546_v19 = vsel %vm1545_vm8, 1, %v12123_v24  ;;  %v9608_v61 = vor.u32 %v5004_v33, %v5003_v12  ;;  %v1559_v3 = vand.u32 65535, %v9605_v47  ;;  %v4245_v11 = vsel %vm2514_vm3, %v4137_v18, 0.0 }
 0x2b1   : > { %v1548_v36 = vadd.s32 %v1546_v19, %v1544_v0  ;;  %v1560_v43 = vshrl.u32 %v9605_v47, 16  ;;  %v4281_v1 = vpack.c.bf16 %v4245_v11, %v4245_v11  ;;  %vm12185_vm5 = vsmask.f32 6400 }
 0x2b2   : > { %v5006_v54 = vsel %vm12185_vm5, %v5002_v21, %v9608_v61  ;;  %v1562_v48 = vmul.u32 14564, %v1559_v3  ;;  %v1563_v15 = vmul.u32 58254, %v1559_v3  ;;  %v9614_v28 = vld [vmem:[#allocation3 + $0x30] sm:$0xff]  ;;  %v4371_v60 = vrot.slane %v9580_v52, 4  ;;  %v4569_v21 = vld [vmem:[#allocation3 + $0x18] sm:$0xc] }
 0x2b3   : > { %v1549_v9 = vadd.s32 %v1548_v36, %v1538_v40  ;;  %v9618_v39 = vadd.f32 %v9564_v41, %v4064_v23  ;;  %5085 = vrot.lane.b32.xlu2 %v5006_v54, %s7525_s20  ;;  %v1564_v59 = vmul.u32 14564, %v1560_v43  ;;  %v9621_v8 = vrot.slane %v4281_v1, 6  ;;  %v3267_v40 = vpop.permute.xlu1 %3266 }
 0x2b4   : > { %v1565_v62 = vmul.u32 58254, %v1560_v43  ;;  %v1566_v38 = vshll.u32 %v1563_v15, 16  ;;  %v9624_v42 = vrot.slane %v9518_v31, 2  ;;  %v9627_v18 = vadd.f32 %v9564_v41, %v4067_v55  ;;  %v3478_v43 = vpop.permute.xlu0 %3477 }
 0x2b5   : > { %v1550_v22 = vadd.s32 %v1549_v9, %v1540_v37  ;;  %v1568_v7 = vshll.u32 %v1564_v59, 16  ;;  %v5395_v52 = vrot.slane %v9614_v28, 3  ;;  %v4373_v23 = vsel %vm7642_vm9, %v4371_v60, %v9621_v8 }
 0x2b6   : > { %v1567_v51 = vshrl.u32 %v1563_v15, 16  ;;  %vm1570_vm4 = vc.u32 %v1562_v48, %v1566_v38  ;;  %v1572_v17 = vadd.s32 %v1566_v38, %v1562_v48  ;;  %vm12186_vm1 = vcmask 125952  }
 0x2b7   : > { %4497 = vst.msk [vmem:[#allocation3 + $0x38] sm:$0xf] %vm12186_vm1, %v4373_v23  ;;  %v1551_v58 = vshrl.u32 %v1550_v22, 4  ;;  %v1571_v46 = vsel %vm1570_vm4, 1, %v12123_v24  ;;  %vm12187_vm2 = vcmask 1045504   ;;  %vm12188_vm8 = vcmask 1044480  }
 0x2b8   : > { %v5130_v53 = vsel %vm12187_vm2, %v5127_v13, %v9624_v42  ;;  %v9644_v6 = vsel %vm12188_vm8, %v5393_v32, %v5395_v52  ;;  %v1573_v10 = vadd.s32 %v1571_v46, %v1565_v62  ;;  %vm1574_vm3 = vc.u32 %v1572_v17, %v1568_v7 }
 0x2b9   : > { %5165 = vrot.lane.b32.xlu1 %v5130_v53, %s7528_s24  ;;  %v5748_v12 = vshrl.u32 %v9546_v63, 16  ;;  %v5752_v16 = vshll.u32 %v9644_v6, 16  ;;  %v1552_v33 = vmul.u32 18, %v1551_v58  ;;  %v1569_v0 = vshrl.u32 %v1564_v59, 16 }
 0x2ba   : > { %v1575_v13 = vsel %vm1574_vm3, 1, %v12123_v24  ;;  %v3713_v19 = vsel %vm3683_vm15, %v9553_v25, %v3267_v40  ;;  %v4138_v36 = vmax.f32 %v9618_v39, 0.0  ;;  %v4693_v1 = vor.u32 %v4691_v4, %v9516_v29  ;;  %v4069_v39 = vpop.f32.mrf.mxu0 }
 0x2bb   : > { %v1577_v3 = vadd.s32 %v1575_v13, %v1573_v10  ;;  %v5750_v32 = vor.u32 %v5748_v12, %v9567_v30  ;;  %v9653_v11 = vrot.slane %v5752_v16, 1  ;;  %v3752_v37 = vsel %vm3722_vm12, %v3713_v19, %v3399_v57  ;;  %v2869_v19 = vpop.permute.xlu1 %2868 }
 0x2bc   : > { %v1553_v63 = vsub.s32 %v9557_v45, %v1552_v33  ;;  %v9662_v54 = vshll.u32 %v9518_v31, 16  ;;  %vm12189_vm5 = vsmask.f32 7424  ;;  %v9667_v48 = vsel %vm12043_vm0, %v3752_v37, %v3478_v43 }
 0x2bd   : > { %v1578_v25 = vadd.s32 %v1577_v3, %v1567_v51  ;;  %v5755_v30 = vsel %vm12189_vm5, %v5750_v32, %v9653_v11  ;;  %v5205_v15 = vunpack.c.l.b16 %v4569_v21  ;;  %v4139_v4 = vmax.f32 %v9627_v18, 0.0  ;;  %vm12190_vm8 = vmmov %vm12189_vm5 }
 0x2be   : > { %vm2263_vm4 = vcmp.ne.s32.totalorder %v1553_v63, 0  ;;  %vm2299_vm1 = vcmp.lt.s32.totalorder %v1553_v63, 0  ;;  %v2371_v45 = vadd.s32 18, %v1553_v63  ;;  %7310 = vmatmul.msk.bf16.gmra.mxu2 %vm3527_vm13, %v5755_v30  ;;  %v4697_v55 = vrot.slane %v9662_v54, 1 }
 0x2bf   : > { %vm2335_vm2 = vmand %vm2299_vm1, %vm2263_vm4  ;;  %v1579_v29 = vadd.s32 %v1578_v25, %v1569_v0  ;;  %v5209_v60 = vpack.c.b16 %v7436_v14, %v5205_v15  ;;  %v9675_v9 = vadd.s32 104, %v8933_v50  ;;  %v4374_v59 = vrot.slane %v9621_v8, 4 }
 0x2c0   : > { %v2407_v62 = vsel %vm2335_vm2, %v2371_v45, %v1553_v63  ;;  %v4698_v38 = vsel %vm12190_vm8, %v4693_v1, %v4697_v55  ;;  %v9682_v22 = vshrl.u32 %v9518_v31, 16  ;;  %v3910_v34 = vshll.u32 %v9667_v48, 16  ;;  %v7486_v1 = vld [vmem:[#allocation2 + $0x80] sm:$0xff] }
 0x2c1   : > { %vm2443_vm3 = vcmp.ge.s32.totalorder %v2407_v62, 1  ;;  %vm2479_vm5 = vcmp.lt.s32.totalorder %v2407_v62, 17  ;;  %v1580_v7 = vshrl.u32 %v1579_v29, 4  ;;  %4825 = vrot.lane.b32.xlu0 %v4698_v38, %s7520_s15  ;;  %v5212_v14 = vrot.slane %v5209_v60, 2  ;;  %v2948_v60 = vpop.permute.xlu2 %2947 }
 0x2c2   : > { %vm2515_vm4 = vmand %vm2443_vm3, %vm2479_vm5  ;;  %v1588_v23 = vand.u32 65535, %v9675_v9  ;;  %v1589_v8 = vshrl.u32 %v9675_v9, 16  ;;  %v9689_v51 = vadd.f32 %v9564_v41, %v4069_v39  ;;  %v5007_v58 = vrot.slane %v9682_v22, 1  ;;  %v4072_v18 = vpop.f32.mrf.mxu0 }
 0x2c3   : > { %v4246_v17 = vsel %vm2515_vm4, %v4138_v36, 0.0  ;;  %v1581_v40 = vmul.u32 18, %v1580_v7  ;;  %v5008_v46 = vrot.slane %v9662_v54, 2  ;;  %vm12191_vm1 = vcmask 1045504  }
 0x2c4   : > { %v4282_v53 = vpack.c.bf16 %v4246_v17, %v4246_v17  ;;  %v5213_v10 = vsel %vm12191_vm1, %v5212_v14, %v9624_v42  ;;  %v1591_v12 = vmul.u32 14564, %v1588_v23  ;;  %v1592_v16 = vmul.u32 58254, %v1588_v23 }
 0x2c5   : > { %v1582_v57 = vsub.s32 %v9605_v47, %v1581_v40  ;;  %v3914_v33 = vshrl.u32 %v9667_v48, 16  ;;  %5218 = vrot.lane.b32.xlu2 %v5213_v10, %s7529_s17  ;;  %v1593_v0 = vmul.u32 14564, %v1589_v8  ;;  %v9698_v13 = vor.u32 %v5008_v46, %v5007_v58  ;;  %v3003_v46 = vpop.permute.xlu0 %3002 }
 0x2c6   : > { %v4375_v21 = vrot.slane %v4282_v53, 6  ;;  %v9700_v3 = vrot.slane %v3910_v34, 1  ;;  %v1594_v32 = vmul.u32 58254, %v1589_v8  ;;  %v1595_v37 = vshll.u32 %v1592_v16, 16 }
 0x2c7   : > { %vm2264_vm2 = vcmp.ne.s32.totalorder %v1582_v57, 0  ;;  %vm2300_vm8 = vcmp.lt.s32.totalorder %v1582_v57, 0  ;;  %v2372_v63 = vadd.s32 18, %v1582_v57  ;;  %v1597_v36 = vshll.u32 %v1593_v0, 16 }
 0x2c8   : > { %v4376_v47 = vsel %vm7642_vm9, %v4374_v59, %v4375_v21  ;;  %vm2336_vm3 = vmand %vm2300_vm8, %vm2264_vm2  ;;  %vm1599_vm5 = vc.u32 %v1591_v12, %v1595_v37  ;;  %v4140_v43 = vmax.f32 %v9689_v51, 0.0  ;;  %v3520_v25 = vsel %vm3487_vm6, %v7486_v1, %v2869_v19 }
 0x2c9   : > { %vm12192_vm4 = vcmask 125952   ;;  %v2408_v30 = vsel %vm2336_vm3, %v2372_v63, %v1582_v57  ;;  %v1600_v15 = vsel %vm1599_vm5, 1, %v12123_v24  ;;  %v1601_v45 = vadd.s32 %v1595_v37, %v1591_v12 }
 0x2ca   : > { %4498 = vst.msk [vmem:[#allocation3 + $0x3c] sm:$0xf] %vm12192_vm4, %v4376_v47  ;;  %vm12193_vm1 = vsmask.f32 6400  ;;  %vm2444_vm14 = vcmp.ge.s32.totalorder %v2408_v30, 1  ;;  %vm2480_vm0 = vcmp.lt.s32.totalorder %v2408_v30, 17  ;;  %v1602_v59 = vadd.s32 %v1600_v15, %v1594_v32  ;;  %vm12197_vm5 = vmmov %vm12192_vm4 }
 0x2cb   : > { %v5010_v29 = vsel %vm12193_vm1, %v9608_v61, %v9698_v13  ;;  %v1596_v39 = vshrl.u32 %v1592_v16, 16  ;;  %vm2516_vm2 = vmand %vm2444_vm14, %vm2480_vm0  ;;  %v1598_v62 = vshrl.u32 %v1593_v0, 16  ;;  %vm1603_vm8 = vc.u32 %v1601_v45, %v1597_v36 }
 0x2cc   : > { %5087 = vrot.lane.b32.xlu1 %v5010_v29, %s7525_s20  ;;  %v3559_v38 = vsel %vm3527_vm13, %v3520_v25, %v2948_v60  ;;  %v9714_v7 = vshll.u32 %v9520_v27, 16  ;;  %v4247_v34 = vsel %vm2516_vm2, %v4139_v4, 0.0  ;;  %v1604_v61 = vsel %vm1603_vm8, 1, %v12123_v24 }
 0x2cd   : > { %vm12194_vm3 = vsmask.f32 7424  ;;  %v9723_v23 = vadd.s32 112, %v8933_v50  ;;  %v4283_v8 = vpack.c.bf16 %v4247_v34, %v4247_v34  ;;  %v1606_v17 = vadd.s32 %v1604_v61, %v1602_v59  ;;  %4903 = vrot.lane.b32.xlu2 %v9595_v49, %s7526_s21 }
 0x2ce   : > { %v3913_v14 = vsel %vm12194_vm3, %v9316_v2, %v9700_v3  ;;  %v4701_v40 = vor.u32 %v9682_v22, %v4697_v55  ;;  %v4705_v58 = vrot.slane %v9714_v7, 1  ;;  %v4377_v4 = vrot.slane %v4375_v21, 4  ;;  %vm12195_vm0 = vmmov %vm12194_vm3 }
 0x2cf   : > { %7200 = vmatmul.msk.bf16.gmra.mxu0 %vm3969_vm10, %v3913_v14  ;;  %v1617_v2 = vand.u32 65535, %v9723_v23  ;;  %v1618_v53 = vshrl.u32 %v9723_v23, 16  ;;  %v5131_v10 = vrot.slane %v9520_v27, 2  ;;  %v9735_v12 = vrot.slane %v4283_v8, 6  ;;  %v3135_v8 = vpop.permute.xlu1 %3134 }
 0x2d0   : > { %v1607_v16 = vadd.s32 %v1606_v17, %v1596_v39  ;;  %v3598_v55 = vsel %vm3566_vm11, %v3559_v38, %v3003_v46  ;;  %v4706_v57 = vsel %vm12195_vm0, %v4701_v40, %v4705_v58  ;;  %v9743_v21 = vadd.f32 %v9564_v41, %v4072_v18 }
 0x2d1   : > { %4827 = vrot.lane.b32.xlu0 %v4706_v57, %s7520_s15  ;;  %v1620_v49 = vmul.u32 14564, %v1617_v2  ;;  %v1621_v0 = vmul.u32 58254, %v1617_v2  ;;  %v1622_v19 = vmul.u32 14564, %v1618_v53  ;;  %v9745_v32 = vld [vmem:[#allocation3 + $0x38] sm:$0xff]  ;;  %v4379_v37 = vsel %vm7642_vm9, %v4377_v4, %v9735_v12  ;;  %v3214_v57 = vpop.permute.xlu2 %3213 }
 0x2d2   : > { %v1608_v63 = vadd.s32 %v1607_v16, %v1598_v62  ;;  %vm12196_vm14 = vcmask 1045504   ;;  %v9757_v47 = vshrl.u32 %v9520_v27, 16  ;;  %4499 = vst.msk [vmem:[#allocation3 + $0x40] sm:$0xf] %vm12197_vm5, %v4379_v37  ;;  %v1623_v1 = vmul.u32 58254, %v1618_v53 }
 0x2d3   : > { %v9754_v36 = vsel %vm12196_vm14, %v9624_v42, %v5131_v10  ;;  %v1624_v25 = vshll.u32 %v1621_v0, 16  ;;  %v1625_v30 = vshrl.u32 %v1621_v0, 16  ;;  %v1626_v15 = vshll.u32 %v1622_v19, 16 }
 0x2d4   : > { %5220 = vrot.lane.b32.xlu1 %v9754_v36, %s7529_s17  ;;  %v1609_v45 = vshrl.u32 %v1608_v63, 4  ;;  %v1627_v29 = vshrl.u32 %v1622_v19, 16  ;;  %v5397_v60 = vrot.slane %v9745_v32, 3  ;;  %v5763_v39 = vshrl.u32 %v9644_v6, 16 }
 0x2d5   : > { %vm1628_vm4 = vc.u32 %v1620_v49, %v1624_v25  ;;  %v1630_v42 = vadd.s32 %v1624_v25, %v1620_v49  ;;  %v5267_v59 = vrot.slane %v9682_v22, 2  ;;  %v5268_v62 = vrot.slane %v9662_v54, 3 }
 0x2d6   : > { %v1610_v38 = vmul.u32 18, %v1609_v45  ;;  %v1629_v34 = vsel %vm1628_vm4, 1, %v12123_v24  ;;  %vm12198_vm1 = vcmask 1044480   ;;  %v5765_v14 = vor.u32 %v5763_v39, %v9653_v11 }
 0x2d7   : > { %v9772_v61 = vsel %vm12198_vm1, %v5395_v52, %v5397_v60  ;;  %v1631_v6 = vadd.s32 %v1629_v34, %v1623_v1  ;;  %vm1632_vm2 = vc.u32 %v1630_v42, %v1626_v15  ;;  %v5269_v22 = vor.u32 %v5268_v62, %v5267_v59  ;;  %v3269_v34 = vpop.permute.xlu0 %3268 }
 0x2d8   : > { %v5767_v17 = vshll.u32 %v9772_v61, 16  ;;  %v1611_v54 = vsub.s32 %v9675_v9, %v1610_v38  ;;  %v1633_v40 = vsel %vm1632_vm2, 1, %v12123_v24  ;;  %v5271_v18 = vrot.slane %v9757_v47, 2 }
 0x2d9   : > { %v5272_v4 = vrot.slane %v9714_v7, 3  ;;  %v1635_v46 = vadd.s32 %v1633_v40, %v1631_v6  ;;  %v5260_v52 = vshrl.u32 %v9524_v56, 16  ;;  %v5263_v11 = vshll.u32 %v9524_v56, 16 }
 0x2da   : > { %v9780_v2 = vrot.slane %v5767_v17, 1  ;;  %vm2265_vm8 = vcmp.ne.s32.totalorder %v1611_v54, 0  ;;  %vm2301_vm3 = vcmp.lt.s32.totalorder %v1611_v54, 0  ;;  %v2373_v53 = vadd.s32 18, %v1611_v54  ;;  %v3401_v17 = vpop.permute.xlu1 %3400 }
 0x2db   : > { %v9784_v16 = vor.u32 %v5272_v4, %v5271_v18  ;;  %vm2337_vm0 = vmand %vm2301_vm3, %vm2265_vm8  ;;  %v1636_v9 = vadd.s32 %v1635_v46, %v1625_v30  ;;  %vm12199_vm14 = vsmask.f32 7424  ;;  %v5262_v0 = vrot.slane %v5260_v52, 2 }
 0x2dc   : > { %v5770_v49 = vsel %vm12199_vm14, %v5765_v14, %v9780_v2  ;;  %v5265_v19 = vrot.slane %v5263_v11, 3  ;;  %v2409_v37 = vsel %vm2337_vm0, %v2373_v53, %v1611_v54  ;;  %v3637_v63 = vsel %vm3605_vm7, %v3598_v55, %v3135_v8 }
 0x2dd   : > { %7311 = vmatmul.msk.bf16.gmra.mxu2 %vm3527_vm13, %v5770_v49  ;;  %vm12200_vm5 = vsmask.f32 5376  ;;  %v9793_v1 = vadd.s32 120, %v8933_v50  ;;  %vm2445_vm4 = vcmp.ge.s32.totalorder %v2409_v37, 1  ;;  %vm2481_vm1 = vcmp.lt.s32.totalorder %v2409_v37, 17 }
 0x2de   : > { %v5274_v56 = vsel %vm12200_vm5, %v5269_v22, %v9784_v16  ;;  %v1637_v25 = vadd.s32 %v1636_v9, %v1627_v29  ;;  %v5266_v30 = vor.u32 %v5265_v19, %v5262_v0  ;;  %vm2517_vm2 = vmand %vm2445_vm4, %vm2481_vm1  ;;  %v4141_v15 = vmax.f32 %v9743_v21, 0.0  ;;  %v4074_v29 = vpop.f32.mrf.mxu0  ;;  %v3480_v9 = vpop.permute.xlu2 %3479 }
 0x2df   : > { %5351 = vrot.lane.b32.xlu0 %v5274_v56, %s7530_s25  ;;  %v1646_v45 = vand.u32 65535, %v9793_v1  ;;  %v1647_v55 = vshrl.u32 %v9793_v1, 16  ;;  %v4869_v39 = vrot.slane %v9520_v27, 1  ;;  %v4248_v42 = vsel %vm2517_vm2, %v4140_v43, 0.0  ;;  %vm12201_vm8 = vmmov %vm12200_vm5 }
 0x2e0   : > { %v1638_v59 = vshrl.u32 %v1637_v25, 4  ;;  %v5270_v62 = vsel %vm12201_vm8, %v5266_v30, %v5269_v22  ;;  %vm12202_vm3 = vcmask 326656   ;;  %v4284_v14 = vpack.c.bf16 %v4248_v42, %v4248_v42 }
 0x2e1   : > { %v3676_v38 = vsel %vm12202_vm3, %v3637_v63, %v3214_v57  ;;  %5349 = vrot.lane.b32.xlu2 %v5270_v62, %s7530_s25  ;;  %v1649_v21 = vmul.u32 14564, %v1646_v45  ;;  %v1650_v8 = vmul.u32 58254, %v1646_v45  ;;  %v1651_v6 = vmul.u32 14564, %v1647_v55 }
 0x2e2   : > { %v4380_v54 = vrot.slane %v9735_v12, 4  ;;  %v1639_v40 = vmul.u32 18, %v1638_v59  ;;  %v1652_v18 = vmul.u32 58254, %v1647_v55  ;;  %vm12203_vm0 = vcmask 1046528  }
 0x2e3   : > { %v4870_v51 = vsel %vm12203_vm0, %v4867_v20, %v4869_v39  ;;  %v9811_v43 = vrot.slane %v4284_v14, 6  ;;  %v1653_v22 = vshll.u32 %v1650_v8, 16  ;;  %v1655_v4 = vshll.u32 %v1651_v6, 16 }
 0x2e4   : > { %v3715_v46 = vsel %vm3683_vm15, %v3676_v38, %v3269_v34  ;;  %4958 = vrot.lane.b32.xlu1 %v4870_v51, %s7524_s19  ;;  %v1640_v52 = vsub.s32 %v9723_v23, %v1639_v40  ;;  %v1654_v11 = vshrl.u32 %v1650_v8, 16  ;;  %v9817_v12 = vadd.f32 %v9564_v41, %v4074_v29 }
 0x2e5   : > { %v3754_v53 = vsel %vm3722_vm12, %v3715_v46, %v3401_v17  ;;  %v4382_v31 = vsel %vm7642_vm9, %v4380_v54, %v9811_v43  ;;  %vm1657_vm14 = vc.u32 %v1649_v21, %v1653_v22  ;;  %v1659_v20 = vadd.s32 %v1653_v22, %v1649_v21 }
 0x2e6   : > { %v5011_v57 = vrot.slane %v9757_v47, 1  ;;  %vm12204_vm5 = vcmask 125952   ;;  %vm2266_vm4 = vcmp.ne.s32.totalorder %v1640_v52, 0  ;;  %vm2302_vm1 = vcmp.lt.s32.totalorder %v1640_v52, 0  ;;  %v4077_v38 = vpop.f32.mrf.mxu0 }
 0x2e7   : > { %4500 = vst.msk [vmem:[#allocation3 + $0x44] sm:$0xf] %vm12204_vm5, %v4382_v31  ;;  %v2374_v23 = vadd.s32 18, %v1640_v52  ;;  %v1658_v49 = vsel %vm1657_vm14, 1, %v12123_v24  ;;  %vm2338_vm2 = vmand %vm2302_vm1, %vm2266_vm4  ;;  %vm1661_vm8 = vc.u32 %v1659_v20, %v1655_v4  ;;  %vm12205_vm3 = vcmask 523264   ;;  %v3005_v31 = vpop.permute.xlu2 %3004 }
 0x2e8   : > { %v1660_v0 = vadd.s32 %v1658_v49, %v1652_v18  ;;  %v9827_v19 = vsel %vm12205_vm3, %v3754_v53, %v3480_v9  ;;  %v5012_v37 = vrot.slane %v9714_v7, 2  ;;  %v1656_v56 = vshrl.u32 %v1651_v6, 16  ;;  %v7487_v9 = vld [vmem:[#allocation2 + $0x88] sm:$0xff] }
 0x2e9   : > { %v2410_v63 = vsel %vm2338_vm2, %v2374_v23, %v1640_v52  ;;  %v1662_v25 = vsel %vm1661_vm8, 1, %v12123_v24  ;;  %v3917_v30 = vshll.u32 %v9827_v19, 16  ;;  %5167 = vrot.lane.b32.xlu2 %v9754_v36, %s7528_s24  ;;  %v3916_v42 = vor.u32 %v3914_v33, %v9700_v3 }
 0x2ea   : > { %vm2446_vm0 = vcmp.ge.s32.totalorder %v2410_v63, 1  ;;  %vm2482_vm5 = vcmp.lt.s32.totalorder %v2410_v63, 17  ;;  %v1664_v45 = vadd.s32 %v1662_v25, %v1660_v0  ;;  %v9832_v55 = vor.u32 %v5012_v37, %v5011_v57 }
 0x2eb   : > { %vm2518_vm14 = vmand %vm2446_vm0, %vm2482_vm5  ;;  %v4142_v59 = vmax.f32 %v9817_v12, 0.0  ;;  %v9840_v62 = vrot.slane %v3917_v30, 1  ;;  %v9843_v29 = vadd.s32 128, %v8933_v50  ;;  %v4383_v34 = vrot.slane %v9811_v43, 4 }
 0x2ec   : > { %v4249_v14 = vsel %vm2518_vm14, %v4141_v15, 0.0  ;;  %v1665_v21 = vadd.s32 %v1664_v45, %v1654_v11  ;;  %vm12206_vm4 = vsmask.f32 6400  ;;  %4905 = vrot.lane.b32.xlu1 %v4870_v51, %s7526_s21  ;;  %v3921_v33 = vshrl.u32 %v9827_v19, 16  ;;  %v2871_v15 = vpop.permute.xlu0 %2870 }
 0x2ed   : > { %v5014_v36 = vsel %vm12206_vm4, %v9698_v13, %v9832_v55  ;;  %v4285_v48 = vpack.c.bf16 %v4249_v14, %v4249_v14  ;;  %v1675_v3 = vand.u32 65535, %v9843_v29  ;;  %v1676_v8 = vshrl.u32 %v9843_v29, 16 }
 0x2ee   : > { %5089 = vrot.lane.b32.xlu0 %v5014_v36, %s7525_s20  ;;  %v1666_v6 = vadd.s32 %v1665_v21, %v1656_v56  ;;  %v9855_v17 = vadd.f32 %v9564_v41, %v4077_v38  ;;  %v9857_v54 = vld [vmem:[#allocation3 + $0x40] sm:$0xff]  ;;  %vm12207_vm1 = vsmask.f32 7424  ;;  %v9862_v40 = vshll.u32 %v9614_v28, 16  ;;  %v2950_v38 = vpop.permute.xlu1 %2949 }
 0x2ef   : > { %v3920_v13 = vsel %vm12207_vm1, %v3916_v42, %v9840_v62  ;;  %v9864_v18 = vrot.slane %v4285_v48, 6  ;;  %v1678_v51 = vmul.u32 14564, %v1675_v3  ;;  %v1679_v43 = vmul.u32 58254, %v1675_v3 }
 0x2f0   : > { %v1680_v22 = vmul.u32 14564, %v1676_v8  ;;  %7201 = vmatmul.msk.bf16.gmra.mxu0 %vm3969_vm10, %v3920_v13  ;;  %v1667_v4 = vshrl.u32 %v1666_v6, 4  ;;  %v5399_v46 = vrot.slane %v9857_v54, 3  ;;  %v5778_v52 = vshrl.u32 %v9772_v61, 16 }
 0x2f1   : > { %v9870_v11 = vshrl.u32 %v9614_v28, 16  ;;  %v4385_v53 = vsel %vm7642_vm9, %v4383_v34, %v9864_v18  ;;  %v1681_v20 = vmul.u32 58254, %v1676_v8  ;;  %v1682_v57 = vshll.u32 %v1679_v43, 16  ;;  %3485 = vrot.lane.b32.xlu2 %v3447_v5, %s7525_s20 }
 0x2f2   : > { %v3522_v23 = vsel %vm3487_vm6, %v7487_v9, %v2871_v15  ;;  %vm12208_vm2 = vcmask 125952   ;;  %v1668_v49 = vmul.u32 18, %v1667_v4  ;;  %v1683_v0 = vshrl.u32 %v1679_v43, 16  ;;  %v4079_v43 = vpop.f32.mrf.mxu0 }
 0x2f3   : > { %4501 = vst.msk [vmem:[#allocation3 + $0x48] sm:$0xf] %vm12208_vm2, %v4385_v53  ;;  %v1684_v37 = vshll.u32 %v1680_v22, 16  ;;  %vm12209_vm8 = vcmask 1044480   ;;  %v1685_v63 = vshrl.u32 %v1680_v22, 16  ;;  %vm1686_vm3 = vc.u32 %v1678_v51, %v1682_v57 }
 0x2f4   : > { %v9882_v61 = vsel %vm12209_vm8, %v5397_v60, %v5399_v46  ;;  %v1688_v56 = vadd.s32 %v1682_v57, %v1678_v51  ;;  %v1669_v30 = vsub.s32 %v9793_v1, %v1668_v49  ;;  %v1687_v45 = vsel %vm1686_vm3, 1, %v12123_v24 }
 0x2f5   : > { %v5782_v25 = vshll.u32 %v9882_v61, 16  ;;  %v5780_v42 = vor.u32 %v5778_v52, %v9780_v2  ;;  %v5275_v34 = vrot.slane %v9870_v11, 2  ;;  %v1689_v60 = vadd.s32 %v1687_v45, %v1681_v20 }
 0x2f6   : > { %vm1690_vm0 = vc.u32 %v1688_v56, %v1684_v37  ;;  %v5276_v44 = vrot.slane %v9862_v40, 3  ;;  %vm2267_vm5 = vcmp.ne.s32.totalorder %v1669_v30, 0  ;;  %vm2303_vm14 = vcmp.lt.s32.totalorder %v1669_v30, 0 }
 0x2f7   : > { %v9892_v14 = vrot.slane %v5782_v25, 1  ;;  %v2375_v5 = vadd.s32 18, %v1669_v30  ;;  %v1691_v21 = vsel %vm1690_vm0, 1, %v12123_v24  ;;  %vm2339_vm4 = vmand %vm2303_vm14, %vm2267_vm5  ;;  %v9901_v48 = vadd.s32 136, %v8933_v50  ;;  %v3137_v25 = vpop.permute.xlu0 %3136 }
 0x2f8   : > { %v1693_v1 = vadd.s32 %v1691_v21, %v1689_v60  ;;  %v9898_v2 = vor.u32 %v5276_v44, %v5275_v34  ;;  %v3561_v8 = vsel %vm3527_vm13, %v3522_v23, %v2950_v38  ;;  %v5133_v6 = vrot.slane %v9614_v28, 2  ;;  %v3216_v38 = vpop.permute.xlu1 %3215 }
 0x2f9   : > { %v5785_v36 = vsel %vm12207_vm1, %v5780_v42, %v9892_v14  ;;  %v2411_v3 = vsel %vm2339_vm4, %v2375_v5, %v1669_v30  ;;  %v5015_v15 = vrot.slane %v9870_v11, 1  ;;  %vm12210_vm3 = vsmask.f32 5376 }
 0x2fa   : > { %7312 = vmatmul.msk.bf16.gmra.mxu2 %vm3527_vm13, %v5785_v36  ;;  %vm2447_vm2 = vcmp.ge.s32.totalorder %v2411_v3, 1  ;;  %vm2483_vm8 = vcmp.lt.s32.totalorder %v2411_v3, 17  ;;  %v1694_v13 = vadd.s32 %v1693_v1, %v1683_v0  ;;  %v5278_v51 = vsel %vm12210_vm3, %v9784_v16, %v9898_v2  ;;  %v9921_v16 = vpop.permute.xlu2 %3270 }
 0x2fb   : > { %vm2519_vm0 = vmand %vm2447_vm2, %vm2483_vm8  ;;  %v4143_v22 = vmax.f32 %v9855_v17, 0.0  ;;  %5353 = vrot.lane.b32.xlu0 %v5278_v51, %s7530_s25  ;;  %v1704_v4 = vand.u32 65535, %v9901_v48  ;;  %v1705_v52 = vshrl.u32 %v9901_v48, 16  ;;  %vm12211_vm5 = vcmask 1045504  }
 0x2fc   : > { %v5134_v53 = vsel %vm12211_vm5, %v5131_v10, %v5133_v6  ;;  %v4250_v20 = vsel %vm2519_vm0, %v4142_v59, 0.0  ;;  %v1695_v57 = vadd.s32 %v1694_v13, %v1685_v63  ;;  %v3600_v9 = vsel %vm3566_vm11, %v3561_v8, %v3005_v31 }
 0x2fd   : > { %5222 = vrot.lane.b32.xlu1 %v5134_v53, %s7529_s17  ;;  %v5016_v23 = vrot.slane %v9862_v40, 2  ;;  %v4286_v49 = vpack.c.bf16 %v4250_v20, %v4250_v20  ;;  %v1707_v0 = vmul.u32 14564, %v1704_v4  ;;  %v1708_v37 = vmul.u32 58254, %v1704_v4  ;;  %v4082_v4 = vpop.f32.mrf.mxu0 }
 0x2fe   : > { %v1709_v56 = vmul.u32 14564, %v1705_v52  ;;  %v4386_v30 = vrot.slane %v9864_v18, 4  ;;  %v1696_v10 = vshrl.u32 %v1695_v57, 4  ;;  %v9928_v12 = vadd.f32 %v9564_v41, %v4079_v43 }
 0x2ff   : > { %v9930_v59 = vor.u32 %v5016_v23, %v5015_v15  ;;  %v9932_v63 = vrot.slane %v4286_v49, 6  ;;  %v1710_v31 = vmul.u32 58254, %v1705_v52  ;;  %v1711_v45 = vshll.u32 %v1708_v37, 16 }
 0x300   : > { %v1713_v42 = vshll.u32 %v1709_v56, 16  ;;  %v1697_v34 = vmul.u32 18, %v1696_v10  ;;  %v1712_v60 = vshrl.u32 %v1708_v37, 16  ;;  %v1714_v44 = vshrl.u32 %v1709_v56, 16  ;;  %v3403_v56 = vpop.permute.xlu0 %3402 }
 0x301   : > { %v3639_v5 = vsel %vm3605_vm7, %v3600_v9, %v3137_v25  ;;  %v4388_v18 = vsel %vm7642_vm9, %v4386_v30, %v9932_v63  ;;  %vm1715_vm14 = vc.u32 %v1707_v0, %v1711_v45  ;;  %v1717_v21 = vadd.s32 %v1711_v45, %v1707_v0  ;;  %v3482_v45 = vpop.permute.xlu1 %3481 }
 0x302   : > { %vm12212_vm4 = vsmask.f32 6400  ;;  %vm12213_vm1 = vcmask 125952   ;;  %v1698_v36 = vsub.s32 %v9843_v29, %v1697_v34  ;;  %v1716_v3 = vsel %vm1715_vm14, 1, %v12123_v24  ;;  %v9964_v37 = vpop.permute.xlu2 %3272 }
 0x303   : > { %v5018_v1 = vsel %vm12212_vm4, %v9832_v55, %v9930_v59  ;;  %4502 = vst.msk [vmem:[#allocation3 + $0x4c] sm:$0xf] %vm12213_vm1, %v4388_v18  ;;  %v4871_v8 = vrot.slane %v9614_v28, 1  ;;  %v9946_v15 = vadd.s32 144, %v8933_v50  ;;  %v1718_v13 = vadd.s32 %v1716_v3, %v1710_v31 }
 0x304   : > { %vm1719_vm2 = vc.u32 %v1717_v21, %v1713_v42  ;;  %vm12214_vm8 = vcmask 326656   ;;  %5091 = vrot.lane.b32.xlu0 %v5018_v1, %s7525_s20  ;;  %v4873_v43 = vrot.slane %v9745_v32, 1  ;;  %vm2268_vm3 = vcmp.ne.s32.totalorder %v1698_v36, 0 }
 0x305   : > { %v3678_v51 = vsel %vm12214_vm8, %v3639_v5, %v3216_v38  ;;  %vm2304_vm0 = vcmp.lt.s32.totalorder %v1698_v36, 0  ;;  %v2376_v55 = vadd.s32 18, %v1698_v36  ;;  %v1720_v29 = vsel %vm1719_vm2, 1, %v12123_v24  ;;  %5169 = vrot.lane.b32.xlu1 %v5134_v53, %s7528_s24 }
 0x306   : > { %vm2340_vm5 = vmand %vm2304_vm0, %vm2268_vm3  ;;  %v1722_v52 = vadd.s32 %v1720_v29, %v1718_v13  ;;  %vm12215_vm14 = vcmask 1046528   ;;  %v1733_v57 = vand.u32 65535, %v9946_v15  ;;  %v1734_v9 = vshrl.u32 %v9946_v15, 16 }
 0x307   : > { %v4872_v20 = vsel %vm12215_vm14, %v4869_v39, %v4871_v8  ;;  %v4389_v23 = vrot.slane %v9932_v63, 4  ;;  %v9962_v49 = vor.u32 %v3921_v33, %v9840_v62  ;;  %v2412_v0 = vsel %vm2340_vm5, %v2376_v55, %v1698_v36  ;;  %vm12216_vm8 = vmmov %vm12215_vm14 }
 0x308   : > { %v4144_v53 = vmax.f32 %v9928_v12, 0.0  ;;  %4960 = vrot.lane.b32.xlu2 %v4872_v20, %s7524_s19  ;;  %vm2448_vm4 = vcmp.ge.s32.totalorder %v2412_v0, 1  ;;  %vm2484_vm1 = vcmp.lt.s32.totalorder %v2412_v0, 17  ;;  %v1723_v27 = vadd.s32 %v1722_v52, %v1712_v60 }
 0x309   : > { %v9969_v39 = vadd.f32 %v9564_v41, %v4082_v4  ;;  %vm2520_vm2 = vmand %vm2448_vm4, %vm2484_vm1  ;;  %v1736_v25 = vmul.u32 14564, %v1733_v57  ;;  %v1737_v30 = vmul.u32 58254, %v1733_v57  ;;  %v1738_v19 = vmul.u32 14564, %v1734_v9 }
 0x30a   : > { %v3717_v62 = vsel %vm3683_vm15, %v3678_v51, %v9921_v16  ;;  %v4251_v33 = vsel %vm2520_vm2, %v4143_v22, 0.0  ;;  %v1724_v10 = vadd.s32 %v1723_v27, %v1714_v44  ;;  %v1739_v63 = vmul.u32 58254, %v1734_v9  ;;  %v9975_v31 = vld [vmem:[#allocation3 + $0x48] sm:$0xff]  ;;  %v10006_v52 = vpop.permute.xlu2 %3483 }
 0x30b   : > { %v9980_v41 = vsel %vm12216_vm8, %v4871_v8, %v4873_v43  ;;  %v4287_v42 = vpack.c.bf16 %v4251_v33, %v4251_v33  ;;  %v1740_v38 = vshll.u32 %v1737_v30, 16  ;;  %v1742_v34 = vshll.u32 %v1738_v19, 16 }
 0x30c   : > { %v3756_v60 = vsel %vm3722_vm12, %v3717_v62, %v3403_v56  ;;  %v1725_v5 = vshrl.u32 %v1724_v10, 4  ;;  %v1741_v16 = vshrl.u32 %v1737_v30, 16  ;;  %v5401_v17 = vrot.slane %v9975_v31, 3  ;;  %4962 = vrot.lane.b32.xlu0 %v9980_v41, %s7524_s19 }
 0x30d   : > { %v5793_v22 = vshrl.u32 %v9882_v61, 16  ;;  %v9987_v44 = vrot.slane %v4287_v42, 6  ;;  %vm1744_vm3 = vc.u32 %v1736_v25, %v1740_v38  ;;  %v1746_v18 = vadd.s32 %v1740_v38, %v1736_v25 }
 0x30e   : > { %vm12217_vm0 = vcmask 523264   ;;  %v1726_v1 = vmul.u32 18, %v1725_v5  ;;  %v1745_v36 = vsel %vm1744_vm3, 1, %v12123_v24  ;;  %vm12218_vm5 = vcmask 1044480  }
 0x30f   : > { %v3795_v21 = vsel %vm12217_vm0, %v3756_v60, %v3482_v45  ;;  %v9996_v3 = vsel %vm12218_vm5, %v5399_v46, %v5401_v17  ;;  %v4391_v8 = vsel %vm7642_vm9, %v4389_v23, %v9987_v44  ;;  %v1743_v13 = vshrl.u32 %v1738_v19, 16 }
 0x310   : > { %v3924_v61 = vshll.u32 %v3795_v21, 16  ;;  %v1747_v51 = vadd.s32 %v1745_v36, %v1739_v63  ;;  %vm1748_vm14 = vc.u32 %v1746_v18, %v1742_v34  ;;  %4907 = vrot.lane.b32.xlu2 %v4872_v20, %s7526_s21  ;;  %vm12219_vm4 = vcmask 125952  }
 0x311   : > { %4503 = vst.msk [vmem:[#allocation3 + $0x50] sm:$0xf] %vm12219_vm4, %v4391_v8  ;;  %v1727_v55 = vsub.s32 %v9901_v48, %v1726_v1  ;;  %v1749_v29 = vsel %vm1748_vm14, 1, %v12123_v24  ;;  %v5797_v4 = vshll.u32 %v9996_v3, 16  ;;  %v5795_v9 = vor.u32 %v5793_v22, %v9892_v14 }
 0x312   : > { %v3926_v46 = vrot.slane %v3924_v61, 1  ;;  %v1751_v57 = vadd.s32 %v1749_v29, %v1747_v51  ;;  %v3928_v23 = vshrl.u32 %v3795_v21, 16  ;;  %v10010_v0 = vadd.s32 152, %v8933_v50  ;;  %v10046_v8 = vpop.permute.xlu2 %3008 }
 0x313   : > { %vm2269_vm1 = vcmp.ne.s32.totalorder %v1727_v55, 0  ;;  %vm2305_vm2 = vcmp.lt.s32.totalorder %v1727_v55, 0  ;;  %v2377_v20 = vadd.s32 18, %v1727_v55  ;;  %v10012_v27 = vrot.slane %v5797_v4, 1 }
 0x314   : > { %vm2341_vm8 = vmand %vm2305_vm2, %vm2269_vm1  ;;  %v1752_v48 = vadd.s32 %v1751_v57, %v1741_v16  ;;  %v10014_v56 = vor.u32 %v3928_v23, %v3926_v46  ;;  %v1762_v25 = vand.u32 65535, %v10010_v0  ;;  %v1763_v30 = vshrl.u32 %v10010_v0, 16  ;;  %v4084_v57 = vpop.f32.mrf.mxu0 }
 0x315   : > { %v2413_v19 = vsel %vm2341_vm8, %v2377_v20, %v1727_v55  ;;  %v4145_v14 = vmax.f32 %v9969_v39, 0.0  ;;  %vm12220_vm3 = vsmask.f32 7424  ;;  %v4713_v33 = vrot.slane %v9862_v40, 1 }
 0x316   : > { %v5800_v62 = vsel %vm12220_vm3, %v5795_v9, %v10012_v27  ;;  %vm2449_vm0 = vcmp.ge.s32.totalorder %v2413_v19, 1  ;;  %vm2485_vm5 = vcmp.lt.s32.totalorder %v2413_v19, 17  ;;  %v1753_v10 = vadd.s32 %v1752_v48, %v1743_v13  ;;  %vm12221_vm4 = vmmov %vm12220_vm3  ;;  %v10069_v19 = vld [vmem:[%s12007_s3] ss:$0 sm:$0xff] }
 0x317   : > { %7313 = vmatmul.msk.bf16.gmra.mxu2 %vm3527_vm13, %v5800_v62  ;;  %v4709_v63 = vor.u32 %v9757_v47, %v4705_v58  ;;  %v4392_v45 = vrot.slane %v9987_v44, 4  ;;  %vm2521_vm14 = vmand %vm2449_vm0, %vm2485_vm5  ;;  %v1765_v42 = vmul.u32 14564, %v1762_v25  ;;  %v1766_v38 = vmul.u32 58254, %v1762_v25 }
 0x318   : > { %v1767_v34 = vmul.u32 14564, %v1763_v30  ;;  %v4252_v60 = vsel %vm2521_vm14, %v4144_v53, 0.0  ;;  %v1754_v5 = vshrl.u32 %v1753_v10, 4  ;;  %vm12222_vm1 = vmmov %vm12220_vm3  ;;  %v1768_v18 = vmul.u32 58254, %v1763_v30 }
 0x319   : > { %v4714_v16 = vsel %vm12221_vm4, %v4709_v63, %v4713_v33  ;;  %v3927_v22 = vsel %vm12222_vm1, %v9962_v49, %v3926_v46  ;;  %v4288_v7 = vpack.c.bf16 %v4252_v60, %v4252_v60  ;;  %v1769_v58 = vshll.u32 %v1766_v38, 16 }
 0x31a   : > { %v1771_v47 = vshll.u32 %v1767_v34, 16  ;;  %4829 = vrot.lane.b32.xlu1 %v4714_v16, %s7520_s15  ;;  %7202 = vmatmul.msk.bf16.gmra.mxu0 %vm3969_vm10, %v3927_v22  ;;  %v1755_v44 = vmul.u32 18, %v1754_v5  ;;  %v1770_v21 = vshrl.u32 %v1766_v38, 16  ;;  %v10037_v12 = vshll.u32 %v9745_v32, 16  ;;  %v10096_v39 = vpop.permute.xlu2 %3274 }
 0x31b   : > { %v10040_v53 = vshrl.u32 %v9745_v32, 16  ;;  %v10042_v1 = vrot.slane %v4288_v7, 6  ;;  %vm1773_vm2 = vc.u32 %v1765_v42, %v1769_v58  ;;  %v1775_v49 = vadd.s32 %v1769_v58, %v1765_v42 }
 0x31c   : > { %v5135_v36 = vrot.slane %v9745_v32, 2  ;;  %v1756_v61 = vsub.s32 %v9946_v15, %v1755_v44  ;;  %v1774_v13 = vsel %vm1773_vm2, 1, %v12123_v24  ;;  %v5280_v55 = vrot.slane %v10037_v12, 3 }
 0x31d   : > { %v5279_v51 = vrot.slane %v10040_v53, 2  ;;  %v4394_v29 = vsel %vm7642_vm9, %v4392_v45, %v10042_v1  ;;  %v1772_v4 = vshrl.u32 %v1767_v34, 16  ;;  %v1776_v46 = vadd.s32 %v1774_v13, %v1768_v18  ;;  %v10080_v45 = vpop.permute.xlu0 %2872 }
 0x31e   : > { %vm1777_vm8 = vc.u32 %v1775_v49, %v1771_v47  ;;  %vm12223_vm3 = vcmask 125952   ;;  %vm2270_vm0 = vcmp.ne.s32.totalorder %v1756_v61, 0  ;;  %vm2306_vm5 = vcmp.lt.s32.totalorder %v1756_v61, 0 }
 0x31f   : > { %4504 = vst.msk [vmem:[#allocation3 + $0x54] sm:$0xf] %vm12223_vm3, %v4394_v29  ;;  %v2378_v15 = vadd.s32 18, %v1756_v61  ;;  %v1778_v9 = vsel %vm1777_vm8, 1, %v12123_v24  ;;  %vm2342_vm14 = vmand %vm2306_vm5, %vm2270_vm0  ;;  %v10056_v20 = vor.u32 %v5280_v55, %v5279_v51  ;;  %vm12224_vm4 = vcmask 1045504   ;;  %v10098_v55 = vpop.permute.xlu1 %3404 }
 0x320   : > { %v1780_v23 = vadd.s32 %v1778_v9, %v1776_v46  ;;  %v5136_v48 = vsel %vm12224_vm4, %v5133_v6, %v5135_v36  ;;  %v10064_v25 = vadd.s32 160, %v8933_v50  ;;  %v10072_v62 = vadd.f32 %v10069_v19, %v4084_v57 }
 0x321   : > { %v2414_v30 = vsel %vm2342_vm14, %v2378_v15, %v1756_v61  ;;  %5224 = vrot.lane.b32.xlu2 %v5136_v48, %s7529_s17  ;;  %v5019_v10 = vrot.slane %v10040_v53, 1  ;;  %v5020_v28 = vrot.slane %v10037_v12, 2  ;;  %vm12225_vm8 = vsmask.f32 5376  ;;  %v4087_v15 = vpop.f32.mrf.mxu0 }
 0x322   : > { %vm2450_vm1 = vcmp.ge.s32.totalorder %v2414_v30, 1  ;;  %vm2486_vm2 = vcmp.lt.s32.totalorder %v2414_v30, 17  ;;  %v1781_v6 = vadd.s32 %v1780_v23, %v1770_v21  ;;  %v5282_v63 = vsel %vm12225_vm8, %v9898_v2, %v10056_v20 }
 0x323   : > { %vm2522_vm3 = vmand %vm2450_vm1, %vm2486_vm2  ;;  %5355 = vrot.lane.b32.xlu0 %v5282_v63, %s7530_s25  ;;  %v1791_v42 = vand.u32 65535, %v10064_v25  ;;  %v1792_v38 = vshrl.u32 %v10064_v25, 16  ;;  %v10087_v5 = vor.u32 %v5020_v28, %v5019_v10  ;;  %v4395_v2 = vrot.slane %v10042_v1, 4 }
 0x324   : > { %v4253_v34 = vsel %vm2522_vm3, %v4145_v14, 0.0  ;;  %v1782_v60 = vadd.s32 %v1781_v6, %v1772_v4  ;;  %v4146_v47 = vmax.f32 %v10072_v62, 0.0  ;;  %v5808_v21 = vshrl.u32 %v9996_v3, 16 }
 0x325   : > { %v4289_v16 = vpack.c.bf16 %v4253_v34, %v4253_v34  ;;  %v1794_v22 = vmul.u32 14564, %v1791_v42  ;;  %v1795_v7 = vmul.u32 58254, %v1791_v42  ;;  %v1796_v18 = vmul.u32 14564, %v1792_v38  ;;  %v10123_v63 = vpop.permute.xlu0 %2951 }
 0x326   : > { %v1783_v58 = vshrl.u32 %v1782_v60, 4  ;;  %v10091_v44 = vld [vmem:[#allocation3 + $0x50] sm:$0xff]  ;;  %v1797_v14 = vmul.u32 58254, %v1792_v38  ;;  %vm12226_vm0 = vsmask.f32 6400  ;;  %v5137_v4 = vrot.slane %v9857_v54, 2 }
 0x327   : > { %v10094_v49 = vrot.slane %v4289_v16, 6  ;;  %v1798_v61 = vshll.u32 %v1795_v7, 16  ;;  %v1800_v13 = vshll.u32 %v1796_v18, 16  ;;  %v5022_v1 = vsel %vm12226_vm0, %v9930_v59, %v10087_v5 }
 0x328   : > { %v1784_v51 = vmul.u32 18, %v1783_v58  ;;  %v5403_v29 = vrot.slane %v10091_v44, 3  ;;  %v1799_v46 = vshrl.u32 %v1795_v7, 16  ;;  %5093 = vrot.lane.b32.xlu1 %v5022_v1, %s7525_s20  ;;  %vm12227_vm14 = vcmask 125952  }
 0x329   : > { %v4397_v3 = vsel %vm7642_vm9, %v4395_v2, %v10094_v49  ;;  %vm1802_vm5 = vc.u32 %v1794_v22, %v1798_v61  ;;  %v1804_v57 = vadd.s32 %v1798_v61, %v1794_v22  ;;  %5171 = vrot.lane.b32.xlu2 %v5136_v48, %s7528_s24  ;;  %v1801_v9 = vshrl.u32 %v1796_v18, 16 }
 0x32a   : > { %4505 = vst.msk [vmem:[#allocation3 + $0x58] sm:$0xf] %vm12227_vm14, %v4397_v3  ;;  %v1785_v59 = vsub.s32 %v10010_v0, %v1784_v51  ;;  %v1803_v23 = vsel %vm1802_vm5, 1, %v12123_v24  ;;  %vm12228_vm4 = vcmask 1044480   ;;  %v5810_v10 = vor.u32 %v5808_v21, %v10012_v27  ;;  %v10166_v51 = vpop.permute.xlu1 %2874 }
 0x32b   : > { %v10118_v30 = vsel %vm12228_vm4, %v5401_v17, %v5403_v29  ;;  %v1805_v62 = vadd.s32 %v1803_v23, %v1797_v14  ;;  %vm1806_vm1 = vc.u32 %v1804_v57, %v1800_v13  ;;  %vm12229_vm0 = vcmask 1045504   ;;  %v10158_v14 = vpop.permute.xlu2 %4821 }
 0x32c   : > { %v5812_v48 = vshll.u32 %v10118_v30, 16  ;;  %vm2271_vm2 = vcmp.ne.s32.totalorder %v1785_v59, 0  ;;  %vm2307_vm8 = vcmp.lt.s32.totalorder %v1785_v59, 0  ;;  %v2379_v28 = vadd.s32 18, %v1785_v59 }
 0x32d   : > { %v1807_v0 = vsel %vm1806_vm1, 1, %v12123_v24  ;;  %vm2343_vm3 = vmand %vm2307_vm8, %vm2271_vm2  ;;  %v10132_v17 = vsel %vm12229_vm0, %v5135_v36, %v5137_v4  ;;  %v10135_v27 = vadd.s32 168, %v8933_v50  ;;  %v10138_v34 = vadd.f32 %v10069_v19, %v4087_v15 }
 0x32e   : > { %v1809_v6 = vadd.s32 %v1807_v0, %v1805_v62  ;;  %v10125_v42 = vrot.slane %v5812_v48, 1  ;;  %v2415_v38 = vsel %vm2343_vm3, %v2379_v28, %v1785_v59  ;;  %5226 = vrot.lane.b32.xlu0 %v10132_v17, %s7529_s17  ;;  %v4875_v60 = vrot.slane %v9857_v54, 1 }
 0x32f   : > { %vm2451_vm5 = vcmp.ge.s32.totalorder %v2415_v38, 1  ;;  %vm2487_vm14 = vcmp.lt.s32.totalorder %v2415_v38, 17  ;;  %vm12230_vm4 = vsmask.f32 7424  ;;  %v1820_v36 = vand.u32 65535, %v10135_v27 }
 0x330   : > { %v1810_v16 = vadd.s32 %v1809_v6, %v1799_v46  ;;  %v5815_v22 = vsel %vm12230_vm4, %v5810_v10, %v10125_v42  ;;  %vm2523_vm1 = vmand %vm2451_vm5, %vm2487_vm14  ;;  %v1821_v7 = vshrl.u32 %v10135_v27, 16  ;;  %vm12231_vm2 = vcmask 1046528   ;;  %v4089_v46 = vpop.f32.mrf.mxu0 }
 0x331   : > { %7314 = vmatmul.msk.bf16.gmra.mxu2 %vm3527_vm13, %v5815_v22  ;;  %v10153_v18 = vsel %vm12231_vm2, %v4873_v43, %v4875_v60  ;;  %v4717_v2 = vor.u32 %v9870_v11, %v4713_v33  ;;  %v4254_v58 = vsel %vm2523_vm1, %v4146_v47, 0.0  ;;  %v4721_v61 = vrot.slane %v10037_v12, 1  ;;  %v7489_v33 = vld [vmem:[#allocation2 + $0x90] sm:$0xff]  ;;  %vm12232_vm8 = vmmov %vm12230_vm4 }
 0x332   : > { %v1811_v21 = vadd.s32 %v1810_v16, %v1801_v9  ;;  %4964 = vrot.lane.b32.xlu1 %v10153_v18, %s7524_s19  ;;  %v10164_v13 = vadd.s32 176, %v8933_v50  ;;  %v4290_v32 = vpack.c.bf16 %v4254_v58, %v4254_v58  ;;  %v1823_v43 = vmul.u32 14564, %v1820_v36  ;;  %v10193_v16 = vpop.permute.xlu0 %3006 }
 0x333   : > { %v1824_v1 = vmul.u32 58254, %v1820_v36  ;;  %v1825_v40 = vmul.u32 14564, %v1821_v7  ;;  %v4398_v11 = vrot.slane %v10094_v49, 4  ;;  %v10171_v47 = vsel %vm3487_vm6, %v7489_v33, %v10080_v45 }
 0x334   : > { %v1812_v3 = vshrl.u32 %v1811_v21, 4  ;;  %v4722_v57 = vsel %vm12232_vm8, %v4717_v2, %v4721_v61  ;;  %v10176_v15 = vrot.slane %v4290_v32, 6  ;;  %v1826_v59 = vmul.u32 58254, %v1821_v7 }
 0x335   : > { %v1827_v9 = vshll.u32 %v1824_v1, 16  ;;  %v1829_v23 = vshll.u32 %v1825_v40, 16  ;;  %4831 = vrot.lane.b32.xlu2 %v4722_v57, %s7520_s15  ;;  %v4147_v49 = vmax.f32 %v10138_v34, 0.0  ;;  %v1849_v10 = vand.u32 65535, %v10164_v13 }
 0x336   : > { %v1813_v62 = vmul.u32 18, %v1812_v3  ;;  %v1850_v45 = vshrl.u32 %v10164_v13, 16  ;;  %v4400_v48 = vsel %vm7642_vm9, %v4398_v11, %v10176_v15  ;;  %v10186_v0 = vadd.f32 %v10069_v19, %v4089_v46  ;;  %4909 = vrot.lane.b32.xlu0 %v9980_v41, %s7526_s21  ;;  %v10198_v3 = vpop.permute.xlu2 %4954 }
 0x337   : > { %vm1831_vm3 = vc.u32 %v1823_v43, %v1827_v9  ;;  %v1833_v28 = vadd.s32 %v1827_v9, %v1823_v43  ;;  %vm12233_vm0 = vcmask 125952   ;;  %v1828_v38 = vshrl.u32 %v1824_v1, 16 }
 0x338   : > { %4506 = vst.msk [vmem:[#allocation3 + $0x5c] sm:$0xf] %vm12233_vm0, %v4400_v48  ;;  %v1814_v6 = vsub.s32 %v10064_v25, %v1813_v62  ;;  %v1832_v34 = vsel %vm1831_vm3, 1, %v12123_v24  ;;  %v1853_v22 = vmul.u32 58254, %v1849_v10  ;;  %v1852_v7 = vmul.u32 14564, %v1849_v10  ;;  %v4092_v62 = vpop.f32.mrf.mxu0 }
 0x339   : > { %v1834_v36 = vadd.s32 %v1832_v34, %v1826_v59  ;;  %vm1835_vm5 = vc.u32 %v1833_v28, %v1829_v23  ;;  %v1854_v2 = vmul.u32 14564, %v1850_v45  ;;  %v1830_v41 = vshrl.u32 %v1825_v40, 16  ;;  %v10200_v59 = vpop.permute.xlu1 %3140 }
 0x33a   : > { %vm2272_vm14 = vcmp.ne.s32.totalorder %v1814_v6, 0  ;;  %vm2308_vm4 = vcmp.lt.s32.totalorder %v1814_v6, 0  ;;  %v2380_v58 = vadd.s32 18, %v1814_v6  ;;  %v1836_v21 = vsel %vm1835_vm5, 1, %v12123_v24 }
 0x33b   : > { %vm2344_vm1 = vmand %vm2308_vm4, %vm2272_vm14  ;;  %v1838_v32 = vadd.s32 %v1836_v21, %v1834_v36  ;;  %v1855_v43 = vmul.u32 58254, %v1850_v45  ;;  %v1856_v25 = vshll.u32 %v1853_v22, 16  ;;  %v4401_v1 = vrot.slane %v10176_v15, 4 }
 0x33c   : > { %v2416_v11 = vsel %vm2344_vm1, %v2380_v58, %v1814_v6  ;;  %v4148_v33 = vmax.f32 %v10186_v0, 0.0  ;;  %v1858_v46 = vshll.u32 %v1854_v2, 16  ;;  %v1857_v9 = vshrl.u32 %v1853_v22, 16 }
 0x33d   : > { %vm2452_vm2 = vcmp.ge.s32.totalorder %v2416_v11, 1  ;;  %vm2488_vm8 = vcmp.lt.s32.totalorder %v2416_v11, 17  ;;  %v1839_v57 = vadd.s32 %v1838_v32, %v1828_v38  ;;  %vm1860_vm3 = vc.u32 %v1852_v7, %v1856_v25 }
 0x33e   : > { %vm2524_vm0 = vmand %vm2452_vm2, %vm2488_vm8  ;;  %v1861_v40 = vsel %vm1860_vm3, 1, %v12123_v24  ;;  %v1862_v23 = vadd.s32 %v1856_v25, %v1852_v7  ;;  %v10204_v15 = vshll.u32 %v9857_v54, 16  ;;  %v10207_v28 = vshrl.u32 %v9857_v54, 16  ;;  %5173 = vrot.lane.b32.xlu0 %v10132_v17, %s7528_s24 }
 0x33f   : > { %v4255_v10 = vsel %vm2524_vm0, %v4147_v49, 0.0  ;;  %v1840_v45 = vadd.s32 %v1839_v57, %v1830_v41  ;;  %v1863_v48 = vadd.s32 %v1861_v40, %v1855_v43  ;;  %v10209_v6 = vld [vmem:[#allocation3 + $0x58] sm:$0xff]  ;;  %v1859_v34 = vshrl.u32 %v1854_v2, 16  ;;  %v10222_v43 = vpop.permute.xlu0 %3138 }
 0x340   : > { %v4291_v38 = vpack.c.bf16 %v4255_v10, %v4255_v10  ;;  %vm1864_vm5 = vc.u32 %v1862_v23, %v1858_v46  ;;  %v5284_v22 = vrot.slane %v10204_v15, 3  ;;  %v5283_v49 = vrot.slane %v10207_v28, 2 }
 0x341   : > { %v1841_v36 = vshrl.u32 %v1840_v45, 4  ;;  %v1865_v7 = vsel %vm1864_vm5, 1, %v12123_v24  ;;  %v5405_v58 = vrot.slane %v10209_v6, 3  ;;  %v10220_v32 = vadd.f32 %v10069_v19, %v4092_v62 }
 0x342   : > { %v10217_v21 = vrot.slane %v4291_v38, 6  ;;  %v1867_v41 = vadd.s32 %v1865_v7, %v1863_v48  ;;  %v5023_v17 = vrot.slane %v10207_v28, 1  ;;  %v10225_v25 = vor.u32 %v5284_v22, %v5283_v49  ;;  %v7443_v38 = vld [vmem:[#allocation3 + $0x8] sm:$0xff]  }
 0x343   : > { %v1842_v2 = vmul.u32 18, %v1841_v36  ;;  %vm12234_vm14 = vcmask 1044480   ;;  %v5024_v46 = vrot.slane %v10204_v15, 2  ;;  %v5823_v23 = vshrl.u32 %v10118_v30, 16  ;;  %v10257_v36 = vpop.permute.xlu1 %3406 }
 0x344   : > { %v10232_v11 = vsel %vm12234_vm14, %v5403_v29, %v5405_v58  ;;  %v4403_v57 = vsel %vm7642_vm9, %v4401_v1, %v10217_v21  ;;  %v1868_v40 = vadd.s32 %v1867_v41, %v1857_v9  ;;  %vm12235_vm4 = vcmask 125952   ;;  %v10250_v9 = vpop.permute.xlu2 %5163 }
 0x345   : > { %v5827_v62 = vshll.u32 %v10232_v11, 16  ;;  %4507 = vst.msk [vmem:[#allocation3 + $0x60] sm:$0xf] %vm12235_vm4, %v4403_v57  ;;  %v1843_v10 = vsub.s32 %v10135_v27, %v1842_v2  ;;  %vm12236_vm1 = vsmask.f32 5376  ;;  %v10245_v45 = vor.u32 %v5024_v46, %v5023_v17  ;;  %v4094_v17 = vpop.f32.mrf.mxu0 }
 0x346   : > { %v5286_v29 = vsel %vm12236_vm1, %v10056_v20, %v10225_v25  ;;  %v10248_v48 = vadd.s32 184, %v8933_v50  ;;  %v1869_v1 = vadd.s32 %v1868_v40, %v1859_v34  ;;  %v5825_v30 = vor.u32 %v5823_v23, %v10125_v42 }
 0x347   : > { %5357 = vrot.lane.b32.xlu1 %v5286_v29, %s7530_s25  ;;  %v10254_v22 = vrot.slane %v5827_v62, 1  ;;  %v5139_v27 = vrot.slane %v9975_v31, 2  ;;  %vm2273_vm2 = vcmp.ne.s32.totalorder %v1843_v10, 0  ;;  %vm2309_vm8 = vcmp.lt.s32.totalorder %v1843_v10, 0 }
 0x348   : > { %v2381_v20 = vadd.s32 18, %v1843_v10  ;;  %vm12237_vm3 = vsmask.f32 6400  ;;  %vm2345_vm0 = vmand %vm2309_vm8, %vm2273_vm2  ;;  %v1870_v34 = vshrl.u32 %v1869_v1, 4  ;;  %vm12238_vm5 = vsmask.f32 7424 }
 0x349   : > { %v5026_v7 = vsel %vm12237_vm3, %v10087_v5, %v10245_v45  ;;  %v5830_v49 = vsel %vm12238_vm5, %v5825_v30, %v10254_v22  ;;  %v1878_v42 = vand.u32 65535, %v10248_v48  ;;  %v1879_v41 = vshrl.u32 %v10248_v48, 16 }
 0x34a   : > { %5095 = vrot.lane.b32.xlu2 %v5026_v7, %s7525_s20  ;;  %v3563_v2 = vsel %vm3527_vm13, %v10171_v47, %v10123_v63  ;;  %v5429_v46 = vsel %vm3527_vm13, %v7443_v38, %v10158_v14  ;;  %v10275_v5 = vsel %vm3487_vm6, %v9104_v26, %v10166_v51  ;;  %v2417_v57 = vsel %vm2345_vm0, %v2381_v20, %v1843_v10  ;;  %v4900_v47 = vpop.permute.xlu0 %4899 }
 0x34b   : > { %7315 = vmatmul.msk.bf16.gmra.mxu2 %vm3527_vm13, %v5830_v49  ;;  %vm2453_vm14 = vcmp.ge.s32.totalorder %v2417_v57, 1  ;;  %vm2489_vm4 = vcmp.lt.s32.totalorder %v2417_v57, 17  ;;  %v1871_v40 = vmul.u32 18, %v1870_v34  ;;  %v4149_v23 = vmax.f32 %v10220_v32, 0.0 }
 0x34c   : > { %vm2525_vm1 = vmand %vm2453_vm14, %vm2489_vm4  ;;  %v1881_v62 = vmul.u32 14564, %v1878_v42  ;;  %v1882_v29 = vmul.u32 58254, %v1878_v42  ;;  %v10279_v63 = vmul.u32 14564, %v1879_v41  ;;  %vm12239_vm2 = vcmask 1045504   ;;  %v5086_v34 = vpop.permute.xlu2 %5085 }
 0x34d   : > { %v10286_v26 = vsel %vm12239_vm2, %v5137_v4, %v5139_v27  ;;  %v4256_v14 = vsel %vm2525_vm1, %v4148_v33, 0.0  ;;  %v1872_v51 = vsub.s32 %v10164_v13, %v1871_v40  ;;  %v4725_v32 = vor.u32 %v10040_v53, %v4721_v61 }
 0x34e   : > { %v4729_v10 = vrot.slane %v10204_v15, 1  ;;  %v4292_v38 = vpack.c.bf16 %v4256_v14, %v4256_v14  ;;  %v1884_v1 = vmul.u32 58254, %v1879_v41  ;;  %v1885_v30 = vshll.u32 %v1882_v29, 16  ;;  %v10307_v41 = vpop.permute.xlu1 %4901  ;;  %v7407_v15 = vld [vmem:[%s12008_s4 + $0x18] sm:$0xff] }
 0x34f   : > { %v4877_v20 = vrot.slane %v9975_v31, 1  ;;  %vm2274_vm6 = vcmp.ne.s32.totalorder %v1872_v51, 0  ;;  %vm2310_vm8 = vcmp.lt.s32.totalorder %v1872_v51, 0  ;;  %v2382_v4 = vadd.s32 18, %v1872_v51  ;;  %5228 = vrot.lane.b32.xlu1 %v10286_v26, %s7529_s17 }
 0x350   : > { %v1887_v0 = vshll.u32 %v10279_v63, 16  ;;  %v4404_v13 = vrot.slane %v10217_v21, 4  ;;  %v4405_v12 = vrot.slane %v4292_v38, 6  ;;  %vm2346_vm3 = vmand %vm2310_vm8, %vm2274_vm6  ;;  %vm1889_vm0 = vc.u32 %v1881_v62, %v1885_v30 }
 0x351   : > { %v1891_v53 = vadd.s32 %v1885_v30, %v1881_v62  ;;  %v2418_v61 = vsel %vm2346_vm3, %v2382_v4, %v1872_v51  ;;  %v1890_v33 = vsel %vm1889_vm0, 1, %v12123_v24  ;;  %v5467_v7 = vsel %vm3605_vm7, %v5429_v46, %v4900_v47  ;;  %v4097_v62 = vpop.f32.mrf.mxu0 }
 0x352   : > { %v4730_v49 = vsel %vm12238_vm5, %v4725_v32, %v4729_v10  ;;  %v4406_v42 = vsel %vm7642_vm9, %v4404_v13, %v4405_v12  ;;  %vm2454_vm14 = vcmp.ge.s32.totalorder %v2418_v61, 1  ;;  %vm2490_vm4 = vcmp.lt.s32.totalorder %v2418_v61, 17  ;;  %v3218_v13 = vpop.permute.xlu0 %3217 }
 0x353   : > { %v1886_v21 = vshrl.u32 %v1882_v29, 16  ;;  %4833 = vrot.lane.b32.xlu0 %v4730_v49, %s7520_s15  ;;  %vm12240_vm1 = vcmask 125952   ;;  %vm2526_vm2 = vmand %vm2454_vm14, %vm2490_vm4  ;;  %v1892_v57 = vadd.s32 %v1890_v33, %v1884_v1  ;;  %vm1893_vm6 = vc.u32 %v1891_v53, %v1887_v0 }
 0x354   : > { %4508 = vst.msk [vmem:[#allocation3 + $0x64] sm:$0xf] %vm12240_vm1, %v4406_v42  ;;  %vm12241_vm8 = vcmask 1046528   ;;  %v10319_v40 = vadd.s32 192, %v8933_v50  ;;  %v3602_v29 = vsel %vm3566_vm11, %v3563_v2, %v10193_v16  ;;  %v4257_v14 = vsel %vm2526_vm2, %v4149_v23, 0.0  ;;  %vm12243_vm0 = vmmov %vm12240_vm1 }
 0x355   : > { %v10316_v46 = vsel %vm12241_vm8, %v4875_v60, %v4877_v20  ;;  %v1888_v51 = vshrl.u32 %v10279_v63, 16  ;;  %v1894_v47 = vsel %vm1893_vm6, 1, %v12123_v24  ;;  %v4293_v32 = vpack.c.bf16 %v4257_v14, %v4257_v14  ;;  %v10358_v14 = vpop.permute.xlu2 %5218 }
 0x356   : > { %4966 = vrot.lane.b32.xlu2 %v10316_v46, %s7524_s19  ;;  %v1896_v54 = vadd.s32 %v1894_v47, %v1892_v57  ;;  %v1907_v60 = vand.u32 65535, %v10319_v40  ;;  %v1908_v38 = vshrl.u32 %v10319_v40, 16  ;;  %v4407_v1 = vrot.slane %v4405_v12, 4 }
 0x357   : > { %v10330_v30 = vadd.f32 %v10069_v19, %v4094_v17  ;;  %v5505_v16 = vsel %vm3683_vm15, %v5467_v7, %v10198_v3  ;;  %v10335_v2 = vadd.f32 %v10069_v19, %v4097_v62  ;;  %v10337_v23 = vrot.slane %v4293_v32, 6  ;;  %4911 = vrot.lane.b32.xlu1 %v10153_v18, %s7526_s21 }
 0x358   : > { %v1897_v63 = vadd.s32 %v1896_v54, %v1886_v21  ;;  %v1910_v4 = vmul.u32 14564, %v1907_v60  ;;  %v1911_v0 = vmul.u32 58254, %v1907_v60  ;;  %v3641_v12 = vsel %vm3605_vm7, %v3602_v29, %v10222_v43 }
 0x359   : > { %v1912_v17 = vmul.u32 14564, %v1908_v38  ;;  %v1913_v53 = vmul.u32 58254, %v1908_v38  ;;  %v10344_v61 = vshll.u32 %v9975_v31, 16  ;;  %v4409_v3 = vsel %vm7642_vm9, %v4407_v1, %v10337_v23 }
 0x35a   : > { %v1898_v33 = vadd.s32 %v1897_v63, %v1888_v51  ;;  %v1914_v7 = vshll.u32 %v1911_v0, 16  ;;  %vm12242_vm3 = vcmask 326656   ;;  %4509 = vst.msk [vmem:[#allocation3 + $0x68] sm:$0xf] %vm12243_vm0, %v4409_v3  ;;  %v4150_v18 = vmax.f32 %v10330_v30, 0.0 }
 0x35b   : > { %v3680_v49 = vsel %vm12242_vm3, %v3641_v12, %v3218_v13  ;;  %vm12244_vm5 = vcmask 523264   ;;  %v1916_v43 = vshll.u32 %v1912_v17, 16  ;;  %v4151_v21 = vmax.f32 %v10335_v2, 0.0  ;;  %v10356_v57 = vld [vmem:[#allocation3 + $0x60] sm:$0xff] }
 0x35c   : > { %v10353_v42 = vsel %vm12244_vm5, %v5505_v16, %v5086_v34  ;;  %v1899_v62 = vshrl.u32 %v1898_v33, 4  ;;  %vm1918_vm14 = vc.u32 %v1910_v4, %v1914_v7  ;;  %v1920_v29 = vadd.s32 %v1914_v7, %v1910_v4  ;;  %v10366_v34 = vpop.permute.xlu1 %4823 }
 0x35d   : > { %v10361_v51 = vshrl.u32 %v9975_v31, 16  ;;  %v1919_v47 = vsel %vm1918_vm14, 1, %v12123_v24  ;;  %v3719_v32 = vsel %vm3683_vm15, %v3680_v49, %v9964_v37  ;;  %v5028_v54 = vrot.slane %v10344_v61, 2 }
 0x35e   : > { %v5288_v60 = vrot.slane %v10344_v61, 3  ;;  %v1900_v38 = vmul.u32 18, %v1899_v62  ;;  %v1915_v1 = vshrl.u32 %v1911_v0, 16  ;;  %v1921_v30 = vadd.s32 %v1919_v47, %v1913_v53 }
 0x35f   : > { %vm1922_vm4 = vc.u32 %v1920_v29, %v1916_v43  ;;  %v1917_v16 = vshrl.u32 %v1912_v17, 16  ;;  %vm5580_vm1 = vcmask 654336   ;;  %v5407_v4 = vrot.slane %v10356_v57, 3  ;;  %5175 = vrot.lane.b32.xlu1 %v10286_v26, %s7528_s24 }
 0x360   : > { %v1923_v63 = vsel %vm1922_vm4, 1, %v12123_v24  ;;  %v1901_v13 = vsub.s32 %v10248_v48, %v1900_v38  ;;  %v3758_v37 = vsel %vm3722_vm12, %v3719_v32, %v10098_v55  ;;  %v5027_v3 = vrot.slane %v10361_v51, 1 }
 0x361   : > { %v1925_v12 = vadd.s32 %v1923_v63, %v1921_v30  ;;  %vm12245_vm2 = vcmask 1044480   ;;  %v5838_v17 = vshrl.u32 %v10232_v11, 16  ;;  %v5287_v48 = vrot.slane %v10361_v51, 2  ;;  %v10407_v30 = vpop.permute.xlu2 %4903 }
 0x362   : > { %v10383_v0 = vsel %vm12245_vm2, %v5405_v58, %v5407_v4  ;;  %v10388_v53 = vadd.s32 200, %v8933_v50  ;;  %vm2275_vm6 = vcmp.ne.s32.totalorder %v1901_v13, 0  ;;  %vm2311_vm8 = vcmp.lt.s32.totalorder %v1901_v13, 0 }
 0x363   : > { %v2383_v55 = vadd.s32 18, %v1901_v13  ;;  %v1926_v33 = vadd.s32 %v1925_v12, %v1915_v1  ;;  %vm2347_vm3 = vmand %vm2311_vm8, %vm2275_vm6  ;;  %v5840_v26 = vor.u32 %v5838_v17, %v10254_v22  ;;  %v5842_v7 = vshll.u32 %v10383_v0, 16  ;;  %v2954_v1 = vpop.permute.xlu0 %2953 }
 0x364   : > { %v10392_v49 = vor.u32 %v5028_v54, %v5027_v3  ;;  %v10394_v58 = vor.u32 %v5288_v60, %v5287_v48  ;;  %v1936_v62 = vand.u32 65535, %v10388_v53  ;;  %v1937_v29 = vshrl.u32 %v10388_v53, 16 }
 0x365   : > { %v2419_v43 = vsel %vm2347_vm3, %v2383_v55, %v1901_v13  ;;  %v1927_v11 = vadd.s32 %v1926_v33, %v1917_v16  ;;  %v10398_v47 = vrot.slane %v5842_v7, 1  ;;  %vm12246_vm14 = vsmask.f32 6400  ;;  %v7411_v16 = vld [vmem:[%s12008_s4 + $0x38] sm:$0xff] }
 0x366   : > { %vm2455_vm0 = vcmp.ge.s32.totalorder %v2419_v43, 1  ;;  %vm2491_vm5 = vcmp.lt.s32.totalorder %v2419_v43, 17  ;;  %v5030_v22 = vsel %vm12246_vm14, %v10245_v45, %v10392_v49  ;;  %vm12247_vm2 = vsmask.f32 5376  ;;  %6122 = vmatpush.bf16.msra.mxu1 %v7411_v16 }
 0x367   : > { %vm2527_vm4 = vmand %vm2455_vm0, %vm2491_vm5  ;;  %v1928_v32 = vshrl.u32 %v1927_v11, 4  ;;  %5097 = vrot.lane.b32.xlu0 %v5030_v22, %s7525_s20  ;;  %v5290_v54 = vsel %vm12247_vm2, %v10225_v25, %v10394_v58  ;;  %v1939_v60 = vmul.u32 14564, %v1936_v62  ;;  %v1940_v38 = vmul.u32 58254, %v1936_v62  ;;  %v10418_v25 = vpop.permute.xlu1 %4956 }
 0x368   : > { %v4410_v63 = vrot.slane %v10337_v23, 4  ;;  %v4258_v45 = vsel %vm2527_vm4, %v4150_v18, 0.0  ;;  %vm12248_vm6 = vsmask.f32 7424  ;;  %5359 = vrot.lane.b32.xlu2 %v5290_v54, %s7530_s25  ;;  %v10416_v12 = vmul.u32 14564, %v1937_v29  ;;  %v7410_v23 = vld [vmem:[%s12008_s4 + $0x30] sm:$0xff] }
 0x369   : > { %v5845_v13 = vsel %vm12248_vm6, %v5840_v26, %v10398_v47  ;;  %v4294_v3 = vpack.c.bf16 %v4258_v45, %v4258_v45  ;;  %v1929_v17 = vmul.u32 18, %v1928_v32  ;;  %vm12249_vm8 = vcmask 523264   ;;  %v4099_v32 = vpop.f32.mrf.mxu0  ;;  %v5350_v45 = vpop.permute.xlu2 %5349 }
 0x36a   : > { %v10422_v48 = vsel %vm12249_vm8, %v3758_v37, %v10006_v52  ;;  %7316 = vmatmul.msk.bf16.gmra.mxu2 %vm3527_vm13, %v5845_v13  ;;  %v1943_v55 = vshll.u32 %v1940_v38, 16  ;;  %vm5619_vm3 = vcmask 785408   ;;  %v5582_v18 = vsel %vm5580_vm1, %v10353_v42, %v10250_v9  ;;  %6123 = vmatpush.bf16.msra.mxu1 %v7410_v23 }
 0x36b   : > { %v1942_v33 = vmul.u32 58254, %v1937_v29  ;;  %v1945_v26 = vshll.u32 %v10416_v12, 16  ;;  %v10432_v7 = vrot.slane %v4294_v3, 6  ;;  %v1930_v52 = vsub.s32 %v10319_v40, %v1929_v17  ;;  %v7409_v40 = vld [vmem:[%s12008_s4 + $0x28] sm:$0xff] }
 0x36c   : > { %vm1947_vm0 = vc.u32 %v1939_v60, %v1943_v55  ;;  %v1949_v37 = vadd.s32 %v1943_v55, %v1939_v60  ;;  %v1944_v43 = vshrl.u32 %v1940_v38, 16  ;;  %v3565_v62 = vsel %vm3527_vm13, %v10275_v5, %v2954_v1 }
 0x36d   : > { %v1948_v11 = vsel %vm1947_vm0, 1, %v12123_v24  ;;  %v3931_v22 = vshll.u32 %v10422_v48, 16  ;;  %v4412_v9 = vsel %vm7642_vm9, %v4410_v63, %v10432_v7  ;;  %vm2276_vm5 = vcmp.ne.s32.totalorder %v1930_v52, 0  ;;  %v3220_v63 = vpop.permute.xlu0 %3219 }
 0x36e   : > { %vm2312_vm14 = vcmp.lt.s32.totalorder %v1930_v52, 0  ;;  %v1946_v42 = vshrl.u32 %v10416_v12, 16  ;;  %vm12250_vm4 = vcmask 125952   ;;  %v2384_v29 = vadd.s32 18, %v1930_v52  ;;  %6124 = vmatpush.bf16.msra.mxu1 %v7409_v40 }
 0x36f   : > { %4510 = vst.msk [vmem:[#allocation3 + $0x6c] sm:$0xf] %vm12250_vm4, %v4412_v9  ;;  %vm2348_vm2 = vmand %vm2312_vm14, %vm2276_vm5  ;;  %v1950_v5 = vadd.s32 %v1948_v11, %v1942_v33  ;;  %vm1951_vm6 = vc.u32 %v1949_v37, %v1945_v26  ;;  %v10447_v54 = vrot.slane %v3931_v22, 1  ;;  %v3604_v38 = vsel %vm3566_vm11, %v3565_v62, %v10046_v8  ;;  %v10462_v55 = vpop.permute.xlu1 %5165  ;;  %v7408_v33 = vld [vmem:[%s12008_s4 + $0x20] sm:$0xff] }
 0x370   : > { %v1952_v60 = vsel %vm1951_vm6, 1, %v12123_v24  ;;  %v10453_v1 = vshll.u32 %v10091_v44, 16  ;;  %v10456_v16 = vshrl.u32 %v10091_v44, 16  ;;  %v2420_v13 = vsel %vm2348_vm2, %v2384_v29, %v1930_v52  ;;  %v7490_v62 = vld [vmem:[#allocation3 + $0x10] sm:$0xff]  }
 0x371   : > { %v1954_v12 = vadd.s32 %v1952_v60, %v1950_v5  ;;  %vm12251_vm8 = vsmask.f32 7424  ;;  %v5141_v17 = vrot.slane %v10091_v44, 2  ;;  %vm2456_vm0 = vcmp.ge.s32.totalorder %v2420_v13, 1 }
 0x372   : > { %v3934_v3 = vsel %vm12251_vm8, %v10014_v56, %v10447_v54  ;;  %vm2492_vm11 = vcmp.lt.s32.totalorder %v2420_v13, 17  ;;  %v5291_v8 = vrot.slane %v10456_v16, 2  ;;  %v5292_v23 = vrot.slane %v10453_v1, 3  ;;  %6125 = vmatpush.bf16.msra.mxu1 %v7408_v33 }
 0x373   : > { %7203 = vmatmul.msk.bf16.gmra.mxu0 %vm3969_vm10, %v3934_v3  ;;  %vm2528_vm5 = vmand %vm2456_vm0, %vm2492_vm11  ;;  %v1955_v26 = vadd.s32 %v1954_v12, %v1944_v43  ;;  %v10471_v56 = vadd.f32 %v10069_v19, %v4099_v32  ;;  %vm12252_vm14 = vcmask 1045504   ;;  %vm5658_vm4 = vcmask 916480  }
 0x374   : > { %v10478_v52 = vsel %vm12252_vm14, %v5139_v27, %v5141_v17  ;;  %v4259_v37 = vsel %vm2528_vm5, %v4151_v21, 0.0  ;;  %v5621_v11 = vsel %vm5619_vm3, %v5582_v18, %v10358_v14  ;;  %v5431_v43 = vsel %vm3527_vm13, %v7490_v62, %v10366_v34 }
 0x375   : > { %v10486_v22 = vor.u32 %v5292_v23, %v5291_v8  ;;  %5230 = vrot.lane.b32.xlu2 %v10478_v52, %s7529_s17  ;;  %v4295_v9 = vpack.c.bf16 %v4259_v37, %v4259_v37  ;;  %v1956_v40 = vadd.s32 %v1955_v26, %v1946_v42  ;;  %v3643_v27 = vsel %vm3605_vm7, %v3604_v38, %v10200_v59  ;;  %v4826_v60 = vpop.permute.xlu0 %4825  ;;  %v10520_v38 = vpop.permute.xlu2 %5167 }
 0x376   : > { %v10493_v2 = vsel %vm5658_vm4, %v5621_v11, %v5350_v45  ;;  %vm12253_vm2 = vsmask.f32 5376  ;;  %vm12254_vm6 = vcmask 326656   ;;  %v4733_v34 = vor.u32 %v10207_v28, %v4729_v10  ;;  %v10503_v29 = vld [vmem:[#allocation3 + $0x68] sm:$0xff]  ;;  %6126 = vmatpush.bf16.msra.mxu1 %v7407_v15 }
 0x377   : > { %v5294_v21 = vsel %vm12253_vm2, %v10394_v58, %v10486_v22  ;;  %v3682_v14 = vsel %vm12254_vm6, %v3643_v27, %v3220_v63  ;;  %v4737_v18 = vrot.slane %v10344_v61, 1  ;;  %v4413_v59 = vrot.slane %v10432_v7, 4  ;;  %v5088_v12 = vpop.permute.xlu1 %5087 }
 0x378   : > { %v10506_v42 = vrot.slane %v4295_v9, 6  ;;  %v1957_v5 = vshrl.u32 %v1956_v40, 4  ;;  %v4152_v32 = vmax.f32 %v10471_v56, 0.0  ;;  %5361 = vrot.lane.b32.xlu0 %v5294_v21, %s7530_s25  ;;  %v5469_v28 = vsel %vm3605_vm7, %v5431_v43, %v10307_v41 }
 0x379   : > { %v5721_v10 = vshll.u32 %v10493_v2, 16  ;;  %v4738_v58 = vsel %vm12251_vm8, %v4733_v34, %v4737_v18  ;;  %v5409_v7 = vrot.slane %v10503_v29, 3  ;;  %v5507_v13 = vsel %vm3683_vm15, %v5469_v28, %v10418_v25 }
 0x37a   : > { %v4415_v63 = vsel %vm7642_vm9, %v4413_v59, %v10506_v42  ;;  %v1958_v45 = vmul.u32 18, %v1957_v5  ;;  %v3721_v41 = vsel %vm3683_vm15, %v3682_v14, %v10096_v39  ;;  %4835 = vrot.lane.b32.xlu1 %v4738_v58, %s7520_s15  ;;  %vm12255_vm0 = vcmask 125952  }
 0x37b   : > { %4511 = vst.msk [vmem:[#allocation3 + $0x70] sm:$0xf] %vm12255_vm0, %v4415_v63  ;;  %vm12256_vm11 = vcmask 1044480   ;;  %v5853_v8 = vshrl.u32 %v10383_v0, 16  ;;  %v4879_v23 = vrot.slane %v10091_v44, 1  ;;  %v5031_v25 = vrot.slane %v10456_v16, 1 }
 0x37c   : > { %v10536_v3 = vsel %vm12256_vm11, %v5407_v4, %v5409_v7  ;;  %v1959_v39 = vsub.s32 %v10388_v53, %v1958_v45  ;;  %v5719_v33 = vshrl.u32 %v10493_v2, 16  ;;  %v5032_v56 = vrot.slane %v10453_v1, 2  ;;  %v7406_v4 = vld [vmem:[%s12008_s4 + $0x10] sm:$0xff] }
 0x37d   : > { %v5857_v26 = vshll.u32 %v10536_v3, 16  ;;  %v5723_v37 = vrot.slane %v5721_v10, 1  ;;  %v5855_v0 = vor.u32 %v5853_v8, %v10398_v47  ;;  %4913 = vrot.lane.b32.xlu2 %v10316_v46, %s7526_s21  ;;  %v10552_v11 = vshll.u32 %v10209_v6, 16  ;;  %6127 = vmatpush.bf16.msra.mxu1 %v7406_v4  ;;  %v4828_v34 = vpop.permute.xlu0 %4827  ;;  %v3486_v59 = vpop.permute.xlu2 %3485 }
 0x37e   : > { %v10555_v53 = vshrl.u32 %v10209_v6, 16  ;;  %vm2277_vm5 = vcmp.ne.s32.totalorder %v1959_v39, 0  ;;  %vm2313_vm14 = vcmp.lt.s32.totalorder %v1959_v39, 0  ;;  %v2385_v62 = vadd.s32 18, %v1959_v39 }
 0x37f   : > { %v10557_v43 = vrot.slane %v5857_v26, 1  ;;  %vm2349_vm2 = vmand %vm2313_vm14, %vm2277_vm5  ;;  %vm12257_vm6 = vcmask 1046528   ;;  %v10566_v46 = vor.u32 %v5032_v56, %v5031_v25  ;;  %v5296_v40 = vrot.slane %v10552_v11, 3  ;;  %v5221_v63 = vpop.permute.xlu1 %5220 }
 0x380   : > { %v10564_v47 = vsel %vm12257_vm6, %v4877_v20, %v4879_v23  ;;  %v5295_v9 = vrot.slane %v10555_v53, 2  ;;  %v2421_v27 = vsel %vm2349_vm2, %v2385_v62, %v1959_v39  ;;  %vm12258_vm0 = vcmask 523264   ;;  %v7405_v20 = vld [vmem:[%s12008_s4 + $0x8] sm:$0xff] }
 0x381   : > { %v5860_v2 = vsel %vm12251_vm8, %v5855_v0, %v10557_v43  ;;  %4968 = vrot.lane.b32.xlu0 %v10564_v47, %s7524_s19  ;;  %v5545_v21 = vsel %vm12258_vm0, %v5507_v13, %v5088_v12  ;;  %v5143_v31 = vrot.slane %v10209_v6, 2  ;;  %vm2457_vm11 = vcmp.ge.s32.totalorder %v2421_v27, 1  ;;  %vm12260_vm6 = vmmov %vm12258_vm0  ;;  %6128 = vmatpush.bf16.msra.mxu1 %v7405_v20 }
 0x382   : > { %vm2493_vm5 = vcmp.lt.s32.totalorder %v2421_v27, 17  ;;  %7317 = vmatmul.msk.bf16.gmra.mxu2 %vm3527_vm13, %v5860_v2  ;;  %vm12259_vm14 = vsmask.f32 6400  ;;  %v3760_v5 = vsel %vm3722_vm12, %v3721_v41, %v10257_v36  ;;  %v4416_v15 = vrot.slane %v10506_v42, 4 }
 0x383   : > { %v5034_v14 = vsel %vm12259_vm14, %v10392_v49, %v10566_v46  ;;  %v3935_v28 = vshrl.u32 %v10422_v48, 16  ;;  %vm2529_vm2 = vmand %vm2457_vm11, %vm2493_vm5  ;;  %v3799_v10 = vsel %vm12260_vm6, %v3760_v5, %v3486_v59  ;;  %v10589_v58 = vor.u32 %v5296_v40, %v5295_v9  ;;  %v7491_v49 = vld [vmem:[#allocation3 + $0x18] sm:$0xff]  }
 0x384   : > { %5099 = vrot.lane.b32.xlu1 %v5034_v14, %s7525_s20  ;;  %v4260_v45 = vsel %vm2529_vm2, %v4152_v32, 0.0  ;;  %v10591_v13 = vor.u32 %v5723_v37, %v5719_v33  ;;  %v5433_v12 = vsel %vm3527_vm13, %v7491_v49, %v4826_v60  ;;  %v3938_v8 = vshll.u32 %v3799_v10, 16  ;;  %v7492_v32 = vld [vmem:[#allocation3 + $0x20] sm:$0xff] }
 0x385   : > { %v4296_v36 = vpack.c.bf16 %v4260_v45, %v4260_v45  ;;  %vm12261_vm12 = vcmask 1045504   ;;  %v5584_v42 = vsel %vm5580_vm1, %v5545_v21, %v10462_v55  ;;  %v5868_v41 = vshrl.u32 %v10536_v3, 16  ;;  %5177 = vrot.lane.b32.xlu2 %v10478_v52, %s7528_s24  ;;  %v5352_v9 = vpop.permute.xlu0 %5351  ;;  %v10642_v40 = vpop.permute.xlu2 %4960 }
 0x386   : > { %v10599_v48 = vsel %vm12261_vm12, %v5141_v17, %v5143_v31  ;;  %v10607_v60 = vsel %vm3527_vm13, %v7492_v32, %v4828_v34  ;;  %v3940_v25 = vrot.slane %v3938_v8, 1  ;;  %v3937_v39 = vor.u32 %v3935_v28, %v10447_v54  ;;  %v4102_v17 = vpop.f32.mrf.mxu0 }
 0x387   : > { %v10611_v33 = vadd.s32 208, %v8933_v50  ;;  %v10613_v26 = vrot.slane %v4296_v36, 6  ;;  %vm12262_vm8 = vsmask.f32 5376  ;;  %v4741_v52 = vor.u32 %v10361_v51, %v4737_v18  ;;  %v7404_v51 = vld [vmem:[%s12008_s4] sm:$0xff]  ;;  %v4959_v34 = vpop.permute.xlu1 %4958 }
 0x388   : > { %v5298_v55 = vsel %vm12262_vm8, %v10486_v22, %v10589_v58  ;;  %v4745_v3 = vrot.slane %v10453_v1, 1  ;;  %vm12263_vm0 = vsmask.f32 7424  ;;  %v4881_v54 = vrot.slane %v10209_v6, 1  ;;  %6129 = vmatpush.bf16.msra.mxu1 %v7404_v51 }
 0x389   : > { %v3941_v56 = vsel %vm12263_vm0, %v3937_v39, %v3940_v25  ;;  %v1965_v4 = vand.u32 65535, %v10611_v33  ;;  %v1966_v37 = vshrl.u32 %v10611_v33, 16  ;;  %v4418_v0 = vsel %vm7642_vm9, %v4416_v15, %v10613_v26  ;;  %5232 = vrot.lane.b32.xlu0 %v10599_v48, %s7529_s17  ;;  %vm12267_vm6 = vmmov %vm12263_vm0 }
 0x38a   : > { %7204 = vmatmul.msk.bf16.gmra.mxu0 %vm3969_vm10, %v3941_v56  ;;  %v10633_v61 = vadd.f32 %v10069_v19, %v4102_v17  ;;  %v5035_v22 = vrot.slane %v10555_v53, 1  ;;  %v5036_v18 = vrot.slane %v10552_v11, 2  ;;  %vm12264_vm11 = vcmask 125952   ;;  %vm12265_vm10 = vmmov %vm12263_vm0 }
 0x38b   : > { %4512 = vst.msk [vmem:[#allocation3 + $0x74] sm:$0xf] %vm12264_vm11, %v4418_v0  ;;  %v5623_v62 = vsel %vm5619_vm3, %v5584_v42, %v5221_v63  ;;  %v1968_v27 = vmul.u32 14564, %v1965_v4  ;;  %v1969_v2 = vmul.u32 58254, %v1965_v4  ;;  %v1970_v21 = vmul.u32 14564, %v1966_v37 }
 0x38c   : > { %5363 = vrot.lane.b32.xlu1 %v5298_v55, %s7530_s25  ;;  %v10646_v19 = vor.u32 %v5868_v41, %v10557_v43  ;;  %v4746_v20 = vsel %vm12265_vm10, %v4741_v52, %v4745_v3  ;;  %v10652_v14 = vsel %vm5658_vm4, %v5623_v62, %v5352_v9  ;;  %v10655_v59 = vadd.s32 216, %v8933_v50 }
 0x38d   : > { %v5725_v5 = vshll.u32 %v10652_v14, 16  ;;  %vm12266_vm5 = vcmask 1046528   ;;  %v1971_v15 = vmul.u32 58254, %v1966_v37  ;;  %v1972_v28 = vshll.u32 %v1969_v2, 16  ;;  %4837 = vrot.lane.b32.xlu2 %v4746_v20, %s7520_s15 }
 0x38e   : > { %v10663_v43 = vsel %vm12266_vm5, %v4879_v23, %v4881_v54  ;;  %v4419_v10 = vrot.slane %v10613_v26, 4  ;;  %v1974_v63 = vshll.u32 %v1970_v21, 16  ;;  %v4153_v45 = vmax.f32 %v10633_v61, 0.0  ;;  %v4104_v4 = vpop.f32.mrf.mxu0 }
 0x38f   : > { %v10667_v49 = vor.u32 %v5036_v18, %v5035_v22  ;;  %v5727_v8 = vrot.slane %v5725_v5, 1  ;;  %vm1976_vm14 = vc.u32 %v1968_v27, %v1972_v28  ;;  %v1978_v36 = vadd.s32 %v1972_v28, %v1968_v27  ;;  %v5090_v22 = vpop.permute.xlu0 %5089  ;;  %v10687_v18 = vpop.permute.xlu2 %4907 }
 0x390   : > { %v1994_v42 = vand.u32 65535, %v10655_v59  ;;  %v1977_v44 = vsel %vm1976_vm14, 1, %v12123_v24  ;;  %v5471_v23 = vsel %vm3605_vm7, %v5433_v12, %v10407_v30  ;;  %v5145_v41 = vrot.slane %v10356_v57, 2  ;;  %vm12272_vm14 = vmmov %vm12267_vm6 }
 0x391   : > { %v1995_v32 = vshrl.u32 %v10655_v59, 16  ;;  %v1973_v25 = vshrl.u32 %v1969_v2, 16  ;;  %v1979_v39 = vadd.s32 %v1977_v44, %v1971_v15  ;;  %vm1980_vm2 = vc.u32 %v1978_v36, %v1974_v63  ;;  %4915 = vrot.lane.b32.xlu0 %v10564_v47, %s7526_s21  ;;  %v4906_v2 = vpop.permute.xlu1 %4905 }
 0x392   : > { %v5728_v17 = vsel %vm12267_vm6, %v10591_v13, %v5727_v8  ;;  %v10678_v55 = vld [vmem:[#allocation3 + $0x70] sm:$0xff]  ;;  %v1981_v52 = vsel %vm1980_vm2, 1, %v12123_v24  ;;  %v1997_v56 = vmul.u32 14564, %v1994_v42  ;;  %v1998_v30 = vmul.u32 58254, %v1994_v42 }
 0x393   : > { %6130 = vmatmul.bf16.vlgmr.msra.gmra.mxu1 %v5728_v17  ;;  %v1999_v12 = vmul.u32 14564, %v1995_v32  ;;  %v5741_v37 = vshrl.u32 %v10652_v14, 16  ;;  %v1975_v0 = vshrl.u32 %v1970_v21, 16  ;;  %v1983_v51 = vadd.s32 %v1981_v52, %v1979_v39  ;;  %v10703_v14 = vld [vmem:[%s12007_s3] ss:$0 sm:$0xff] }
 0x394   : > { %vm12268_vm12 = vsmask.f32 6400  ;;  %v5411_v47 = vrot.slane %v10678_v55, 3  ;;  %4970 = vrot.lane.b32.xlu1 %v10663_v43, %s7524_s19  ;;  %v5509_v62 = vsel %vm3683_vm15, %v5471_v23, %v4959_v34  ;;  %v2000_v9 = vmul.u32 58254, %v1995_v32 }
 0x395   : > { %v5038_v13 = vsel %vm12268_vm12, %v10566_v46, %v10667_v49  ;;  %v2001_v27 = vshll.u32 %v1998_v30, 16  ;;  %v1984_v20 = vadd.s32 %v1983_v51, %v1973_v25  ;;  %vm12269_vm8 = vcmask 1045504  }
 0x396   : > { %v10698_v46 = vsel %vm12269_vm8, %v5143_v31, %v5145_v41  ;;  %v2003_v21 = vshll.u32 %v1999_v12, 16  ;;  %v10706_v5 = vadd.f32 %v10703_v14, %v4104_v4  ;;  %vm12270_vm0 = vcmask 1044480   ;;  %5101 = vrot.lane.b32.xlu2 %v5038_v13, %s7525_s20 }
 0x397   : > { %v10713_v34 = vsel %vm12270_vm0, %v5409_v7, %v5411_v47  ;;  %vm12271_vm11 = vcmask 523264   ;;  %vm2005_vm10 = vc.u32 %v1997_v56, %v2001_v27  ;;  %v2007_v31 = vadd.s32 %v2001_v27, %v1997_v56  ;;  %vm12274_vm0 = vmmov %vm12272_vm14 }
 0x398   : > { %v5547_v15 = vsel %vm12271_vm11, %v5509_v62, %v5090_v22  ;;  %v5872_v28 = vshll.u32 %v10713_v34, 16  ;;  %v1985_v63 = vadd.s32 %v1984_v20, %v1975_v0  ;;  %v2006_v36 = vsel %vm2005_vm10, 1, %v12123_v24  ;;  %v5354_v62 = vpop.permute.xlu0 %5353 }
 0x399   : > { %v10720_v42 = vshll.u32 %v10356_v57, 16  ;;  %v2002_v44 = vshrl.u32 %v1998_v30, 16  ;;  %v2008_v23 = vadd.s32 %v2006_v36, %v2000_v9  ;;  %vm2009_vm5 = vc.u32 %v2007_v31, %v2003_v21  ;;  %5179 = vrot.lane.b32.xlu0 %v10599_v48, %s7528_s24  ;;  %v10741_v9 = vpop.permute.xlu2 %5224  ;;  %v5223_v48 = vpop.permute.xlu1 %5222 }
 0x39a   : > { %v10723_v7 = vshrl.u32 %v10356_v57, 16  ;;  %v10725_v32 = vrot.slane %v5872_v28, 1  ;;  %v1986_v25 = vshrl.u32 %v1985_v63, 4  ;;  %v2010_v39 = vsel %vm2009_vm5, 1, %v12123_v24 }
 0x39b   : > { %v5300_v17 = vrot.slane %v10720_v42, 3  ;;  %v2004_v52 = vshrl.u32 %v1999_v12, 16  ;;  %v2012_v56 = vadd.s32 %v2010_v39, %v2008_v23  ;;  %v4749_v30 = vor.u32 %v10456_v16, %v4745_v3 }
 0x39c   : > { %v5299_v4 = vrot.slane %v10723_v7, 2  ;;  %v5875_v0 = vsel %vm12272_vm14, %v10646_v19, %v10725_v32  ;;  %v10738_v51 = vor.u32 %v5741_v37, %v5727_v8  ;;  %v1987_v13 = vmul.u32 18, %v1986_v25  ;;  %5234 = vrot.lane.b32.xlu1 %v10698_v46, %s7529_s17  ;;  %v4107_v25 = vpop.f32.mrf.mxu0 }
 0x39d   : > { %v4753_v22 = vrot.slane %v10552_v11, 1  ;;  %7318 = vmatmul.msk.bf16.gmra.mxu2 %vm3527_vm13, %v5875_v0  ;;  %v2013_v1 = vadd.s32 %v2012_v56, %v2002_v44  ;;  %v5586_v3 = vsel %vm5580_vm1, %v5547_v15, %v10520_v38  ;;  %v10751_v19 = vadd.s32 224, %v8933_v50 }
 0x39e   : > { %v10746_v16 = vor.u32 %v5300_v17, %v5299_v4  ;;  %v1988_v8 = vsub.s32 %v10611_v33, %v1987_v13  ;;  %v5473_v12 = vsel %vm3605_vm7, %v10607_v60, %v4906_v2  ;;  %v5625_v37 = vsel %vm5619_vm3, %v5586_v3, %v5223_v48 }
 0x39f   : > { %v5039_v27 = vrot.slane %v10723_v7, 1  ;;  %v2014_v20 = vadd.s32 %v2013_v1, %v2004_v52  ;;  %vm12273_vm2 = vsmask.f32 5376  ;;  %v10762_v31 = vsel %vm5658_vm4, %v5625_v37, %v5354_v62 }
 0x3a0   : > { %v5302_v21 = vsel %vm12273_vm2, %v10589_v58, %v10746_v16  ;;  %v5040_v38 = vrot.slane %v10720_v42, 2  ;;  %vm2278_vm6 = vcmp.ne.s32.totalorder %v1988_v8, 0  ;;  %vm2314_vm12 = vcmp.lt.s32.totalorder %v1988_v8, 0  ;;  %v5092_v52 = vpop.permute.xlu0 %5091 }
 0x3a1   : > { %v2386_v33 = vadd.s32 18, %v1988_v8  ;;  %5365 = vrot.lane.b32.xlu2 %v5302_v21, %s7530_s25  ;;  %v4883_v60 = vrot.slane %v10356_v57, 1  ;;  %vm2350_vm8 = vmand %vm2314_vm12, %vm2278_vm6  ;;  %v2015_v2 = vshrl.u32 %v2014_v20, 4  ;;  %v5744_v15 = vshll.u32 %v10762_v31, 16  ;;  %v10788_v56 = vpop.permute.xlu2 %5171 }
 0x3a2   : > { %v2023_v28 = vand.u32 65535, %v10751_v19  ;;  %v2024_v58 = vshrl.u32 %v10751_v19, 16  ;;  %v4154_v36 = vmax.f32 %v10706_v5, 0.0  ;;  %v4754_v44 = vsel %vm12274_vm0, %v4749_v30, %v4753_v22 }
 0x3a3   : > { %v2422_v63 = vsel %vm2350_vm8, %v2386_v33, %v1988_v8  ;;  %v10776_v23 = vsel %vm3683_vm15, %v5473_v12, %v10642_v40  ;;  %v2016_v39 = vmul.u32 18, %v2015_v2  ;;  %4839 = vrot.lane.b32.xlu0 %v4754_v44, %s7520_s15  ;;  %v10779_v17 = vor.u32 %v5040_v38, %v5039_v27 }
 0x3a4   : > { %vm2458_vm11 = vcmp.ge.s32.totalorder %v2422_v63, 1  ;;  %vm2494_vm10 = vcmp.lt.s32.totalorder %v2422_v63, 17  ;;  %vm12275_vm14 = vcmask 1046528   ;;  %v2026_v40 = vmul.u32 14564, %v2023_v28  ;;  %4917 = vrot.lane.b32.xlu1 %v10663_v43, %s7526_s21 }
 0x3a5   : > { %vm2530_vm5 = vmand %vm2458_vm11, %vm2494_vm10  ;;  %v10786_v5 = vsel %vm12275_vm14, %v4881_v54, %v4883_v60  ;;  %v2027_v30 = vmul.u32 58254, %v2023_v28  ;;  %v10790_v4 = vmul.u32 14564, %v2024_v58  ;;  %v2017_v13 = vsub.s32 %v10655_v59, %v2016_v39  ;;  %v5170_v54 = vpop.permute.xlu1 %5169 }
 0x3a6   : > { %v4261_v0 = vsel %vm2530_vm5, %v4153_v45, 0.0  ;;  %v10798_v6 = vadd.f32 %v10703_v14, %v4107_v25  ;;  %v10800_v62 = vrot.slane %v5744_v15, 1  ;;  %v2029_v48 = vmul.u32 58254, %v2024_v58 }
 0x3a7   : > { %v4297_v1 = vpack.c.bf16 %v4261_v0, %v4261_v0  ;;  %v2030_v3 = vshll.u32 %v2027_v30, 16  ;;  %v10803_v8 = vshll.u32 %v10503_v29, 16  ;;  %vm2279_vm2 = vcmp.ne.s32.totalorder %v2017_v13, 0 }
 0x3a8   : > { %vm2315_vm6 = vcmp.lt.s32.totalorder %v2017_v13, 0  ;;  %v2387_v61 = vadd.s32 18, %v2017_v13  ;;  %v2032_v59 = vshll.u32 %v10790_v4, 16  ;;  %vm12276_vm8 = vsmask.f32 6400  ;;  %v10828_v28 = vpop.permute.xlu0 %4962 }
 0x3a9   : > { %v4420_v45 = vrot.slane %v4297_v1, 6  ;;  %vm2351_vm12 = vmand %vm2315_vm6, %vm2279_vm2  ;;  %v5042_v43 = vsel %vm12276_vm8, %v10667_v49, %v10779_v17  ;;  %4972 = vrot.lane.b32.xlu2 %v10786_v5, %s7524_s19  ;;  %vm2034_vm0 = vc.u32 %v2026_v40, %v2030_v3  ;;  %v2036_v12 = vadd.s32 %v2030_v3, %v2026_v40  ;;  %v4832_v58 = vpop.permute.xlu2 %4831 }
 0x3aa   : > { %v2423_v37 = vsel %vm2351_vm12, %v2387_v61, %v2017_v13  ;;  %v2035_v27 = vsel %vm2034_vm0, 1, %v12123_v24  ;;  %vm12277_vm11 = vsmask.f32 7424  ;;  %v10816_v21 = vshrl.u32 %v10503_v29, 16 }
 0x3ab   : > { %v5747_v20 = vsel %vm12277_vm11, %v10738_v51, %v10800_v62  ;;  %v4421_v49 = vsel %vm7642_vm9, %v4419_v10, %v4420_v45  ;;  %vm2459_vm10 = vcmp.ge.s32.totalorder %v2423_v37, 1  ;;  %vm2495_vm5 = vcmp.lt.s32.totalorder %v2423_v37, 17  ;;  %5103 = vrot.lane.b32.xlu0 %v5042_v43, %s7525_s20 }
 0x3ac   : > { %v2031_v38 = vshrl.u32 %v2027_v30, 16  ;;  %6135 = vmatmul.bf16.gmra.mxu1 %v5747_v20  ;;  %vm12278_vm14 = vcmask 125952   ;;  %vm2531_vm2 = vmand %vm2459_vm10, %vm2495_vm5  ;;  %v2037_v33 = vadd.s32 %v2035_v27, %v2029_v48  ;;  %vm2038_vm6 = vc.u32 %v2036_v12, %v2032_v59  ;;  %5181 = vrot.lane.b32.xlu1 %v10698_v46, %s7528_s24  ;;  %v4109_v12 = vpop.f32.mrf.mxu0 }
 0x3ad   : > { %4513 = vst.msk [vmem:[#allocation3 + $0x78] sm:$0xf] %vm12278_vm14, %v4421_v49  ;;  %v5303_v51 = vrot.slane %v10816_v21, 2  ;;  %v5304_v2 = vrot.slane %v10803_v8, 3  ;;  %v4262_v15 = vsel %vm2531_vm2, %v4154_v36, 0.0  ;;  %v2039_v26 = vsel %vm2038_vm6, 1, %v12123_v24  ;;  %v4830_v46 = vpop.permute.xlu1 %4829  ;;  %vm12281_vm0 = vmmov %vm12278_vm14 }
 0x3ae   : > { %v5147_v10 = vrot.slane %v10503_v29, 2  ;;  %v10831_v63 = vadd.s32 232, %v8933_v50  ;;  %v4298_v44 = vpack.c.bf16 %v4262_v15, %v4262_v15  ;;  %v5756_v25 = vshrl.u32 %v10762_v31, 16 }
 0x3af   : > { %v2033_v39 = vshrl.u32 %v10790_v4, 16  ;;  %v2041_v40 = vadd.s32 %v2039_v26, %v2037_v33  ;;  %v10837_v36 = vor.u32 %v5304_v2, %v5303_v51  ;;  %v4761_v13 = vrot.slane %v10720_v42, 1  ;;  %v7494_v2 = vld [vmem:[#allocation3 + $0x30] sm:$0xff] }
 0x3b0   : > { %v2052_v30 = vand.u32 65535, %v10831_v63  ;;  %v2053_v0 = vshrl.u32 %v10831_v63, 16  ;;  %v4422_v1 = vrot.slane %v4420_v45, 4  ;;  %v10842_v48 = vrot.slane %v4298_v44, 6  ;;  %v5356_v15 = vpop.permute.xlu0 %5355 }
 0x3b1   : > { %v2042_v3 = vadd.s32 %v2041_v40, %v2031_v38  ;;  %vm12279_vm12 = vcmask 1045504   ;;  %vm12280_vm8 = vcmask 523264   ;;  %vm12282_vm11 = vsmask.f32 5376  ;;  %v10877_v26 = vpop.permute.xlu2 %5095 }
 0x3b2   : > { %v10849_v4 = vsel %vm12279_vm12, %v5145_v41, %v5147_v10  ;;  %v5549_v61 = vsel %vm12280_vm8, %v10776_v23, %v5092_v52  ;;  %v2055_v59 = vmul.u32 14564, %v2052_v30  ;;  %v2056_v43 = vmul.u32 58254, %v2052_v30 }
 0x3b3   : > { %5236 = vrot.lane.b32.xlu2 %v10849_v4, %s7529_s17  ;;  %v2057_v45 = vmul.u32 14564, %v2053_v0  ;;  %v4424_v37 = vsel %vm7642_vm9, %v4422_v1, %v10842_v48  ;;  %v2043_v27 = vadd.s32 %v2042_v3, %v2033_v39  ;;  %v5588_v20 = vsel %vm5580_vm1, %v5549_v61, %v5170_v54 }
 0x3b4   : > { %v4757_v41 = vor.u32 %v10555_v53, %v4753_v22  ;;  %4514 = vst.msk [vmem:[#allocation3 + $0x7c] sm:$0xf] %vm12281_vm0, %v4424_v37  ;;  %v5306_v23 = vsel %vm12282_vm11, %v10746_v16, %v10837_v36  ;;  %v2058_v52 = vmul.u32 58254, %v2053_v0  ;;  %v2059_v49 = vshll.u32 %v2056_v43, 16 }
 0x3b5   : > { %v2061_v38 = vshll.u32 %v2057_v45, 16  ;;  %v2044_v33 = vshrl.u32 %v2043_v27, 4  ;;  %v4155_v51 = vmax.f32 %v10798_v6, 0.0  ;;  %5367 = vrot.lane.b32.xlu0 %v5306_v23, %s7530_s25  ;;  %v10869_v54 = vsel %vm3527_vm13, %v7494_v2, %v4832_v58  ;;  %v10896_v27 = vpop.permute.xlu1 %5093 }
 0x3b6   : > { %v10872_v11 = vadd.f32 %v10703_v14, %v4109_v12  ;;  %v2060_v53 = vshrl.u32 %v2056_v43, 16  ;;  %vm2063_vm10 = vc.u32 %v2055_v59, %v2059_v49  ;;  %v2065_v22 = vadd.s32 %v2059_v49, %v2055_v59 }
 0x3b7   : > { %vm12283_vm5 = vsmask.f32 7424  ;;  %v2045_v6 = vmul.u32 18, %v2044_v33  ;;  %v2064_v44 = vsel %vm2063_vm10, 1, %v12123_v24  ;;  %v4885_v58 = vrot.slane %v10503_v29, 1 }
 0x3b8   : > { %v4762_v16 = vsel %vm12283_vm5, %v4757_v41, %v4761_v13  ;;  %v5627_v39 = vsel %vm5619_vm3, %v5588_v20, %v10741_v9  ;;  %v2066_v40 = vadd.s32 %v2064_v44, %v2058_v52  ;;  %vm2067_vm14 = vc.u32 %v2065_v22, %v2061_v38  ;;  %v10922_v2 = vpop.permute.xlu0 %5226 }
 0x3b9   : > { %4841 = vrot.lane.b32.xlu1 %v4762_v16, %s7520_s15  ;;  %v10885_v30 = vsel %vm5658_vm4, %v5627_v39, %v5356_v15  ;;  %v5043_v0 = vrot.slane %v10816_v21, 1  ;;  %v4425_v1 = vrot.slane %v10842_v48, 4  ;;  %v2046_v3 = vsub.s32 %v10751_v19, %v2045_v6  ;;  %v10941_v16 = vpop.permute.xlu2 %4966 }
 0x3ba   : > { %v2068_v61 = vsel %vm2067_vm14, 1, %v12123_v24  ;;  %v5759_v59 = vshll.u32 %v10885_v30, 16  ;;  %v2062_v43 = vshrl.u32 %v2057_v45, 16  ;;  %v4156_v37 = vmax.f32 %v10872_v11, 0.0  ;;  %v7495_v45 = vld [vmem:[#allocation3 + $0x28] sm:$0xff] }
 0x3bb   : > { %v2070_v12 = vadd.s32 %v2068_v61, %v2066_v40  ;;  %4919 = vrot.lane.b32.xlu2 %v10786_v5, %s7526_s21  ;;  %v5044_v9 = vrot.slane %v10803_v8, 2  ;;  %vm2280_vm2 = vcmp.ne.s32.totalorder %v2046_v3, 0  ;;  %vm2316_vm6 = vcmp.lt.s32.totalorder %v2046_v3, 0  ;;  %v10898_v20 = vld [vmem:[#allocation3 + $0x78] sm:$0xff] }
 0x3bc   : > { %v2388_v48 = vadd.s32 18, %v2046_v3  ;;  %v10900_v19 = vrot.slane %v5759_v59, 1  ;;  %vm2352_vm12 = vmand %vm2316_vm6, %vm2280_vm2  ;;  %v5437_v23 = vsel %vm3527_vm13, %v7495_v45, %v4830_v46  ;;  %vm12284_vm8 = vcmask 1046528  }
 0x3bd   : > { %v2071_v41 = vadd.s32 %v2070_v12, %v2060_v53  ;;  %v10908_v5 = vsel %vm12284_vm8, %v4883_v60, %v4885_v58  ;;  %v10910_v52 = vor.u32 %v5044_v9, %v5043_v0  ;;  %v5413_v38 = vrot.slane %v10898_v20, 3 }
 0x3be   : > { %v2424_v49 = vsel %vm2352_vm12, %v2388_v48, %v2046_v3  ;;  %4974 = vrot.lane.b32.xlu0 %v10908_v5, %s7524_s19  ;;  %v5883_v33 = vshrl.u32 %v10713_v34, 16  ;;  %v5758_v46 = vor.u32 %v5756_v25, %v10800_v62  ;;  %vm12285_vm10 = vsmask.f32 6400  ;;  %v10969_v48 = vpop.permute.xlu1 %4964 }
 0x3bf   : > { %vm2460_vm0 = vcmp.ge.s32.totalorder %v2424_v49, 1  ;;  %vm2496_vm11 = vcmp.lt.s32.totalorder %v2424_v49, 17  ;;  %v2072_v57 = vadd.s32 %v2071_v41, %v2062_v43  ;;  %v5046_v60 = vsel %vm12285_vm10, %v10779_v17, %v10910_v52 }
 0x3c0   : > { %vm2532_vm5 = vmand %vm2460_vm0, %vm2496_vm11  ;;  %v5475_v53 = vsel %vm3605_vm7, %v5437_v23, %v10687_v18  ;;  %vm12286_vm14 = vcmask 1044480   ;;  %vm12287_vm2 = vsmask.f32 7424  ;;  %v10937_v17 = vadd.s32 240, %v8933_v50 }
 0x3c1   : > { %v10931_v34 = vsel %vm12286_vm14, %v5411_v47, %v5413_v38  ;;  %5105 = vrot.lane.b32.xlu1 %v5046_v60, %s7525_s20  ;;  %v5762_v31 = vsel %vm12287_vm2, %v5758_v46, %v10900_v19  ;;  %v4263_v62 = vsel %vm2532_vm5, %v4155_v51, 0.0  ;;  %v2073_v25 = vshrl.u32 %v2072_v57, 4  ;;  %vm12288_vm6 = vmmov %vm12287_vm2 }
 0x3c2   : > { %v5887_v22 = vshll.u32 %v10931_v34, 16  ;;  %v5149_v18 = vrot.slane %v10678_v55, 2  ;;  %6140 = vmatmul.bf16.gmra.mxu1 %v5762_v31  ;;  %v4299_v15 = vpack.c.bf16 %v4263_v62, %v4263_v62  ;;  %v5885_v47 = vor.u32 %v5883_v33, %v10725_v32 }
 0x3c3   : > { %v2081_v6 = vand.u32 65535, %v10937_v17  ;;  %v2082_v44 = vshrl.u32 %v10937_v17, 16  ;;  %v2074_v39 = vmul.u32 18, %v2073_v25  ;;  %v5771_v51 = vshrl.u32 %v10885_v30, 16  ;;  %5183 = vrot.lane.b32.xlu2 %v10849_v4, %s7528_s24 }
 0x3c4   : > { %v10946_v40 = vrot.slane %v5887_v22, 1  ;;  %v10952_v0 = vshrl.u32 %v10678_v55, 16  ;;  %v10954_v3 = vrot.slane %v4299_v15, 6  ;;  %vm12289_vm12 = vcmask 1045504  }
 0x3c5   : > { %v2084_v61 = vmul.u32 14564, %v2081_v6  ;;  %v2085_v59 = vmul.u32 58254, %v2081_v6  ;;  %v2086_v32 = vmul.u32 14564, %v2082_v44  ;;  %v2075_v43 = vsub.s32 %v10831_v63, %v2074_v39  ;;  %v4112_v39 = vpop.f32.mrf.mxu0 }
 0x3c6   : > { %v5890_v12 = vsel %vm12288_vm6, %v5885_v47, %v10946_v40  ;;  %v10964_v9 = vsel %vm12289_vm12, %v5147_v10, %v5149_v18  ;;  %v10967_v4 = vshll.u32 %v10678_v55, 16  ;;  %v4427_v41 = vsel %vm7642_vm9, %v4425_v1, %v10954_v3  ;;  %v10989_v47 = vpop.permute.xlu2 %5359 }
 0x3c7   : > { %7319 = vmatmul.msk.bf16.gmra.mxu2 %vm3527_vm13, %v5890_v12  ;;  %v5513_v63 = vsel %vm3683_vm15, %v5475_v53, %v10828_v28  ;;  %5238 = vrot.lane.b32.xlu0 %v10964_v9, %s7529_s17  ;;  %v2087_v45 = vmul.u32 58254, %v2082_v44  ;;  %v2088_v10 = vshll.u32 %v2085_v59, 16  ;;  %vm12290_vm8 = vcmask 125952   ;;  %v4910_v28 = vpop.permute.xlu0 %4909 }
 0x3c8   : > { %4515 = vst.msk [vmem:[#allocation3 + $0x80] sm:$0xf] %vm12290_vm8, %v4427_v41  ;;  %vm2281_vm0 = vcmp.ne.s32.totalorder %v2075_v43, 0  ;;  %vm2317_vm11 = vcmp.lt.s32.totalorder %v2075_v43, 0  ;;  %v2389_v23 = vadd.s32 18, %v2075_v43  ;;  %v2090_v49 = vshll.u32 %v2086_v32, 16 }
 0x3c9   : > { %vm2353_vm10 = vmand %vm2317_vm11, %vm2281_vm0  ;;  %vm12291_vm5 = vcmask 523264   ;;  %vm2092_vm14 = vc.u32 %v2084_v61, %v2088_v10  ;;  %v2094_v33 = vadd.s32 %v2088_v10, %v2084_v61  ;;  %v5307_v46 = vrot.slane %v10952_v0, 2 }
 0x3ca   : > { %v5551_v1 = vsel %vm12291_vm5, %v5513_v63, %v10896_v27  ;;  %v2425_v57 = vsel %vm2353_vm10, %v2389_v23, %v2075_v43  ;;  %v2089_v60 = vshrl.u32 %v2085_v59, 16  ;;  %v2093_v53 = vsel %vm2092_vm14, 1, %v12123_v24 }
 0x3cb   : > { %v5308_v31 = vrot.slane %v10967_v4, 3  ;;  %vm2461_vm2 = vcmp.ge.s32.totalorder %v2425_v57, 1  ;;  %vm2497_vm6 = vcmp.lt.s32.totalorder %v2425_v57, 17  ;;  %v2095_v62 = vadd.s32 %v2093_v53, %v2087_v45 }
 0x3cc   : > { %vm2096_vm12 = vc.u32 %v2094_v33, %v2090_v49  ;;  %vm2533_vm8 = vmand %vm2461_vm2, %vm2497_vm6  ;;  %v2091_v25 = vshrl.u32 %v2086_v32, 16  ;;  %v4769_v15 = vrot.slane %v10803_v8, 1  ;;  %v4765_v61 = vor.u32 %v10723_v7, %v4761_v13 }
 0x3cd   : > { %v2097_v22 = vsel %vm2096_vm12, 1, %v12123_v24  ;;  %v10986_v27 = vor.u32 %v5308_v31, %v5307_v46  ;;  %v4264_v6 = vsel %vm2533_vm8, %v4156_v37, 0.0  ;;  %v10997_v59 = vadd.s32 248, %v8933_v50 }
 0x3ce   : > { %v2099_v44 = vadd.s32 %v2097_v22, %v2095_v62  ;;  %v4428_v32 = vrot.slane %v10954_v3, 4  ;;  %v4300_v43 = vpack.c.bf16 %v4264_v6, %v4264_v6  ;;  %v5590_v12 = vsel %vm5580_vm1, %v5551_v1, %v10788_v56 }
 0x3cf   : > { %vm12292_vm0 = vsmask.f32 5376  ;;  %4921 = vrot.lane.b32.xlu0 %v10908_v5, %s7526_s21  ;;  %vm12293_vm11 = vsmask.f32 7424  ;;  %v2110_v7 = vand.u32 65535, %v10997_v59  ;;  %v2111_v13 = vshrl.u32 %v10997_v59, 16  ;;  %v5174_v53 = vpop.permute.xlu0 %5173 }
 0x3d0   : > { %v5310_v11 = vsel %vm12292_vm0, %v10837_v36, %v10986_v27  ;;  %v2100_v37 = vadd.s32 %v2099_v44, %v2089_v60  ;;  %v4770_v42 = vsel %vm12293_vm11, %v4765_v61, %v4769_v15  ;;  %v11013_v3 = vrot.slane %v4300_v43, 6  ;;  %v5358_v36 = vpop.permute.xlu1 %5357  ;;  %v4114_v43 = vpop.f32.mrf.mxu0 }
 0x3d1   : > { %5369 = vrot.lane.b32.xlu1 %v5310_v11, %s7530_s25  ;;  %4843 = vrot.lane.b32.xlu2 %v4770_v42, %s7520_s15  ;;  %v5477_v56 = vsel %vm3605_vm7, %v10869_v54, %v4910_v28  ;;  %v5047_v41 = vrot.slane %v10952_v0, 1  ;;  %v5048_v5 = vrot.slane %v10967_v4, 2  ;;  %v2113_v45 = vmul.u32 14564, %v2110_v7 }
 0x3d2   : > { %v2101_v63 = vadd.s32 %v2100_v37, %v2091_v25  ;;  %v2114_v10 = vmul.u32 58254, %v2110_v7  ;;  %v2115_v23 = vmul.u32 14564, %v2111_v13  ;;  %v4430_v49 = vsel %vm7642_vm9, %v4428_v32, %v11013_v3 }
 0x3d3   : > { %v5773_v1 = vor.u32 %v5771_v51, %v10900_v19  ;;  %v5629_v54 = vsel %vm5619_vm3, %v5590_v12, %v10922_v2  ;;  %v4887_v33 = vrot.slane %v10678_v55, 1  ;;  %vm12294_vm10 = vcmask 125952  }
 0x3d4   : > { %4516 = vst.msk [vmem:[#allocation3 + $0x84] sm:$0xf] %vm12294_vm10, %v4430_v49  ;;  %v2102_v46 = vshrl.u32 %v2101_v63, 4  ;;  %v2116_v28 = vmul.u32 58254, %v2111_v13  ;;  %v2117_v57 = vshll.u32 %v2114_v10, 16  ;;  %v2119_v60 = vshll.u32 %v2115_v23, 16 }
 0x3d5   : > { %v4113_v31 = vadd.f32 %v10703_v14, %v4112_v39  ;;  %v5515_v62 = vsel %vm3683_vm15, %v5477_v56, %v10969_v48  ;;  %v11034_v30 = vsel %vm5658_vm4, %v5629_v54, %v5358_v36  ;;  %v11036_v19 = vor.u32 %v5048_v5, %v5047_v41  ;;  %v11050_v39 = vpop.permute.xlu2 %5230 }
 0x3d6   : > { %v2103_v2 = vmul.u32 18, %v2102_v46  ;;  %vm2121_vm5 = vc.u32 %v2113_v45, %v2117_v57  ;;  %v2123_v51 = vadd.s32 %v2117_v57, %v2113_v45  ;;  %v5774_v25 = vshll.u32 %v11034_v30, 16 }
 0x3d7   : > { %v2118_v22 = vshrl.u32 %v2114_v10, 16  ;;  %v2122_v6 = vsel %vm2121_vm5, 1, %v12123_v24  ;;  %vm12295_vm14 = vcmask 1046528   ;;  %vm12296_vm2 = vsmask.f32 6400  ;;  %5185 = vrot.lane.b32.xlu0 %v10964_v9, %s7528_s24 }
 0x3d8   : > { %v11045_v44 = vsel %vm12295_vm14, %v4885_v58, %v4887_v33  ;;  %v5050_v48 = vsel %vm12296_vm2, %v10910_v52, %v11036_v19  ;;  %v2104_v61 = vsub.s32 %v10937_v17, %v2103_v2  ;;  %v2124_v32 = vadd.s32 %v2122_v6, %v2116_v28  ;;  %v5229_v17 = vpop.permute.xlu1 %5228 }
 0x3d9   : > { %vm2125_vm6 = vc.u32 %v2123_v51, %v2119_v60  ;;  %4976 = vrot.lane.b32.xlu1 %v11045_v44, %s7524_s19  ;;  %v11055_v12 = vrot.slane %v5774_v25, 1  ;;  %v4157_v29 = vmax.f32 %v4113_v31, 0.0  ;;  %v2120_v58 = vshrl.u32 %v2115_v23, 16  ;;  %5107 = vrot.lane.b32.xlu2 %v5050_v48, %s7525_s20 }
 0x3da   : > { %v2126_v11 = vsel %vm2125_vm6, 1, %v12123_v24  ;;  %v5151_v52 = vrot.slane %v10898_v20, 2  ;;  %vm2282_vm12 = vcmp.ne.s32.totalorder %v2104_v61, 0  ;;  %vm2318_vm8 = vcmp.lt.s32.totalorder %v2104_v61, 0 }
 0x3db   : > { %v2390_v37 = vadd.s32 18, %v2104_v61  ;;  %v2128_v42 = vadd.s32 %v2126_v11, %v2124_v32  ;;  %vm2354_vm0 = vmand %vm2318_vm8, %vm2282_vm12  ;;  %v11063_v7 = vadd.f32 %v10703_v14, %v4114_v43  ;;  %v11065_v13 = vld [vmem:[#allocation3 + $0x80] sm:$0xff]  ;;  %vm12297_vm11 = vcmask 523264  }
 0x3dc   : > { %v5553_v9 = vsel %vm12297_vm11, %v5515_v62, %v10877_v26  ;;  %vm12298_vm10 = vsmask.f32 7424  ;;  %v4773_v36 = vor.u32 %v10816_v21, %v4769_v15  ;;  %v4777_v45 = vrot.slane %v10967_v4, 1  ;;  %v4834_v15 = vpop.permute.xlu0 %4833 }
 0x3dd   : > { %v5777_v56 = vsel %vm12298_vm10, %v5773_v1, %v11055_v12  ;;  %v2426_v41 = vsel %vm2354_vm0, %v2390_v37, %v2104_v61  ;;  %v2129_v5 = vadd.s32 %v2128_v42, %v2118_v22  ;;  %v5592_v63 = vsel %vm5580_vm1, %v5553_v9, %v5174_v53  ;;  %vm12300_vm12 = vmmov %vm12298_vm10 }
 0x3de   : > { %6145 = vmatmul.bf16.gmra.mxu1 %v5777_v56  ;;  %vm2462_vm5 = vcmp.ge.s32.totalorder %v2426_v41, 1  ;;  %vm2498_vm14 = vcmp.lt.s32.totalorder %v2426_v41, 17  ;;  %v5415_v10 = vrot.slane %v11065_v13, 3  ;;  %v5631_v26 = vsel %vm5619_vm3, %v5592_v63, %v5229_v17  ;;  %vm12302_vm0 = vmmov %vm12298_vm10 }
 0x3df   : > { %vm2534_vm2 = vmand %vm2462_vm5, %vm2498_vm14  ;;  %v2130_v23 = vadd.s32 %v2129_v5, %v2120_v58  ;;  %v5898_v49 = vshrl.u32 %v10931_v34, 16  ;;  %vm12299_vm6 = vcmask 1045504   ;;  %v4778_v21 = vsel %vm12300_vm12, %v4773_v36, %v4777_v45  ;;  %v7496_v58 = vld [vmem:[#allocation3 + $0x38] sm:$0xff] }
 0x3e0   : > { %v11084_v8 = vsel %vm12299_vm6, %v5149_v18, %v5151_v52  ;;  %v4265_v1 = vsel %vm2534_vm2, %v4157_v29, 0.0  ;;  %vm12301_vm8 = vcmask 1044480   ;;  %v11097_v34 = vshll.u32 %v10898_v20, 16  ;;  %v11102_v18 = vpop.permute.xlu2 %4913  ;;  %4845 = vrot.lane.b32.xlu0 %v4778_v21, %s7520_s15  ;;  %v4912_v2 = vpop.permute.xlu1 %4911 }
 0x3e1   : > { %v11094_v54 = vsel %vm12301_vm8, %v5413_v38, %v5415_v10  ;;  %v11100_v46 = vshrl.u32 %v10898_v20, 16  ;;  %v4301_v28 = vpack.c.bf16 %v4265_v1, %v4265_v1  ;;  %v2131_v57 = vshrl.u32 %v2130_v23, 4  ;;  %5240 = vrot.lane.b32.xlu1 %v11084_v8, %s7529_s17 }
 0x3e2   : > { %v5902_v60 = vshll.u32 %v11094_v54, 16  ;;  %v11109_v53 = vsel %vm5658_vm4, %v5631_v26, %v10989_v47  ;;  %v4431_v38 = vrot.slane %v11013_v3, 4  ;;  %v5312_v62 = vrot.slane %v11097_v34, 3 }
 0x3e3   : > { %v5311_v31 = vrot.slane %v11100_v46, 2  ;;  %v5051_v51 = vrot.slane %v11100_v46, 1  ;;  %v11116_v25 = vrot.slane %v4301_v28, 6  ;;  %v2132_v22 = vmul.u32 18, %v2131_v57 }
 0x3e4   : > { %v5900_v6 = vor.u32 %v5898_v49, %v10946_v40  ;;  %v11119_v48 = vrot.slane %v5902_v60, 1  ;;  %v5789_v47 = vshll.u32 %v11109_v53, 16  ;;  %v5052_v32 = vrot.slane %v11097_v34, 2  ;;  %v5098_v63 = vpop.permute.xlu0 %5097 }
 0x3e5   : > { %v5313_v61 = vor.u32 %v5312_v62, %v5311_v31  ;;  %v4433_v3 = vsel %vm7642_vm9, %v4431_v38, %v11116_v25  ;;  %v2133_v43 = vsub.s32 %v10997_v59, %v2132_v22  ;;  %v5441_v11 = vsel %vm3527_vm13, %v7496_v58, %v4834_v15 }
 0x3e6   : > { %v5905_v29 = vsel %vm12302_vm0, %v5900_v6, %v11119_v48  ;;  %vm12303_vm11 = vcmask 125952   ;;  %v4158_v40 = vmax.f32 %v11063_v7, 0.0  ;;  %vm12304_vm10 = vsmask.f32 5376 }
 0x3e7   : > { %4517 = vst.msk [vmem:[#allocation3 + $0x88] sm:$0xf] %vm12303_vm11, %v4433_v3  ;;  %7320 = vmatmul.msk.bf16.gmra.mxu2 %vm3527_vm13, %v5905_v29  ;;  %v5314_v17 = vsel %vm12304_vm10, %v10986_v27, %v5313_v61  ;;  %v5479_v37 = vsel %vm3605_vm7, %v5441_v11, %v4912_v2  ;;  %v11136_v42 = vor.u32 %v5052_v32, %v5051_v51  ;;  %vm2283_vm5 = vcmp.ne.s32.totalorder %v2133_v43, 0 }
 0x3e8   : > { %vm2319_vm14 = vcmp.lt.s32.totalorder %v2133_v43, 0  ;;  %v2391_v59 = vadd.s32 18, %v2133_v43  ;;  %v5786_v9 = vshrl.u32 %v11034_v30, 16  ;;  %5371 = vrot.lane.b32.xlu2 %v5314_v17, %s7530_s25  ;;  %vm12305_vm6 = vsmask.f32 6400  ;;  %v11158_v26 = vpop.permute.xlu2 %5177 }
 0x3e9   : > { %vm2355_vm2 = vmand %vm2319_vm14, %vm2283_vm5  ;;  %v5054_v7 = vsel %vm12305_vm6, %v11036_v19, %v11136_v42  ;;  %v11143_v56 = vrot.slane %v5789_v47, 1  ;;  %v11146_v27 = vshll.u32 %v11065_v13, 16  ;;  %v11149_v36 = vshrl.u32 %v11065_v13, 16  ;;  %4923 = vrot.lane.b32.xlu1 %v11045_v44, %s7526_s21 }
 0x3ea   : > { %v2427_v41 = vsel %vm2355_vm2, %v2391_v59, %v2133_v43  ;;  %v5788_v5 = vor.u32 %v5786_v9, %v11055_v12  ;;  %5109 = vrot.lane.b32.xlu0 %v5054_v7, %s7525_s20  ;;  %v4889_v30 = vrot.slane %v10898_v20, 1  ;;  %v5517_v19 = vsel %vm3683_vm15, %v5479_v37, %v10941_v16  ;;  %v5176_v12 = vpop.permute.xlu1 %5175 }
 0x3eb   : > { %vm2463_vm12 = vcmp.ge.s32.totalorder %v2427_v41, 1  ;;  %vm2499_vm8 = vcmp.lt.s32.totalorder %v2427_v41, 17  ;;  %v5315_v23 = vrot.slane %v11149_v36, 2  ;;  %v5316_v49 = vrot.slane %v11146_v27, 3 }
 0x3ec   : > { %vm2535_vm0 = vmand %vm2463_vm12, %vm2499_vm8  ;;  %vm12306_vm11 = vsmask.f32 7424  ;;  %v11167_v1 = vadd.s32 256, %v8933_v50  ;;  %v4434_v16 = vrot.slane %v11116_v25, 4  ;;  %vm12307_vm10 = vcmask 1046528  }
 0x3ed   : > { %v4266_v21 = vsel %vm2535_vm0, %v4158_v40, 0.0  ;;  %v5792_v44 = vsel %vm12306_vm11, %v5788_v5, %v11143_v56  ;;  %v11164_v15 = vor.u32 %v5316_v49, %v5315_v23  ;;  %v11173_v57 = vsel %vm12307_vm10, %v4887_v33, %v4889_v30  ;;  %vm12312_vm12 = vmmov %vm12306_vm11  ;;  %v7497_v23 = vld [vmem:[#allocation3 + $0x40] sm:$0xff] }
 0x3ee   : > { %v4302_v28 = vpack.c.bf16 %v4266_v21, %v4266_v21  ;;  %vm12308_vm5 = vcmask 523264   ;;  %6150 = vmatmul.bf16.gmra.mxu1 %v5792_v44  ;;  %v5153_v31 = vrot.slane %v11065_v13, 2  ;;  %v2139_v62 = vand.u32 65535, %v11167_v1  ;;  %vm12313_vm8 = vmmov %vm12307_vm10 }
 0x3ef   : > { %v5555_v60 = vsel %vm12308_vm5, %v5517_v19, %v5098_v63  ;;  %v2140_v2 = vshrl.u32 %v11167_v1, 16  ;;  %v4781_v55 = vor.u32 %v10952_v0, %v4777_v45  ;;  %v4785_v33 = vrot.slane %v11097_v34, 1  ;;  %vm12315_vm5 = vmmov %vm12312_vm12 }
 0x3f0   : > { %v5594_v38 = vsel %vm5580_vm1, %v5555_v60, %v5176_v12  ;;  %v11180_v51 = vrot.slane %v4302_v28, 6  ;;  %4978 = vrot.lane.b32.xlu2 %v11173_v57, %s7524_s19  ;;  %v4891_v25 = vrot.slane %v11065_v13, 1  ;;  %vm12309_vm14 = vsmask.f32 5376  ;;  %v11220_v37 = vpop.permute.xlu2 %4837 }
 0x3f1   : > { %v5318_v22 = vsel %vm12309_vm14, %v5313_v61, %v11164_v15  ;;  %v2142_v6 = vmul.u32 14564, %v2139_v62  ;;  %v2143_v47 = vmul.u32 58254, %v2139_v62  ;;  %v2144_v32 = vmul.u32 14564, %v2140_v2  ;;  %5187 = vrot.lane.b32.xlu1 %v11084_v8, %s7528_s24 }
 0x3f2   : > { %v4436_v3 = vsel %vm7642_vm9, %v4434_v16, %v11180_v51  ;;  %5373 = vrot.lane.b32.xlu0 %v5318_v22, %s7530_s25  ;;  %v5633_v0 = vsel %vm5619_vm3, %v5594_v38, %v11050_v39  ;;  %v5055_v4 = vrot.slane %v11149_v36, 1  ;;  %v5056_v45 = vrot.slane %v11146_v27, 2  ;;  %v5362_v39 = vpop.permute.xlu0 %5361  ;;  %v4836_v59 = vpop.permute.xlu1 %4835 }
 0x3f3   : > { %vm12310_vm2 = vcmask 125952   ;;  %v5801_v61 = vshrl.u32 %v11109_v53, 16  ;;  %v2145_v43 = vmul.u32 58254, %v2140_v2  ;;  %v2146_v29 = vshll.u32 %v2143_v47, 16  ;;  %v11239_v38 = vpop.f32.mrf.mxu2 }
 0x3f4   : > { %4518 = vst.msk [vmem:[#allocation3 + $0x8c] sm:$0xf] %vm12310_vm2, %v4436_v3  ;;  %v2148_v58 = vshll.u32 %v2144_v32, 16  ;;  %v5913_v11 = vshrl.u32 %v11094_v54, 16  ;;  %vm12311_vm6 = vcmask 1045504   ;;  %v4786_v40 = vsel %vm12312_vm12, %v4781_v55, %v4785_v33  ;;  %v4117_v55 = vpop.f32.mrf.mxu0 }
 0x3f5   : > { %v11209_v8 = vsel %vm12311_vm6, %v5151_v52, %v5153_v31  ;;  %v11215_v17 = vadd.s32 264, %v8933_v50  ;;  %v11218_v53 = vsel %vm5658_vm4, %v5633_v0, %v5362_v39  ;;  %v11225_v20 = vsel %vm12313_vm8, %v4889_v30, %v4891_v25 }
 0x3f6   : > { %vm2150_vm0 = vc.u32 %v2142_v6, %v2146_v29  ;;  %v2152_v52 = vadd.s32 %v2146_v29, %v2142_v6  ;;  %v5804_v54 = vshll.u32 %v11218_v53, 16  ;;  %v11229_v7 = vor.u32 %v5056_v45, %v5055_v4 }
 0x3f7   : > { %v2151_v9 = vsel %vm2150_vm0, 1, %v12123_v24  ;;  %v2168_v41 = vand.u32 65535, %v11215_v17  ;;  %v2147_v5 = vshrl.u32 %v2143_v47, 16  ;;  %v2169_v63 = vshrl.u32 %v11215_v17, 16  ;;  %vm12319_vm0 = vmmov %vm12315_vm5 }
 0x3f8   : > { %v2153_v19 = vadd.s32 %v2151_v9, %v2145_v43  ;;  %vm2154_vm11 = vc.u32 %v2152_v52, %v2148_v58  ;;  %5242 = vrot.lane.b32.xlu2 %v11209_v8, %s7529_s17  ;;  %v5806_v30 = vrot.slane %v5804_v54, 1  ;;  %v5443_v49 = vsel %vm3527_vm13, %v7497_v23, %v4836_v59  ;;  %v11271_v54 = vpop.permute.xlu2 %5101 }
 0x3f9   : > { %v2149_v12 = vshrl.u32 %v2144_v32, 16  ;;  %v2155_v21 = vsel %vm2154_vm11, 1, %v12123_v24  ;;  %v2171_v16 = vmul.u32 14564, %v2168_v41  ;;  %v2172_v28 = vmul.u32 58254, %v2168_v41  ;;  %4847 = vrot.lane.b32.xlu1 %v4786_v40, %s7520_s15 }
 0x3fa   : > { %v2157_v44 = vadd.s32 %v2155_v21, %v2153_v19  ;;  %v11237_v60 = vmul.u32 14564, %v2169_v63  ;;  %v5915_v2 = vor.u32 %v5913_v11, %v11119_v48  ;;  %4980 = vrot.lane.b32.xlu0 %v11225_v20, %s7524_s19  ;;  %vm12314_vm10 = vsmask.f32 6400  ;;  %v4969_v45 = vpop.permute.xlu0 %4968 }
 0x3fb   : > { %v11241_v62 = vld [vmem:[#allocation3 + $0x88] sm:$0xff]  ;;  %v5058_v22 = vsel %vm12314_vm10, %v11136_v42, %v11229_v7  ;;  %v5803_v6 = vor.u32 %v5801_v61, %v11143_v56  ;;  %v5816_v47 = vshrl.u32 %v11218_v53, 16  ;;  %v2174_v3 = vmul.u32 58254, %v2169_v63 }
 0x3fc   : > { %v2158_v32 = vadd.s32 %v2157_v44, %v2147_v5  ;;  %v2175_v0 = vshll.u32 %v2172_v28, 16  ;;  %v5417_v4 = vrot.slane %v11241_v62, 3  ;;  %v5481_v48 = vsel %vm3605_vm7, %v5443_v49, %v11102_v18  ;;  %v5100_v18 = vpop.permute.xlu1 %5099 }
 0x3fd   : > { %v5807_v43 = vsel %vm12315_vm5, %v5803_v6, %v5806_v30  ;;  %v2177_v29 = vshll.u32 %v11237_v60, 16  ;;  %v11258_v42 = vadd.f32 %v10703_v14, %v4117_v55  ;;  %v5155_v56 = vrot.slane %v11241_v62, 2  ;;  %v11304_v55 = vpop.f32.mrf.mxu2 }
 0x3fe   : > { %v2159_v58 = vadd.s32 %v2158_v32, %v2149_v12  ;;  %vm2179_vm14 = vc.u32 %v2171_v16, %v2175_v0  ;;  %vm12316_vm2 = vcmask 1044480   ;;  %6155 = vmatmul.bf16.gmra.mxu1 %v5807_v43  ;;  %v2176_v11 = vshrl.u32 %v2172_v28, 16 }
 0x3ff   : > { %v11266_v61 = vsel %vm12316_vm2, %v5415_v10, %v5417_v4  ;;  %v2180_v39 = vsel %vm2179_vm14, 1, %v12123_v24  ;;  %v2181_v40 = vadd.s32 %v2175_v0, %v2171_v16  ;;  %v5519_v52 = vsel %vm3683_vm15, %v5481_v48, %v4969_v45 }
 0x400   : > { %v5917_v53 = vshll.u32 %v11266_v61, 16  ;;  %v2160_v14 = vshrl.u32 %v2159_v58, 4  ;;  %v2182_v59 = vadd.s32 %v2180_v39, %v2174_v3  ;;  %4925 = vrot.lane.b32.xlu2 %v11173_v57, %s7526_s21  ;;  %vm12317_vm6 = vcmask 523264  }
 0x401   : > { %v5557_v10 = vsel %vm12317_vm6, %v5519_v52, %v5100_v18  ;;  %vm2183_vm12 = vc.u32 %v2181_v40, %v2177_v29  ;;  %v11277_v9 = vshll.u32 %v11241_v62, 16  ;;  %v11280_v41 = vshrl.u32 %v11241_v62, 16  ;;  %5111 = vrot.lane.b32.xlu1 %v5058_v22, %s7525_s20  ;;  %v7498_v22 = vld [vmem:[#allocation3 + $0x48] sm:$0xff] }
 0x402   : > { %v11282_v5 = vrot.slane %v5917_v53, 1  ;;  %v2161_v19 = vmul.u32 18, %v2160_v14  ;;  %vm12318_vm8 = vcmask 1045504   ;;  %v2184_v57 = vsel %vm2183_vm12, 1, %v12123_v24  ;;  %v5233_v3 = vpop.permute.xlu0 %5232 }
 0x403   : > { %v11289_v63 = vsel %vm12318_vm8, %v5153_v31, %v5155_v56  ;;  %v2178_v23 = vshrl.u32 %v11237_v60, 16  ;;  %v2186_v49 = vadd.s32 %v2184_v57, %v2182_v59  ;;  %v5319_v12 = vrot.slane %v11280_v41, 2  ;;  %vm12321_vm8 = vmmov %vm12319_vm0 }
 0x404   : > { %5244 = vrot.lane.b32.xlu0 %v11289_v63, %s7529_s17  ;;  %v5320_v21 = vrot.slane %v11277_v9, 3  ;;  %v4437_v44 = vrot.slane %v11180_v51, 4  ;;  %v5920_v31 = vsel %vm12319_vm0, %v5915_v2, %v11282_v5  ;;  %v2162_v16 = vsub.s32 %v11167_v1, %v2161_v19  ;;  %v5364_v45 = vpop.permute.xlu1 %5363 }
 0x405   : > { %v5596_v28 = vsel %vm5580_vm1, %v5557_v10, %v11158_v26  ;;  %7321 = vmatmul.msk.bf16.gmra.mxu2 %vm3527_vm13, %v5920_v31  ;;  %v5818_v60 = vor.u32 %v5816_v47, %v5806_v30  ;;  %v5445_v6 = vsel %vm3527_vm13, %v7498_v22, %v11220_v37  ;;  %v2187_v32 = vadd.s32 %v2186_v49, %v2176_v11  ;;  %v4119_v30 = vpop.f32.mrf.mxu0  ;;  %v11333_v11 = vpop.permute.xlu2 %5365 }
 0x406   : > { %v4789_v2 = vor.u32 %v11100_v46, %v4785_v33  ;;  %vm2284_vm11 = vcmp.ne.s32.totalorder %v2162_v16, 0  ;;  %vm2320_vm10 = vcmp.lt.s32.totalorder %v2162_v16, 0  ;;  %v2392_v1 = vadd.s32 18, %v2162_v16 }
 0x407   : > { %v11312_v0 = vor.u32 %v5320_v21, %v5319_v12  ;;  %vm2356_vm5 = vmand %vm2320_vm10, %vm2284_vm11  ;;  %v4159_v26 = vmax.f32 %v11258_v42, 0.0  ;;  %v2188_v48 = vadd.s32 %v2187_v32, %v2178_v23  ;;  %v5635_v47 = vsel %vm5619_vm3, %v5596_v28, %v5233_v3  ;;  %v11330_v42 = vld [vmem:[%s12007_s3] ss:$0 sm:$0xff] }
 0x408   : > { %v4793_v37 = vrot.slane %v11146_v27, 1  ;;  %v2428_v43 = vsel %vm2356_vm5, %v2392_v1, %v2162_v16  ;;  %v11318_v34 = vsel %vm5658_vm4, %v5635_v47, %v5364_v45  ;;  %v4893_v46 = vrot.slane %v11241_v62, 1  ;;  %5189 = vrot.lane.b32.xlu2 %v11209_v8, %s7528_s24  ;;  %v7501_v62 = vld [vmem:[#allocation3 + $0x58] sm:$0xff] }
 0x409   : > { %v11322_v33 = vadd.s32 272, %v8933_v50  ;;  %vm2464_vm14 = vcmp.ge.s32.totalorder %v2428_v43, 1  ;;  %vm2500_vm2 = vcmp.lt.s32.totalorder %v2428_v43, 17  ;;  %v2189_v29 = vshrl.u32 %v2188_v48, 4 }
 0x40a   : > { %v5819_v58 = vshll.u32 %v11318_v34, 16  ;;  %vm2536_vm6 = vmand %vm2464_vm14, %vm2500_vm2  ;;  %v4120_v18 = vadd.f32 %v11330_v42, %v4119_v30  ;;  %vm12320_vm12 = vsmask.f32 5376  ;;  %v5059_v59 = vrot.slane %v11280_v41, 1  ;;  %v4916_v12 = vpop.permute.xlu0 %4915 }
 0x40b   : > { %v5322_v39 = vsel %vm12320_vm12, %v11164_v15, %v11312_v0  ;;  %v2197_v40 = vand.u32 65535, %v11322_v33  ;;  %v2198_v8 = vshrl.u32 %v11322_v33, 16  ;;  %v4267_v53 = vsel %vm2536_vm6, %v4159_v26, 0.0 }
 0x40c   : > { %v2190_v14 = vmul.u32 18, %v2189_v29  ;;  %5375 = vrot.lane.b32.xlu1 %v5322_v39, %s7530_s25  ;;  %v11341_v52 = vrot.slane %v5819_v58, 1  ;;  %4927 = vrot.lane.b32.xlu0 %v11225_v20, %s7526_s21  ;;  %v4303_v10 = vpack.c.bf16 %v4267_v53, %v4267_v53  ;;  %v5060_v19 = vrot.slane %v11277_v9, 2  ;;  %v4971_v32 = vpop.permute.xlu1 %4970 }
 0x40d   : > { %v2201_v57 = vmul.u32 58254, %v2197_v40  ;;  %v11347_v15 = vmul.u32 14564, %v2198_v8  ;;  %v4794_v49 = vsel %vm12321_vm8, %v4789_v2, %v4793_v37  ;;  %v2200_v31 = vmul.u32 14564, %v2197_v40  ;;  %v11378_v47 = vpop.permute.xlu2 %4972 }
 0x40e   : > { %v2191_v23 = vsub.s32 %v11215_v17, %v2190_v14  ;;  %v5822_v21 = vsel %vm12319_vm0, %v5818_v60, %v11341_v52  ;;  %v4438_v20 = vrot.slane %v4303_v10, 6  ;;  %v4160_v16 = vmax.f32 %v4120_v18, 0.0 }
 0x40f   : > { %vm12322_vm11 = vcmask 1046528   ;;  %v2204_v22 = vshll.u32 %v2201_v57, 16  ;;  %6160 = vmatmul.bf16.gmra.mxu1 %v5822_v21  ;;  %v2203_v3 = vmul.u32 58254, %v2198_v8  ;;  %v5483_v2 = vsel %vm3605_vm7, %v5445_v6, %v4916_v12 }
 0x410   : > { %v11360_v28 = vsel %vm12322_vm11, %v4891_v25, %v4893_v46  ;;  %vm2285_vm10 = vcmp.ne.s32.totalorder %v2191_v23, 0  ;;  %vm2321_vm5 = vcmp.lt.s32.totalorder %v2191_v23, 0  ;;  %v2393_v17 = vadd.s32 18, %v2191_v23  ;;  %4849 = vrot.lane.b32.xlu2 %v4794_v49, %s7520_s15 }
 0x411   : > { %v4439_v60 = vsel %vm7642_vm9, %v4437_v44, %v4438_v20  ;;  %vm2357_vm14 = vmand %vm2321_vm5, %vm2285_vm10  ;;  %v11367_v1 = vor.u32 %v5060_v19, %v5059_v59  ;;  %v2206_v13 = vshll.u32 %v11347_v15, 16  ;;  %vm12323_vm2 = vcmask 125952  }
 0x412   : > { %4519 = vst.msk [vmem:[#allocation3 + $0x90] sm:$0xf] %vm12323_vm2, %v4439_v60  ;;  %v2429_v25 = vsel %vm2357_vm14, %v2393_v17, %v2191_v23  ;;  %v5521_v26 = vsel %vm3683_vm15, %v5483_v2, %v4971_v32  ;;  %vm2208_vm6 = vc.u32 %v2200_v31, %v2204_v22  ;;  %v2210_v44 = vadd.s32 %v2204_v22, %v2200_v31  ;;  %v5180_v18 = vpop.permute.xlu0 %5179  ;;  %vm12326_vm14 = vmmov %vm12323_vm2 }
 0x413   : > { %vm2465_vm12 = vcmp.ge.s32.totalorder %v2429_v25, 1  ;;  %vm2501_vm8 = vcmp.lt.s32.totalorder %v2429_v25, 17  ;;  %v2209_v51 = vsel %vm2208_vm6, 1, %v12123_v24  ;;  %v2205_v6 = vshrl.u32 %v2201_v57, 16 }
 0x414   : > { %vm2537_vm0 = vmand %vm2465_vm12, %vm2501_vm8  ;;  %4982 = vrot.lane.b32.xlu1 %v11360_v28, %s7524_s19  ;;  %5191 = vrot.lane.b32.xlu0 %v11289_v63, %s7528_s24  ;;  %v2211_v48 = vadd.s32 %v2209_v51, %v2203_v3  ;;  %vm12324_vm11 = vcmask 523264   ;;  %vm2212_vm10 = vc.u32 %v2210_v44, %v2206_v13  ;;  %v11383_v43 = vadd.s32 280, %v8933_v50  ;;  %v5235_v59 = vpop.permute.xlu1 %5234 }
 0x415   : > { %v4268_v30 = vsel %vm2537_vm0, %v4160_v16, 0.0  ;;  %v5559_v45 = vsel %vm12324_vm11, %v5521_v26, %v11271_v54  ;;  %vm12325_vm5 = vsmask.f32 6400  ;;  %v2213_v63 = vsel %vm2212_vm10, 1, %v12123_v24  ;;  %v11419_v13 = vpop.permute.xlu2 %5236 }
 0x416   : > { %v4304_v29 = vpack.c.bf16 %v4268_v30, %v4268_v30  ;;  %v5062_v58 = vsel %vm12325_vm5, %v11229_v7, %v11367_v1  ;;  %v2207_v39 = vshrl.u32 %v11347_v15, 16  ;;  %v2215_v40 = vadd.s32 %v2213_v63, %v2211_v48  ;;  %v7500_v30 = vld [vmem:[#allocation3 + $0x50] sm:$0xff] }
 0x417   : > { %v4801_v8 = vrot.slane %v11277_v9, 1  ;;  %v2226_v53 = vand.u32 65535, %v11383_v43  ;;  %v4440_v54 = vrot.slane %v4438_v20, 4  ;;  %v5598_v50 = vsel %vm5580_vm1, %v5559_v45, %v5180_v18 }
 0x418   : > { %v11392_v14 = vrot.slane %v4304_v29, 6  ;;  %v2227_v10 = vshrl.u32 %v11383_v43, 16  ;;  %v5637_v7 = vsel %vm5619_vm3, %v5598_v50, %v5235_v59  ;;  %v2216_v19 = vadd.s32 %v2215_v40, %v2205_v6  ;;  %5113 = vrot.lane.b32.xlu2 %v5062_v58, %s7525_s20  ;;  %v11424_v6 = vpop.f32.mrf.mxu2 }
 0x419   : > { %v4797_v57 = vor.u32 %v11149_v36, %v4793_v37  ;;  %v2230_v15 = vmul.u32 58254, %v2226_v53  ;;  %v5831_v49 = vshrl.u32 %v11318_v34, 16  ;;  %v11407_v12 = vsel %vm5658_vm4, %v5637_v7, %v11333_v11  ;;  %v4122_v36 = vpop.f32.mrf.mxu0 }
 0x41a   : > { %v4442_v23 = vsel %vm7642_vm9, %v4440_v54, %v11392_v14  ;;  %v2229_v21 = vmul.u32 14564, %v2226_v53  ;;  %v5834_v27 = vshll.u32 %v11407_v12, 16  ;;  %v2217_v31 = vadd.s32 %v2216_v19, %v2207_v39  ;;  %v4840_v3 = vpop.permute.xlu0 %4839 }
 0x41b   : > { %4520 = vst.msk [vmem:[#allocation3 + $0x94] sm:$0xf] %vm12326_vm14, %v4442_v23  ;;  %vm12327_vm2 = vsmask.f32 7424  ;;  %v2231_v20 = vmul.u32 14564, %v2227_v10  ;;  %v2232_v34 = vmul.u32 58254, %v2227_v10  ;;  %v5833_v22 = vor.u32 %v5831_v49, %v11341_v52 }
 0x41c   : > { %v4802_v37 = vsel %vm12327_vm2, %v4797_v57, %v4801_v8  ;;  %v2233_v16 = vshll.u32 %v2230_v15, 16  ;;  %v2218_v11 = vshrl.u32 %v2217_v31, 4  ;;  %v4123_v32 = vadd.f32 %v11330_v42, %v4122_v36  ;;  %v4918_v51 = vpop.permute.xlu1 %4917  ;;  %vm12328_vm8 = vmmov %vm12327_vm2 }
 0x41d   : > { %4851 = vrot.lane.b32.xlu0 %v4802_v37, %s7520_s15  ;;  %v2235_v17 = vshll.u32 %v2231_v20, 16  ;;  %v11417_v2 = vrot.slane %v5834_v27, 1  ;;  %v5447_v45 = vsel %vm3527_vm13, %v7500_v30, %v4840_v3  ;;  %v2234_v29 = vshrl.u32 %v2230_v15, 16 }
 0x41e   : > { %vm2237_vm6 = vc.u32 %v2229_v21, %v2233_v16  ;;  %v2239_v60 = vadd.s32 %v2233_v16, %v2229_v21  ;;  %v2219_v25 = vmul.u32 18, %v2218_v11  ;;  %v4161_v18 = vmax.f32 %v4123_v32, 0.0  ;;  %v11453_v21 = vpop.f32.mrf.mxu1 }
 0x41f   : > { %v2238_v26 = vsel %vm2237_vm6, 1, %v12123_v24  ;;  %v5837_v52 = vsel %vm12328_vm8, %v5833_v22, %v11417_v2  ;;  %v5485_v39 = vsel %vm3605_vm7, %v5447_v45, %v4918_v51  ;;  %v2236_v54 = vshrl.u32 %v2231_v20, 16  ;;  %v11466_v22 = vpop.permute.xlu2 %4919 }
 0x420   : > { %v2240_v44 = vadd.s32 %v2238_v26, %v2232_v34  ;;  %vm2241_vm12 = vc.u32 %v2239_v60, %v2235_v17  ;;  %v2220_v48 = vsub.s32 %v11322_v33, %v2219_v25  ;;  %6165 = vmatmul.bf16.gmra.mxu1 %v5837_v52  ;;  %v5523_v19 = vsel %vm3683_vm15, %v5485_v39, %v11378_v47  ;;  %v11477_v26 = vpop.f32.mrf.mxu2 }
 0x421   : > { %v2242_v58 = vsel %vm2241_vm12, 1, %v12123_v24  ;;  %vm12329_vm2 = vcmask 1045504   ;;  %vm12330_vm12 = vcmask 1044480   ;;  %v5928_v36 = vshrl.u32 %v11266_v61, 16  ;;  %v4124_v32 = vpop.f32.mrf.mxu0 }
 0x422   : > { %v11429_v63 = vld [vmem:[#allocation3 + $0x90] sm:$0xff]  ;;  %v2244_v40 = vadd.s32 %v2242_v58, %v2240_v44  ;;  %vm2286_vm0 = vcmp.ne.s32.totalorder %v2220_v48, 0  ;;  %vm2322_vm11 = vcmp.lt.s32.totalorder %v2220_v48, 0  ;;  %v2394_v53 = vadd.s32 18, %v2220_v48  ;;  %v5104_v23 = vpop.permute.xlu0 %5103 }
 0x423   : > { %vm2358_vm10 = vmand %vm2322_vm11, %vm2286_vm0  ;;  %v5157_v33 = vrot.slane %v11429_v63, 2  ;;  %v11434_v50 = vshll.u32 %v11429_v63, 16  ;;  %v11437_v59 = vshrl.u32 %v11429_v63, 16  ;;  %v5419_v24 = vrot.slane %v11429_v63, 3 }
 0x424   : > { %v2430_v10 = vsel %vm2358_vm10, %v2394_v53, %v2220_v48  ;;  %v2245_v7 = vadd.s32 %v2244_v40, %v2234_v29  ;;  %v5182_v34 = vpop.permute.xlu1 %5181  ;;  %vm12331_vm8 = vcmask 523264   ;;  %v5930_v3 = vor.u32 %v5928_v36, %v11282_v5 }
 0x425   : > { %vm2466_vm5 = vcmp.ge.s32.totalorder %v2430_v10, 1  ;;  %vm2502_vm14 = vcmp.lt.s32.totalorder %v2430_v10, 17  ;;  %v11447_v57 = vsel %vm12329_vm2, %v5155_v56, %v5157_v33  ;;  %v5323_v15 = vrot.slane %v11437_v59, 2 }
 0x426   : > { %vm2538_vm6 = vmand %vm2466_vm5, %vm2502_vm14  ;;  %5246 = vrot.lane.b32.xlu1 %v11447_v57, %s7529_s17  ;;  %v5324_v49 = vrot.slane %v11434_v50, 3  ;;  %v11460_v47 = vsel %vm12330_vm12, %v5417_v4, %v5419_v24  ;;  %v2246_v56 = vadd.s32 %v2245_v7, %v2236_v54  ;;  %v5063_v27 = vrot.slane %v11437_v59, 1  ;;  %v11508_v53 = vpop.f32.mrf.mxu1 }
 0x427   : > { %v4269_v31 = vsel %vm2538_vm6, %v4161_v18, 0.0  ;;  %v5932_v37 = vshll.u32 %v11460_v47, 16  ;;  %v5064_v20 = vrot.slane %v11434_v50, 2  ;;  %v5561_v4 = vsel %vm12331_vm8, %v5523_v19, %v5104_v23 }
 0x428   : > { %v4305_v16 = vpack.c.bf16 %v4269_v31, %v4269_v31  ;;  %v11468_v11 = vor.u32 %v5324_v49, %v5323_v15  ;;  %v2247_v17 = vshrl.u32 %v2246_v56, 4  ;;  %v5600_v61 = vsel %vm5580_vm1, %v5561_v4, %v5182_v34  ;;  %v11520_v23 = vpop.f32.mrf.mxu2 }
 0x429   : > { %v11472_v60 = vrot.slane %v5932_v37, 1  ;;  %v11474_v25 = vor.u32 %v5064_v20, %v5063_v27  ;;  %v4443_v51 = vrot.slane %v11392_v14, 4  ;;  %vm12332_vm0 = vsmask.f32 5376 }
 0x42a   : > { %v4444_v44 = vrot.slane %v4305_v16, 6  ;;  %v5326_v52 = vsel %vm12332_vm0, %v11312_v0, %v11468_v11  ;;  %v2248_v48 = vmul.u32 18, %v2247_v17  ;;  %vm12333_vm11 = vsmask.f32 7424  ;;  %v5368_v58 = vpop.permute.xlu0 %5367 }
 0x42b   : > { %5377 = vrot.lane.b32.xlu2 %v5326_v52, %s7530_s25  ;;  %v5935_v5 = vsel %vm12333_vm11, %v5930_v3, %v11472_v60  ;;  %v4125_v30 = vadd.f32 %v11330_v42, %v4124_v32  ;;  %vm12334_vm10 = vsmask.f32 6400  ;;  %v5639_v14 = vsel %vm5619_vm3, %v5600_v61, %v11419_v13 }
 0x42c   : > { %v5066_v45 = vsel %vm12334_vm10, %v11367_v1, %v11474_v25  ;;  %v4445_v29 = vsel %vm7642_vm9, %v4443_v51, %v4444_v44  ;;  %7322 = vmatmul.msk.bf16.gmra.mxu2 %vm3527_vm13, %v5935_v5  ;;  %v2249_v0 = vsub.s32 %v11383_v43, %v2248_v48  ;;  %vm12335_vm5 = vcmask 125952   ;;  %v4842_v54 = vpop.permute.xlu1 %4841 }
 0x42d   : > { %5115 = vrot.lane.b32.xlu0 %v5066_v45, %s7525_s20  ;;  %4521 = vst.msk [vmem:[#allocation3 + $0x98] sm:$0xf] %vm12335_vm5, %v4445_v29  ;;  %v11499_v42 = vrot.slane %v11429_v63, 1  ;;  %v11504_v13 = vsel %vm5658_vm4, %v5639_v14, %v5368_v58  ;;  %v5846_v18 = vshrl.u32 %v11407_v12, 16  ;;  %v4162_v43 = vmax.f32 %v4125_v30, 0.0 }
 0x42e   : > { %vm2287_vm14 = vcmp.ne.s32.totalorder %v2249_v0, 0  ;;  %vm2323_vm2 = vcmp.lt.s32.totalorder %v2249_v0, 0  ;;  %v2395_v1 = vadd.s32 18, %v2249_v0  ;;  %4929 = vrot.lane.b32.xlu1 %v11360_v28, %s7526_s21  ;;  %v5849_v39 = vshll.u32 %v11504_v13, 16  ;;  %v5184_v28 = vpop.permute.xlu2 %5183  ;;  %v11527_v37 = vpop.f32.mrf.mxu1 }
 0x42f   : > { %vm2359_vm6 = vmand %vm2323_vm2, %vm2287_vm14  ;;  %v5848_v7 = vor.u32 %v5846_v18, %v11417_v2  ;;  %vm12336_vm11 = vcmask 1046528   ;;  %vm12337_vm10 = vsmask.f32 7424  ;;  %v4446_v2 = vrot.slane %v4444_v44, 4 }
 0x430   : > { %v2431_v40 = vsel %vm2359_vm6, %v2395_v1, %v2249_v0  ;;  %v5851_v10 = vrot.slane %v5849_v39, 1  ;;  %v11515_v12 = vsel %vm12336_vm11, %v4893_v46, %v11499_v42  ;;  %v5449_v46 = vsel %vm3527_vm13, %v7501_v62, %v4842_v54  ;;  %v11542_v61 = vpop.f32.mrf.mxu2 }
 0x431   : > { %vm2467_vm12 = vcmp.ge.s32.totalorder %v2431_v40, 1  ;;  %vm2503_vm8 = vcmp.lt.s32.totalorder %v2431_v40, 17  ;;  %v4809_v20 = vrot.slane %v11434_v50, 1  ;;  %v5487_v34 = vsel %vm3605_vm7, %v5449_v46, %v11466_v22  ;;  %v11672_v50 = vld [vmem:[%s12009_s5] ss:$0 sm:$0xff] }
 0x432   : > { %vm2539_vm0 = vmand %vm2467_vm12, %vm2503_vm8  ;;  %v5852_v15 = vsel %vm12337_vm10, %v5848_v7, %v5851_v10  ;;  %v4975_v56 = vpop.permute.xlu0 %4974  ;;  %vm12338_vm14 = vcmask 123904   ;;  %vm12340_vm2 = vcmask 523264   ;;  %v5943_v30 = vshrl.u32 %v11460_v47, 16 }
 0x433   : > { %v4270_v19 = vsel %vm2539_vm0, %v4162_v43, 0.0  ;;  %4984 = vrot.lane.b32.xlu2 %v11515_v12, %s7524_s19  ;;  %6170 = vmatmul.bf16.gmra.mxu1 %v5852_v15  ;;  %v5525_v35 = vsel %vm3683_vm15, %v5487_v34, %v4975_v56  ;;  %vm12341_vm6 = vcmask 1045504   ;;  %vm12342_vm12 = vcmask 1044480  }
 0x434   : > { %v4306_v49 = vpack.c.bf16 %v4270_v19, %v4270_v19  ;;  %v5106_v16 = vpop.permute.xlu1 %5105  ;;  %vm12343_vm8 = vsmask.f32 5376  ;;  %v5945_v56 = vor.u32 %v5943_v30, %v11472_v60  ;;  %vm12344_vm0 = vsmask.f32 6400 }
 0x435   : > { %v5563_v4 = vsel %vm12340_vm2, %v5525_v35, %v5106_v16 }
 0x436   : > { %v4447_v27 = vrot.slane %v4306_v49, 6  ;;  %5193 = vrot.lane.b32.xlu1 %v11447_v57, %s7528_s24  ;;  %v4805_v57 = vor.u32 %v11280_v41, %v4801_v8  ;;  %v4844_v17 = vpop.permute.xlu2 %4843  ;;  %v5602_v9 = vsel %vm5580_vm1, %v5563_v4, %v5184_v28  ;;  %v11555_v52 = vpop.f32.mrf.mxu1 }
 0x438   : > { %v4448_v31 = vsel %vm7642_vm9, %v4446_v2, %v4447_v27  ;;  %v4449_v36 = vrot.slane %v4447_v27, 4  ;;  %vm12339_vm9 = vmmov %vm12337_vm10  ;;  %v4560_v2 = vld [vmem:[#allocation3 + $0x98] sm:$0x1] }
 0x439   : > { %4522 = vst.msk [vmem:[#allocation3 + $0x9c] sm:$0xf] %vm12335_vm5, %v4448_v31  ;;  %v4810_v32 = vsel %vm12339_vm9, %v4805_v57, %v4809_v20  ;;  %vm12345_vm11 = vmmov %vm12339_vm9  ;;  %v4648_v16 = vunpack.c.l.b16 %v4560_v2  ;;  %v7502_v57 = vld [vmem:[#allocation3 + $0x60] sm:$0xff] }
 0x43a   : > { %4523 = vst.msk [vmem:[#allocation3 + $0xa0] sm:$0x3] %vm12338_vm14, %v4449_v36  ;;  %v5239_v3 = vpop.permute.xlu0 %5238  ;;  %vm12346_vm10 = vmmov %vm12339_vm9  ;;  %v5451_v35 = vsel %vm3527_vm13, %v7502_v57, %v4844_v17  ;;  %vm12348_vm14 = vcmask 1046528  }
 0x43b   : > { %v5641_v5 = vsel %vm5619_vm3, %v5602_v9, %v5239_v3  ;;  %vm12347_vm5 = vmmov %vm12342_vm12 }
 0x43c   : > { %vm12349_vm9 = vmmov %vm12343_vm8 }
 0x43e   : > { %4853 = vrot.lane.b32.xlu1 %v4810_v32, %s7520_s15  ;;  %v5108_v40 = vpop.permute.xlu2 %5107 }
 0x43f   : > { %v11596_v36 = vpop.f32.mrf.mxu1 }
 0x440   : > { %v11545_v22 = vld [vmem:[#allocation3 + $0x98] sm:$0xff] }
 0x441   : > { %v11548_v51 = vld [vmem:[#allocation3 + $0xa0] sm:$0xff]  ;;  %v11551_v41 = vrot.slane %v11545_v22, 2  ;;  %v5068_v8 = vshrl.u32 %v11545_v22, 16  ;;  %v5071_v44 = vshll.u32 %v11545_v22, 16  ;;  %v5421_v48 = vrot.slane %v11545_v22, 3 }
 0x442   : > { %v4922_v47 = vpop.permute.xlu0 %4921  ;;  %v5332_v43 = vshrl.u32 %v11548_v51, 16  ;;  %v5335_v39 = vshll.u32 %v11548_v51, 16  ;;  %v5423_v34 = vrot.slane %v11548_v51, 3 }
 0x443   : > { %v11564_v45 = vsel %vm12341_vm6, %v5157_v33, %v11551_v41  ;;  %v5327_v14 = vrot.slane %v5068_v8, 2  ;;  %v5328_v29 = vrot.slane %v5071_v44, 3  ;;  %v5070_v0 = vrot.slane %v5068_v8, 1  ;;  %v5370_v18 = vpop.permute.xlu1 %5369 }
 0x444   : > { %5248 = vrot.lane.b32.xlu2 %v11564_v45, %s7529_s17  ;;  %v5073_v58 = vrot.slane %v5071_v44, 2  ;;  %v11571_v1 = vsel %vm12342_vm12, %v5419_v24, %v5421_v48  ;;  %v5861_v33 = vshrl.u32 %v11504_v13, 16  ;;  %v11578_v28 = vsel %vm5658_vm4, %v5641_v5, %v5370_v18  ;;  %v11583_v24 = vpop.f32.mrf.mxu2  ;;  %v4572_v18 = vld [vmem:[#allocation3 + $0xa8] sm:$0x7]  ;;  %vm12350_vm12 = vmmov %vm12348_vm14 }
 0x445   : > { %v5329_v54 = vor.u32 %v5328_v29, %v5327_v14  ;;  %v5947_v7 = vshll.u32 %v11571_v1, 16  ;;  %v5864_v63 = vshll.u32 %v11578_v28, 16  ;;  %v5334_v46 = vrot.slane %v5332_v43, 2  ;;  %v4562_v29 = vld [vmem:[#allocation3 + $0x98] sm:$0x3] }
 0x446   : > { %v11580_v19 = vor.u32 %v5073_v58, %v5070_v0  ;;  %v5863_v15 = vor.u32 %v5861_v33, %v5851_v10  ;;  %v5337_v31 = vrot.slane %v5335_v39, 3  ;;  %v5489_v8 = vsel %vm3605_vm7, %v5451_v35, %v4922_v47  ;;  %v5372_v17 = vpop.permute.xlu2 %5371  ;;  %v4574_v47 = vld [vmem:[#allocation3 + $0xa8] sm:$0xf]  ;;  %v4568_v35 = vld [vmem:[#allocation3 + $0xa0] sm:$0x7] }
 0x447   : > { %v5330_v49 = vsel %vm12343_vm8, %v11468_v11, %v5329_v54  ;;  %v5949_v13 = vrot.slane %v5947_v7, 1  ;;  %v11592_v62 = vrot.slane %v5864_v63, 1  ;;  %v4566_v11 = vld [vmem:[#allocation3 + $0xa0] sm:$0x3]  ;;  %v11615_v5 = vpack.c.b16 %v4648_v16, %v4648_v16  ;;  %vm12351_vm8 = vmmov %vm12346_vm10 }
 0x448   : > { %5379 = vrot.lane.b32.xlu0 %v5330_v49, %s7530_s25  ;;  %v5075_v27 = vsel %vm12344_vm0, %v11474_v25, %v11580_v19  ;;  %v4950_v25 = vrot.slane %v11545_v22, 1  ;;  %v11606_v32 = vor.u32 %v5337_v31, %v5334_v46  ;;  %v4944_v9 = vunpack.c.l.b16 %v4566_v11  ;;  %vm12352_vm0 = vmmov %vm12351_vm8 }
 0x449   : > { %5117 = vrot.lane.b32.xlu1 %v5075_v27, %s7525_s20  ;;  %v5950_v10 = vsel %vm12345_vm11, %v5945_v56, %v5949_v13  ;;  %v5867_v60 = vsel %vm12346_vm10, %v5863_v15, %v11592_v62  ;;  %v11613_v22 = vsel %vm12347_vm5, %v5421_v48, %v5423_v34  ;;  %v5214_v43 = vrot.slane %v11548_v51, 2  ;;  %vm12353_vm11 = vmmov %vm12352_vm0 }
 0x44a   : > { %7323 = vmatmul.msk.bf16.gmra.mxu2 %vm3527_vm13, %v5950_v10  ;;  %6175 = vmatmul.bf16.gmra.mxu1 %v5867_v60  ;;  %v5186_v3 = vpop.permute.xlu0 %5185  ;;  %v5339_v30 = vsel %vm12349_vm9, %v5329_v54, %v11606_v32  ;;  %v11622_v14 = vpack.c.b16 %v4944_v9, %v4944_v9  ;;  %v5962_v58 = vshll.u32 %v11613_v22, 16  ;;  %v4815_v39 = vshll.u32 %v11615_v5, 16  ;;  %v11632_v54 = vpop.f32.mrf.mxu1  ;;  %vm12354_vm10 = vmmov %vm12350_vm12 }
 0x44b   : > { %v4977_v4 = vpop.permute.xlu1 %4976  ;;  %v5958_v33 = vshrl.u32 %v11571_v1, 16  ;;  %v4860_v7 = vunpack.c.l.b16 %v4562_v29  ;;  %v5208_v56 = vunpack.c.l.b16 %v4572_v18  ;;  %v5388_v2 = vunpack.c.l.b16 %v4574_v47  ;;  %vm12355_vm5 = vmmov %vm12341_vm6 }
 0x44c   : > { %4931 = vrot.lane.b32.xlu2 %v11515_v12, %s7526_s21  ;;  %v5527_v44 = vsel %vm3683_vm15, %v5489_v8, %v4977_v4  ;;  %v4951_v12 = vsel %vm12348_vm14, %v11499_v42, %v4950_v25  ;;  %v11624_v0 = vpop.f32.mrf.mxu2  ;;  %v11638_v46 = vrot.slane %v5962_v58, 1  ;;  %v5876_v1 = vshrl.u32 %v11578_v28, 16 }
 0x44d   : > { %v5565_v48 = vsel %vm12340_vm2, %v5527_v44, %v5108_v40  ;;  %v4952_v40 = vrot.slane %v11622_v14, 1  ;;  %v5960_v27 = vor.u32 %v5958_v33, %v5949_v13  ;;  %v5215_v10 = vsel %vm12341_vm6, %v11551_v41, %v5214_v43  ;;  %vm12358_vm6 = vmmov %vm12355_vm5 }
 0x44e   : > { %v5604_v63 = vsel %vm5580_vm1, %v5565_v48, %v5186_v3  ;;  %v4817_v11 = vrot.slane %v4815_v39, 1  ;;  %v11648_v16 = vpack.c.b16 %v4860_v7, %v4860_v7  ;;  %v5077_v57 = vshrl.u32 %v11622_v14, 16  ;;  %v4979_v44 = vpop.permute.xlu2 %4978 }
 0x44f   : > { %v5080_v13 = vshll.u32 %v11622_v14, 16  ;;  %v4953_v28 = vsel %vm12350_vm12, %v4950_v25, %v4952_v40  ;;  %v4813_v4 = vor.u32 %v11437_v59, %v4809_v20  ;;  %v11659_v3 = vpack.c.b16 %v5208_v56, %v5208_v56  ;;  %vm12359_vm12 = vmmov %vm12352_vm0 }
 0x450   : > { %4986 = vrot.lane.b32.xlu0 %v4951_v12, %s7524_s19  ;;  %v11661_v9 = vpack.c.b16 %v5388_v2, %v5388_v2  ;;  %v5878_v8 = vor.u32 %v5876_v1, %v11592_v62  ;;  %v5124_v20 = vunpack.c.l.b16 %v4568_v35  ;;  %v4897_v62 = vrot.slane %v11648_v16, 1 }
 0x451   : > { %5381 = vrot.lane.b32.xlu1 %v5339_v30, %s7530_s25  ;;  %v4818_v59 = vsel %vm12352_vm0, %v4813_v4, %v4817_v11  ;;  %v11679_v30 = vrot.slane %v5077_v57, 1  ;;  %v5082_v29 = vrot.slane %v5080_v13, 2  ;;  %v5216_v18 = vrot.slane %v11659_v3, 2 }
 0x452   : > { %v4846_v49 = vpop.permute.xlu0 %4845  ;;  %v5425_v33 = vrot.slane %v11661_v9, 3  ;;  %v6134_v7 = vadd.f32 %v11672_v50, %v11508_v53  ;;  %v6132_v56 = vadd.f32 %v11672_v50, %v11453_v21  ;;  %v5344_v11 = vshll.u32 %v11659_v3, 16 }
 0x453   : > { %v5241_v15 = vpop.permute.xlu1 %5240  ;;  %v5083_v1 = vor.u32 %v5082_v29, %v11679_v30  ;;  %v5217_v53 = vsel %vm12355_vm5, %v5214_v43, %v5216_v18  ;;  %vm12356_vm14 = vcmask 1044480   ;;  %v6137_v43 = vadd.f32 %v11672_v50, %v11527_v37  ;;  %vm12363_vm5 = vmmov %vm12352_vm0 }
 0x454   : > { %5195 = vrot.lane.b32.xlu2 %v11564_v45, %s7528_s24  ;;  %v5643_v31 = vsel %vm5619_vm3, %v5604_v63, %v5241_v15  ;;  %v11676_v25 = vpop.f32.mrf.mxu2  ;;  %v7503_v63 = vld [vmem:[#allocation3 + $0x68] sm:$0xff]  ;;  %v11710_v21 = vsel %vm12356_vm14, %v5423_v34, %v5425_v33  ;;  %v5973_v57 = vshrl.u32 %v11613_v22, 16  ;;  %vm12357_vm9 = vsmask.f32 6400  ;;  %vm12364_vm14 = vmmov %vm12352_vm0 }
 0x455   : > { %v11645_v45 = vsel %vm5658_vm4, %v5643_v31, %v5372_v17  ;;  %v5965_v17 = vsel %vm12351_vm8, %v5960_v27, %v11638_v46  ;;  %v5453_v15 = vsel %vm3527_vm13, %v7503_v63, %v4846_v49  ;;  %v11694_v27 = vpack.c.b16 %v5124_v20, %v5124_v20 }
 0x456   : > { %v5879_v60 = vshll.u32 %v11645_v45, 16  ;;  %v4898_v31 = vsel %vm12354_vm10, %v11499_v42, %v4897_v62  ;;  %v6233_v42 = vadd.f32 %v11304_v55, %v6134_v7  ;;  %v5243_v13 = vpop.permute.xlu2 %5242  ;;  %v5084_v51 = vsel %vm12357_vm9, %v11580_v19, %v5083_v1  ;;  %vm12362_vm10 = vmmov %vm12352_vm0 }
 0x457   : > { %v5161_v16 = vrot.slane %v11694_v27, 2  ;;  %v5977_v34 = vshll.u32 %v11710_v21, 16  ;;  %v5346_v35 = vrot.slane %v5344_v11, 3  ;;  %v5975_v22 = vor.u32 %v5973_v57, %v11638_v46 }
 0x458   : > { %5250 = vrot.lane.b32.xlu0 %v5215_v10, %s7529_s17  ;;  %v11667_v12 = vrot.slane %v5879_v60, 1  ;;  %v5341_v10 = vshrl.u32 %v11659_v3, 16  ;;  %v6231_v60 = vadd.f32 %v11239_v38, %v6132_v56  ;;  %v5891_v46 = vshrl.u32 %v11645_v45, 16 }
 0x459   : > { %4988 = vrot.lane.b32.xlu1 %v4953_v28, %s7524_s19  ;;  %v5162_v29 = vsel %vm12358_vm6, %v11551_v41, %v5161_v16  ;;  %vm12360_vm8 = vsmask.f32 5376  ;;  %v4819_v11 = vshrl.u32 %v11615_v5, 16  ;;  %vm12365_vm6 = vmmov %vm12352_vm0 }
 0x45a   : > { %7324 = vmatmul.msk.bf16.gmra.mxu2 %vm3527_vm13, %v5965_v17  ;;  %v5882_v48 = vsel %vm12353_vm11, %v5878_v8, %v11667_v12  ;;  %v11723_v55 = vrot.slane %v5341_v10, 2  ;;  %v6321_v8 = vmax.f32 %v6233_v42, 0.0  ;;  %v6320_v19 = vmax.f32 %v6231_v60, 0.0  ;;  %v7504_v42 = vld [vmem:[#allocation3 + $0x70] sm:$0xff]  ;;  %vm12361_vm11 = vmmov %vm12340_vm2 }
 0x45b   : > { %v11683_v58 = vpop.f32.mrf.mxu1  ;;  %v4924_v47 = vpop.permute.xlu1 %4923  ;;  %6180 = vmatmul.bf16.gmra.mxu1 %v5882_v48  ;;  %v5979_v48 = vrot.slane %v5977_v34, 1 }
 0x45c   : > { %4855 = vrot.lane.b32.xlu2 %v4818_v59, %s7520_s15  ;;  %v5110_v39 = vpop.permute.xlu0 %5109  ;;  %v5491_v2 = vsel %vm3605_vm7, %v5453_v15, %v4924_v47  ;;  %v11731_v17 = vpop.f32.mrf.mxu2  ;;  %v6236_v59 = vadd.f32 %v11424_v6, %v6137_v43  ;;  %v5347_v47 = vor.u32 %v5346_v35, %v11723_v55  ;;  %v6357_v63 = vpack.c.bf16 %v6321_v8, %v6321_v8 }
 0x45d   : > { %v5529_v49 = vsel %vm3683_vm15, %v5491_v2, %v4979_v44  ;;  %v5980_v6 = vsel %vm12359_vm12, %v5975_v22, %v5979_v48  ;;  %v5893_v15 = vor.u32 %v5891_v46, %v11667_v12  ;;  %v6356_v56 = vpack.c.bf16 %v6320_v19, %v6320_v19  ;;  %vm12366_vm12 = vmmov %vm12360_vm8 }
 0x45e   : > { %v5567_v38 = vsel %vm12340_vm2, %v5529_v49, %v5110_v39  ;;  %v6322_v2 = vmax.f32 %v6236_v59, 0.0  ;;  %v5348_v45 = vsel %vm12360_vm8, %v11606_v32, %v5347_v47  ;;  %v6396_v1 = vunpack.c.l.b16 %v6357_v63  ;;  %v4926_v10 = vpop.permute.xlu2 %4925  ;;  %vm12367_vm8 = vmmov %vm12340_vm2 }
 0x45f   : > { %v6139_v43 = vadd.f32 %v11672_v50, %v11555_v52  ;;  %v6142_v35 = vadd.f32 %v11672_v50, %v11596_v36 }
 0x460   : > { %4933 = vrot.lane.b32.xlu0 %v4898_v31, %s7526_s21  ;;  %v6358_v12 = vpack.c.bf16 %v6322_v2, %v6322_v2 }
 0x461   : > { %5252 = vrot.lane.b32.xlu1 %v5217_v53, %s7529_s17  ;;  %v6395_v53 = vunpack.c.l.b16 %v6356_v56  ;;  %v6238_v52 = vadd.f32 %v11477_v26, %v6139_v43  ;;  %v6241_v36 = vadd.f32 %v11520_v23, %v6142_v35 }
 0x462   : > { %v6397_v34 = vunpack.c.l.b16 %v6358_v12 }
 0x463   : > { %v11725_v28 = vpop.f32.mrf.mxu1  ;;  %v5188_v37 = vpop.permute.xlu1 %5187  ;;  %v6398_v57 = vpack.c.b16 %v6396_v1, %v6395_v53  ;;  %v6323_v26 = vmax.f32 %v6238_v52, 0.0  ;;  %v6144_v53 = vadd.f32 %v11672_v50, %v11632_v54 }
 0x464   : > { %5119 = vrot.lane.b32.xlu2 %v5084_v51, %s7525_s20  ;;  %v5374_v4 = vpop.permute.xlu0 %5373  ;;  %v5606_v44 = vsel %vm5580_vm1, %v5567_v38, %v5188_v37  ;;  %v11759_v32 = vpop.f32.mrf.mxu2  ;;  %v5988_v38 = vshrl.u32 %v11710_v21, 16 }
 0x465   : > { %v5645_v20 = vsel %vm5619_vm3, %v5606_v44, %v5243_v13  ;;  %v5992_v13 = vshll.u32 %v5425_v33, 16  ;;  %v6403_v8 = vshll.u32 %v6398_v57, 16  ;;  %v6399_v44 = vpack.c.b16 %v6397_v34, %v6397_v34 }
 0x466   : > { %v11739_v39 = vsel %vm5658_vm4, %v5645_v20, %v5374_v4  ;;  %v5990_v33 = vor.u32 %v5988_v38, %v5979_v48  ;;  %v5190_v21 = vpop.permute.xlu2 %5189  ;;  %v6401_v47 = vshrl.u32 %v6398_v57, 16  ;;  %v6243_v43 = vadd.f32 %v11542_v61, %v6144_v53 }
 0x467   : > { %v5894_v7 = vshll.u32 %v11739_v39, 16  ;;  %v5994_v4 = vrot.slane %v5992_v13, 1  ;;  %v6405_v59 = vrot.slane %v6403_v8, 1  ;;  %v6408_v23 = vshll.u32 %v6399_v44, 16 }
 0x468   : > { %5197 = vrot.lane.b32.xlu0 %v5162_v29, %s7528_s24  ;;  %v6324_v29 = vmax.f32 %v6241_v36, 0.0  ;;  %v5906_v56 = vshrl.u32 %v11739_v39, 16  ;;  %v6325_v52 = vmax.f32 %v6243_v43, 0.0 }
 0x469   : > { %4935 = vrot.lane.b32.xlu1 %v4897_v62, %s7526_s21  ;;  %v11747_v41 = vrot.slane %v5894_v7, 1  ;;  %v5995_v19 = vsel %vm12362_vm10, %v5990_v33, %v5994_v4  ;;  %vm12369_vm10 = vmmov %vm12340_vm2 }
 0x46a   : > { %7325 = vmatmul.msk.bf16.gmra.mxu2 %vm3527_vm13, %v5980_v6  ;;  %v6406_v6 = vor.u32 %v6405_v59, %v6401_v47 }
 0x46b   : > { %v11752_v27 = vpop.f32.mrf.mxu1  ;;  %v4848_v31 = vpop.permute.xlu1 %4847  ;;  %v5897_v62 = vsel %vm12352_vm0, %v5893_v15, %v11747_v41  ;;  %v6410_v15 = vrot.slane %v6408_v23, 1  ;;  %vm6464_vm0 = vsmask.f32 4352 }
 0x46c   : > { %5383 = vrot.lane.b32.xlu2 %v5348_v45, %s7530_s25  ;;  %6185 = vmatmul.bf16.gmra.mxu1 %v5897_v62  ;;  %v5455_v49 = vsel %vm3527_vm13, %v7504_v42, %v4848_v31  ;;  %v4981_v60 = vpop.permute.xlu0 %4980  ;;  %v11784_v20 = vpop.f32.mrf.mxu2  ;;  %v6360_v45 = vpack.c.bf16 %v6324_v29, %v6324_v29  ;;  %v5908_v62 = vor.u32 %v5906_v56, %v11747_v41 }
 0x46d   : > { %v5493_v51 = vsel %vm3605_vm7, %v5455_v49, %v4926_v10  ;;  %v11799_v31 = vsel %vm12363_vm5, %v6406_v6, %v6410_v15  ;;  %v6147_v41 = vadd.f32 %v11672_v50, %v11683_v58  ;;  %v6152_v47 = vadd.f32 %v11672_v50, %v11752_v27 }
 0x46e   : > { %v5531_v9 = vsel %vm3683_vm15, %v5493_v51, %v4981_v60  ;;  %v6415_v10 = vunpack.c.l.b16 %v6360_v45  ;;  %v4850_v12 = vpop.permute.xlu2 %4849 }
 0x470   : > { %4857 = vrot.lane.b32.xlu0 %v4819_v11, %s7520_s15  ;;  %v6417_v42 = vpack.c.b16 %v6415_v10, %v6415_v10 }
 0x471   : > { %5199 = vrot.lane.b32.xlu1 %v5161_v16, %s7528_s24 }
 0x472   : > { %v6427_v13 = vshrl.u32 %v6417_v42, 16  ;;  %v6430_v51 = vshll.u32 %v6417_v42, 16 }
 0x473   : > { %v11771_v37 = vpop.f32.mrf.mxu1  ;;  %v5112_v16 = vpop.permute.xlu1 %5111 }
 0x474   : > { %4990 = vrot.lane.b32.xlu2 %v4952_v40, %s7524_s19  ;;  %v5569_v22 = vsel %vm12361_vm11, %v5531_v9, %v5112_v16  ;;  %v11809_v49 = vpop.f32.mrf.mxu2  ;;  %v7505_v9 = vld [vmem:[#allocation3 + $0x78] sm:$0xff]  ;;  %v6429_v4 = vrot.slane %v6427_v13, 1  ;;  %v6432_v58 = vrot.slane %v6430_v51, 2  ;;  %vm12368_vm11 = vmmov %vm12363_vm5 }
 0x475   : > { %v5608_v14 = vsel %vm5580_vm1, %v5569_v22, %v5190_v21  ;;  %v5457_v33 = vsel %vm3527_vm13, %v7505_v9, %v4850_v12  ;;  %vm12370_vm5 = vmmov %vm12366_vm12 }
 0x476   : > { %v5245_v40 = vpop.permute.xlu0 %5244  ;;  %v5114_v22 = vpop.permute.xlu2 %5113  ;;  %v6433_v21 = vor.u32 %v6432_v58, %v6429_v4 }
 0x477   : > { %v5647_v46 = vsel %vm5619_vm3, %v5608_v14, %v5245_v40 }
 0x478   : > { %5121 = vrot.lane.b32.xlu0 %v11679_v30, %s7525_s20  ;;  %v6359_v30 = vpack.c.bf16 %v6323_v26, %v6323_v26 }
 0x47a   : > { %7326 = vmatmul.msk.bf16.gmra.mxu2 %vm3527_vm13, %v5995_v19 }
 0x47b   : > { %v11787_v48 = vpop.f32.mrf.mxu1 }
 0x47c   : > { %5254 = vrot.lane.b32.xlu2 %v5216_v18, %s7529_s17  ;;  %v6414_v18 = vunpack.c.l.b16 %v6359_v30  ;;  %v11820_v26 = vpop.f32.mrf.mxu2 }
 0x47e   : > { %v5376_v7 = vpop.permute.xlu1 %5375  ;;  %v6416_v39 = vpack.c.b16 %v6414_v18, %v6397_v34  ;;  %v4928_v57 = vpop.permute.xlu0 %4927  ;;  %v6246_v34 = vadd.f32 %v11583_v24, %v6147_v41  ;;  %v6361_v24 = vpack.c.bf16 %v6325_v52, %v6325_v52 }
 0x47f   : > { %v11794_v63 = vsel %vm5658_vm4, %v5647_v46, %v5376_v7  ;;  %v5495_v61 = vsel %vm3605_vm7, %v5457_v33, %v4928_v57  ;;  %v6149_v46 = vadd.f32 %v11672_v50, %v11725_v28 }
 0x480   : > { %v5909_v2 = vshll.u32 %v11794_v63, 16  ;;  %5385 = vrot.lane.b32.xlu0 %v11723_v55, %s7530_s25  ;;  %v6419_v55 = vshrl.u32 %v6416_v39, 16  ;;  %v6422_v60 = vshll.u32 %v6416_v39, 16  ;;  %v6326_v8 = vmax.f32 %v6246_v34, 0.0  ;;  %s7333_s25 = sshll.u32 %s12382_s28, 4 }
 0x481   : > { %v6437_v23 = vunpack.c.l.b16 %v6361_v24  ;;  %v6248_v18 = vadd.f32 %v11624_v0, %v6149_v46  ;;  %v5921_v27 = vshrl.u32 %v11794_v63, 16  ;;  %v7506_v46 = vld [vmem:[#allocation3 + $0x80] sm:$0xff]  ;;  %s325_s26 = scalar_lea.vmem %s12012_s8, %s7333_s25 }
 0x482   : > { %v5911_v3 = vrot.slane %v5909_v2, 1  ;;  %v6421_v38 = vrot.slane %v6419_v55, 1  ;;  %v6424_v54 = vrot.slane %v6422_v60, 2  ;;  %v6362_v14 = vpack.c.bf16 %v6326_v8, %v6326_v8 }
 0x483   : > { %v11805_v11 = vpop.f32.mrf.mxu1  ;;  %v6251_v2 = vadd.f32 %v11676_v25, %v6152_v47  ;;  %v6327_v41 = vmax.f32 %v6248_v18, 0.0 }
 0x484   : > { %v5912_v1 = vsel %vm12364_vm14, %v5908_v62, %v5911_v3  ;;  %v6425_v36 = vor.u32 %v6424_v54, %v6421_v38  ;;  %v6438_v6 = vunpack.c.l.b16 %v6362_v14  ;;  %v6439_v62 = vpack.c.b16 %v6437_v23, %v6415_v10  ;;  %v6265_v28 = vpop.f32.mrf.mxu2  ;;  %vm12371_vm14 = vmmov %vm12365_vm6 }
 0x485   : > { %6190 = vmatmul.bf16.gmra.mxu1 %v5912_v1  ;;  %v5378_v15 = vpop.permute.xlu2 %5377  ;;  %v5923_v53 = vor.u32 %v5921_v27, %v5911_v3  ;;  %v6328_v42 = vmax.f32 %v6251_v2, 0.0  ;;  %v6363_v13 = vpack.c.bf16 %v6327_v41, %v6327_v41 }
 0x486   : > { %v4983_v16 = vpop.permute.xlu1 %4982  ;;  %v11823_v19 = vsel %vm12357_vm9, %v6425_v36, %v6433_v21  ;;  %v5192_v59 = vpop.permute.xlu0 %5191  ;;  %v6440_v39 = vpack.c.b16 %v6438_v6, %v6438_v6  ;;  %v6442_v60 = vshrl.u32 %v6439_v62, 16  ;;  %v6445_v43 = vshll.u32 %v6439_v62, 16 }
 0x487   : > { %v5533_v44 = vsel %vm3683_vm15, %v5495_v61, %v4983_v16  ;;  %v6364_v63 = vpack.c.bf16 %v6328_v42, %v6328_v42  ;;  %v6460_v9 = vunpack.c.l.b16 %v6363_v13 }
 0x488   : > { %v5571_v40 = vsel %vm12340_vm2, %v5533_v44, %v5114_v22  ;;  %v6450_v10 = vshrl.u32 %v6440_v39, 16  ;;  %v6453_v0 = vshll.u32 %v6440_v39, 16  ;;  %v6444_v34 = vrot.slane %v6442_v60, 2 }
 0x489   : > { %v5610_v7 = vsel %vm5580_vm1, %v5571_v40, %v5192_v59  ;;  %v6447_v38 = vrot.slane %v6445_v43, 3  ;;  %v6461_v52 = vunpack.c.l.b16 %v6364_v63  ;;  %v6462_v44 = vpack.c.b16 %v6460_v9, %v6438_v6 }
 0x48a   : > { %v6452_v3 = vrot.slane %v6450_v10, 2  ;;  %v6455_v54 = vrot.slane %v6453_v0, 3 }
 0x48b   : > { %v6448_v33 = vor.u32 %v6447_v38, %v6444_v34  ;;  %v6463_v61 = vpack.c.b16 %v6461_v52, %v6461_v52  ;;  %v6466_v47 = vshrl.u32 %v6462_v44, 16  ;;  %v6469_v23 = vshll.u32 %v6462_v44, 16 }
 0x48c   : > { %v11814_v35 = vpop.f32.mrf.mxu1  ;;  %v6267_v16 = vpop.f32.mrf.mxu2  ;;  %v6456_v4 = vor.u32 %v6455_v54, %v6452_v3 }
 0x48d   : > { %v4985_v51 = vpop.permute.xlu2 %4984  ;;  %v6474_v14 = vshrl.u32 %v6463_v61, 16  ;;  %v6477_v40 = vshll.u32 %v6463_v61, 16  ;;  %v6471_v42 = vrot.slane %v6469_v23, 4  ;;  %v6162_v0 = vadd.f32 %v11672_v50, %v11814_v35 }
 0x48e   : > { %v11844_v22 = vsel %vm12366_vm12, %v6448_v33, %v6456_v4  ;;  %vm12372_vm12 = vmmov %vm12365_vm6 }
 0x48f   : > { %v4852_v58 = vpop.permute.xlu0 %4851  ;;  %v6476_v62 = vrot.slane %v6474_v14, 3  ;;  %v6479_v27 = vrot.slane %v6477_v40, 4 }
 0x491   : > { %v6480_v34 = vor.u32 %v6479_v27, %v6476_v62 }
 0x494   : > { %v6163_v29 = vpop.f32.mrf.mxu1 }
 0x495   : > { %v6164_v2 = vadd.f32 %v11672_v50, %v6163_v29  ;;  %v6159_v29 = vadd.f32 %v11672_v50, %v11805_v11 }
 0x497   : > { %v6263_v60 = vadd.f32 %v11820_v26, %v6164_v2  ;;  %v6258_v9 = vadd.f32 %v11784_v20, %v6159_v29  ;;  %v6154_v20 = vadd.f32 %v11672_v50, %v11771_v37 }
 0x498   : > { %v5247_v30 = vpop.permute.xlu1 %5246 }
 0x499   : > { %v5649_v56 = vsel %vm5619_vm3, %v5610_v7, %v5247_v30  ;;  %v5459_v7 = vsel %vm3527_vm13, %v7506_v46, %v4852_v58  ;;  %v6333_v26 = vmax.f32 %v6263_v60, 0.0 }
 0x49a   : > { %v11834_v45 = vsel %vm5658_vm4, %v5649_v56, %v5378_v15  ;;  %v6270_v15 = vpop.f32.mrf.mxu2 }
 0x49b   : > { %v5924_v1 = vshll.u32 %v11834_v45, 16  ;;  %v6369_v14 = vpack.c.bf16 %v6333_v26, %v6333_v26 }
 0x49d   : > { %v11839_v12 = vrot.slane %v5924_v1, 1  ;;  %v6166_v55 = vpop.f32.mrf.mxu1  ;;  %v6505_v2 = vunpack.c.l.b16 %v6369_v14 }
 0x49e   : > { %v5249_v36 = vpop.permute.xlu2 %5248  ;;  %v6167_v59 = vadd.f32 %v11672_v50, %v6166_v55 }
 0x49f   : > { %v5927_v25 = vsel %vm12365_vm6, %v5923_v53, %v11839_v12  ;;  %v5116_v1 = vpop.permute.xlu0 %5115  ;;  %v6468_v53 = vrot.slane %v6466_v47, 3 }
 0x4a0   : > { %6195 = vmatmul.bf16.gmra.mxu1 %v5927_v25  ;;  %v4930_v57 = vpop.permute.xlu1 %4929  ;;  %v6266_v39 = vadd.f32 %v6265_v28, %v6167_v59 }
 0x4a1   : > { %v5497_v56 = vsel %vm3605_vm7, %v5459_v7, %v4930_v57  ;;  %v6472_v13 = vor.u32 %v6471_v42, %v6468_v53 }
 0x4a2   : > { %v5535_v41 = vsel %vm3683_vm15, %v5497_v56, %v4985_v51  ;;  %v6334_v28 = vmax.f32 %v6266_v39, 0.0  ;;  %v6272_v35 = vpop.f32.mrf.mxu2  ;;  %v6253_v39 = vadd.f32 %v11731_v17, %v6154_v20 }
 0x4a3   : > { %v5573_v63 = vsel %vm12367_vm8, %v5535_v41, %v5116_v1  ;;  %v11861_v52 = vsel %vm6464_vm0, %v6472_v13, %v6480_v34  ;;  %vm12373_vm8 = vmmov %vm12340_vm2 }
 0x4a4   : > { %v6370_v33 = vpack.c.bf16 %v6334_v28, %v6334_v28 }
 0x4a5   : > { %v6168_v8 = vpop.f32.mrf.mxu1 }
 0x4a6   : > { %v6169_v24 = vadd.f32 %v11672_v50, %v6168_v8  ;;  %v4932_v43 = vpop.permute.xlu2 %4931  ;;  %v6261_v8 = vadd.f32 %v11809_v49, %v6162_v0  ;;  %v6527_v49 = vunpack.c.l.b16 %v6370_v33 }
 0x4a8   : > { %v5194_v21 = vpop.permute.xlu1 %5193  ;;  %v6268_v30 = vadd.f32 %v6267_v16, %v6169_v24  ;;  %v5936_v24 = vshrl.u32 %v11834_v45, 16  ;;  %v6332_v45 = vmax.f32 %v6261_v8, 0.0 }
 0x4a9   : > { %v5612_v51 = vsel %vm5580_vm1, %v5573_v63, %v5194_v21 }
 0x4aa   : > { %v6335_v25 = vmax.f32 %v6268_v30, 0.0  ;;  %v5651_v4 = vsel %vm5619_vm3, %v5612_v51, %v5249_v36  ;;  %v6157_v36 = vadd.f32 %v11672_v50, %v11787_v48  ;;  %v5938_v30 = vor.u32 %v5936_v24, %v11839_v12 }
 0x4ab   : > { %v6529_v12 = vpack.c.b16 %v6527_v49, %v6505_v2  ;;  %v6368_v41 = vpack.c.bf16 %v6332_v45, %v6332_v45  ;;  %v6329_v51 = vmax.f32 %v6253_v39, 0.0 }
 0x4ac   : > { %v6371_v38 = vpack.c.bf16 %v6335_v25, %v6335_v25  ;;  %v6256_v53 = vadd.f32 %v11759_v32, %v6157_v36 }
 0x4ad   : > { %v6535_v32 = vshll.u32 %v6529_v12, 16  ;;  %v6504_v26 = vunpack.c.l.b16 %v6368_v41 }
 0x4ae   : > { %v6528_v61 = vunpack.c.l.b16 %v6371_v38  ;;  %v5196_v46 = vpop.permute.xlu2 %5195  ;;  %v6330_v17 = vmax.f32 %v6256_v53, 0.0  ;;  %v6532_v38 = vshrl.u32 %v6529_v12, 16 }
 0x4b0   : > { %v6171_v6 = vpop.f32.mrf.mxu1  ;;  %v4854_v10 = vpop.permute.xlu1 %4853  ;;  %v6366_v24 = vpack.c.bf16 %v6330_v17, %v6330_v17  ;;  %v6534_v20 = vrot.slane %v6532_v38, 2 }
 0x4b1   : > { %v6172_v18 = vadd.f32 %v11672_v50, %v6171_v6  ;;  %v7507_v6 = vld [vmem:[#allocation3 + $0x88] sm:$0xff] }
 0x4b2   : > { %v5461_v62 = vsel %vm3527_vm13, %v7507_v6, %v4854_v10 }
 0x4b3   : > { %v6271_v55 = vadd.f32 %v6270_v15, %v6172_v18  ;;  %v6331_v15 = vmax.f32 %v6258_v9, 0.0  ;;  %v6530_v18 = vpack.c.b16 %v6528_v61, %v6528_v61  ;;  %v5499_v25 = vsel %vm3605_vm7, %v5461_v62, %v4932_v43 }
 0x4b5   : > { %v6336_v57 = vmax.f32 %v6271_v55, 0.0  ;;  %v6367_v60 = vpack.c.bf16 %v6331_v15, %v6331_v15  ;;  %v6540_v10 = vshrl.u32 %v6530_v18, 16  ;;  %v6543_v29 = vshll.u32 %v6530_v18, 16 }
 0x4b6   : > { %v6486_v18 = vunpack.c.l.b16 %v6366_v24 }
 0x4b7   : > { %v6372_v3 = vpack.c.bf16 %v6336_v57, %v6336_v57  ;;  %v6275_v57 = vpop.f32.mrf.mxu2  ;;  %v6542_v33 = vrot.slane %v6540_v10, 2 }
 0x4b8   : > { %v6173_v54 = vpop.f32.mrf.mxu1 }
 0x4b9   : > { %v6550_v11 = vunpack.c.l.b16 %v6372_v3  ;;  %v6174_v16 = vadd.f32 %v11672_v50, %v6173_v54 }
 0x4ba   : > { %v5380_v58 = vpop.permute.xlu0 %5379 }
 0x4bb   : > { %v11868_v44 = vsel %vm5658_vm4, %v5651_v4, %v5380_v58  ;;  %v6273_v21 = vadd.f32 %v6272_v35, %v6174_v16  ;;  %v5118_v40 = vpop.permute.xlu1 %5117  ;;  %v6552_v47 = vpack.c.b16 %v6550_v11, %v6528_v61  ;;  %v6507_v16 = vpack.c.b16 %v6505_v2, %v6505_v2  ;;  %v4856_v35 = vpop.permute.xlu2 %4855 }
 0x4bc   : > { %v5939_v59 = vshll.u32 %v11868_v44, 16  ;;  %v6545_v4 = vrot.slane %v6543_v29, 3  ;;  %v11887_v58 = vunpack.c.l.b16 %v6367_v60 }
 0x4bd   : > { %v6337_v23 = vmax.f32 %v6273_v21, 0.0  ;;  %v6555_v48 = vshrl.u32 %v6552_v47, 16  ;;  %v6558_v1 = vshll.u32 %v6552_v47, 16  ;;  %v6537_v47 = vrot.slane %v6535_v32, 3 }
 0x4be   : > { %v11876_v7 = vrot.slane %v5939_v59, 1  ;;  %v6520_v2 = vshll.u32 %v6507_v16, 16 }
 0x4bf   : > { %v6373_v56 = vpack.c.bf16 %v6337_v23, %v6337_v23  ;;  %v6557_v13 = vrot.slane %v6555_v48, 3  ;;  %v6560_v34 = vrot.slane %v6558_v1, 4  ;;  %v6506_v23 = vpack.c.b16 %v6504_v26, %v11887_v58 }
 0x4c0   : > { %v5942_v37 = vsel %vm12368_vm11, %v5938_v30, %v11876_v7  ;;  %v6517_v30 = vshrl.u32 %v6507_v16, 16  ;;  %v6522_v29 = vrot.slane %v6520_v2, 2 }
 0x4c1   : > { %6200 = vmatmul.bf16.gmra.mxu1 %v5942_v37  ;;  %v6551_v27 = vunpack.c.l.b16 %v6373_v56  ;;  %v6561_v61 = vor.u32 %v6560_v34, %v6557_v13  ;;  %v6546_v56 = vor.u32 %v6545_v4, %v6542_v33  ;;  %v6538_v37 = vor.u32 %v6537_v47, %v6534_v20 }
 0x4c2   : > { %v4987_v42 = vpop.permute.xlu0 %4986  ;;  %v6509_v48 = vshrl.u32 %v6506_v23, 16  ;;  %v6512_v1 = vshll.u32 %v6506_v23, 16 }
 0x4c3   : > { %v6553_v55 = vpack.c.b16 %v6551_v27, %v6551_v27  ;;  %v5537_v0 = vsel %vm3683_vm15, %v5499_v25, %v4987_v42  ;;  %v5382_v3 = vpop.permute.xlu1 %5381  ;;  %v6277_v27 = vpop.f32.mrf.mxu2  ;;  %v6547_v25 = vsel %vm12370_vm5, %v6538_v37, %v6546_v56 }
 0x4c4   : > { %v5575_v54 = vsel %vm12369_vm10, %v5537_v0, %v5118_v40  ;;  %v6365_v40 = vpack.c.bf16 %v6329_v51, %v6329_v51  ;;  %v6511_v34 = vrot.slane %v6509_v48, 1  ;;  %v6514_v51 = vrot.slane %v6512_v1, 2 }
 0x4c5   : > { %v6563_v63 = vshrl.u32 %v6553_v55, 16  ;;  %v6566_v28 = vshll.u32 %v6553_v55, 16  ;;  %v5614_v14 = vsel %vm5580_vm1, %v5575_v54, %v5196_v46  ;;  %v5951_v46 = vshrl.u32 %v11868_v44, 16 }
 0x4c6   : > { %v6485_v12 = vunpack.c.l.b16 %v6365_v40  ;;  %v6519_v55 = vrot.slane %v6517_v30, 1  ;;  %v6778_v38 = vsel %vm3527_vm13, %v6547_v25, 0  ;;  %v6489_v54 = vpack.c.b16 %v11887_v58, %v11887_v58 }
 0x4c7   : > { %v6565_v43 = vrot.slane %v6563_v63, 3  ;;  %v6568_v11 = vrot.slane %v6566_v28, 4  ;;  %v6176_v9 = vpop.f32.mrf.mxu1  ;;  %v5953_v39 = vor.u32 %v5951_v46, %v11876_v7  ;;  %v7508_v28 = vld [vmem:[#allocation3 + $0x90] sm:$0xff] }
 0x4c8   : > { %v6177_v8 = vadd.f32 %v11672_v50, %v6176_v9  ;;  %v6488_v0 = vpack.c.b16 %v6486_v18, %v6485_v12  ;;  %v5463_v7 = vsel %vm3527_vm13, %v7508_v28, %v4856_v35  ;;  %v6523_v26 = vor.u32 %v6522_v29, %v6519_v55 }
 0x4c9   : > { %v6569_v21 = vor.u32 %v6568_v11, %v6565_v43  ;;  %v6515_v35 = vor.u32 %v6514_v51, %v6511_v34 }
 0x4ca   : > { %v5251_v59 = vpop.permute.xlu0 %5250  ;;  %v6276_v62 = vadd.f32 %v6275_v57, %v6177_v8  ;;  %v5120_v57 = vpop.permute.xlu2 %5119  ;;  %v6493_v11 = vshll.u32 %v6488_v0, 16 }
 0x4cb   : > { %v5653_v36 = vsel %vm5619_vm3, %v5614_v14, %v5251_v59  ;;  %v6570_v49 = vsel %vm6464_vm0, %v6561_v61, %v6569_v21  ;;  %v4989_v42 = vpop.permute.xlu1 %4988  ;;  %v6280_v43 = vpop.f32.mrf.mxu2  ;;  %v6524_v61 = vsel %vm12357_vm9, %v6515_v35, %v6523_v26  ;;  %v6498_v21 = vshll.u32 %v6489_v54, 16 }
 0x4cc   : > { %v11895_v15 = vsel %vm5658_vm4, %v5653_v36, %v5382_v3  ;;  %v6781_v45 = vsel %vm3527_vm13, %v6570_v49, 0  ;;  %v6338_v60 = vmax.f32 %v6276_v62, 0.0  ;;  %v6495_v40 = vrot.slane %v6493_v11, 1 }
 0x4cd   : > { %v5954_v6 = vshll.u32 %v11895_v15, 16  ;;  %6807 = vmatpush.bf16.xpose.msra.mxu3 %v6781_v45  ;;  %v6775_v49 = vsel %vm3527_vm13, %v6524_v61, 0  ;;  %v6491_v45 = vshrl.u32 %v6488_v0, 16  ;;  %v6500_v56 = vrot.slane %v6498_v21, 1 }
 0x4ce   : > { %v6374_v32 = vpack.c.bf16 %v6338_v60, %v6338_v60  ;;  %v5966_v2 = vshrl.u32 %v11895_v15, 16 }
 0x4cf   : > { %v5956_v53 = vrot.slane %v5954_v6, 1  ;;  %v6178_v41 = vpop.f32.mrf.mxu1  ;;  %v6496_v62 = vor.u32 %v6495_v40, %v6491_v45 }
 0x4d0   : > { %v6179_v10 = vadd.f32 %v11672_v50, %v6178_v41  ;;  %v6574_v33 = vunpack.c.l.b16 %v6374_v32 }
 0x4d1   : > { %v5957_v44 = vsel %vm12371_vm14, %v5953_v39, %v5956_v53  ;;  %v5968_v18 = vor.u32 %v5966_v2, %v5956_v53  ;;  %v6501_v1 = vsel %vm12365_vm6, %v6496_v62, %v6500_v56  ;;  %v6760_v2 = vsel %vm3527_vm13, %v11799_v31, 0 }
 0x4d2   : > { %6205 = vmatmul.bf16.gmra.mxu1 %v5957_v44  ;;  %v4934_v63 = vpop.permute.xlu0 %4933  ;;  %v6278_v13 = vadd.f32 %v6277_v27, %v6179_v10  ;;  %v5384_v23 = vpop.permute.xlu2 %5383  ;;  %v6772_v15 = vsel %vm3527_vm13, %v6501_v1, 0 }
 0x4d3   : > { %v5501_v17 = vsel %vm3605_vm7, %v5463_v7, %v4934_v63  ;;  %v5253_v24 = vpop.permute.xlu1 %5252  ;;  %v6282_v27 = vpop.f32.mrf.mxu2 }
 0x4d4   : > { %v6339_v3 = vmax.f32 %v6278_v13, 0.0  ;;  %v5539_v16 = vsel %vm3683_vm15, %v5501_v17, %v4989_v42 }
 0x4d5   : > { %6808 = vmatpush.bf16.xpose.msra.mxu3 %v6778_v38  ;;  %v5577_v14 = vsel %vm12340_vm2, %v5539_v16, %v5120_v57  ;;  %v6769_v38 = vsel %vm3527_vm13, %v11861_v52, 0  ;;  %v6766_v52 = vsel %vm3527_vm13, %v11844_v22, 0 }
 0x4d6   : > { %v6375_v9 = vpack.c.bf16 %v6339_v3, %v6339_v3 }
 0x4d8   : > { %v6575_v4 = vunpack.c.l.b16 %v6375_v9  ;;  %v6181_v8 = vpop.f32.mrf.mxu1 }
 0x4d9   : > { %v6182_v20 = vadd.f32 %v11672_v50, %v6181_v8 }
 0x4da   : > { %v5198_v59 = vpop.permute.xlu0 %5197  ;;  %v11913_v47 = vpack.c.b16 %v6575_v4, %v6574_v33  ;;  %v4991_v10 = vpop.permute.xlu2 %4990 }
 0x4db   : > { %v5616_v58 = vsel %vm5580_vm1, %v5577_v14, %v5198_v59  ;;  %v6281_v46 = vadd.f32 %v6280_v43, %v6182_v20  ;;  %v4936_v25 = vpop.permute.xlu1 %4935  ;;  %v6285_v57 = vpop.f32.mrf.mxu2 }
 0x4dc   : > { %v5655_v36 = vsel %vm5619_vm3, %v5616_v58, %v5253_v24  ;;  %v6580_v31 = vshrl.u32 %v11913_v47, 16 }
 0x4dd   : > { %v5694_v30 = vsel %vm5658_vm4, %v5655_v36, %v5384_v23  ;;  %6809 = vmatpush.bf16.xpose.msra.mxu3 %v6775_v49  ;;  %v6340_v39 = vmax.f32 %v6281_v46, 0.0  ;;  %v6763_v49 = vsel %vm3527_vm13, %v11823_v19, 0 }
 0x4de   : > { %v5969_v6 = vshll.u32 %v5694_v30, 16  ;;  %v5981_v8 = vshrl.u32 %v5694_v30, 16 }
 0x4df   : > { %v6376_v53 = vpack.c.bf16 %v6340_v39, %v6340_v39 }
 0x4e0   : > { %v5971_v37 = vrot.slane %v5969_v6, 1  ;;  %v6183_v48 = vpop.f32.mrf.mxu1 }
 0x4e1   : > { %v6184_v41 = vadd.f32 %v11672_v50, %v6183_v48  ;;  %v6576_v63 = vunpack.c.l.b16 %v6376_v53 }
 0x4e2   : > { %v4858_v12 = vpop.permute.xlu0 %4857  ;;  %v5972_v42 = vsel %vm12372_vm12, %v5968_v18, %v5971_v37  ;;  %v5255_v3 = vpop.permute.xlu2 %5254  ;;  %v5983_v14 = vor.u32 %v5981_v8, %v5971_v37 }
 0x4e3   : > { %6210 = vmatmul.bf16.gmra.mxu1 %v5972_v42  ;;  %v6283_v55 = vadd.f32 %v6282_v27, %v6184_v41  ;;  %v5465_v60 = vsel %vm3527_vm13, %v11615_v5, %v4858_v12  ;;  %v5200_v32 = vpop.permute.xlu1 %5199  ;;  %v6287_v4 = vpop.f32.mrf.mxu2  ;;  %v6582_v41 = vshll.u32 %v11913_v47, 16 }
 0x4e4   : > { %v5503_v29 = vsel %vm3605_vm7, %v5465_v60, %v4936_v25  ;;  %v6578_v25 = vpack.c.b16 %v6576_v63, %v6576_v63  ;;  %vm12375_vm7 = vmmov %vm12365_vm6 }
 0x4e5   : > { %6810 = vmatpush.bf16.xpose.msra.mxu3 %v6772_v15  ;;  %v6341_v44 = vmax.f32 %v6283_v55, 0.0  ;;  %v5541_v34 = vsel %vm3683_vm15, %v5503_v29, %v4991_v10  ;;  %vm12374_vm15 = vmmov %vm12365_vm6  ;;  %v6584_v55 = vrot.slane %v6582_v41, 1 }
 0x4e6   : > { %v6587_v15 = vshll.u32 %v6578_v25, 16 }
 0x4e7   : > { %v6377_v0 = vpack.c.bf16 %v6341_v44, %v6341_v44  ;;  %v6585_v60 = vor.u32 %v6584_v55, %v6580_v31 }
 0x4e8   : > { %v6589_v53 = vrot.slane %v6587_v15, 1 }
 0x4e9   : > { %v6593_v28 = vunpack.c.l.b16 %v6377_v0  ;;  %v6186_v13 = vpop.f32.mrf.mxu1 }
 0x4ea   : > { %v5122_v7 = vpop.permute.xlu0 %5121  ;;  %v6187_v51 = vadd.f32 %v11672_v50, %v6186_v13  ;;  %v11952_v44 = vsel %vm12375_vm7, %v6585_v60, %v6589_v53 }
 0x4eb   : > { %v11929_v17 = vpack.c.b16 %v6593_v28, %v6576_v63  ;;  %v5579_v5 = vsel %vm12373_vm8, %v5541_v34, %v5122_v7  ;;  %v6290_v45 = vpop.f32.mrf.mxu2 }
 0x4ec   : > { %v5618_v26 = vsel %vm5580_vm1, %v5579_v5, %v5200_v32  ;;  %v6286_v54 = vadd.f32 %v6285_v57, %v6187_v51  ;;  %vm12376_vm1 = vmmov %vm12357_vm9 }
 0x4ed   : > { %6811 = vmatpush.bf16.xpose.msra.mxu3 %v6769_v38  ;;  %v5657_v43 = vsel %vm5619_vm3, %v5618_v26, %v5255_v3  ;;  %v6598_v0 = vshrl.u32 %v11929_v17, 16  ;;  %v6601_v57 = vshll.u32 %v11929_v17, 16  ;;  %vm12377_vm3 = vmmov %vm12370_vm5 }
 0x4ee   : > { %v6342_v35 = vmax.f32 %v6286_v54, 0.0  ;;  %vm12379_vm11 = vmmov %vm12377_vm3 }
 0x4ef   : > { %v6600_v34 = vrot.slane %v6598_v0, 1  ;;  %v6603_v63 = vrot.slane %v6601_v57, 2 }
 0x4f0   : > { %v6378_v59 = vpack.c.bf16 %v6342_v35, %v6342_v35 }
 0x4f1   : > { %v6188_v16 = vpop.f32.mrf.mxu1  ;;  %v6604_v47 = vor.u32 %v6603_v63, %v6600_v34 }
 0x4f2   : > { %v5386_v11 = vpop.permute.xlu0 %5385  ;;  %v6189_v33 = vadd.f32 %v11672_v50, %v6188_v16  ;;  %v6594_v23 = vunpack.c.l.b16 %v6378_v59 }
 0x4f3   : > { %v5696_v9 = vsel %vm5658_vm4, %v5657_v43, %v5386_v11  ;;  %v6292_v37 = vpop.f32.mrf.mxu2  ;;  %vm12378_vm4 = vmmov %vm12365_vm6 }
 0x4f4   : > { %v5984_v61 = vshll.u32 %v5696_v9, 16  ;;  %v6288_v21 = vadd.f32 %v6287_v4, %v6189_v33  ;;  %v6596_v10 = vpack.c.b16 %v6594_v23, %v6594_v23 }
 0x4f5   : > { %6812 = vmatpush.bf16.xpose.msra.mxu3 %v6766_v52 }
 0x4f6   : > { %v5986_v24 = vrot.slane %v5984_v61, 1  ;;  %v6343_v20 = vmax.f32 %v6288_v21, 0.0  ;;  %v6606_v7 = vshrl.u32 %v6596_v10, 16  ;;  %v6609_v13 = vshll.u32 %v6596_v10, 16 }
 0x4f8   : > { %v5987_v58 = vsel %vm12374_vm15, %v5983_v14, %v5986_v24  ;;  %v6379_v40 = vpack.c.bf16 %v6343_v20, %v6343_v20  ;;  %v6608_v51 = vrot.slane %v6606_v7, 1  ;;  %v6611_v5 = vrot.slane %v6609_v13, 2 }
 0x4f9   : > { %6215 = vmatmul.bf16.gmra.mxu1 %v5987_v58 }
 0x4fa   : > { %v6616_v36 = vunpack.c.l.b16 %v6379_v40  ;;  %v6612_v38 = vor.u32 %v6611_v5, %v6608_v51 }
 0x4fb   : > { %v6295_v29 = vpop.f32.mrf.mxu2 }
 0x4fc   : > { %v6618_v30 = vpack.c.b16 %v6616_v36, %v6594_v23  ;;  %v11957_v3 = vsel %vm12376_vm1, %v6604_v47, %v6612_v38 }
 0x4fd   : > { %6813 = vmatpush.bf16.xpose.msra.mxu3 %v6763_v49 }
 0x4fe   : > { %v6621_v9 = vshrl.u32 %v6618_v30, 16  ;;  %v6624_v35 = vshll.u32 %v6618_v30, 16 }
 0x500   : > { %v6623_v59 = vrot.slane %v6621_v9, 2  ;;  %v6626_v20 = vrot.slane %v6624_v35, 3 }
 0x502   : > { %v6191_v56 = vpop.f32.mrf.mxu1  ;;  %v6627_v30 = vor.u32 %v6626_v20, %v6623_v59 }
 0x503   : > { %v6192_v22 = vadd.f32 %v11672_v50, %v6191_v56  ;;  %v6297_v32 = vpop.f32.mrf.mxu2 }
 0x505   : > { %v6291_v46 = vadd.f32 %v6290_v45, %v6192_v22  ;;  %6814 = vmatpush.bf16.xpose.msra.mxu3 %v6760_v2 }
 0x507   : > { %v6344_v62 = vmax.f32 %v6291_v46, 0.0 }
 0x509   : > { %v6380_v48 = vpack.c.bf16 %v6344_v62, %v6344_v62 }
 0x50a   : > { %v6193_v6 = vpop.f32.mrf.mxu1 }
 0x50b   : > { %v6194_v18 = vadd.f32 %v11672_v50, %v6193_v6  ;;  %v6617_v39 = vunpack.c.l.b16 %v6380_v48  ;;  %v6300_v43 = vpop.f32.mrf.mxu2 }
 0x50d   : > { %v6293_v27 = vadd.f32 %v6292_v37, %v6194_v18  ;;  %v6619_v16 = vpack.c.b16 %v6617_v39, %v6617_v39 }
 0x50f   : > { %v6345_v1 = vmax.f32 %v6293_v27, 0.0  ;;  %v6629_v52 = vshrl.u32 %v6619_v16, 16  ;;  %v6632_v21 = vshll.u32 %v6619_v16, 16 }
 0x511   : > { %v6381_v19 = vpack.c.bf16 %v6345_v1, %v6345_v1  ;;  %v6631_v36 = vrot.slane %v6629_v52, 2  ;;  %v6634_v49 = vrot.slane %v6632_v21, 3 }
 0x513   : > { %v6639_v12 = vunpack.c.l.b16 %v6381_v19  ;;  %v6302_v23 = vpop.f32.mrf.mxu2  ;;  %v6635_v2 = vor.u32 %v6634_v49, %v6631_v36 }
 0x515   : > { %v11947_v42 = vpack.c.b16 %v6639_v12, %v6617_v39  ;;  %v11966_v18 = vsel %vm12377_vm3, %v6627_v30, %v6635_v2 }
 0x517   : > { %v6644_v12 = vshrl.u32 %v11947_v42, 16  ;;  %v6647_v41 = vshll.u32 %v11947_v42, 16 }
 0x519   : > { %v6646_v60 = vrot.slane %v6644_v12, 3  ;;  %v6649_v53 = vrot.slane %v6647_v41, 4 }
 0x51b   : > { %v6305_v1 = vpop.f32.mrf.mxu2  ;;  %v6650_v0 = vor.u32 %v6649_v53, %v6646_v60 }
 0x51d   : > { %v6196_v28 = vpop.f32.mrf.mxu1 }
 0x51e   : > { %v6197_v11 = vadd.f32 %v11672_v50, %v6196_v28 }
 0x520   : > { %v6296_v33 = vadd.f32 %v6295_v29, %v6197_v11 }
 0x522   : > { %v6346_v14 = vmax.f32 %v6296_v33, 0.0 }
 0x523   : > { %v6307_v10 = vpop.f32.mrf.mxu2 }
 0x524   : > { %v6382_v56 = vpack.c.bf16 %v6346_v14, %v6346_v14 }
 0x525   : > { %v6198_v26 = vpop.f32.mrf.mxu1 }
 0x526   : > { %v6199_v54 = vadd.f32 %v11672_v50, %v6198_v26  ;;  %v6640_v48 = vunpack.c.l.b16 %v6382_v56 }
 0x528   : > { %v6298_v17 = vadd.f32 %v6297_v32, %v6199_v54  ;;  %v6642_v19 = vpack.c.b16 %v6640_v48, %v6640_v48 }
 0x52a   : > { %v6347_v8 = vmax.f32 %v6298_v17, 0.0  ;;  %v6652_v25 = vshrl.u32 %v6642_v19, 16  ;;  %v6655_v55 = vshll.u32 %v6642_v19, 16 }
 0x52b   : > { %v6310_v7 = vpop.f32.mrf.mxu2 }
 0x52c   : > { %v6383_v58 = vpack.c.bf16 %v6347_v8, %v6347_v8  ;;  %v6654_v31 = vrot.slane %v6652_v25, 3  ;;  %v6657_v15 = vrot.slane %v6655_v55, 4 }
 0x52e   : > { %v6663_v46 = vunpack.c.l.b16 %v6383_v58  ;;  %v6658_v57 = vor.u32 %v6657_v15, %v6654_v31 }
 0x530   : > { %v11971_v28 = vsel %vm6464_vm0, %v6650_v0, %v6658_v57 }
 0x533   : > { %v6312_v34 = vpop.f32.mrf.mxu2 }
 0x53b   : > { %v6315_v32 = vpop.f32.mrf.mxu2 }
 0x53e   : > { %v6201_v4 = vpop.f32.mrf.mxu1 }
 0x53f   : > { %v6202_v61 = vadd.f32 %v11672_v50, %v6201_v4  ;;  %v7509_v50 = vld [vmem:[%s12009_s5] ss:$0 sm:$0xff] }
 0x541   : > { %v6301_v24 = vadd.f32 %v6300_v43, %v6202_v61 }
 0x543   : > { %v6348_v40 = vmax.f32 %v6301_v24, 0.0  ;;  %v6317_v49 = vpop.f32.mrf.mxu2 }
 0x545   : > { %v6384_v45 = vpack.c.bf16 %v6348_v40, %v6348_v40 }
 0x546   : > { %v6203_v22 = vpop.f32.mrf.mxu1 }
 0x547   : > { %v6664_v6 = vunpack.c.l.b16 %v6384_v45  ;;  %v6204_v62 = vadd.f32 %v7509_v50, %v6203_v22 }
 0x549   : > { %v6666_v37 = vpack.c.b16 %v6664_v6, %v6663_v46  ;;  %v6303_v27 = vadd.f32 %v6302_v23, %v6204_v62 }
 0x54b   : > { %v6349_v51 = vmax.f32 %v6303_v27, 0.0  ;;  %v6671_v16 = vshll.u32 %v6666_v37, 16  ;;  %v6669_v23 = vshrl.u32 %v6666_v37, 16 }
 0x54d   : > { %v6385_v42 = vpack.c.bf16 %v6349_v51, %v6349_v51  ;;  %v6673_v14 = vrot.slane %v6671_v16, 1 }
 0x54f   : > { %v6206_v39 = vpop.f32.mrf.mxu1  ;;  %v6665_v43 = vunpack.c.l.b16 %v6385_v42  ;;  %v6674_v2 = vor.u32 %v6673_v14, %v6669_v23 }
 0x550   : > { %v6207_v61 = vadd.f32 %v7509_v50, %v6206_v39 }
 0x551   : > { %v6667_v4 = vpack.c.b16 %v6665_v43, %v6665_v43 }
 0x552   : > { %v6306_v45 = vadd.f32 %v6305_v1, %v6207_v61 }
 0x553   : > { %v6676_v36 = vshll.u32 %v6667_v4, 16  ;;  %v6749_v4 = vld [vmem:[%s12010_s6] sm:$0xf] }
 0x554   : > { %v6350_v19 = vmax.f32 %v6306_v45, 0.0  ;;  %7327 = vmatmul.msk.bf16.vlgmr.msra.gmra.mxu3 %vm3527_vm13, %v6749_v4  ;;  %v6793_v45 = vsel %vm3527_vm13, %v11971_v28, 0 }
 0x555   : > { %v6678_v46 = vrot.slane %v6676_v36, 1 }
 0x556   : > { %v6386_v31 = vpack.c.bf16 %v6350_v19, %v6350_v19 }
 0x557   : > { %v6208_v29 = vpop.f32.mrf.mxu1  ;;  %v6679_v48 = vsel %vm12378_vm4, %v6674_v2, %v6678_v46  ;;  %v6784_v2 = vsel %vm3527_vm13, %v11952_v44, 0 }
 0x558   : > { %v6209_v26 = vadd.f32 %v7509_v50, %v6208_v29 }
 0x55a   : > { %v6308_v33 = vadd.f32 %v6307_v10, %v6209_v26 }
 0x55c   : > { %v6351_v59 = vmax.f32 %v6308_v33, 0.0 }
 0x55e   : > { %v6387_v6 = vpack.c.bf16 %v6351_v59, %v6351_v59 }
 0x560   : > { %v6211_v13 = vpop.f32.mrf.mxu1  ;;  %v6683_v25 = vunpack.c.l.b16 %v6387_v6 }
 0x561   : > { %v6212_v47 = vadd.f32 %v7509_v50, %v6211_v13 }
 0x563   : > { %v6311_v17 = vadd.f32 %v6310_v7, %v6212_v47  ;;  %v6682_v7 = vunpack.c.l.b16 %v6386_v31 }
 0x565   : > { %v6352_v52 = vmax.f32 %v6311_v17, 0.0  ;;  %v6684_v26 = vpack.c.b16 %v6682_v7, %v6665_v43 }
 0x567   : > { %v6388_v56 = vpack.c.bf16 %v6352_v52, %v6352_v52  ;;  %v6690_v61 = vshll.u32 %v6684_v26, 16 }
 0x568   : > { %v6213_v63 = vpop.f32.mrf.mxu1 }
 0x569   : > { %v6214_v5 = vadd.f32 %v7509_v50, %v6213_v63  ;;  %v6705_v39 = vunpack.c.l.b16 %v6388_v56  ;;  %v6692_v59 = vrot.slane %v6690_v61, 2  ;;  %v6750_v56 = vld [vmem:[%s12011_s7] sm:$0xff] }
 0x56a   : > { %6753 = vperm.xlu1 %7470, %v6750_v56  }
 0x56b   : > { %v6313_v38 = vadd.f32 %v6312_v34, %v6214_v5  ;;  %v6707_v1 = vpack.c.b16 %v6705_v39, %v6683_v25  ;;  %v6685_v5 = vpack.c.b16 %v6683_v25, %v6683_v25 }
 0x56d   : > { %v6353_v9 = vmax.f32 %v6313_v38, 0.0  ;;  %v6710_v13 = vshrl.u32 %v6707_v1, 16  ;;  %v6713_v34 = vshll.u32 %v6707_v1, 16 }
 0x56f   : > { %v6389_v21 = vpack.c.bf16 %v6353_v9, %v6353_v9  ;;  %v6715_v17 = vrot.slane %v6713_v34, 3  ;;  %v6695_v9 = vshrl.u32 %v6685_v5, 16 }
 0x571   : > { %v6706_v22 = vunpack.c.l.b16 %v6389_v21  ;;  %v6697_v21 = vrot.slane %v6695_v9, 1 }
 0x573   : > { %v6708_v41 = vpack.c.b16 %v6706_v22, %v6706_v22 }
 0x575   : > { %v6718_v60 = vshrl.u32 %v6708_v41, 16  ;;  %v6721_v53 = vshll.u32 %v6708_v41, 16 }
 0x576   : > { %v6216_v54 = vpop.f32.mrf.mxu1 }
 0x577   : > { %v6217_v11 = vadd.f32 %v7509_v50, %v6216_v54  ;;  %v6720_v38 = vrot.slane %v6718_v60, 2 }
 0x579   : > { %v6316_v35 = vadd.f32 %v6315_v32, %v6217_v11  ;;  %v6723_v32 = vrot.slane %v6721_v53, 3  ;;  %v6712_v11 = vrot.slane %v6710_v13, 2 }
 0x57b   : > { %v6354_v8 = vmax.f32 %v6316_v35, 0.0  ;;  %v6698_v35 = vshll.u32 %v6685_v5, 16  ;;  %v6724_v33 = vor.u32 %v6723_v32, %v6720_v38  ;;  %v6716_v52 = vor.u32 %v6715_v17, %v6712_v11 }
 0x57d   : > { %v6390_v24 = vpack.c.bf16 %v6354_v8, %v6354_v8  ;;  %v6687_v8 = vshrl.u32 %v6684_v26, 16  ;;  %v6725_v43 = vsel %vm12379_vm11, %v6716_v52, %v6724_v33 }
 0x57e   : > { %v6218_v20 = vpop.f32.mrf.mxu1 }
 0x57f   : > { %v6728_v58 = vunpack.c.l.b16 %v6390_v24  ;;  %v6219_v40 = vadd.f32 %v7509_v50, %v6218_v20  ;;  %v6700_v24 = vrot.slane %v6698_v35, 2  ;;  %v6689_v14 = vrot.slane %v6687_v8, 1 }
 0x580   : > { %v6802_v20 = vsel %vm3527_vm13, %v6725_v43, 0 }
 0x581   : > { %v6318_v30 = vadd.f32 %v6317_v49, %v6219_v40  ;;  %v6730_v62 = vpack.c.b16 %v6728_v58, %v6706_v22  ;;  %v6701_v58 = vor.u32 %v6700_v24, %v6697_v21  ;;  %v6693_v40 = vor.u32 %v6692_v59, %v6689_v14 }
 0x582   : > { %v6796_v49 = vsel %vm3527_vm13, %v6679_v48, 0  ;;  %v6790_v22 = vsel %vm3527_vm13, %v11966_v18, 0 }
 0x583   : > { %v6355_v27 = vmax.f32 %v6318_v30, 0.0  ;;  %v6733_v50 = vshrl.u32 %v6730_v62, 16  ;;  %v6736_v37 = vshll.u32 %v6730_v62, 16  ;;  %v6787_v30 = vsel %vm3527_vm13, %v11957_v3, 0 }
 0x585   : > { %v6391_v12 = vpack.c.bf16 %v6355_v27, %v6355_v27  ;;  %v6735_v0 = vrot.slane %v6733_v50, 3  ;;  %v6738_v57 = vrot.slane %v6736_v37, 4 }
 0x587   : > { %v6729_v55 = vunpack.c.l.b16 %v6391_v12  ;;  %v6739_v42 = vor.u32 %v6738_v57, %v6735_v0 }
 0x589   : > { %v6731_v15 = vpack.c.b16 %v6729_v55, %v6729_v55 }
 0x58b   : > { %v6741_v10 = vshrl.u32 %v6731_v15, 16  ;;  %v6744_v29 = vshll.u32 %v6731_v15, 16 }
 0x58d   : > { %v6743_v63 = vrot.slane %v6741_v10, 3  ;;  %v6746_v51 = vrot.slane %v6744_v29, 4 }
 0x58f   : > { %v6747_v47 = vor.u32 %v6746_v51, %v6743_v63 }
 0x591   : > { %v6748_v54 = vsel %vm6464_vm0, %v6739_v42, %v6747_v47  ;;  %vm12380_vm0 = vmmov %vm12376_vm1 }
 0x592   : > { %v6805_v16 = vsel %vm3527_vm13, %v6748_v54, 0  ;;  %v6702_v23 = vsel %vm12380_vm0, %v6693_v40, %v6701_v58 }
 0x593   : > { %6820 = vmatpush.bf16.xpose.msrb.mxu3 %v6805_v16  ;;  %v6799_v36 = vsel %vm3527_vm13, %v6702_v23, 0 }
 0x59b   : > { %6821 = vmatpush.bf16.xpose.msrb.mxu3 %v6802_v20 }
 0x5a3   : > { %6822 = vmatpush.bf16.xpose.msrb.mxu3 %v6799_v36 }
 0x5ab   : > { %6823 = vmatpush.bf16.xpose.msrb.mxu3 %v6796_v49 }
 0x5b3   : > { %6824 = vmatpush.bf16.xpose.msrb.mxu3 %v6793_v45 }
 0x5bb   : > { %6825 = vmatpush.bf16.xpose.msrb.mxu3 %v6790_v22 }
 0x5c3   : > { %6826 = vmatpush.bf16.xpose.msrb.mxu3 %v6787_v30 }
 0x5cb   : > { %6827 = vmatpush.bf16.xpose.msrb.mxu3 %v6784_v2 }
 0x5d2   : > { %7328 = vmatmul.msk.bf16.vlgmr.msrb.gmra.mxu3 %vm3527_vm13, %v6749_v4 }
 0x5d7   : > { %v6816_v28 = vpop.f32.mrf.mxu3 }
 0x5dc   : > { %v6754_v6 = vpop.permute.xlu1 %6753 }
 0x5dd   : > { %v6817_v62 = vadd.f32 %v6816_v28, %v6754_v6 }
 0x5df   : > { %v6818_v46 = vpop.f32.mrf.mxu3  ;;  %v6833_v18 = vmax.f32 %v6817_v62, 0.0 }
 0x5e1   : > { %6835 = vst [vmem:[%s325_s26] sm:$0xff] %v6833_v18 }
 0x655   : > { %v6829_v27 = vpop.f32.mrf.mxu3 }
 0x656   : > { %v6830_v3 = vadd.f32 %v6829_v27, %v6754_v6 }
 0x658   : > { %v6834_v48 = vmax.f32 %v6830_v3, 0.0 }
 0x65a   : > { %6836 = vst [vmem:[%s325_s26 + $0x8] sm:$0xff] %v6834_v48 }
 0x65d   : > { %v6831_v19 = vpop.f32.mrf.mxu3 }
 0x65e PF: > { %s18_s27 = sadd.s32 1, %s7516_s27  }
 0x65f   : > { %p15_p4 = scmp.ge.s32.totalorder %s18_s27, 4  }
 0x661   :  { %17 = sbr.rel (!%p15_p4) target bundleno = 1 (0x1), region = 115 }

</bundles_post_ra>
